<compile_context>
chip_gen: v7x
topology: tpu7x:2x2x1
jax: 0.10.0
libtpu: 0.0.40
codegen_flags: <defaults>
</compile_context>

<pallas_src>
import functools
import math

import jax
import jax.numpy as jnp
from jax import lax
from jax.experimental import pallas as pl
from jax.experimental.pallas import tpu as pltpu


# --------------------------------------------------------------- hw prefs

@functools.lru_cache(maxsize=None)
def _hw_prefs():
    """(vmem_limit_bytes, row_tile_pref, col_tile_pref), generation-aware."""
    vmem_cap = 0
    try:
        vmem_cap = int(pltpu.get_tpu_info().vmem_capacity_bytes)
    except Exception:   # unknown part -> stay conservative
        pass
    if vmem_cap >= 96 * 1024 * 1024:        # v5e / v6e: 128 MiB physical VMEM
        return 64 * 1024 * 1024, 512, 512   # 512-row tiles hit ~85% of HBM roofline
    return 36 * 1024 * 1024, 256, 256       # v7x (64 MiB physical) or unknown


def _pick_tile(n, pref, align):
    """Largest multiple of `align` <= pref that divides n, else the whole dim."""
    if n <= pref:
        return n
    t = (pref // align) * align
    while t >= align:
        if n % t == 0:
            return t
        t -= align
    # TODO(synk): remainder/masking path for dims that are not `align`-multiples.
    return n


def _vmem_guard(limit, blocks):
    """Static check that the (double-buffered) per-step blocks fit the budget."""
    need = 2 * sum(math.prod(s) * jnp.dtype(d).itemsize for s, d in blocks)
    assert need <= limit, (
        f"per-step blocks need ~{need} B (double-buffered) > VMEM cap {limit} B; "
        "shrink the tile sizes")


def _cparams(semantics):
    vmem_limit, _, _ = _hw_prefs()
    return pltpu.CompilerParams(dimension_semantics=semantics,
                                vmem_limit_bytes=vmem_limit)


def _ln(x, eps):
    mu = jnp.mean(x, axis=-1, keepdims=True)
    var = jnp.mean(jnp.square(x - mu), axis=-1, keepdims=True)
    return (x - mu) * lax.rsqrt(var + eps)


def _gelu_erf(x):
    # exact-erf GELU, matching torch.nn.functional.gelu's default
    return 0.5 * x * (1.0 + lax.erf(x * (1.0 / math.sqrt(2.0))))


# ----------------------------------------------------------------- kernels

def _ln_qkv_kernel(x_ref, g_ref, b_ref, w_ref, o_ref, xn_ref, *, eps):
    # qkv = LayerNorm(x) @ Wqkv  (bias-free).  LN runs once per row tile
    # (j == 0) into a bf16 scratch and is reused for every column tile j.
    @pl.when(pl.program_id(1) == 0)
    def _():
        xn_ref[...] = (_ln(x_ref[...], eps) * g_ref[...] + b_ref[...]
                       ).astype(jnp.bfloat16)

    o_ref[...] = jnp.dot(xn_ref[...], w_ref[...],
                         preferred_element_type=jnp.float32).astype(o_ref.dtype)


def _attn_kernel(qkv_ref, o_ref, *, heads, dim_head):
    # Non-causal, unmasked attention for ALL heads of one batch item; the
    # q-scale is already folded into the qkv weight (build-time transform).
    inner = heads * dim_head
    qkv = qkv_ref[0]                                    # (N, 3*inner) bf16

    def split_heads(base):                              # -> (heads, N, dh)
        return jnp.stack(
            [qkv[:, base + h * dim_head: base + (h + 1) * dim_head]
             for h in range(heads)], axis=0)

    q = split_heads(0)
    k = split_heads(inner)
    v = split_heads(2 * inner)
    s = jnp.einsum("hqd,hkd->hqk", q, k, preferred_element_type=jnp.float32)
    s = s - jnp.max(s, axis=-1, keepdims=True)
    p = jnp.exp(s)
    p = p / jnp.sum(p, axis=-1, keepdims=True)          # exact softmax
    o = jnp.einsum("hqk,hkd->hqd", p.astype(jnp.bfloat16), v,
                   preferred_element_type=jnp.float32)  # (heads, N, dh)
    # back to "n (h d)" and a single lane-dense (inner >= 128) store
    o_ref[0] = jnp.concatenate([o[h] for h in range(heads)],
                               axis=-1).astype(o_ref.dtype)
    # TODO(synk): flash-style KV-tile grid axis (online softmax) for long seqs.


def _proj_res_ln_geglu_kernel(h_ref, wo_ref, bo_ref, so_ref, r_ref,
                              g_ref, b_ref, wa_ref, wg_ref, ba_ref, bg_ref,
                              rout_ref, o_ref, xn_ref, *, eps):
    # j == 0: attn-out projection + bias + LayerScale + residual add (f32),
    #         emit the new residual and cache LN(residual) for the FF matmuls.
    @pl.when(pl.program_id(1) == 0)
    def _():
        acc = jnp.dot(h_ref[...], wo_ref[...], preferred_element_type=jnp.float32)
        r = r_ref[...] + (acc + bo_ref[...]) * so_ref[...]
        rout_ref[...] = r
        xn_ref[...] = (_ln(r, eps) * g_ref[...] + b_ref[...]).astype(jnp.bfloat16)

    # every j: ff1 + exact-erf GEGLU for this output-column tile
    xn = xn_ref[...]
    a = jnp.dot(xn, wa_ref[...], preferred_element_type=jnp.float32) + ba_ref[...]
    gt = jnp.dot(xn, wg_ref[...], preferred_element_type=jnp.float32) + bg_ref[...]
    o_ref[...] = (a * _gelu_erf(gt)).astype(o_ref.dtype)


def _proj_res_ln_matmul_kernel(h_ref, w2_ref, b2_ref, s2_ref, r_ref,
                               g_ref, b_ref, wq_ref, rout_ref, o_ref, xn_ref,
                               *, eps):
    # j == 0: ff2 projection + bias + LayerScale + residual add (f32), emit the
    #         new residual and cache LN(residual) for the next layer's qkv proj.
    @pl.when(pl.program_id(1) == 0)
    def _():
        acc = jnp.dot(h_ref[...], w2_ref[...], preferred_element_type=jnp.float32)
        r = r_ref[...] + (acc + b2_ref[...]) * s2_ref[...]
        rout_ref[...] = r
        xn_ref[...] = (_ln(r, eps) * g_ref[...] + b_ref[...]).astype(jnp.bfloat16)

    o_ref[...] = jnp.dot(xn_ref[...], wq_ref[...],
                         preferred_element_type=jnp.float32).astype(o_ref.dtype)


def _proj_scale_res_kernel(h_ref, w_ref, b_ref, s_ref, r_ref, o_ref):
    # final-layer ff2 projection + bias + LayerScale + residual (f32 epilogue)
    acc = jnp.dot(h_ref[...], w_ref[...], preferred_element_type=jnp.float32)
    o_ref[...] = r_ref[...] + (acc + b_ref[...]) * s_ref[...]


# ---------------------------------------------------------------- wrappers

def ln_qkv(x, gamma, beta, wq, *, eps=1e-5):
    """LayerNorm(x) @ Wqkv for the first layer (later ones are fused)."""
    M, D = x.shape
    Nq = wq.shape[1]
    vmem_limit, tm_pref, tn_pref = _hw_prefs()
    tm = _pick_tile(M, tm_pref, 8)
    tn = _pick_tile(Nq, tn_pref, 128)
    _vmem_guard(vmem_limit, [((tm, D), jnp.float32), ((D, tn), jnp.bfloat16),
                             ((tm, tn), jnp.bfloat16), ((tm, D), jnp.bfloat16)])
    return pl.pallas_call(
        functools.partial(_ln_qkv_kernel, eps=eps),
        out_shape=jax.ShapeDtypeStruct((M, Nq), jnp.bfloat16),
        grid=(M // tm, Nq // tn),
        in_specs=[
            pl.BlockSpec((tm, D), lambda i, j: (i, 0)),
            pl.BlockSpec((1, D), lambda i, j: (0, 0)),
            pl.BlockSpec((1, D), lambda i, j: (0, 0)),
            pl.BlockSpec((D, tn), lambda i, j: (0, j)),
        ],
        out_specs=pl.BlockSpec((tm, tn), lambda i, j: (i, j)),
        scratch_shapes=[pltpu.VMEM((tm, D), jnp.bfloat16)],
        compiler_params=_cparams(("parallel", "arbitrary")),
    )(x, gamma.reshape(1, D), beta.reshape(1, D), wq)


def attention(qkv, heads, dim_head):
    """qkv: (B, N, 3*heads*dim_head) bf16 -> (B, N, heads*dim_head) bf16."""
    B, N, three_inner = qkv.shape
    inner = heads * dim_head
    assert three_inner == 3 * inner, "fused qkv layout must be [q|k|v], each 'b n (h d)'"
    vmem_limit, _, _ = _hw_prefs()
    _vmem_guard(vmem_limit, [((1, N, 3 * inner), jnp.bfloat16),
                             ((1, N, inner), jnp.bfloat16)])
    kern = functools.partial(_attn_kernel, heads=heads, dim_head=dim_head)
    return pl.pallas_call(
        kern,
        out_shape=jax.ShapeDtypeStruct((B, N, inner), jnp.bfloat16),
        grid=(B,),                                  # one batch item per step,
        in_specs=[pl.BlockSpec((1, N, 3 * inner), lambda b: (b, 0, 0))],
        out_specs=pl.BlockSpec((1, N, inner), lambda b: (b, 0, 0)),
        compiler_params=_cparams(("parallel",)),    # sharded across v7x's 2 TCs
    )(qkv)


def proj_res_ln_geglu(h, wo, bo, so, r, gamma, beta, wa, wg, ba, bg, *, eps=1e-5):
    """Returns (new_residual_f32, GEGLU(LN(new_residual) @ [Wa|Wg] + [ba|bg]))."""
    M, inner = h.shape
    D = wo.shape[1]
    H = wa.shape[1]
    vmem_limit, tm_pref, tn_pref = _hw_prefs()
    tm = _pick_tile(M, tm_pref, 8)
    tn = _pick_tile(H, tn_pref, 128)
    _vmem_guard(vmem_limit, [((tm, inner), jnp.bfloat16), ((inner, D), jnp.bfloat16),
                             ((tm, D), jnp.float32), ((D, tn), jnp.bfloat16),
                             ((D, tn), jnp.bfloat16), ((tm, D), jnp.float32),
                             ((tm, tn), jnp.bfloat16), ((tm, D), jnp.bfloat16)])
    return pl.pallas_call(
        functools.partial(_proj_res_ln_geglu_kernel, eps=eps),
        out_shape=(jax.ShapeDtypeStruct((M, D), jnp.float32),
                   jax.ShapeDtypeStruct((M, H), jnp.bfloat16)),
        grid=(M // tm, H // tn),
        in_specs=[
            pl.BlockSpec((tm, inner), lambda i, j: (i, 0)),   # attention output
            pl.BlockSpec((inner, D), lambda i, j: (0, 0)),    # W_attn_out
            pl.BlockSpec((1, D), lambda i, j: (0, 0)),        # b_attn_out
            pl.BlockSpec((1, D), lambda i, j: (0, 0)),        # attn LayerScale
            pl.BlockSpec((tm, D), lambda i, j: (i, 0)),       # residual in (f32)
            pl.BlockSpec((1, D), lambda i, j: (0, 0)),        # ff LN gamma
            pl.BlockSpec((1, D), lambda i, j: (0, 0)),        # ff LN beta
            pl.BlockSpec((D, tn), lambda i, j: (0, j)),       # W_ff "x" half
            pl.BlockSpec((D, tn), lambda i, j: (0, j)),       # W_ff "gates" half
            pl.BlockSpec((1, tn), lambda i, j: (0, j)),       # b_ff "x" half
            pl.BlockSpec((1, tn), lambda i, j: (0, j)),       # b_ff "gates" half
        ],
        out_specs=(
            pl.BlockSpec((tm, D), lambda i, j: (i, 0)),       # new residual (resident over j)
            pl.BlockSpec((tm, tn), lambda i, j: (i, j)),      # GEGLU output
        ),
        scratch_shapes=[pltpu.VMEM((tm, D), jnp.bfloat16)],   # LN(residual) cache
        compiler_params=_cparams(("parallel", "arbitrary")),
    )(h, wo, bo.reshape(1, D), so.reshape(1, D), r,
      gamma.reshape(1, D), beta.reshape(1, D), wa, wg,
      ba.reshape(1, H), bg.reshape(1, H))


def proj_res_ln_matmul(h, w2, b2, s2, r, gamma, beta, wq, *, eps=1e-5):
    """Returns (new_residual_f32, LN(new_residual) @ Wqkv_next)."""
    M, hid = h.shape
    D = w2.shape[1]
    Nq = wq.shape[1]
    vmem_limit, tm_pref, tn_pref = _hw_prefs()
    tm = _pick_tile(M, tm_pref, 8)
    tn = _pick_tile(Nq, tn_pref, 128)
    _vmem_guard(vmem_limit, [((tm, hid), jnp.bfloat16), ((hid, D), jnp.bfloat16),
                             ((tm, D), jnp.float32), ((D, tn), jnp.bfloat16),
                             ((tm, D), jnp.float32), ((tm, tn), jnp.bfloat16),
                             ((tm, D), jnp.bfloat16)])
    return pl.pallas_call(
        functools.partial(_proj_res_ln_matmul_kernel, eps=eps),
        out_shape=(jax.ShapeDtypeStruct((M, D), jnp.float32),
                   jax.ShapeDtypeStruct((M, Nq), jnp.bfloat16)),
        grid=(M // tm, Nq // tn),
        in_specs=[
            pl.BlockSpec((tm, hid), lambda i, j: (i, 0)),     # GEGLU output
            pl.BlockSpec((hid, D), lambda i, j: (0, 0)),      # W_ff2
            pl.BlockSpec((1, D), lambda i, j: (0, 0)),        # b_ff2
            pl.BlockSpec((1, D), lambda i, j: (0, 0)),        # ff LayerScale
            pl.BlockSpec((tm, D), lambda i, j: (i, 0)),       # residual in (f32)
            pl.BlockSpec((1, D), lambda i, j: (0, 0)),        # next attn LN gamma
            pl.BlockSpec((1, D), lambda i, j: (0, 0)),        # next attn LN beta
            pl.BlockSpec((D, tn), lambda i, j: (0, j)),       # next W_qkv (q prescaled)
        ],
        out_specs=(
            pl.BlockSpec((tm, D), lambda i, j: (i, 0)),       # new residual (resident over j)
            pl.BlockSpec((tm, tn), lambda i, j: (i, j)),      # next layer's qkv
        ),
        scratch_shapes=[pltpu.VMEM((tm, D), jnp.bfloat16)],   # LN(residual) cache
        compiler_params=_cparams(("parallel", "arbitrary")),
    )(h, w2, b2.reshape(1, D), s2.reshape(1, D), r,
      gamma.reshape(1, D), beta.reshape(1, D), wq)


def proj_scale_residual(h, w, b, scale, r):
    """Last layer only: residual + LayerScale * (h @ W + b), f32."""
    M, K = h.shape
    D = w.shape[1]
    vmem_limit, tm_pref, tn_pref = _hw_prefs()
    tm = _pick_tile(M, tm_pref, 8)
    tn = _pick_tile(D, tn_pref, 128)
    _vmem_guard(vmem_limit, [((tm, K), jnp.bfloat16), ((K, tn), jnp.bfloat16),
                             ((tm, tn), jnp.float32), ((tm, tn), jnp.float32)])
    return pl.pallas_call(
        _proj_scale_res_kernel,
        out_shape=jax.ShapeDtypeStruct((M, D), jnp.float32),
        grid=(M // tm, D // tn),
        in_specs=[
            pl.BlockSpec((tm, K), lambda i, j: (i, 0)),
            pl.BlockSpec((K, tn), lambda i, j: (0, j)),
            pl.BlockSpec((1, tn), lambda i, j: (0, j)),
            pl.BlockSpec((1, tn), lambda i, j: (0, j)),
            pl.BlockSpec((tm, tn), lambda i, j: (i, j)),
        ],
        out_specs=pl.BlockSpec((tm, tn), lambda i, j: (i, j)),
        compiler_params=_cparams(("parallel", "parallel")),
    )(h, w, b.reshape(1, D), scale.reshape(1, D), r)


# ------------------------------------------------------------- model glue

@functools.partial(jax.jit, static_argnames=("heads", "dim_head"))
def transformer_forward(x, layers, *, heads, dim_head):
    """SequentialSequence of LayerScale(PreNorm(Attention)) / LayerScale(PreNorm(FF))."""
    # TODO(synk): optional key-padding `mask` routing to attention is not
    # implemented (eval path passes no mask; causal=False matches reference).
    B, N, D = x.shape
    inner = heads * dim_head
    M = B * N
    depth = len(layers)
    xf = x.reshape(M, D)                                   # f32 residual stream
    # first LayerNorm + qkv projection (subsequent ones are fused into the
    # previous layer's ff2-projection kernel, so the f32 residual never makes
    # an extra HBM round trip between projection and LayerNorm)
    qkv = ln_qkv(xf, layers[0]["attn_ln_g"], layers[0]["attn_ln_b"],
                 layers[0]["w_qkv"])
    for li, lyr in enumerate(layers):
        # ---- x = x + LayerScale(PreNorm(Attention)(x)); then FF's LN+ff1+GEGLU
        ao = attention(qkv.reshape(B, N, 3 * inner), heads, dim_head)
        xf, gg = proj_res_ln_geglu(
            ao.reshape(M, inner), lyr["w_attn_out"], lyr["b_attn_out"],
            lyr["attn_scale"], xf, lyr["ff_ln_g"], lyr["ff_ln_b"],
            lyr["w_ff_a"], lyr["w_ff_g"], lyr["b_ff_a"], lyr["b_ff_g"])
        # ---- x = x + LayerScale(PreNorm(FeedForward)(x)); then next LN+qkv
        if li + 1 < depth:
            nxt = layers[li + 1]
            xf, qkv = proj_res_ln_matmul(
                gg, lyr["w_ff2"], lyr["b_ff2"], lyr["ff_scale"], xf,
                nxt["attn_ln_g"], nxt["attn_ln_b"], nxt["w_qkv"])
        else:
            xf = proj_scale_residual(gg, lyr["w_ff2"], lyr["b_ff2"],
                                     lyr["ff_scale"], xf)
    return xf.reshape(B, N, D)


# ------------------------------------------------------------- param init

def make_params(key, cfg):
    D = cfg["dim"]
    heads, dh = cfg["heads"], cfg["dim_head"]
    inner = heads * dh
    hid = D * cfg["ff_mult"]
    keys = iter(jax.random.split(key, 16 * cfg["depth"] + 8))

    def nrm(shape, s=0.02):
        return s * jax.random.normal(next(keys), shape, jnp.float32)

    layers = []
    for ind in range(cfg["depth"]):
        d = ind + 1
        init_eps = 0.1 if d <= 18 else (1e-5 if d <= 24 else 1e-6)  # LayerScale init
        # bias-free qkv weight with the attention q-scale (dim_head**-0.5)
        # folded into its first `inner` (query) columns — one-time weight
        # transform, mathematically identical to the reference's `q = q*scale`.
        w_qkv = nrm((D, 3 * inner))
        w_qkv = w_qkv.at[:, :inner].multiply(dh ** -0.5)
        layers.append(dict(
            attn_ln_g=jnp.ones((D,), jnp.float32),
            attn_ln_b=jnp.zeros((D,), jnp.float32),
            w_qkv=w_qkv.astype(jnp.bfloat16),                # bias=False
            w_attn_out=nrm((inner, D)).astype(jnp.bfloat16),
            b_attn_out=nrm((D,)),
            attn_scale=jnp.full((D,), init_eps, jnp.float32),
            ff_ln_g=jnp.ones((D,), jnp.float32),
            ff_ln_b=jnp.zeros((D,), jnp.float32),
            # Linear(dim, 2*hid) split into the GEGLU "x" and "gates" halves
            w_ff_a=nrm((D, hid)).astype(jnp.bfloat16),
            w_ff_g=nrm((D, hid)).astype(jnp.bfloat16),
            b_ff_a=nrm((hid,)),
            b_ff_g=nrm((hid,)),
            w_ff2=nrm((hid, D)).astype(jnp.bfloat16),
            b_ff2=nrm((D,)),
            ff_scale=jnp.full((D,), init_eps, jnp.float32),
        ))
    return layers


# ------------------------------------------------------------------- main

if __name__ == "__main__":
    cfg = dict(dim=256, depth=2, heads=4, dim_head=64, ff_mult=4,
               seq_len=32, batch=2)

    root = jax.random.PRNGKey(0)
    kp, kx = jax.random.split(root)
    layers = make_params(kp, cfg)

    x = jax.random.normal(kx, (cfg["batch"], cfg["seq_len"], cfg["dim"]),
                          jnp.float32)

    y = transformer_forward(x, layers, heads=cfg["heads"],
                            dim_head=cfg["dim_head"])
    y = jax.block_until_ready(y)
    assert y.shape == x.shape
    assert bool(jnp.all(jnp.isfinite(y)))
    print("KERNEL_OK")
</pallas_src>

<mosaic_0001>
module attributes {stable_mosaic.version = 11 : i64} {
  func.func @_proj_res_ln_matmul_kernel(%arg0: i32, %arg1: i32, %arg2: memref<64x1024xbf16, #tpu.memory_space<vmem>>, %arg3: memref<1024x256xbf16, #tpu.memory_space<vmem>>, %arg4: memref<1x256xf32, #tpu.memory_space<vmem>>, %arg5: memref<1x256xf32, #tpu.memory_space<vmem>>, %arg6: memref<64x256xf32, #tpu.memory_space<vmem>>, %arg7: memref<1x256xf32, #tpu.memory_space<vmem>>, %arg8: memref<1x256xf32, #tpu.memory_space<vmem>>, %arg9: memref<256x256xbf16, #tpu.memory_space<vmem>>, %arg10: memref<64x256xf32, #tpu.memory_space<vmem>>, %arg11: memref<64x256xbf16, #tpu.memory_space<vmem>>, %arg12: memref<64x256xbf16, #tpu.memory_space<vmem>>) attributes {dimension_semantics = [#tpu.dimension_semantics<parallel>, #tpu.dimension_semantics<arbitrary>], iteration_bounds = array<i64: 1, 3>, scalar_prefetch = 0 : i64, scratch_operands = 1 : i64, tpu.core_type = #tpu.core_type<tc>, window_params = [{transform_indices = @transform_0, window_bounds = array<i64: 64, 1024>}, {pipeline_mode = #tpu.pipeline_mode<synchronous>, transform_indices = @transform_1, window_bounds = array<i64: 1024, 256>}, {pipeline_mode = #tpu.pipeline_mode<synchronous>, transform_indices = @transform_2, window_bounds = array<i64: 1, 256>}, {pipeline_mode = #tpu.pipeline_mode<synchronous>, transform_indices = @transform_3, window_bounds = array<i64: 1, 256>}, {transform_indices = @transform_4, window_bounds = array<i64: 64, 256>}, {pipeline_mode = #tpu.pipeline_mode<synchronous>, transform_indices = @transform_5, window_bounds = array<i64: 1, 256>}, {pipeline_mode = #tpu.pipeline_mode<synchronous>, transform_indices = @transform_6, window_bounds = array<i64: 1, 256>}, {transform_indices = @transform_7, window_bounds = array<i64: 256, 256>}, {transform_indices = @transform_8, window_bounds = array<i64: 64, 256>}, {transform_indices = @transform_9, window_bounds = array<i64: 64, 256>}]} {
    %c0_i32 = arith.constant 0 : i32
    %0 = arith.cmpi eq, %arg1, %c0_i32 : i32
    %1 = arith.extui %0 : i1 to i32
    %c0_i32_0 = arith.constant 0 : i32
    %2 = arith.cmpi ne, %1, %c0_i32_0 : i32
    scf.if %2 {
      %c0_6 = arith.constant 0 : index
      %c0_7 = arith.constant 0 : index
      %8 = vector.load %arg2[%c0_6, %c0_7] : memref<64x1024xbf16, #tpu.memory_space<vmem>>, vector<64x1024xbf16>
      %c0_8 = arith.constant 0 : index
      %c0_9 = arith.constant 0 : index
      %9 = vector.load %arg3[%c0_8, %c0_9] : memref<1024x256xbf16, #tpu.memory_space<vmem>>, vector<1024x256xbf16>
      %cst_10 = arith.constant dense<0.000000e+00> : vector<64x256xf32>
      %10 = tpu.matmul %8, %9, %cst_10 {dimension_numbers = #tpu.dot_dimension_numbers<[1], [0], [0], [1], [0, 0, 1, 1], [], []>} : vector<64x1024xbf16>, vector<1024x256xbf16>, vector<64x256xf32> -> vector<64x256xf32>
      %c0_11 = arith.constant 0 : index
      %c0_12 = arith.constant 0 : index
      %11 = vector.load %arg6[%c0_11, %c0_12] : memref<64x256xf32, #tpu.memory_space<vmem>>, vector<64x256xf32>
      %c0_13 = arith.constant 0 : index
      %c0_14 = arith.constant 0 : index
      %12 = vector.load %arg4[%c0_13, %c0_14] : memref<1x256xf32, #tpu.memory_space<vmem>>, vector<1x256xf32>
      %13 = vector.broadcast %12 : vector<1x256xf32> to vector<64x256xf32>
      %14 = arith.addf %10, %13 : vector<64x256xf32>
      %c0_15 = arith.constant 0 : index
      %c0_16 = arith.constant 0 : index
      %15 = vector.load %arg5[%c0_15, %c0_16] : memref<1x256xf32, #tpu.memory_space<vmem>>, vector<1x256xf32>
      %16 = vector.broadcast %15 : vector<1x256xf32> to vector<64x256xf32>
      %17 = arith.mulf %14, %16 : vector<64x256xf32>
      %18 = arith.addf %11, %17 : vector<64x256xf32>
      %c0_17 = arith.constant 0 : index
      %c0_18 = arith.constant 0 : index
      %19 = vector.load %arg10[%c0_17, %c0_18] : memref<64x256xf32, #tpu.memory_space<vmem>>, vector<64x256xf32>
      tpu.vector_store %arg10[%c0_17, %c0_18], %18 {strides = array<i32>} : memref<64x256xf32, #tpu.memory_space<vmem>>, vector<64x256xf32>,
      %cst_19 = arith.constant dense<0.000000e+00> : vector<64xf32>
      %20 = vector.multi_reduction <add>, %18, %cst_19 [1] : vector<64x256xf32> to vector<64xf32>
      %21 = vector.shape_cast %20 : vector<64xf32> to vector<64x1xf32>
      %cst_20 = arith.constant 2.560000e+02 : f32
      %22 = vector.broadcast %cst_20 : f32 to vector<64x1xf32>
      %23 = arith.divf %21, %22 : vector<64x1xf32>
      %24 = vector.broadcast %23 : vector<64x1xf32> to vector<64x256xf32>
      %25 = arith.subf %18, %24 : vector<64x256xf32>
      %26 = arith.mulf %25, %25 : vector<64x256xf32>
      %cst_21 = arith.constant dense<0.000000e+00> : vector<64xf32>
      %27 = vector.multi_reduction <add>, %26, %cst_21 [1] : vector<64x256xf32> to vector<64xf32>
      %28 = vector.shape_cast %27 : vector<64xf32> to vector<64x1xf32>
      %cst_22 = arith.constant 2.560000e+02 : f32
      %29 = vector.broadcast %cst_22 : f32 to vector<64x1xf32>
      %30 = arith.divf %28, %29 : vector<64x1xf32>
      %31 = vector.broadcast %23 : vector<64x1xf32> to vector<64x256xf32>
      %32 = arith.subf %18, %31 : vector<64x256xf32>
      %cst_23 = arith.constant 9.99999974E-6 : f32
      %33 = vector.broadcast %cst_23 : f32 to vector<64x1xf32>
      %34 = arith.addf %30, %33 : vector<64x1xf32>
      %35 = math.rsqrt %34 : vector<64x1xf32>
      %36 = vector.broadcast %35 : vector<64x1xf32> to vector<64x256xf32>
      %37 = arith.mulf %32, %36 : vector<64x256xf32>
      %c0_24 = arith.constant 0 : index
      %c0_25 = arith.constant 0 : index
      %38 = vector.load %arg7[%c0_24, %c0_25] : memref<1x256xf32, #tpu.memory_space<vmem>>, vector<1x256xf32>
      %39 = vector.broadcast %38 : vector<1x256xf32> to vector<64x256xf32>
      %40 = arith.mulf %37, %39 : vector<64x256xf32>
      %c0_26 = arith.constant 0 : index
      %c0_27 = arith.constant 0 : index
      %41 = vector.load %arg8[%c0_26, %c0_27] : memref<1x256xf32, #tpu.memory_space<vmem>>, vector<1x256xf32>
      %42 = vector.broadcast %41 : vector<1x256xf32> to vector<64x256xf32>
      %43 = arith.addf %40, %42 : vector<64x256xf32>
      %44 = arith.truncf %43 : vector<64x256xf32> to vector<64x256xbf16>
      %c0_28 = arith.constant 0 : index
      %c0_29 = arith.constant 0 : index
      %45 = vector.load %arg12[%c0_28, %c0_29] : memref<64x256xbf16, #tpu.memory_space<vmem>>, vector<64x256xbf16>
      tpu.vector_store %arg12[%c0_28, %c0_29], %44 {strides = array<i32>} : memref<64x256xbf16, #tpu.memory_space<vmem>>, vector<64x256xbf16>,
    } else {
    }
    %c0 = arith.constant 0 : index
    %c0_1 = arith.constant 0 : index
    %3 = vector.load %arg12[%c0, %c0_1] : memref<64x256xbf16, #tpu.memory_space<vmem>>, vector<64x256xbf16>
    %c0_2 = arith.constant 0 : index
    %c0_3 = arith.constant 0 : index
    %4 = vector.load %arg9[%c0_2, %c0_3] : memref<256x256xbf16, #tpu.memory_space<vmem>>, vector<256x256xbf16>
    %cst = arith.constant dense<0.000000e+00> : vector<64x256xf32>
    %5 = tpu.matmul %3, %4, %cst {dimension_numbers = #tpu.dot_dimension_numbers<[1], [0], [0], [1], [0, 0, 1, 1], [], []>} : vector<64x256xbf16>, vector<256x256xbf16>, vector<64x256xf32> -> vector<64x256xf32>
    %6 = arith.truncf %5 : vector<64x256xf32> to vector<64x256xbf16>
    %c0_4 = arith.constant 0 : index
    %c0_5 = arith.constant 0 : index
    %7 = vector.load %arg11[%c0_4, %c0_5] : memref<64x256xbf16, #tpu.memory_space<vmem>>, vector<64x256xbf16>
    tpu.vector_store %arg11[%c0_4, %c0_5], %6 {strides = array<i32>} : memref<64x256xbf16, #tpu.memory_space<vmem>>, vector<64x256xbf16>,
    return
  }
  func.func @transform_0(%arg0: i32, %arg1: i32) -> (i32, i32) {
    %c0_i32 = arith.constant 0 : i32
    %c0_i32_0 = arith.constant 0 : i32
    return %arg0, %c0_i32 : i32, i32
  }
  func.func @transform_1(%arg0: i32, %arg1: i32) -> (i32, i32) {
    %c0_i32 = arith.constant 0 : i32
    %c0_i32_0 = arith.constant 0 : i32
    %c0_i32_1 = arith.constant 0 : i32
    return %c0_i32, %c0_i32_0 : i32, i32
  }
  func.func @transform_2(%arg0: i32, %arg1: i32) -> (i32, i32) {
    %c0_i32 = arith.constant 0 : i32
    %c0_i32_0 = arith.constant 0 : i32
    %c0_i32_1 = arith.constant 0 : i32
    return %c0_i32, %c0_i32_0 : i32, i32
  }
  func.func @transform_3(%arg0: i32, %arg1: i32) -> (i32, i32) {
    %c0_i32 = arith.constant 0 : i32
    %c0_i32_0 = arith.constant 0 : i32
    %c0_i32_1 = arith.constant 0 : i32
    return %c0_i32, %c0_i32_0 : i32, i32
  }
  func.func @transform_4(%arg0: i32, %arg1: i32) -> (i32, i32) {
    %c0_i32 = arith.constant 0 : i32
    %c0_i32_0 = arith.constant 0 : i32
    return %arg0, %c0_i32 : i32, i32
  }
  func.func @transform_5(%arg0: i32, %arg1: i32) -> (i32, i32) {
    %c0_i32 = arith.constant 0 : i32
    %c0_i32_0 = arith.constant 0 : i32
    %c0_i32_1 = arith.constant 0 : i32
    return %c0_i32, %c0_i32_0 : i32, i32
  }
  func.func @transform_6(%arg0: i32, %arg1: i32) -> (i32, i32) {
    %c0_i32 = arith.constant 0 : i32
    %c0_i32_0 = arith.constant 0 : i32
    %c0_i32_1 = arith.constant 0 : i32
    return %c0_i32, %c0_i32_0 : i32, i32
  }
  func.func @transform_7(%arg0: i32, %arg1: i32) -> (i32, i32) {
    %c0_i32 = arith.constant 0 : i32
    %c0_i32_0 = arith.constant 0 : i32
    return %c0_i32, %arg1 : i32, i32
  }
  func.func @transform_8(%arg0: i32, %arg1: i32) -> (i32, i32) {
    %c0_i32 = arith.constant 0 : i32
    %c0_i32_0 = arith.constant 0 : i32
    return %arg0, %c0_i32 : i32, i32
  }
  func.func @transform_9(%arg0: i32, %arg1: i32) -> (i32, i32) {
    %c0_i32 = arith.constant 0 : i32
    return %arg0, %arg1 : i32, i32
  }
}

module attributes {stable_mosaic.version = 11 : i64} {
  func.func @_attn_kernel(%arg0: i32, %arg1: memref<1x32x768xbf16, #tpu.memory_space<vmem>>, %arg2: memref<1x32x256xbf16, #tpu.memory_space<vmem>>) attributes {dimension_semantics = [#tpu.dimension_semantics<parallel>], iteration_bounds = array<i64: 2>, scalar_prefetch = 0 : i64, scratch_operands = 0 : i64, tpu.core_type = #tpu.core_type<tc>, window_params = [{transform_indices = @transform_0, window_bounds = array<i64: 1, 32, 768>}, {transform_indices = @transform_1, window_bounds = array<i64: 1, 32, 256>}]} {
    %c0 = arith.constant 0 : index
    %c0_0 = arith.constant 0 : index
    %c0_1 = arith.constant 0 : index
    %0 = vector.load %arg1[%c0, %c0_0, %c0_1] : memref<1x32x768xbf16, #tpu.memory_space<vmem>>, vector<1x32x768xbf16>
    %1 = vector.shape_cast %0 : vector<1x32x768xbf16> to vector<32x768xbf16>
    %2 = vector.extract_strided_slice %1 {offsets = [0, 0], sizes = [32, 64], strides = [1, 1]} : vector<32x768xbf16> to vector<32x64xbf16>
    %3 = vector.extract_strided_slice %1 {offsets = [0, 64], sizes = [32, 64], strides = [1, 1]} : vector<32x768xbf16> to vector<32x64xbf16>
    %4 = vector.extract_strided_slice %1 {offsets = [0, 128], sizes = [32, 64], strides = [1, 1]} : vector<32x768xbf16> to vector<32x64xbf16>
    %5 = vector.extract_strided_slice %1 {offsets = [0, 192], sizes = [32, 64], strides = [1, 1]} : vector<32x768xbf16> to vector<32x64xbf16>
    %6 = vector.shape_cast %2 : vector<32x64xbf16> to vector<1x32x64xbf16>
    %7 = vector.shape_cast %3 : vector<32x64xbf16> to vector<1x32x64xbf16>
    %8 = vector.shape_cast %4 : vector<32x64xbf16> to vector<1x32x64xbf16>
    %9 = vector.shape_cast %5 : vector<32x64xbf16> to vector<1x32x64xbf16>
    %10 = tpu.concatenate %6, %7, %8, %9 in 0 : vector<1x32x64xbf16>, vector<1x32x64xbf16>, vector<1x32x64xbf16>, vector<1x32x64xbf16> -> vector<4x32x64xbf16>
    %11 = vector.extract_strided_slice %1 {offsets = [0, 256], sizes = [32, 64], strides = [1, 1]} : vector<32x768xbf16> to vector<32x64xbf16>
    %12 = vector.extract_strided_slice %1 {offsets = [0, 320], sizes = [32, 64], strides = [1, 1]} : vector<32x768xbf16> to vector<32x64xbf16>
    %13 = vector.extract_strided_slice %1 {offsets = [0, 384], sizes = [32, 64], strides = [1, 1]} : vector<32x768xbf16> to vector<32x64xbf16>
    %14 = vector.extract_strided_slice %1 {offsets = [0, 448], sizes = [32, 64], strides = [1, 1]} : vector<32x768xbf16> to vector<32x64xbf16>
    %15 = vector.shape_cast %11 : vector<32x64xbf16> to vector<1x32x64xbf16>
    %16 = vector.shape_cast %12 : vector<32x64xbf16> to vector<1x32x64xbf16>
    %17 = vector.shape_cast %13 : vector<32x64xbf16> to vector<1x32x64xbf16>
    %18 = vector.shape_cast %14 : vector<32x64xbf16> to vector<1x32x64xbf16>
    %19 = tpu.concatenate %15, %16, %17, %18 in 0 : vector<1x32x64xbf16>, vector<1x32x64xbf16>, vector<1x32x64xbf16>, vector<1x32x64xbf16> -> vector<4x32x64xbf16>
    %20 = vector.extract_strided_slice %1 {offsets = [0, 512], sizes = [32, 64], strides = [1, 1]} : vector<32x768xbf16> to vector<32x64xbf16>
    %21 = vector.extract_strided_slice %1 {offsets = [0, 576], sizes = [32, 64], strides = [1, 1]} : vector<32x768xbf16> to vector<32x64xbf16>
    %22 = vector.extract_strided_slice %1 {offsets = [0, 640], sizes = [32, 64], strides = [1, 1]} : vector<32x768xbf16> to vector<32x64xbf16>
    %23 = vector.extract_strided_slice %1 {offsets = [0, 704], sizes = [32, 64], strides = [1, 1]} : vector<32x768xbf16> to vector<32x64xbf16>
    %24 = vector.shape_cast %20 : vector<32x64xbf16> to vector<1x32x64xbf16>
    %25 = vector.shape_cast %21 : vector<32x64xbf16> to vector<1x32x64xbf16>
    %26 = vector.shape_cast %22 : vector<32x64xbf16> to vector<1x32x64xbf16>
    %27 = vector.shape_cast %23 : vector<32x64xbf16> to vector<1x32x64xbf16>
    %28 = tpu.concatenate %24, %25, %26, %27 in 0 : vector<1x32x64xbf16>, vector<1x32x64xbf16>, vector<1x32x64xbf16>, vector<1x32x64xbf16> -> vector<4x32x64xbf16>
    "tpu.trace_start"() <{level = 10 : i32, message = "hqd,hkd->hqk"}> : () -> ()
    %cst = arith.constant dense<0.000000e+00> : vector<4x32x32xf32>
    %29 = tpu.matmul %10, %19, %cst {dimension_numbers = #tpu.dot_dimension_numbers<[2], [2], [1], [1], [0, 0, 0, 1, 1, 1], [0], [0]>} : vector<4x32x64xbf16>, vector<4x32x64xbf16>, vector<4x32x32xf32> -> vector<4x32x32xf32>
    "tpu.trace_stop"() : () -> ()
    %cst_2 = arith.constant dense<0xFF800000> : vector<4x32xf32>
    %30 = vector.multi_reduction <maximumf>, %29, %cst_2 [2] : vector<4x32x32xf32> to vector<4x32xf32>
    %31 = vector.shape_cast %30 : vector<4x32xf32> to vector<4x32x1xf32>
    %32 = vector.broadcast %31 : vector<4x32x1xf32> to vector<4x32x32xf32>
    %33 = arith.subf %29, %32 : vector<4x32x32xf32>
    %34 = math.exp %33 : vector<4x32x32xf32>
    %cst_3 = arith.constant dense<0.000000e+00> : vector<4x32xf32>
    %35 = vector.multi_reduction <add>, %34, %cst_3 [2] : vector<4x32x32xf32> to vector<4x32xf32>
    %36 = vector.shape_cast %35 : vector<4x32xf32> to vector<4x32x1xf32>
    %37 = vector.broadcast %36 : vector<4x32x1xf32> to vector<4x32x32xf32>
    %38 = arith.divf %34, %37 : vector<4x32x32xf32>
    %39 = arith.truncf %38 : vector<4x32x32xf32> to vector<4x32x32xbf16>
    "tpu.trace_start"() <{level = 10 : i32, message = "hqk,hkd->hqd"}> : () -> ()
    %cst_4 = arith.constant dense<0.000000e+00> : vector<4x32x64xf32>
    %40 = tpu.matmul %39, %28, %cst_4 {dimension_numbers = #tpu.dot_dimension_numbers<[2], [1], [1], [2], [0, 0, 0, 1, 1, 2], [0], [0]>} : vector<4x32x32xbf16>, vector<4x32x64xbf16>, vector<4x32x64xf32> -> vector<4x32x64xf32>
    "tpu.trace_stop"() : () -> ()
    %41 = vector.extract_strided_slice %40 {offsets = [0, 0, 0], sizes = [1, 32, 64], strides = [1, 1, 1]} : vector<4x32x64xf32> to vector<1x32x64xf32>
    %42 = vector.shape_cast %41 : vector<1x32x64xf32> to vector<32x64xf32>
    %43 = vector.extract_strided_slice %40 {offsets = [1, 0, 0], sizes = [1, 32, 64], strides = [1, 1, 1]} : vector<4x32x64xf32> to vector<1x32x64xf32>
    %44 = vector.shape_cast %43 : vector<1x32x64xf32> to vector<32x64xf32>
    %45 = vector.extract_strided_slice %40 {offsets = [2, 0, 0], sizes = [1, 32, 64], strides = [1, 1, 1]} : vector<4x32x64xf32> to vector<1x32x64xf32>
    %46 = vector.shape_cast %45 : vector<1x32x64xf32> to vector<32x64xf32>
    %47 = vector.extract_strided_slice %40 {offsets = [3, 0, 0], sizes = [1, 32, 64], strides = [1, 1, 1]} : vector<4x32x64xf32> to vector<1x32x64xf32>
    %48 = vector.shape_cast %47 : vector<1x32x64xf32> to vector<32x64xf32>
    %49 = tpu.concatenate %42, %44, %46, %48 in 1 : vector<32x64xf32>, vector<32x64xf32>, vector<32x64xf32>, vector<32x64xf32> -> vector<32x256xf32>
    %50 = arith.truncf %49 : vector<32x256xf32> to vector<32x256xbf16>
    %c0_5 = arith.constant 0 : index
    %c0_6 = arith.constant 0 : index
    %c0_7 = arith.constant 0 : index
    %51 = vector.load %arg2[%c0_5, %c0_6, %c0_7] : memref<1x32x256xbf16, #tpu.memory_space<vmem>>, vector<1x32x256xbf16>
    %52 = vector.shape_cast %51 : vector<1x32x256xbf16> to vector<32x256xbf16>
    %53 = vector.shape_cast %50 : vector<32x256xbf16> to vector<1x32x256xbf16>
    tpu.vector_store %arg2[%c0_5, %c0_6, %c0_7], %53 {strides = array<i32>} : memref<1x32x256xbf16, #tpu.memory_space<vmem>>, vector<1x32x256xbf16>,
    return
  }
  func.func @transform_0(%arg0: i32) -> (i32, i32, i32) {
    %c0_i32 = arith.constant 0 : i32
    %c0_i32_0 = arith.constant 0 : i32
    %c0_i32_1 = arith.constant 0 : i32
    return %arg0, %c0_i32, %c0_i32_0 : i32, i32, i32
  }
  func.func @transform_1(%arg0: i32) -> (i32, i32, i32) {
    %c0_i32 = arith.constant 0 : i32
    %c0_i32_0 = arith.constant 0 : i32
    %c0_i32_1 = arith.constant 0 : i32
    return %arg0, %c0_i32, %c0_i32_0 : i32, i32, i32
  }
}

module attributes {stable_mosaic.version = 11 : i64} {
  func.func @_ln_qkv_kernel(%arg0: i32, %arg1: i32, %arg2: memref<64x256xf32, #tpu.memory_space<vmem>>, %arg3: memref<1x256xf32, #tpu.memory_space<vmem>>, %arg4: memref<1x256xf32, #tpu.memory_space<vmem>>, %arg5: memref<256x256xbf16, #tpu.memory_space<vmem>>, %arg6: memref<64x256xbf16, #tpu.memory_space<vmem>>, %arg7: memref<64x256xbf16, #tpu.memory_space<vmem>>) attributes {dimension_semantics = [#tpu.dimension_semantics<parallel>, #tpu.dimension_semantics<arbitrary>], iteration_bounds = array<i64: 1, 3>, scalar_prefetch = 0 : i64, scratch_operands = 1 : i64, tpu.core_type = #tpu.core_type<tc>, window_params = [{transform_indices = @transform_0, window_bounds = array<i64: 64, 256>}, {pipeline_mode = #tpu.pipeline_mode<synchronous>, transform_indices = @transform_1, window_bounds = array<i64: 1, 256>}, {pipeline_mode = #tpu.pipeline_mode<synchronous>, transform_indices = @transform_2, window_bounds = array<i64: 1, 256>}, {transform_indices = @transform_3, window_bounds = array<i64: 256, 256>}, {transform_indices = @transform_4, window_bounds = array<i64: 64, 256>}]} {
    %c0_i32 = arith.constant 0 : i32
    %0 = arith.cmpi eq, %arg1, %c0_i32 : i32
    %1 = arith.extui %0 : i1 to i32
    %c0_i32_0 = arith.constant 0 : i32
    %2 = arith.cmpi ne, %1, %c0_i32_0 : i32
    scf.if %2 {
      %c0_6 = arith.constant 0 : index
      %c0_7 = arith.constant 0 : index
      %8 = vector.load %arg2[%c0_6, %c0_7] : memref<64x256xf32, #tpu.memory_space<vmem>>, vector<64x256xf32>
      %cst_8 = arith.constant dense<0.000000e+00> : vector<64xf32>
      %9 = vector.multi_reduction <add>, %8, %cst_8 [1] : vector<64x256xf32> to vector<64xf32>
      %10 = vector.shape_cast %9 : vector<64xf32> to vector<64x1xf32>
      %cst_9 = arith.constant 2.560000e+02 : f32
      %11 = vector.broadcast %cst_9 : f32 to vector<64x1xf32>
      %12 = arith.divf %10, %11 : vector<64x1xf32>
      %13 = vector.broadcast %12 : vector<64x1xf32> to vector<64x256xf32>
      %14 = arith.subf %8, %13 : vector<64x256xf32>
      %15 = arith.mulf %14, %14 : vector<64x256xf32>
      %cst_10 = arith.constant dense<0.000000e+00> : vector<64xf32>
      %16 = vector.multi_reduction <add>, %15, %cst_10 [1] : vector<64x256xf32> to vector<64xf32>
      %17 = vector.shape_cast %16 : vector<64xf32> to vector<64x1xf32>
      %cst_11 = arith.constant 2.560000e+02 : f32
      %18 = vector.broadcast %cst_11 : f32 to vector<64x1xf32>
      %19 = arith.divf %17, %18 : vector<64x1xf32>
      %20 = vector.broadcast %12 : vector<64x1xf32> to vector<64x256xf32>
      %21 = arith.subf %8, %20 : vector<64x256xf32>
      %cst_12 = arith.constant 9.99999974E-6 : f32
      %22 = vector.broadcast %cst_12 : f32 to vector<64x1xf32>
      %23 = arith.addf %19, %22 : vector<64x1xf32>
      %24 = math.rsqrt %23 : vector<64x1xf32>
      %25 = vector.broadcast %24 : vector<64x1xf32> to vector<64x256xf32>
      %26 = arith.mulf %21, %25 : vector<64x256xf32>
      %c0_13 = arith.constant 0 : index
      %c0_14 = arith.constant 0 : index
      %27 = vector.load %arg3[%c0_13, %c0_14] : memref<1x256xf32, #tpu.memory_space<vmem>>, vector<1x256xf32>
      %28 = vector.broadcast %27 : vector<1x256xf32> to vector<64x256xf32>
      %29 = arith.mulf %26, %28 : vector<64x256xf32>
      %c0_15 = arith.constant 0 : index
      %c0_16 = arith.constant 0 : index
      %30 = vector.load %arg4[%c0_15, %c0_16] : memref<1x256xf32, #tpu.memory_space<vmem>>, vector<1x256xf32>
      %31 = vector.broadcast %30 : vector<1x256xf32> to vector<64x256xf32>
      %32 = arith.addf %29, %31 : vector<64x256xf32>
      %33 = arith.truncf %32 : vector<64x256xf32> to vector<64x256xbf16>
      %c0_17 = arith.constant 0 : index
      %c0_18 = arith.constant 0 : index
      %34 = vector.load %arg7[%c0_17, %c0_18] : memref<64x256xbf16, #tpu.memory_space<vmem>>, vector<64x256xbf16>
      tpu.vector_store %arg7[%c0_17, %c0_18], %33 {strides = array<i32>} : memref<64x256xbf16, #tpu.memory_space<vmem>>, vector<64x256xbf16>,
    } else {
    }
    %c0 = arith.constant 0 : index
    %c0_1 = arith.constant 0 : index
    %3 = vector.load %arg7[%c0, %c0_1] : memref<64x256xbf16, #tpu.memory_space<vmem>>, vector<64x256xbf16>
    %c0_2 = arith.constant 0 : index
    %c0_3 = arith.constant 0 : index
    %4 = vector.load %arg5[%c0_2, %c0_3] : memref<256x256xbf16, #tpu.memory_space<vmem>>, vector<256x256xbf16>
    %cst = arith.constant dense<0.000000e+00> : vector<64x256xf32>
    %5 = tpu.matmul %3, %4, %cst {dimension_numbers = #tpu.dot_dimension_numbers<[1], [0], [0], [1], [0, 0, 1, 1], [], []>} : vector<64x256xbf16>, vector<256x256xbf16>, vector<64x256xf32> -> vector<64x256xf32>
    %6 = arith.truncf %5 : vector<64x256xf32> to vector<64x256xbf16>
    %c0_4 = arith.constant 0 : index
    %c0_5 = arith.constant 0 : index
    %7 = vector.load %arg6[%c0_4, %c0_5] : memref<64x256xbf16, #tpu.memory_space<vmem>>, vector<64x256xbf16>
    tpu.vector_store %arg6[%c0_4, %c0_5], %6 {strides = array<i32>} : memref<64x256xbf16, #tpu.memory_space<vmem>>, vector<64x256xbf16>,
    return
  }
  func.func @transform_0(%arg0: i32, %arg1: i32) -> (i32, i32) {
    %c0_i32 = arith.constant 0 : i32
    %c0_i32_0 = arith.constant 0 : i32
    return %arg0, %c0_i32 : i32, i32
  }
  func.func @transform_1(%arg0: i32, %arg1: i32) -> (i32, i32) {
    %c0_i32 = arith.constant 0 : i32
    %c0_i32_0 = arith.constant 0 : i32
    %c0_i32_1 = arith.constant 0 : i32
    return %c0_i32, %c0_i32_0 : i32, i32
  }
  func.func @transform_2(%arg0: i32, %arg1: i32) -> (i32, i32) {
    %c0_i32 = arith.constant 0 : i32
    %c0_i32_0 = arith.constant 0 : i32
    %c0_i32_1 = arith.constant 0 : i32
    return %c0_i32, %c0_i32_0 : i32, i32
  }
  func.func @transform_3(%arg0: i32, %arg1: i32) -> (i32, i32) {
    %c0_i32 = arith.constant 0 : i32
    %c0_i32_0 = arith.constant 0 : i32
    return %c0_i32, %arg1 : i32, i32
  }
  func.func @transform_4(%arg0: i32, %arg1: i32) -> (i32, i32) {
    %c0_i32 = arith.constant 0 : i32
    return %arg0, %arg1 : i32, i32
  }
}

module attributes {stable_mosaic.version = 11 : i64} {
  func.func @_proj_res_ln_geglu_kernel(%arg0: i32, %arg1: i32, %arg2: memref<64x256xbf16, #tpu.memory_space<vmem>>, %arg3: memref<256x256xbf16, #tpu.memory_space<vmem>>, %arg4: memref<1x256xf32, #tpu.memory_space<vmem>>, %arg5: memref<1x256xf32, #tpu.memory_space<vmem>>, %arg6: memref<64x256xf32, #tpu.memory_space<vmem>>, %arg7: memref<1x256xf32, #tpu.memory_space<vmem>>, %arg8: memref<1x256xf32, #tpu.memory_space<vmem>>, %arg9: memref<256x256xbf16, #tpu.memory_space<vmem>>, %arg10: memref<256x256xbf16, #tpu.memory_space<vmem>>, %arg11: memref<1x256xf32, #tpu.memory_space<vmem>>, %arg12: memref<1x256xf32, #tpu.memory_space<vmem>>, %arg13: memref<64x256xf32, #tpu.memory_space<vmem>>, %arg14: memref<64x256xbf16, #tpu.memory_space<vmem>>, %arg15: memref<64x256xbf16, #tpu.memory_space<vmem>>) attributes {dimension_semantics = [#tpu.dimension_semantics<parallel>, #tpu.dimension_semantics<arbitrary>], iteration_bounds = array<i64: 1, 4>, scalar_prefetch = 0 : i64, scratch_operands = 1 : i64, tpu.core_type = #tpu.core_type<tc>, window_params = [{transform_indices = @transform_0, window_bounds = array<i64: 64, 256>}, {pipeline_mode = #tpu.pipeline_mode<synchronous>, transform_indices = @transform_1, window_bounds = array<i64: 256, 256>}, {pipeline_mode = #tpu.pipeline_mode<synchronous>, transform_indices = @transform_2, window_bounds = array<i64: 1, 256>}, {pipeline_mode = #tpu.pipeline_mode<synchronous>, transform_indices = @transform_3, window_bounds = array<i64: 1, 256>}, {transform_indices = @transform_4, window_bounds = array<i64: 64, 256>}, {pipeline_mode = #tpu.pipeline_mode<synchronous>, transform_indices = @transform_5, window_bounds = array<i64: 1, 256>}, {pipeline_mode = #tpu.pipeline_mode<synchronous>, transform_indices = @transform_6, window_bounds = array<i64: 1, 256>}, {transform_indices = @transform_7, window_bounds = array<i64: 256, 256>}, {transform_indices = @transform_8, window_bounds = array<i64: 256, 256>}, {transform_indices = @transform_9, window_bounds = array<i64: 1, 256>}, {transform_indices = @transform_10, window_bounds = array<i64: 1, 256>}, {transform_indices = @transform_11, window_bounds = array<i64: 64, 256>}, {transform_indices = @transform_12, window_bounds = array<i64: 64, 256>}]} {
    %c0_i32 = arith.constant 0 : i32
    %0 = arith.cmpi eq, %arg1, %c0_i32 : i32
    %1 = arith.extui %0 : i1 to i32
    %c0_i32_0 = arith.constant 0 : i32
    %2 = arith.cmpi ne, %1, %c0_i32_0 : i32
    scf.if %2 {
      %c0_16 = arith.constant 0 : index
      %c0_17 = arith.constant 0 : index
      %25 = vector.load %arg2[%c0_16, %c0_17] : memref<64x256xbf16, #tpu.memory_space<vmem>>, vector<64x256xbf16>
      %c0_18 = arith.constant 0 : index
      %c0_19 = arith.constant 0 : index
      %26 = vector.load %arg3[%c0_18, %c0_19] : memref<256x256xbf16, #tpu.memory_space<vmem>>, vector<256x256xbf16>
      %cst_20 = arith.constant dense<0.000000e+00> : vector<64x256xf32>
      %27 = tpu.matmul %25, %26, %cst_20 {dimension_numbers = #tpu.dot_dimension_numbers<[1], [0], [0], [1], [0, 0, 1, 1], [], []>} : vector<64x256xbf16>, vector<256x256xbf16>, vector<64x256xf32> -> vector<64x256xf32>
      %c0_21 = arith.constant 0 : index
      %c0_22 = arith.constant 0 : index
      %28 = vector.load %arg6[%c0_21, %c0_22] : memref<64x256xf32, #tpu.memory_space<vmem>>, vector<64x256xf32>
      %c0_23 = arith.constant 0 : index
      %c0_24 = arith.constant 0 : index
      %29 = vector.load %arg4[%c0_23, %c0_24] : memref<1x256xf32, #tpu.memory_space<vmem>>, vector<1x256xf32>
      %30 = vector.broadcast %29 : vector<1x256xf32> to vector<64x256xf32>
      %31 = arith.addf %27, %30 : vector<64x256xf32>
      %c0_25 = arith.constant 0 : index
      %c0_26 = arith.constant 0 : index
      %32 = vector.load %arg5[%c0_25, %c0_26] : memref<1x256xf32, #tpu.memory_space<vmem>>, vector<1x256xf32>
      %33 = vector.broadcast %32 : vector<1x256xf32> to vector<64x256xf32>
      %34 = arith.mulf %31, %33 : vector<64x256xf32>
      %35 = arith.addf %28, %34 : vector<64x256xf32>
      %c0_27 = arith.constant 0 : index
      %c0_28 = arith.constant 0 : index
      %36 = vector.load %arg13[%c0_27, %c0_28] : memref<64x256xf32, #tpu.memory_space<vmem>>, vector<64x256xf32>
      tpu.vector_store %arg13[%c0_27, %c0_28], %35 {strides = array<i32>} : memref<64x256xf32, #tpu.memory_space<vmem>>, vector<64x256xf32>,
      %cst_29 = arith.constant dense<0.000000e+00> : vector<64xf32>
      %37 = vector.multi_reduction <add>, %35, %cst_29 [1] : vector<64x256xf32> to vector<64xf32>
      %38 = vector.shape_cast %37 : vector<64xf32> to vector<64x1xf32>
      %cst_30 = arith.constant 2.560000e+02 : f32
      %39 = vector.broadcast %cst_30 : f32 to vector<64x1xf32>
      %40 = arith.divf %38, %39 : vector<64x1xf32>
      %41 = vector.broadcast %40 : vector<64x1xf32> to vector<64x256xf32>
      %42 = arith.subf %35, %41 : vector<64x256xf32>
      %43 = arith.mulf %42, %42 : vector<64x256xf32>
      %cst_31 = arith.constant dense<0.000000e+00> : vector<64xf32>
      %44 = vector.multi_reduction <add>, %43, %cst_31 [1] : vector<64x256xf32> to vector<64xf32>
      %45 = vector.shape_cast %44 : vector<64xf32> to vector<64x1xf32>
      %cst_32 = arith.constant 2.560000e+02 : f32
      %46 = vector.broadcast %cst_32 : f32 to vector<64x1xf32>
      %47 = arith.divf %45, %46 : vector<64x1xf32>
      %48 = vector.broadcast %40 : vector<64x1xf32> to vector<64x256xf32>
      %49 = arith.subf %35, %48 : vector<64x256xf32>
      %cst_33 = arith.constant 9.99999974E-6 : f32
      %50 = vector.broadcast %cst_33 : f32 to vector<64x1xf32>
      %51 = arith.addf %47, %50 : vector<64x1xf32>
      %52 = math.rsqrt %51 : vector<64x1xf32>
      %53 = vector.broadcast %52 : vector<64x1xf32> to vector<64x256xf32>
      %54 = arith.mulf %49, %53 : vector<64x256xf32>
      %c0_34 = arith.constant 0 : index
      %c0_35 = arith.constant 0 : index
      %55 = vector.load %arg7[%c0_34, %c0_35] : memref<1x256xf32, #tpu.memory_space<vmem>>, vector<1x256xf32>
      %56 = vector.broadcast %55 : vector<1x256xf32> to vector<64x256xf32>
      %57 = arith.mulf %54, %56 : vector<64x256xf32>
      %c0_36 = arith.constant 0 : index
      %c0_37 = arith.constant 0 : index
      %58 = vector.load %arg8[%c0_36, %c0_37] : memref<1x256xf32, #tpu.memory_space<vmem>>, vector<1x256xf32>
      %59 = vector.broadcast %58 : vector<1x256xf32> to vector<64x256xf32>
      %60 = arith.addf %57, %59 : vector<64x256xf32>
      %61 = arith.truncf %60 : vector<64x256xf32> to vector<64x256xbf16>
      %c0_38 = arith.constant 0 : index
      %c0_39 = arith.constant 0 : index
      %62 = vector.load %arg15[%c0_38, %c0_39] : memref<64x256xbf16, #tpu.memory_space<vmem>>, vector<64x256xbf16>
      tpu.vector_store %arg15[%c0_38, %c0_39], %61 {strides = array<i32>} : memref<64x256xbf16, #tpu.memory_space<vmem>>, vector<64x256xbf16>,
    } else {
    }
    %c0 = arith.constant 0 : index
    %c0_1 = arith.constant 0 : index
    %3 = vector.load %arg15[%c0, %c0_1] : memref<64x256xbf16, #tpu.memory_space<vmem>>, vector<64x256xbf16>
    %c0_2 = arith.constant 0 : index
    %c0_3 = arith.constant 0 : index
    %4 = vector.load %arg9[%c0_2, %c0_3] : memref<256x256xbf16, #tpu.memory_space<vmem>>, vector<256x256xbf16>
    %cst = arith.constant dense<0.000000e+00> : vector<64x256xf32>
    %5 = tpu.matmul %3, %4, %cst {dimension_numbers = #tpu.dot_dimension_numbers<[1], [0], [0], [1], [0, 0, 1, 1], [], []>} : vector<64x256xbf16>, vector<256x256xbf16>, vector<64x256xf32> -> vector<64x256xf32>
    %c0_4 = arith.constant 0 : index
    %c0_5 = arith.constant 0 : index
    %6 = vector.load %arg11[%c0_4, %c0_5] : memref<1x256xf32, #tpu.memory_space<vmem>>, vector<1x256xf32>
    %7 = vector.broadcast %6 : vector<1x256xf32> to vector<64x256xf32>
    %8 = arith.addf %5, %7 : vector<64x256xf32>
    %c0_6 = arith.constant 0 : index
    %c0_7 = arith.constant 0 : index
    %9 = vector.load %arg10[%c0_6, %c0_7] : memref<256x256xbf16, #tpu.memory_space<vmem>>, vector<256x256xbf16>
    %cst_8 = arith.constant dense<0.000000e+00> : vector<64x256xf32>
    %10 = tpu.matmul %3, %9, %cst_8 {dimension_numbers = #tpu.dot_dimension_numbers<[1], [0], [0], [1], [0, 0, 1, 1], [], []>} : vector<64x256xbf16>, vector<256x256xbf16>, vector<64x256xf32> -> vector<64x256xf32>
    %c0_9 = arith.constant 0 : index
    %c0_10 = arith.constant 0 : index
    %11 = vector.load %arg12[%c0_9, %c0_10] : memref<1x256xf32, #tpu.memory_space<vmem>>, vector<1x256xf32>
    %12 = vector.broadcast %11 : vector<1x256xf32> to vector<64x256xf32>
    %13 = arith.addf %10, %12 : vector<64x256xf32>
    %cst_11 = arith.constant 5.000000e-01 : f32
    %14 = vector.broadcast %cst_11 : f32 to vector<64x256xf32>
    %15 = arith.mulf %14, %13 : vector<64x256xf32>
    %cst_12 = arith.constant 0.707106769 : f32
    %16 = vector.broadcast %cst_12 : f32 to vector<64x256xf32>
    %17 = arith.mulf %13, %16 : vector<64x256xf32>
    %18 = math.erf %17 : vector<64x256xf32>
    %cst_13 = arith.constant 1.000000e+00 : f32
    %19 = vector.broadcast %cst_13 : f32 to vector<64x256xf32>
    %20 = arith.addf %19, %18 : vector<64x256xf32>
    %21 = arith.mulf %15, %20 : vector<64x256xf32>
    %22 = arith.mulf %8, %21 : vector<64x256xf32>
    %23 = arith.truncf %22 : vector<64x256xf32> to vector<64x256xbf16>
    %c0_14 = arith.constant 0 : index
    %c0_15 = arith.constant 0 : index
    %24 = vector.load %arg14[%c0_14, %c0_15] : memref<64x256xbf16, #tpu.memory_space<vmem>>, vector<64x256xbf16>
    tpu.vector_store %arg14[%c0_14, %c0_15], %23 {strides = array<i32>} : memref<64x256xbf16, #tpu.memory_space<vmem>>, vector<64x256xbf16>,
    return
  }
  func.func @transform_0(%arg0: i32, %arg1: i32) -> (i32, i32) {
    %c0_i32 = arith.constant 0 : i32
    %c0_i32_0 = arith.constant 0 : i32
    return %arg0, %c0_i32 : i32, i32
  }
  func.func @transform_1(%arg0: i32, %arg1: i32) -> (i32, i32) {
    %c0_i32 = arith.constant 0 : i32
    %c0_i32_0 = arith.constant 0 : i32
    %c0_i32_1 = arith.constant 0 : i32
    return %c0_i32, %c0_i32_0 : i32, i32
  }
  func.func @transform_2(%arg0: i32, %arg1: i32) -> (i32, i32) {
    %c0_i32 = arith.constant 0 : i32
    %c0_i32_0 = arith.constant 0 : i32
    %c0_i32_1 = arith.constant 0 : i32
    return %c0_i32, %c0_i32_0 : i32, i32
  }
  func.func @transform_3(%arg0: i32, %arg1: i32) -> (i32, i32) {
    %c0_i32 = arith.constant 0 : i32
    %c0_i32_0 = arith.constant 0 : i32
    %c0_i32_1 = arith.constant 0 : i32
    return %c0_i32, %c0_i32_0 : i32, i32
  }
  func.func @transform_4(%arg0: i32, %arg1: i32) -> (i32, i32) {
    %c0_i32 = arith.constant 0 : i32
    %c0_i32_0 = arith.constant 0 : i32
    return %arg0, %c0_i32 : i32, i32
  }
  func.func @transform_5(%arg0: i32, %arg1: i32) -> (i32, i32) {
    %c0_i32 = arith.constant 0 : i32
    %c0_i32_0 = arith.constant 0 : i32
    %c0_i32_1 = arith.constant 0 : i32
    return %c0_i32, %c0_i32_0 : i32, i32
  }
  func.func @transform_6(%arg0: i32, %arg1: i32) -> (i32, i32) {
    %c0_i32 = arith.constant 0 : i32
    %c0_i32_0 = arith.constant 0 : i32
    %c0_i32_1 = arith.constant 0 : i32
    return %c0_i32, %c0_i32_0 : i32, i32
  }
  func.func @transform_7(%arg0: i32, %arg1: i32) -> (i32, i32) {
    %c0_i32 = arith.constant 0 : i32
    %c0_i32_0 = arith.constant 0 : i32
    return %c0_i32, %arg1 : i32, i32
  }
  func.func @transform_8(%arg0: i32, %arg1: i32) -> (i32, i32) {
    %c0_i32 = arith.constant 0 : i32
    %c0_i32_0 = arith.constant 0 : i32
    return %c0_i32, %arg1 : i32, i32
  }
  func.func @transform_9(%arg0: i32, %arg1: i32) -> (i32, i32) {
    %c0_i32 = arith.constant 0 : i32
    %c0_i32_0 = arith.constant 0 : i32
    return %c0_i32, %arg1 : i32, i32
  }
  func.func @transform_10(%arg0: i32, %arg1: i32) -> (i32, i32) {
    %c0_i32 = arith.constant 0 : i32
    %c0_i32_0 = arith.constant 0 : i32
    return %c0_i32, %arg1 : i32, i32
  }
  func.func @transform_11(%arg0: i32, %arg1: i32) -> (i32, i32) {
    %c0_i32 = arith.constant 0 : i32
    %c0_i32_0 = arith.constant 0 : i32
    return %arg0, %c0_i32 : i32, i32
  }
  func.func @transform_12(%arg0: i32, %arg1: i32) -> (i32, i32) {
    %c0_i32 = arith.constant 0 : i32
    return %arg0, %arg1 : i32, i32
  }
}

module attributes {stable_mosaic.version = 11 : i64} {
  func.func @_proj_res_ln_geglu_kernel(%arg0: i32, %arg1: i32, %arg2: memref<64x256xbf16, #tpu.memory_space<vmem>>, %arg3: memref<256x256xbf16, #tpu.memory_space<vmem>>, %arg4: memref<1x256xf32, #tpu.memory_space<vmem>>, %arg5: memref<1x256xf32, #tpu.memory_space<vmem>>, %arg6: memref<64x256xf32, #tpu.memory_space<vmem>>, %arg7: memref<1x256xf32, #tpu.memory_space<vmem>>, %arg8: memref<1x256xf32, #tpu.memory_space<vmem>>, %arg9: memref<256x256xbf16, #tpu.memory_space<vmem>>, %arg10: memref<256x256xbf16, #tpu.memory_space<vmem>>, %arg11: memref<1x256xf32, #tpu.memory_space<vmem>>, %arg12: memref<1x256xf32, #tpu.memory_space<vmem>>, %arg13: memref<64x256xf32, #tpu.memory_space<vmem>>, %arg14: memref<64x256xbf16, #tpu.memory_space<vmem>>, %arg15: memref<64x256xbf16, #tpu.memory_space<vmem>>) attributes {dimension_semantics = [#tpu.dimension_semantics<parallel>, #tpu.dimension_semantics<arbitrary>], iteration_bounds = array<i64: 1, 4>, scalar_prefetch = 0 : i64, scratch_operands = 1 : i64, tpu.core_type = #tpu.core_type<tc>, window_params = [{transform_indices = @transform_0, window_bounds = array<i64: 64, 256>}, {pipeline_mode = #tpu.pipeline_mode<synchronous>, transform_indices = @transform_1, window_bounds = array<i64: 256, 256>}, {pipeline_mode = #tpu.pipeline_mode<synchronous>, transform_indices = @transform_2, window_bounds = array<i64: 1, 256>}, {pipeline_mode = #tpu.pipeline_mode<synchronous>, transform_indices = @transform_3, window_bounds = array<i64: 1, 256>}, {transform_indices = @transform_4, window_bounds = array<i64: 64, 256>}, {pipeline_mode = #tpu.pipeline_mode<synchronous>, transform_indices = @transform_5, window_bounds = array<i64: 1, 256>}, {pipeline_mode = #tpu.pipeline_mode<synchronous>, transform_indices = @transform_6, window_bounds = array<i64: 1, 256>}, {transform_indices = @transform_7, window_bounds = array<i64: 256, 256>}, {transform_indices = @transform_8, window_bounds = array<i64: 256, 256>}, {transform_indices = @transform_9, window_bounds = array<i64: 1, 256>}, {transform_indices = @transform_10, window_bounds = array<i64: 1, 256>}, {transform_indices = @transform_11, window_bounds = array<i64: 64, 256>}, {transform_indices = @transform_12, window_bounds = array<i64: 64, 256>}]} {
    %c0_i32 = arith.constant 0 : i32
    %0 = arith.cmpi eq, %arg1, %c0_i32 : i32
    %1 = arith.extui %0 : i1 to i32
    %c0_i32_0 = arith.constant 0 : i32
    %2 = arith.cmpi ne, %1, %c0_i32_0 : i32
    scf.if %2 {
      %c0_16 = arith.constant 0 : index
      %c0_17 = arith.constant 0 : index
      %25 = vector.load %arg2[%c0_16, %c0_17] : memref<64x256xbf16, #tpu.memory_space<vmem>>, vector<64x256xbf16>
      %c0_18 = arith.constant 0 : index
      %c0_19 = arith.constant 0 : index
      %26 = vector.load %arg3[%c0_18, %c0_19] : memref<256x256xbf16, #tpu.memory_space<vmem>>, vector<256x256xbf16>
      %cst_20 = arith.constant dense<0.000000e+00> : vector<64x256xf32>
      %27 = tpu.matmul %25, %26, %cst_20 {dimension_numbers = #tpu.dot_dimension_numbers<[1], [0], [0], [1], [0, 0, 1, 1], [], []>} : vector<64x256xbf16>, vector<256x256xbf16>, vector<64x256xf32> -> vector<64x256xf32>
      %c0_21 = arith.constant 0 : index
      %c0_22 = arith.constant 0 : index
      %28 = vector.load %arg6[%c0_21, %c0_22] : memref<64x256xf32, #tpu.memory_space<vmem>>, vector<64x256xf32>
      %c0_23 = arith.constant 0 : index
      %c0_24 = arith.constant 0 : index
      %29 = vector.load %arg4[%c0_23, %c0_24] : memref<1x256xf32, #tpu.memory_space<vmem>>, vector<1x256xf32>
      %30 = vector.broadcast %29 : vector<1x256xf32> to vector<64x256xf32>
      %31 = arith.addf %27, %30 : vector<64x256xf32>
      %c0_25 = arith.constant 0 : index
      %c0_26 = arith.constant 0 : index
      %32 = vector.load %arg5[%c0_25, %c0_26] : memref<1x256xf32, #tpu.memory_space<vmem>>, vector<1x256xf32>
      %33 = vector.broadcast %32 : vector<1x256xf32> to vector<64x256xf32>
      %34 = arith.mulf %31, %33 : vector<64x256xf32>
      %35 = arith.addf %28, %34 : vector<64x256xf32>
      %c0_27 = arith.constant 0 : index
      %c0_28 = arith.constant 0 : index
      %36 = vector.load %arg13[%c0_27, %c0_28] : memref<64x256xf32, #tpu.memory_space<vmem>>, vector<64x256xf32>
      tpu.vector_store %arg13[%c0_27, %c0_28], %35 {strides = array<i32>} : memref<64x256xf32, #tpu.memory_space<vmem>>, vector<64x256xf32>,
      %cst_29 = arith.constant dense<0.000000e+00> : vector<64xf32>
      %37 = vector.multi_reduction <add>, %35, %cst_29 [1] : vector<64x256xf32> to vector<64xf32>
      %38 = vector.shape_cast %37 : vector<64xf32> to vector<64x1xf32>
      %cst_30 = arith.constant 2.560000e+02 : f32
      %39 = vector.broadcast %cst_30 : f32 to vector<64x1xf32>
      %40 = arith.divf %38, %39 : vector<64x1xf32>
      %41 = vector.broadcast %40 : vector<64x1xf32> to vector<64x256xf32>
      %42 = arith.subf %35, %41 : vector<64x256xf32>
      %43 = arith.mulf %42, %42 : vector<64x256xf32>
      %cst_31 = arith.constant dense<0.000000e+00> : vector<64xf32>
      %44 = vector.multi_reduction <add>, %43, %cst_31 [1] : vector<64x256xf32> to vector<64xf32>
      %45 = vector.shape_cast %44 : vector<64xf32> to vector<64x1xf32>
      %cst_32 = arith.constant 2.560000e+02 : f32
      %46 = vector.broadcast %cst_32 : f32 to vector<64x1xf32>
      %47 = arith.divf %45, %46 : vector<64x1xf32>
      %48 = vector.broadcast %40 : vector<64x1xf32> to vector<64x256xf32>
      %49 = arith.subf %35, %48 : vector<64x256xf32>
      %cst_33 = arith.constant 9.99999974E-6 : f32
      %50 = vector.broadcast %cst_33 : f32 to vector<64x1xf32>
      %51 = arith.addf %47, %50 : vector<64x1xf32>
      %52 = math.rsqrt %51 : vector<64x1xf32>
      %53 = vector.broadcast %52 : vector<64x1xf32> to vector<64x256xf32>
      %54 = arith.mulf %49, %53 : vector<64x256xf32>
      %c0_34 = arith.constant 0 : index
      %c0_35 = arith.constant 0 : index
      %55 = vector.load %arg7[%c0_34, %c0_35] : memref<1x256xf32, #tpu.memory_space<vmem>>, vector<1x256xf32>
      %56 = vector.broadcast %55 : vector<1x256xf32> to vector<64x256xf32>
      %57 = arith.mulf %54, %56 : vector<64x256xf32>
      %c0_36 = arith.constant 0 : index
      %c0_37 = arith.constant 0 : index
      %58 = vector.load %arg8[%c0_36, %c0_37] : memref<1x256xf32, #tpu.memory_space<vmem>>, vector<1x256xf32>
      %59 = vector.broadcast %58 : vector<1x256xf32> to vector<64x256xf32>
      %60 = arith.addf %57, %59 : vector<64x256xf32>
      %61 = arith.truncf %60 : vector<64x256xf32> to vector<64x256xbf16>
      %c0_38 = arith.constant 0 : index
      %c0_39 = arith.constant 0 : index
      %62 = vector.load %arg15[%c0_38, %c0_39] : memref<64x256xbf16, #tpu.memory_space<vmem>>, vector<64x256xbf16>
      tpu.vector_store %arg15[%c0_38, %c0_39], %61 {strides = array<i32>} : memref<64x256xbf16, #tpu.memory_space<vmem>>, vector<64x256xbf16>,
    } else {
    }
    %c0 = arith.constant 0 : index
    %c0_1 = arith.constant 0 : index
    %3 = vector.load %arg15[%c0, %c0_1] : memref<64x256xbf16, #tpu.memory_space<vmem>>, vector<64x256xbf16>
    %c0_2 = arith.constant 0 : index
    %c0_3 = arith.constant 0 : index
    %4 = vector.load %arg9[%c0_2, %c0_3] : memref<256x256xbf16, #tpu.memory_space<vmem>>, vector<256x256xbf16>
    %cst = arith.constant dense<0.000000e+00> : vector<64x256xf32>
    %5 = tpu.matmul %3, %4, %cst {dimension_numbers = #tpu.dot_dimension_numbers<[1], [0], [0], [1], [0, 0, 1, 1], [], []>} : vector<64x256xbf16>, vector<256x256xbf16>, vector<64x256xf32> -> vector<64x256xf32>
    %c0_4 = arith.constant 0 : index
    %c0_5 = arith.constant 0 : index
    %6 = vector.load %arg11[%c0_4, %c0_5] : memref<1x256xf32, #tpu.memory_space<vmem>>, vector<1x256xf32>
    %7 = vector.broadcast %6 : vector<1x256xf32> to vector<64x256xf32>
    %8 = arith.addf %5, %7 : vector<64x256xf32>
    %c0_6 = arith.constant 0 : index
    %c0_7 = arith.constant 0 : index
    %9 = vector.load %arg10[%c0_6, %c0_7] : memref<256x256xbf16, #tpu.memory_space<vmem>>, vector<256x256xbf16>
    %cst_8 = arith.constant dense<0.000000e+00> : vector<64x256xf32>
    %10 = tpu.matmul %3, %9, %cst_8 {dimension_numbers = #tpu.dot_dimension_numbers<[1], [0], [0], [1], [0, 0, 1, 1], [], []>} : vector<64x256xbf16>, vector<256x256xbf16>, vector<64x256xf32> -> vector<64x256xf32>
    %c0_9 = arith.constant 0 : index
    %c0_10 = arith.constant 0 : index
    %11 = vector.load %arg12[%c0_9, %c0_10] : memref<1x256xf32, #tpu.memory_space<vmem>>, vector<1x256xf32>
    %12 = vector.broadcast %11 : vector<1x256xf32> to vector<64x256xf32>
    %13 = arith.addf %10, %12 : vector<64x256xf32>
    %cst_11 = arith.constant 5.000000e-01 : f32
    %14 = vector.broadcast %cst_11 : f32 to vector<64x256xf32>
    %15 = arith.mulf %14, %13 : vector<64x256xf32>
    %cst_12 = arith.constant 0.707106769 : f32
    %16 = vector.broadcast %cst_12 : f32 to vector<64x256xf32>
    %17 = arith.mulf %13, %16 : vector<64x256xf32>
    %18 = math.erf %17 : vector<64x256xf32>
    %cst_13 = arith.constant 1.000000e+00 : f32
    %19 = vector.broadcast %cst_13 : f32 to vector<64x256xf32>
    %20 = arith.addf %19, %18 : vector<64x256xf32>
    %21 = arith.mulf %15, %20 : vector<64x256xf32>
    %22 = arith.mulf %8, %21 : vector<64x256xf32>
    %23 = arith.truncf %22 : vector<64x256xf32> to vector<64x256xbf16>
    %c0_14 = arith.constant 0 : index
    %c0_15 = arith.constant 0 : index
    %24 = vector.load %arg14[%c0_14, %c0_15] : memref<64x256xbf16, #tpu.memory_space<vmem>>, vector<64x256xbf16>
    tpu.vector_store %arg14[%c0_14, %c0_15], %23 {strides = array<i32>} : memref<64x256xbf16, #tpu.memory_space<vmem>>, vector<64x256xbf16>,
    return
  }
  func.func @transform_0(%arg0: i32, %arg1: i32) -> (i32, i32) {
    %c0_i32 = arith.constant 0 : i32
    %c0_i32_0 = arith.constant 0 : i32
    return %arg0, %c0_i32 : i32, i32
  }
  func.func @transform_1(%arg0: i32, %arg1: i32) -> (i32, i32) {
    %c0_i32 = arith.constant 0 : i32
    %c0_i32_0 = arith.constant 0 : i32
    %c0_i32_1 = arith.constant 0 : i32
    return %c0_i32, %c0_i32_0 : i32, i32
  }
  func.func @transform_2(%arg0: i32, %arg1: i32) -> (i32, i32) {
    %c0_i32 = arith.constant 0 : i32
    %c0_i32_0 = arith.constant 0 : i32
    %c0_i32_1 = arith.constant 0 : i32
    return %c0_i32, %c0_i32_0 : i32, i32
  }
  func.func @transform_3(%arg0: i32, %arg1: i32) -> (i32, i32) {
    %c0_i32 = arith.constant 0 : i32
    %c0_i32_0 = arith.constant 0 : i32
    %c0_i32_1 = arith.constant 0 : i32
    return %c0_i32, %c0_i32_0 : i32, i32
  }
  func.func @transform_4(%arg0: i32, %arg1: i32) -> (i32, i32) {
    %c0_i32 = arith.constant 0 : i32
    %c0_i32_0 = arith.constant 0 : i32
    return %arg0, %c0_i32 : i32, i32
  }
  func.func @transform_5(%arg0: i32, %arg1: i32) -> (i32, i32) {
    %c0_i32 = arith.constant 0 : i32
    %c0_i32_0 = arith.constant 0 : i32
    %c0_i32_1 = arith.constant 0 : i32
    return %c0_i32, %c0_i32_0 : i32, i32
  }
  func.func @transform_6(%arg0: i32, %arg1: i32) -> (i32, i32) {
    %c0_i32 = arith.constant 0 : i32
    %c0_i32_0 = arith.constant 0 : i32
    %c0_i32_1 = arith.constant 0 : i32
    return %c0_i32, %c0_i32_0 : i32, i32
  }
  func.func @transform_7(%arg0: i32, %arg1: i32) -> (i32, i32) {
    %c0_i32 = arith.constant 0 : i32
    %c0_i32_0 = arith.constant 0 : i32
    return %c0_i32, %arg1 : i32, i32
  }
  func.func @transform_8(%arg0: i32, %arg1: i32) -> (i32, i32) {
    %c0_i32 = arith.constant 0 : i32
    %c0_i32_0 = arith.constant 0 : i32
    return %c0_i32, %arg1 : i32, i32
  }
  func.func @transform_9(%arg0: i32, %arg1: i32) -> (i32, i32) {
    %c0_i32 = arith.constant 0 : i32
    %c0_i32_0 = arith.constant 0 : i32
    return %c0_i32, %arg1 : i32, i32
  }
  func.func @transform_10(%arg0: i32, %arg1: i32) -> (i32, i32) {
    %c0_i32 = arith.constant 0 : i32
    %c0_i32_0 = arith.constant 0 : i32
    return %c0_i32, %arg1 : i32, i32
  }
  func.func @transform_11(%arg0: i32, %arg1: i32) -> (i32, i32) {
    %c0_i32 = arith.constant 0 : i32
    %c0_i32_0 = arith.constant 0 : i32
    return %arg0, %c0_i32 : i32, i32
  }
  func.func @transform_12(%arg0: i32, %arg1: i32) -> (i32, i32) {
    %c0_i32 = arith.constant 0 : i32
    return %arg0, %arg1 : i32, i32
  }
}

module attributes {stable_mosaic.version = 11 : i64} {
  func.func @_proj_scale_res_kernel(%arg0: i32, %arg1: i32, %arg2: memref<64x1024xbf16, #tpu.memory_space<vmem>>, %arg3: memref<1024x256xbf16, #tpu.memory_space<vmem>>, %arg4: memref<1x256xf32, #tpu.memory_space<vmem>>, %arg5: memref<1x256xf32, #tpu.memory_space<vmem>>, %arg6: memref<64x256xf32, #tpu.memory_space<vmem>>, %arg7: memref<64x256xf32, #tpu.memory_space<vmem>>) attributes {dimension_semantics = [#tpu.dimension_semantics<parallel>, #tpu.dimension_semantics<parallel>], iteration_bounds = array<i64: 1, 1>, scalar_prefetch = 0 : i64, scratch_operands = 0 : i64, tpu.core_type = #tpu.core_type<tc>, window_params = [{transform_indices = @transform_0, window_bounds = array<i64: 64, 1024>}, {transform_indices = @transform_1, window_bounds = array<i64: 1024, 256>}, {transform_indices = @transform_2, window_bounds = array<i64: 1, 256>}, {transform_indices = @transform_3, window_bounds = array<i64: 1, 256>}, {transform_indices = @transform_4, window_bounds = array<i64: 64, 256>}, {transform_indices = @transform_5, window_bounds = array<i64: 64, 256>}]} {
    %c0 = arith.constant 0 : index
    %c0_0 = arith.constant 0 : index
    %0 = vector.load %arg2[%c0, %c0_0] : memref<64x1024xbf16, #tpu.memory_space<vmem>>, vector<64x1024xbf16>
    %c0_1 = arith.constant 0 : index
    %c0_2 = arith.constant 0 : index
    %1 = vector.load %arg3[%c0_1, %c0_2] : memref<1024x256xbf16, #tpu.memory_space<vmem>>, vector<1024x256xbf16>
    %cst = arith.constant dense<0.000000e+00> : vector<64x256xf32>
    %2 = tpu.matmul %0, %1, %cst {dimension_numbers = #tpu.dot_dimension_numbers<[1], [0], [0], [1], [0, 0, 1, 1], [], []>} : vector<64x1024xbf16>, vector<1024x256xbf16>, vector<64x256xf32> -> vector<64x256xf32>
    %c0_3 = arith.constant 0 : index
    %c0_4 = arith.constant 0 : index
    %3 = vector.load %arg6[%c0_3, %c0_4] : memref<64x256xf32, #tpu.memory_space<vmem>>, vector<64x256xf32>
    %c0_5 = arith.constant 0 : index
    %c0_6 = arith.constant 0 : index
    %4 = vector.load %arg4[%c0_5, %c0_6] : memref<1x256xf32, #tpu.memory_space<vmem>>, vector<1x256xf32>
    %5 = vector.broadcast %4 : vector<1x256xf32> to vector<64x256xf32>
    %6 = arith.addf %2, %5 : vector<64x256xf32>
    %c0_7 = arith.constant 0 : index
    %c0_8 = arith.constant 0 : index
    %7 = vector.load %arg5[%c0_7, %c0_8] : memref<1x256xf32, #tpu.memory_space<vmem>>, vector<1x256xf32>
    %8 = vector.broadcast %7 : vector<1x256xf32> to vector<64x256xf32>
    %9 = arith.mulf %6, %8 : vector<64x256xf32>
    %10 = arith.addf %3, %9 : vector<64x256xf32>
    %c0_9 = arith.constant 0 : index
    %c0_10 = arith.constant 0 : index
    %11 = vector.load %arg7[%c0_9, %c0_10] : memref<64x256xf32, #tpu.memory_space<vmem>>, vector<64x256xf32>
    tpu.vector_store %arg7[%c0_9, %c0_10], %10 {strides = array<i32>} : memref<64x256xf32, #tpu.memory_space<vmem>>, vector<64x256xf32>,
    return
  }
  func.func @transform_0(%arg0: i32, %arg1: i32) -> (i32, i32) {
    %c0_i32 = arith.constant 0 : i32
    %c0_i32_0 = arith.constant 0 : i32
    return %arg0, %c0_i32 : i32, i32
  }
  func.func @transform_1(%arg0: i32, %arg1: i32) -> (i32, i32) {
    %c0_i32 = arith.constant 0 : i32
    %c0_i32_0 = arith.constant 0 : i32
    return %c0_i32, %arg1 : i32, i32
  }
  func.func @transform_2(%arg0: i32, %arg1: i32) -> (i32, i32) {
    %c0_i32 = arith.constant 0 : i32
    %c0_i32_0 = arith.constant 0 : i32
    return %c0_i32, %arg1 : i32, i32
  }
  func.func @transform_3(%arg0: i32, %arg1: i32) -> (i32, i32) {
    %c0_i32 = arith.constant 0 : i32
    %c0_i32_0 = arith.constant 0 : i32
    return %c0_i32, %arg1 : i32, i32
  }
  func.func @transform_4(%arg0: i32, %arg1: i32) -> (i32, i32) {
    %c0_i32 = arith.constant 0 : i32
    return %arg0, %arg1 : i32, i32
  }
  func.func @transform_5(%arg0: i32, %arg1: i32) -> (i32, i32) {
    %c0_i32 = arith.constant 0 : i32
    return %arg0, %arg1 : i32, i32
  }
}

</mosaic_0001>

<bundles_post_ra>
// kernel: transformer_forward.7
= control target key start
LH: loop header
LB: loop body
LE: loop exit
PB: predicated region body
PF: predicated region fallthrough
CT: control target
= control target key end

     0   :  { %s1866_s0 = inlined_call_operand.hbm [shape: f32[64,256], index: 0, kind: input, shape index: {}]   ;;  %s1867_s1 = inlined_call_operand.hbm [shape: f32[1,256], index: 1, kind: input, shape index: {}]   ;;  %s1868_s2 = inlined_call_operand.hbm [shape: f32[1,256], index: 2, kind: input, shape index: {}]   ;;  %s1869_s3 = inlined_call_operand.hbm [shape: bf16[256,768], index: 3, kind: input, shape index: {}]   ;;  %s1870_s4 = inlined_call_operand.vmem [shape: bf16[64,768], index: 4, kind: output, shape index: {}]  }
   0x1   :  { %1876 = sst [smem:[#allocation14_spill]] %s1867_s1 }
   0x2   :  { %9 = vsyncpa [#allocation4], 0 }
   0x3   :  { %10 = vsyncpa [#allocation6], 0 }
   0x4   :  { %11 = vsyncpa [#allocation9], 0 }
   0x5   :  { %13 = vsyncpa [#allocation9 + $0x1], 0  ;;  %s1475_s15 = smov 0   ;;  %s1477_s16 = smov 0  }
   0x6   :  { %s1479_s17 = smov 0   ;;  %s1481_s18 = smov 0  }
   0x7   :  { %s1483_s19 = smov 0   ;;  %s1485_s20 = smov 0  }
   0x8 LB: > { %s1008_s21 = sadd.s32 4294967295, %s1439_s20   ;;  %p113_p0 = scmp.ne.s32.totalorder %s1427_s17, %s1423_s16  ;;  %s1439_s20 = sphi %s1485_s20, %s19_s20   ;;  %s1435_s19 = sphi %s1483_s19, %s1894_s19   ;;  %s1431_s18 = sphi %s1481_s18, %s1893_s18   ;;  %s1427_s17 = sphi %s1479_s17, %s1892_s17   ;;  %s1423_s16 = sphi %s1477_s16, %s1891_s16   ;;  %s1419_s15 = sphi %s1475_s15, %s1890_s15  }
   0x9   : > { %p114_p1 = scmp.eq.s32.totalorder %s1439_s20, 0  ;;  %p119_p2 = scmp.ne.s32.totalorder %s1423_s16, %s1419_s15 }
   0xa   : > { %p1508_p3 = scmp.eq.s32.totalorder %s1008_s21, 0  ;;  %p145_p4 = scmp.eq.s32.totalorder %s1008_s21, 2 }
   0xb   : > { %p115_p5 = por %p114_p1, %p113_p0  ;;  %p1010_p6 = scmp.ge.s32.totalorder %s1439_s20, 1 }
   0xc   : > { %s1877_s22 = scalar_select %p1508_p3, 1, 0 }
   0xd   : > { %p1515_p7 = por %p1508_p3, %p119_p2  ;;  %p1519_p8 = por %p145_p4, %p113_p0 }
   0xe   : > { %p158_p9 = scmp.lt.s32.totalorder %s1439_s20, 4  ;;  %s1441_s26 = smov [#allocation5]  }
   0xf   : > { %s1878_s23 = scalar_select %p1515_p7, 1, 0 }
  0x10   : > { %s1879_s24 = scalar_select %p1519_p8, 1, 0 }
  0x11   : > { %p1524_p10 = pnand %p1010_p6, %p158_p9  ;;  %s188_s27 = sshll.u32 %s1441_s26, 4  ;;  %s189_s27 = int_to_ptr.vmem [resolvable:$true] %s188_s27 }
  0x12   : > { %p1143_p11 = scmp.lt.s32.totalorder %s1439_s20, 3  ;;  %s1442_s30 = smov [#allocation3]  }
  0x13   : > { %s1880_s25 = scalar_select %p1524_p10, 1, 0 }
  0x14   : > { %p1126_p12 = pneg %p1524_p10  ;;  %p1531_p13 = pnand %p1143_p11, %p115_p5 }
  0x15   : > { %s174_s5 = sshll.u32 %s1442_s30, 4  ;;  %s1883_s1 = sld [smem:[#allocation14_spill]]  ;;  %s1541_s5 = int_to_ptr.vmem [resolvable:$true] %s174_s5 }
  0x16   : > { %s1881_s28 = scalar_select %p1531_p13, 1, 0 }
  0x17   : > { %p1537_p0 = pnand %p1126_p12, %p1508_p3 }
  0x19   : > { %p1551_p2 = pneg %p1537_p0 }
  0x1b   : > { %s1267_s8 = scalar_lea.hbm %s1883_s1, 32 }
  0x1c   : > { %p1268_p1 = scmp.ne.s32.totalorder %s1883_s1, %s1267_s8  ;;  %p1274_p6 = scmp.lt.u32.totalorder %s1267_s8, %s1883_s1 }
  0x1e   : > { %p1270_p4 = pnand %p1551_p2, %p1268_p1 }
  0x20   : > { %p1271_p5 = pneg %p1270_p4 }
  0x22   : > { %p1276_p9 = pnand %p1274_p6, %p1271_p5 }
  0x24   : > { %1279 = shalt.err (!%p1276_p9)
}
  0x25   : > { %s1280_s14 = scalar_lea.vmem %s189_s27, 32  ;;  %p1288_p7 = scmp.lt.s32.totalorder %s189_s27, %s189_s27 }
  0x26   : > { %p1281_p11 = scmp.ne.s32.totalorder %s189_s27, %s1280_s14  ;;  %p1289_p3 = scmp.lt.s32.totalorder %s1280_s14, %s1280_s14 }
  0x28   : > { %p1283_p12 = pnand %p1281_p11, %p1551_p2  ;;  %p1290_p10 = por %p1289_p3, %p1288_p7 }
  0x2a   : > { %p1284_p8 = pneg %p1283_p12 }
  0x2c   : > { %p1291_p13 = pnand %p1290_p10, %p1284_p8 }
  0x2e   : > { %1294 = shalt.err (!%p1291_p13)
}
  0x2f   : > { %1132 = dma.hbm_to_vmem [thread:$0]  (!%p1537_p0), %s1883_s1, 32, %s189_s27, [#allocation6]  }
  0x30   : > { %s1295_s6 = scalar_lea.hbm %s1866_s0, 2048 }
  0x31   : > { %p1296_p1 = scmp.ne.s32.totalorder %s1866_s0, %s1295_s6  ;;  %p1302_p7 = scmp.lt.u32.totalorder %s1295_s6, %s1866_s0 }
  0x33   : > { %p1298_p4 = pnand %p1296_p1, %p1551_p2 }
  0x35   : > { %p1299_p3 = pneg %p1298_p4 }
  0x37   : > { %p1304_p8 = pnand %p1302_p7, %p1299_p3 }
  0x39   : > { %1307 = shalt.err (!%p1304_p8)
}
  0x3a   : > { %s1308_s27 = scalar_lea.vmem %s1541_s5, 2048  ;;  %p1316_p6 = scmp.lt.s32.totalorder %s1541_s5, %s1541_s5 }
  0x3b   : > { %p1309_p10 = scmp.ne.s32.totalorder %s1541_s5, %s1308_s27  ;;  %p1317_p9 = scmp.lt.s32.totalorder %s1308_s27, %s1308_s27 }
  0x3d   : > { %p1311_p13 = pnand %p1309_p10, %p1551_p2  ;;  %p1318_p11 = por %p1317_p9, %p1316_p6 }
  0x3f   : > { %p1312_p5 = pneg %p1311_p13 }
  0x41   : > { %p1319_p12 = pnand %p1318_p11, %p1312_p5 }
  0x43   : > { %1322 = shalt.err (!%p1319_p12)
}
  0x44   : > { %s1443_s12 = smov 256   ;;  %s1444_s13 = smov 16  }
  0x45   : > { %1129 = dma.hbm_to_vmem [thread:$0]  (!%p1537_p0), %s1866_s0, 2048, %s1541_s5, [#allocation4], %s1443_s12, %s1443_s12, %s1444_s13  }
  0x46   : > { %s1445_s21 = smov [#allocation7]   ;;  %s28_s30 = sadd.s32 1, %s1435_s19 }
  0x47   : > { %s199_s26 = sshll.u32 %s1445_s21, 4  ;;  %s1323_s8 = scalar_lea.hbm %s1868_s2, 32  ;;  %s200_s26 = int_to_ptr.vmem [resolvable:$true] %s199_s26 }
  0x48   : > { %p1324_p1 = scmp.ne.s32.totalorder %s1868_s2, %s1323_s8  ;;  %p1330_p7 = scmp.lt.u32.totalorder %s1323_s8, %s1868_s2 }
  0x4a   : > { %p1326_p4 = pnand %p1324_p1, %p1551_p2 }
  0x4c   : > { %p1327_p3 = pneg %p1326_p4 }
  0x4e   : > { %p1332_p8 = pnand %p1330_p7, %p1327_p3 }
  0x50   : > { %1335 = shalt.err (!%p1332_p8)
}
  0x51   : > { %s1336_s5 = scalar_lea.vmem %s200_s26, 32  ;;  %p1344_p6 = scmp.lt.s32.totalorder %s200_s26, %s200_s26 }
  0x52   : > { %p1337_p10 = scmp.ne.s32.totalorder %s200_s26, %s1336_s5  ;;  %p1345_p9 = scmp.lt.s32.totalorder %s1336_s5, %s1336_s5 }
  0x54   : > { %p1339_p13 = pnand %p1337_p10, %p1551_p2  ;;  %p1346_p11 = por %p1345_p9, %p1344_p6 }
  0x56   : > { %p1340_p5 = pneg %p1339_p13 }
  0x58   : > { %p1347_p12 = pnand %p1346_p11, %p1340_p5 }
  0x5a   : > { %1350 = shalt.err (!%p1347_p12)
}
  0x5b   : > { %1135 = dma.hbm_to_vmem [thread:$0]  (!%p1537_p0), %s1868_s2, 32, %s200_s26, [#allocation6]  }
  0x5c   : > { %p29_p1 = scmp.ge.s32.totalorder %s28_s30, 3  ;;  %s106_s1 = sadd.s32 1, %s1427_s17 }
  0x5d   : > { %s210_s11 = sand.u32 1, %s1427_s17   ;;  %s1070_s14 = sshll.u32 %s1435_s19, 7 }
  0x5e   : > { %s1896_s30 = smov (%p29_p1, %s28_s30), 0  ;;  %s1015_s15 = sshll.u32 %s210_s11, 8 }
  0x5f   : > { %s103_s29 = ssub.s32 %s1435_s19, %s1896_s30  ;;  %s1619_s7 = scalar_lea.hbm %s1869_s3, %s1070_s14 }
  0x60   : > { %p104_p2 = scmp.eq.s32.totalorder %s103_s29, 0  ;;  %s214_s26 = scalar_lea.vmem [#allocation8], %s1015_s15 }
  0x61   : > { %s221_s8 = sshll.u32 %s214_s26, 4  ;;  %s1626_s10 = scalar_lea.sflag [#allocation9], %s210_s11  ;;  %s1624_s8 = int_to_ptr.vmem [resolvable:$true] %s221_s8 }
  0x62   : > { %s1622_s9 = scalar_select %p104_p2, %s1427_s17, %s106_s1  }
  0x63   : > { %s1351_s27 = scalar_lea.hbm %s1619_s7, 4096  ;;  %p1885_p4 = scmp.ne.s32.totalorder %s1881_s28, 0 }
  0x64   : > { %p1352_p0 = scmp.ne.s32.totalorder %s1619_s7, %s1351_s27  ;;  %s1356_s13 = scalar_lea.hbm %s1869_s3, 12288 }
  0x65   : > { %p1353_p3 = pneg %p1885_p4  ;;  %p1357_p10 = scmp.lt.u32.totalorder %s1619_s7, %s1869_s3 }
  0x66   : > { %p1358_p13 = scmp.lt.u32.totalorder %s1356_s13, %s1351_s27  ;;  %p1360_p6 = scmp.lt.u32.totalorder %s1351_s27, %s1619_s7 }
  0x67   : > { %p1354_p7 = pnand %p1353_p3, %p1352_p0 }
  0x68   : > { %p1359_p5 = por %p1358_p13, %p1357_p10 }
  0x69   : > { %p1355_p8 = pneg %p1354_p7 }
  0x6a   : > { %p1361_p9 = por %p1360_p6, %p1359_p5 }
  0x6c   : > { %p1362_p11 = pnand %p1361_p9, %p1355_p8 }
  0x6e   : > { %1365 = shalt.err (!%p1362_p11)
}
  0x6f   : > { %s1366_s1 = scalar_lea.vmem %s1624_s8, 4096  ;;  %s1446_s11 = smov [#allocation8]  }
  0x70   : > { %p1367_p12 = scmp.ne.s32.totalorder %s1624_s8, %s1366_s1  ;;  %s1371_s29 = sshll.u32 %s1446_s11, 4  ;;  %s1372_s29 = int_to_ptr.vmem [resolvable:$false] %s1371_s29 }
  0x71   : > { %s1373_s21 = scalar_lea.vmem %s1372_s29, 8192  ;;  %p1374_p0 = scmp.lt.s32.totalorder %s1624_s8, %s1372_s29 }
  0x72   : > { %p1369_p1 = pnand %p1367_p12, %p1353_p3  ;;  %p1375_p7 = scmp.lt.s32.totalorder %s1373_s21, %s1366_s1 }
  0x74   : > { %p1370_p2 = pneg %p1369_p1  ;;  %p1376_p10 = por %p1375_p7, %p1374_p0 }
  0x76   : > { %p1377_p13 = pnand %p1376_p10, %p1370_p2 }
  0x78   : > { %1380 = shalt.err (!%p1377_p13)
}
  0x79   : > { %s1447_s6 = smov 384   ;;  %s1448_s26 = smov 128  }
  0x7a   : > { %s1449_s27 = smov 8   ;;  %p1886_p3 = scmp.ne.s32.totalorder %s1880_s25, 0 }
  0x7b   : > { %1139 = dma.hbm_to_vmem [thread:$0]  (!%p1885_p4), %s1619_s7, 4096, %s1624_s8, %s1626_s10, %s1447_s6, %s1448_s26, %s1449_s27  }
  0x7c   : > { %233 = sbr.rel (%p1886_p3) target bundleno = 774 (0x306), region = 36  ;;  %p1887_p8 = scmp.ne.s32.totalorder (!%p1886_p3), %s1877_s22, 0 }
  0x83   : > { %1406 = dma.done.wait (%p1887_p8), [#allocation4], 2048  }
  0x84   : > { %1408 = vsyncadd (%p1887_p8), [#allocation4], 4294965248 }
  0x85   : > { %1410 = dma.done.wait (%p1887_p8), [#allocation6], 64  }
  0x86   : > { %1412 = vsyncadd (%p1887_p8), [#allocation6], 4294967232  ;;  %s247_s5 = sand.u32 1, %s1423_s16   ;;  %p1888_p4 = scmp.ne.s32.totalorder %s1878_s23, 0 }
  0x87   : > { %s1022_s28 = sshll.u32 %s247_s5, 8  ;;  %s248_s7 = scalar_lea.sflag [#allocation9], %s247_s5 }
  0x88   : > { %s1665_s8 = scalar_lea.vmem [#allocation8], %s1022_s28 }
  0x89   : > { %1414 = dma.done.wait (%p1888_p4), %s248_s7, 4096  }
  0x8a   : > { %1416 = vsyncadd (%p1888_p4), %s248_s7, 4294963200  ;;  %s1023_s25 = sshll.u32 %s247_s5, 6  ;;  %p1024_p5 = scmp.ne.s32.totalorder %s1431_s18, 0 }
  0x8b   : > { %s1671_s10 = scalar_lea.vmem [#allocation10], %s1023_s25  ;;  %v283_v0 = vld [vmem:[#allocation3] sm:$0xff] (!%p1024_p5)  ;;  %v284_v1 = vld [vmem:[#allocation3 + $0x8] sm:$0xff] (!%p1024_p5)  ;;  %v285_v5 = vld [vmem:[#allocation3 + $0x10] sm:$0xff] (!%p1024_p5) }
  0x8c   : > { %282 = sbr.rel (%p1024_p5) target bundleno = 474 (0x1da), region = 56  ;;  %v287_v2 = vld [vmem:[#allocation3 + $0x20] sm:$0xff] (!%p1024_p5)  ;;  %v299_v3 = vadd.f32 (!%p1024_p5), %v284_v1, %v283_v0  ;;  %v288_v4 = vld [vmem:[#allocation3 + $0x28] sm:$0xff] (!%p1024_p5)  ;;  %v286_v6 = vld [vmem:[#allocation3 + $0x18] sm:$0xff] (!%p1024_p5) }
  0x8d   : > { %v305_v7 = vadd.f32 (!%p1024_p5), %v288_v4, %v287_v2  ;;  %v289_v8 = vld [vmem:[#allocation3 + $0x30] sm:$0xff] (!%p1024_p5)  ;;  %v290_v9 = vld [vmem:[#allocation3 + $0x38] sm:$0xff] (!%p1024_p5)  ;;  %v302_v10 = vadd.f32 (!%p1024_p5), %v286_v6, %v285_v5  ;;  %v291_v12 = vld [vmem:[#allocation3 + $0x40] sm:$0xff] (!%p1024_p5) }
  0x8e   : > { %300 = vadd.xlane.f32.xlu0 (!%p1024_p5), %v299_v3  ;;  %v308_v11 = vadd.f32 (!%p1024_p5), %v290_v9, %v289_v8  ;;  %v292_v13 = vld [vmem:[#allocation3 + $0x48] sm:$0xff] (!%p1024_p5)  ;;  %v293_v14 = vld [vmem:[#allocation3 + $0x50] sm:$0xff] (!%p1024_p5)  ;;  %v294_v15 = vld [vmem:[#allocation3 + $0x58] sm:$0xff] (!%p1024_p5) }
  0x8f   : > { %306 = vadd.xlane.f32.xlu1 (!%p1024_p5), %v305_v7  ;;  %v311_v16 = vadd.f32 (!%p1024_p5), %v292_v13, %v291_v12  ;;  %v314_v17 = vadd.f32 (!%p1024_p5), %v294_v15, %v293_v14  ;;  %v295_v18 = vld [vmem:[#allocation3 + $0x60] sm:$0xff] (!%p1024_p5)  ;;  %v296_v19 = vld [vmem:[#allocation3 + $0x68] sm:$0xff] (!%p1024_p5)  ;;  %v297_v20 = vld [vmem:[#allocation3 + $0x70] sm:$0xff] (!%p1024_p5) }
  0x90   : > { %v298_v21 = vld [vmem:[#allocation3 + $0x78] sm:$0xff] (!%p1024_p5)  ;;  %v317_v22 = vadd.f32 (!%p1024_p5), %v296_v19, %v295_v18 }
  0x91   : > { %v320_v23 = vadd.f32 (!%p1024_p5), %v298_v21, %v297_v20 }
  0x92   : > { %303 = vadd.xlane.f32.xlu0 (!%p1024_p5), %v302_v10 }
  0x93   : > { %309 = vadd.xlane.f32.xlu1 %v308_v11 }
  0x96   : > { %312 = vadd.xlane.f32.xlu0 %v311_v16 }
  0x97   : > { %315 = vadd.xlane.f32.xlu1 %v314_v17 }
  0x9a   : > { %318 = vadd.xlane.f32.xlu0 %v317_v22 }
  0x9b   : > { %321 = vadd.xlane.f32.xlu1 %v320_v23 }
 0x11b   : > { %v301_v24 = vpop.xlane.xlu0 %300 }
 0x11c   : > { %v324_v25 = vmul.f32 0.00390625, %v301_v24  ;;  %v307_v26 = vpop.xlane.xlu1 %306 }
 0x11d   : > { %v326_v27 = vmul.f32 0.00390625, %v307_v26 }
 0x11e   : > { %v1674_v28 = vsub.f32 %v283_v0, %v324_v25  ;;  %v1676_v29 = vsub.f32 %v284_v1, %v324_v25 }
 0x11f   : > { %v1678_v30 = vsub.f32 %v287_v2, %v326_v27  ;;  %v1680_v31 = vsub.f32 %v288_v4, %v326_v27  ;;  %v304_v32 = vpop.xlane.xlu0 %303 }
 0x120   : > { %v325_v33 = vmul.f32 0.00390625, %v304_v32  ;;  %v310_v34 = vpop.xlane.xlu1 %309  ;;  %v348_v35 = vmul.f32 %v1674_v28, %v1674_v28  ;;  %v349_v36 = vmul.f32 %v1676_v29, %v1676_v29 }
 0x121   : > { %v327_v37 = vmul.f32 0.00390625, %v310_v34  ;;  %v352_v38 = vmul.f32 %v1678_v30, %v1678_v30  ;;  %v353_v39 = vmul.f32 %v1680_v31, %v1680_v31 }
 0x122   : > { %v1690_v40 = vsub.f32 %v285_v5, %v325_v33  ;;  %v1692_v41 = vsub.f32 %v286_v6, %v325_v33  ;;  %v364_v42 = vadd.f32 %v349_v36, %v348_v35 }
 0x123   : > { %v1694_v43 = vsub.f32 %v289_v8, %v327_v37  ;;  %v1696_v44 = vsub.f32 %v290_v9, %v327_v37  ;;  %v313_v45 = vpop.xlane.xlu0 %312  ;;  %v370_v48 = vadd.f32 %v353_v39, %v352_v38  ;;  %v428_v39 = vld [vmem:[#allocation5] sm:$0x3] }
 0x124   : > { %v328_v46 = vmul.f32 0.00390625, %v313_v45  ;;  %365 = vadd.xlane.f32.xlu0 %v364_v42  ;;  %v316_v47 = vpop.xlane.xlu1 %315  ;;  %v350_v49 = vmul.f32 %v1690_v40, %v1690_v40  ;;  %v351_v50 = vmul.f32 %v1692_v41, %v1692_v41 }
 0x125   : > { %v329_v51 = vmul.f32 0.00390625, %v316_v47  ;;  %v354_v52 = vmul.f32 %v1694_v43, %v1694_v43  ;;  %v355_v53 = vmul.f32 %v1696_v44, %v1696_v44 }
 0x126   : > { %v1706_v54 = vsub.f32 %v291_v12, %v328_v46  ;;  %v1708_v55 = vsub.f32 %v292_v13, %v328_v46  ;;  %v367_v56 = vadd.f32 %v351_v50, %v350_v49 }
 0x127   : > { %v1710_v57 = vsub.f32 %v293_v14, %v329_v51  ;;  %v1712_v58 = vsub.f32 %v294_v15, %v329_v51  ;;  %v319_v59 = vpop.xlane.xlu0 %318  ;;  %v373_v62 = vadd.f32 %v355_v53, %v354_v52  ;;  %v456_v51 = vld [vmem:[#allocation7] sm:$0x3] }
 0x128   : > { %v330_v60 = vmul.f32 0.00390625, %v319_v59  ;;  %371 = vadd.xlane.f32.xlu0 %v370_v48  ;;  %368 = vadd.xlane.f32.xlu1 %v367_v56  ;;  %v322_v61 = vpop.xlane.xlu1 %321  ;;  %v356_v63 = vmul.f32 %v1706_v54, %v1706_v54  ;;  %v357_v0 = vmul.f32 %v1708_v55, %v1708_v55 }
 0x129   : > { %v331_v1 = vmul.f32 0.00390625, %v322_v61  ;;  %v358_v2 = vmul.f32 %v1710_v57, %v1710_v57  ;;  %v359_v3 = vmul.f32 %v1712_v58, %v1712_v58 }
 0x12a   : > { %v1722_v4 = vsub.f32 %v295_v18, %v330_v60  ;;  %v1724_v5 = vsub.f32 %v296_v19, %v330_v60  ;;  %v376_v6 = vadd.f32 %v357_v0, %v356_v63  ;;  %v430_v18 = vlaneseq }
 0x12b   : > { %v1726_v7 = vsub.f32 %v297_v20, %v331_v1  ;;  %v1728_v8 = vsub.f32 %v298_v21, %v331_v1  ;;  %v379_v9 = vadd.f32 %v359_v3, %v358_v2 }
 0x12c   : > { %374 = vadd.xlane.f32.xlu1 %v373_v62  ;;  %377 = vadd.xlane.f32.xlu0 %v376_v6  ;;  %v360_v10 = vmul.f32 %v1722_v4, %v1722_v4  ;;  %v361_v11 = vmul.f32 %v1724_v5, %v1724_v5  ;;  %v431_v24 = vshrl.u32 %v430_v18, 7 }
 0x12d   : > { %v362_v12 = vmul.f32 %v1726_v7, %v1726_v7  ;;  %v363_v13 = vmul.f32 %v1728_v8, %v1728_v8 }
 0x12e   : > { %v382_v14 = vadd.f32 %v361_v11, %v360_v10  ;;  %v432_v35 = vsub.s32 0, %v431_v24  ;;  %v436_v36 = vsub.s32 1, %v431_v24 }
 0x12f   : > { %v385_v15 = vadd.f32 %v363_v13, %v362_v12 }
 0x130   : > { %380 = vadd.xlane.f32.xlu1 %v379_v9  ;;  %383 = vadd.xlane.f32.xlu0 %v382_v14  ;;  %v1738_v49 = vrot.slane %v428_v39, %v432_v35  ;;  %v1740_v50 = vrot.slane %v428_v39, %v436_v36  ;;  %v1744_v62 = vrot.slane %v456_v51, %v432_v35 }
 0x131   : > { %v1746_v0 = vrot.slane %v456_v51, %v436_v36 }
 0x134   : > { %386 = vadd.xlane.f32.xlu1 %v385_v15 }
 0x1b1   : > { %v366_v16 = vpop.xlane.xlu0 %365 }
 0x1b2   : > { %v388_v17 = vmul.f32 0.00390625, %v366_v16 }
 0x1b4   : > { %v396_v19 = vadd.f32 1e-05, %v388_v17 }
 0x1b5   : > { %v369_v20 = vpop.xlane.xlu1 %368  ;;  %v372_v21 = vpop.xlane.xlu0 %371 }
 0x1b6   : > { %1203 = vrsqrt.f32 %v396_v19  ;;  %v389_v22 = vmul.f32 0.00390625, %v369_v20  ;;  %v390_v23 = vmul.f32 0.00390625, %v372_v21 }
 0x1b8   : > { %v397_v25 = vadd.f32 1e-05, %v389_v22  ;;  %v398_v26 = vadd.f32 1e-05, %v390_v23 }
 0x1b9   : > { %v375_v27 = vpop.xlane.xlu1 %374  ;;  %v378_v32 = vpop.xlane.xlu0 %377 }
 0x1ba   : > { %1205 = vrsqrt.f32 %v397_v25  ;;  %v391_v33 = vmul.f32 0.00390625, %v375_v27  ;;  %v392_v34 = vmul.f32 0.00390625, %v378_v32 }
 0x1bb   : > { %1207 = vrsqrt.f32 %v398_v26 }
 0x1bc   : > { %v399_v37 = vadd.f32 1e-05, %v391_v33  ;;  %v400_v38 = vadd.f32 1e-05, %v392_v34 }
 0x1bd   : > { %v381_v42 = vpop.xlane.xlu1 %380  ;;  %v384_v45 = vpop.xlane.xlu0 %383 }
 0x1be   : > { %1209 = vrsqrt.f32 %v399_v37  ;;  %v393_v46 = vmul.f32 0.00390625, %v381_v42  ;;  %v394_v47 = vmul.f32 0.00390625, %v384_v45 }
 0x1bf   : > { %1211 = vrsqrt.f32 %v400_v38 }
 0x1c0   : > { %v1204_v48 = vpop.eup %1203  ;;  %v401_v52 = vadd.f32 1e-05, %v393_v46  ;;  %v402_v53 = vadd.f32 1e-05, %v394_v47 }
 0x1c1   : > { %v412_v56 = vmul.f32 %v1204_v48, %v1674_v28  ;;  %v413_v59 = vmul.f32 %v1204_v48, %v1676_v29  ;;  %v387_v60 = vpop.xlane.xlu1 %386 }
 0x1c2   : > { %1213 = vrsqrt.f32 %v401_v52  ;;  %v395_v61 = vmul.f32 0.00390625, %v387_v60 }
 0x1c3   : > { %1215 = vrsqrt.f32 %v402_v53  ;;  %v440_v1 = vmul.f32 %v1738_v49, %v412_v56  ;;  %v441_v2 = vmul.f32 %v1740_v50, %v413_v59 }
 0x1c4   : > { %v1206_v63 = vpop.eup %1205  ;;  %v403_v3 = vadd.f32 1e-05, %v395_v61 }
 0x1c5   : > { %v1208_v6 = vpop.eup %1207  ;;  %v414_v9 = vmul.f32 %v1206_v63, %v1690_v40  ;;  %v415_v28 = vmul.f32 %v1206_v63, %v1692_v41  ;;  %v468_v14 = vadd.f32 %v1744_v62, %v440_v1  ;;  %v469_v15 = vadd.f32 %v1746_v0, %v441_v2 }
 0x1c6   : > { %v416_v29 = vmul.f32 %v1208_v6, %v1678_v30  ;;  %v417_v10 = vmul.f32 %v1208_v6, %v1680_v31  ;;  %1217 = vrsqrt.f32 %v403_v3 }
 0x1c7   : > { %v442_v11 = vmul.f32 %v1738_v49, %v414_v9  ;;  %v443_v12 = vmul.f32 %v1740_v50, %v415_v28 }
 0x1c8   : > { %v1210_v13 = vpop.eup %1209  ;;  %v444_v16 = vmul.f32 %v1738_v49, %v416_v29  ;;  %v445_v40 = vmul.f32 %v1740_v50, %v417_v10 }
 0x1c9   : > { %v1212_v17 = vpop.eup %1211  ;;  %v470_v41 = vadd.f32 %v1744_v62, %v442_v11  ;;  %v471_v30 = vadd.f32 %v1746_v0, %v443_v12  ;;  %v418_v31 = vmul.f32 %v1210_v13, %v1694_v43  ;;  %v419_v18 = vmul.f32 %v1210_v13, %v1696_v44 }
 0x1ca   : > { %v420_v19 = vmul.f32 %v1212_v17, %v1706_v54  ;;  %v421_v20 = vmul.f32 %v1212_v17, %v1708_v55  ;;  %v472_v26 = vadd.f32 %v1744_v62, %v444_v16  ;;  %v473_v27 = vadd.f32 %v1746_v0, %v445_v40 }
 0x1cb   : > { %v484_v21 = vpack.c.bf16 %v470_v41, %v468_v14  ;;  %v485_v22 = vpack.c.bf16 %v471_v30, %v469_v15  ;;  %v446_v23 = vmul.f32 %v1738_v49, %v418_v31  ;;  %v447_v24 = vmul.f32 %v1740_v50, %v419_v18 }
 0x1cc   : > { %v1214_v25 = vpop.eup %1213  ;;  %v448_v32 = vmul.f32 %v1738_v49, %v420_v19  ;;  %v449_v43 = vmul.f32 %v1740_v50, %v421_v20 }
 0x1cd   : > { %v1216_v44 = vpop.eup %1215  ;;  %492 = vst [vmem:[#allocation2] sm:$0xff] %v484_v21  ;;  %493 = vst [vmem:[#allocation2 + $0x8] sm:$0xff] %v485_v22  ;;  %v474_v54 = vadd.f32 %v1744_v62, %v446_v23  ;;  %v475_v55 = vadd.f32 %v1746_v0, %v447_v24  ;;  %v422_v33 = vmul.f32 %v1214_v25, %v1710_v57 }
 0x1ce   : > { %v423_v34 = vmul.f32 %v1214_v25, %v1712_v58  ;;  %v424_v35 = vmul.f32 %v1216_v44, %v1722_v4  ;;  %v425_v36 = vmul.f32 %v1216_v44, %v1724_v5  ;;  %v476_v46 = vadd.f32 %v1744_v62, %v448_v32 }
 0x1cf   : > { %v486_v37 = vpack.c.bf16 %v474_v54, %v472_v26  ;;  %v487_v38 = vpack.c.bf16 %v475_v55, %v473_v27  ;;  %v450_v39 = vmul.f32 %v1738_v49, %v422_v33  ;;  %v477_v47 = vadd.f32 %v1746_v0, %v449_v43 }
 0x1d0   : > { %v451_v42 = vmul.f32 %v1740_v50, %v423_v34  ;;  %v1218_v45 = vpop.eup %1217  ;;  %v452_v48 = vmul.f32 %v1738_v49, %v424_v35  ;;  %v453_v57 = vmul.f32 %v1740_v50, %v425_v36 }
 0x1d1   : > { %494 = vst [vmem:[#allocation2 + $0x10] sm:$0xff] %v486_v37  ;;  %495 = vst [vmem:[#allocation2 + $0x18] sm:$0xff] %v487_v38  ;;  %v478_v58 = vadd.f32 %v1744_v62, %v450_v39  ;;  %v426_v5 = vmul.f32 %v1218_v45, %v1726_v7  ;;  %v427_v51 = vmul.f32 %v1218_v45, %v1728_v8 }
 0x1d2   : > { %v479_v4 = vadd.f32 %v1746_v0, %v451_v42  ;;  %v480_v60 = vadd.f32 %v1744_v62, %v452_v48  ;;  %v481_v61 = vadd.f32 %v1746_v0, %v453_v57 }
 0x1d3   : > { %v488_v52 = vpack.c.bf16 %v478_v58, %v476_v46  ;;  %v454_v56 = vmul.f32 %v1738_v49, %v426_v5  ;;  %v455_v59 = vmul.f32 %v1740_v50, %v427_v51 }
 0x1d4   : > { %v489_v53 = vpack.c.bf16 %v479_v4, %v477_v47 }
 0x1d5   : > { %496 = vst [vmem:[#allocation2 + $0x20] sm:$0xff] %v488_v52  ;;  %v482_v63 = vadd.f32 %v1744_v62, %v454_v56  ;;  %v483_v1 = vadd.f32 %v1746_v0, %v455_v59 }
 0x1d6   : > { %497 = vst [vmem:[#allocation2 + $0x28] sm:$0xff] %v489_v53 }
 0x1d7   : > { %v490_v2 = vpack.c.bf16 %v482_v63, %v480_v60  ;;  %v491_v7 = vpack.c.bf16 %v483_v1, %v481_v61 }
 0x1d9   : > { %498 = vst [vmem:[#allocation2 + $0x30] sm:$0xff] %v490_v2  ;;  %499 = vst [vmem:[#allocation2 + $0x38] sm:$0xff] %v491_v7 }
 0x1da PF: > { %v1219_v8 = vld [vmem:[%s1665_s8 + $0x4] ss:$8 sps:$4 sm:$0xff]   ;;  %v1221_v49 = vld [vmem:[%s1665_s8] ss:$8 sps:$4 sm:$0xff]   ;;  %v1222_v50 = vld [vmem:[%s1665_s8 + $0x14] ss:$8 sps:$4 sm:$0xff]  }
 0x1db   : > { %700 = vmatprep.subr.bf16.mxu0 %v1219_v8  ;;  %1080 = vmatprep.subr.bf16.mxu1 %v1219_v8  ;;  %v1224_v62 = vld [vmem:[%s1665_s8 + $0x10] ss:$8 sps:$4 sm:$0xff]   ;;  %v1225_v0 = vld [vmem:[%s1665_s8 + $0x24] ss:$8 sps:$4 sm:$0xff]   ;;  %v1227_v3 = vld [vmem:[%s1665_s8 + $0x20] ss:$8 sps:$4 sm:$0xff]  }
 0x1dc   : > { %701 = vmatpush1.bf16.msra.mxu0 %v1221_v49  ;;  %1096 = vmatpush1.bf16.msra.mxu1 %v1221_v49  ;;  %v1228_v6 = vld [vmem:[%s1665_s8 + $0x34] ss:$8 sps:$4 sm:$0xff]   ;;  %v1230_v9 = vld [vmem:[%s1665_s8 + $0x30] ss:$8 sps:$4 sm:$0xff]   ;;  %v1231_v28 = vld [vmem:[%s1665_s8 + $0x44] ss:$8 sps:$4 sm:$0xff]  }
 0x1dd   : > { %702 = vmatprep.subr.bf16.mxu0 %v1222_v50  ;;  %1081 = vmatprep.subr.bf16.mxu1 %v1222_v50  ;;  %v1233_v29 = vld [vmem:[%s1665_s8 + $0x40] ss:$8 sps:$4 sm:$0xff]   ;;  %v1234_v10 = vld [vmem:[%s1665_s8 + $0x54] ss:$8 sps:$4 sm:$0xff]   ;;  %v1236_v11 = vld [vmem:[%s1665_s8 + $0x50] ss:$8 sps:$4 sm:$0xff]  }
 0x1de   : > { %v1237_v12 = vld [vmem:[%s1665_s8 + $0x64] ss:$8 sps:$4 sm:$0xff]   ;;  %v1239_v15 = vld [vmem:[%s1665_s8 + $0x60] ss:$8 sps:$4 sm:$0xff]   ;;  %v1240_v16 = vld [vmem:[%s1665_s8 + $0x74] ss:$8 sps:$4 sm:$0xff]  }
 0x1df   : > { %v501_v13 = vld [vmem:[#allocation2 + $0x8] sm:$0xff]  ;;  %v1242_v40 = vld [vmem:[%s1665_s8 + $0x70] ss:$8 sps:$4 sm:$0xff]   ;;  %v1246_v30 = vld [vmem:[%s1665_s8 + $0x94] ss:$8 sps:$4 sm:$0xff]   ;;  %p1889_p6 = scmp.ne.s32.totalorder %s1879_s24, 0 }
 0x1e0   : > { %703 = vmatpush1.bf16.msra.mxu0 %v1224_v62  ;;  %1097 = vmatpush1.bf16.msra.mxu1 %v1224_v62  ;;  %v505_v14 = vld [vmem:[#allocation2 + $0x28] sm:$0xff]  ;;  %v1248_v31 = vld [vmem:[%s1665_s8 + $0x90] ss:$8 sps:$4 sm:$0xff]   ;;  %v1252_v20 = vld [vmem:[%s1665_s8 + $0xb4] ss:$8 sps:$4 sm:$0xff]   ;;  %s1079_s22 = sshll.u32 (%p1889_p6), %s1431_s18, 3 }
 0x1e1   : > { %704 = vmatprep.subr.bf16.mxu0 %v1225_v0  ;;  %1082 = vmatprep.subr.bf16.mxu1 %v1225_v0  ;;  %v1243_v17 = vld [vmem:[%s1665_s8 + $0x84] ss:$8 sps:$4 sm:$0xff]   ;;  %v1245_v41 = vld [vmem:[%s1665_s8 + $0x80] ss:$8 sps:$4 sm:$0xff]   ;;  %v1254_v21 = vld [vmem:[%s1665_s8 + $0xb0] ss:$8 sps:$4 sm:$0xff]   ;;  %s841_s13 = scalar_lea.vmem (%p1889_p6), %s1870_s4, %s1079_s22 }
 0x1e2   : > { %732 = vmatprep.mubr.bf16.mxu0 %v501_v13  ;;  %752 = vmatprep.mubr.bf16.mxu1 %v505_v14  ;;  %v1249_v18 = vld [vmem:[%s1665_s8 + $0xa4] ss:$8 sps:$4 sm:$0xff]   ;;  %v1251_v19 = vld [vmem:[%s1665_s8 + $0xa0] ss:$8 sps:$4 sm:$0xff]   ;;  %v1258_v24 = vld [vmem:[%s1665_s8 + $0xd4] ss:$8 sps:$4 sm:$0xff]  }
 0x1e3   : > { %v1255_v22 = vld [vmem:[%s1665_s8 + $0xc4] ss:$8 sps:$4 sm:$0xff]   ;;  %v1257_v23 = vld [vmem:[%s1665_s8 + $0xc0] ss:$8 sps:$4 sm:$0xff]   ;;  %v1260_v25 = vld [vmem:[%s1665_s8 + $0xd0] ss:$8 sps:$4 sm:$0xff]  }
 0x1e4   : > { %705 = vmatpush1.bf16.msra.mxu0 %v1227_v3  ;;  %1098 = vmatpush1.bf16.msra.mxu1 %v1227_v3  ;;  %v1261_v26 = vld [vmem:[%s1665_s8 + $0xe4] ss:$8 sps:$4 sm:$0xff]   ;;  %v1263_v27 = vld [vmem:[%s1665_s8 + $0xe0] ss:$8 sps:$4 sm:$0xff]   ;;  %v1264_v32 = vld [vmem:[%s1665_s8 + $0xf4] ss:$8 sps:$4 sm:$0xff]  }
 0x1e5   : > { %706 = vmatprep.subr.bf16.mxu0 %v1228_v6  ;;  %1083 = vmatprep.subr.bf16.mxu1 %v1228_v6  ;;  %v1266_v43 = vld [vmem:[%s1665_s8 + $0xf0] ss:$8 sps:$4 sm:$0xff]   ;;  %v500_v44 = vld [vmem:[#allocation2] sm:$0xff] }
 0x1e6   : > { %v504_v54 = vld [vmem:[#allocation2 + $0x20] sm:$0xff]  ;;  %v503_v55 = vld [vmem:[#allocation2 + $0x18] sm:$0xff]  ;;  %v502_v34 = vld [vmem:[#allocation2 + $0x10] sm:$0xff] }
 0x1e7   : > { %v507_v33 = vld [vmem:[#allocation2 + $0x38] sm:$0xff]  ;;  %v506_v35 = vld [vmem:[#allocation2 + $0x30] sm:$0xff] }
 0x1e8   : > { %707 = vmatpush1.bf16.msra.mxu0 %v1230_v9  ;;  %1099 = vmatpush1.bf16.msra.mxu1 %v1230_v9 }
 0x1e9   : > { %708 = vmatprep.subr.bf16.mxu0 %v1231_v28  ;;  %1084 = vmatprep.subr.bf16.mxu1 %v1231_v28 }
 0x1ec   : > { %709 = vmatpush1.bf16.msra.mxu0 %v1233_v29  ;;  %1100 = vmatpush1.bf16.msra.mxu1 %v1233_v29 }
 0x1ed   : > { %710 = vmatprep.subr.bf16.mxu0 %v1234_v10  ;;  %1085 = vmatprep.subr.bf16.mxu1 %v1234_v10 }
 0x1f0   : > { %711 = vmatpush1.bf16.msra.mxu0 %v1236_v11  ;;  %1101 = vmatpush1.bf16.msra.mxu1 %v1236_v11 }
 0x1f1   : > { %712 = vmatprep.subr.bf16.mxu0 %v1237_v12  ;;  %1086 = vmatprep.subr.bf16.mxu1 %v1237_v12 }
 0x1f4   : > { %713 = vmatpush1.bf16.msra.mxu0 %v1239_v15  ;;  %1102 = vmatpush1.bf16.msra.mxu1 %v1239_v15 }
 0x1f5   : > { %714 = vmatprep.subr.bf16.mxu0 %v1240_v16  ;;  %1087 = vmatprep.subr.bf16.mxu1 %v1240_v16 }
 0x1f8   : > { %715 = vmatpush1.bf16.msra.mxu0 %v1242_v40  ;;  %1103 = vmatpush1.bf16.msra.mxu1 %v1242_v40 }
 0x1f9   : > { %716 = vmatprep.subr.bf16.mxu0 %v1243_v17  ;;  %1088 = vmatprep.subr.bf16.mxu1 %v1243_v17 }
 0x1fc   : > { %717 = vmatpush1.bf16.msra.mxu0 %v1245_v41  ;;  %1104 = vmatpush1.bf16.msra.mxu1 %v1245_v41 }
 0x1fd   : > { %718 = vmatprep.subr.bf16.mxu0 %v1246_v30  ;;  %1089 = vmatprep.subr.bf16.mxu1 %v1246_v30 }
 0x200   : > { %719 = vmatpush1.bf16.msra.mxu0 %v1248_v31  ;;  %1105 = vmatpush1.bf16.msra.mxu1 %v1248_v31 }
 0x201   : > { %720 = vmatprep.subr.bf16.mxu0 %v1249_v18  ;;  %1090 = vmatprep.subr.bf16.mxu1 %v1249_v18 }
 0x204   : > { %721 = vmatpush1.bf16.msra.mxu0 %v1251_v19  ;;  %1106 = vmatpush1.bf16.msra.mxu1 %v1251_v19 }
 0x205   : > { %722 = vmatprep.subr.bf16.mxu0 %v1252_v20  ;;  %1091 = vmatprep.subr.bf16.mxu1 %v1252_v20 }
 0x208   : > { %723 = vmatpush1.bf16.msra.mxu0 %v1254_v21  ;;  %1107 = vmatpush1.bf16.msra.mxu1 %v1254_v21 }
 0x209   : > { %724 = vmatprep.subr.bf16.mxu0 %v1255_v22  ;;  %1092 = vmatprep.subr.bf16.mxu1 %v1255_v22 }
 0x20c   : > { %725 = vmatpush1.bf16.msra.mxu0 %v1257_v23  ;;  %1108 = vmatpush1.bf16.msra.mxu1 %v1257_v23 }
 0x20d   : > { %726 = vmatprep.subr.bf16.mxu0 %v1258_v24  ;;  %1093 = vmatprep.subr.bf16.mxu1 %v1258_v24 }
 0x210   : > { %727 = vmatpush1.bf16.msra.mxu0 %v1260_v25  ;;  %1109 = vmatpush1.bf16.msra.mxu1 %v1260_v25 }
 0x211   : > { %728 = vmatprep.subr.bf16.mxu0 %v1261_v26  ;;  %1094 = vmatprep.subr.bf16.mxu1 %v1261_v26 }
 0x214   : > { %729 = vmatpush1.bf16.msra.mxu0 %v1263_v27  ;;  %1110 = vmatpush1.bf16.msra.mxu1 %v1263_v27 }
 0x215   : > { %730 = vmatprep.subr.bf16.mxu0 %v1264_v32  ;;  %1095 = vmatprep.subr.bf16.mxu1 %v1264_v32 }
 0x218   : > { %731 = vmatpush1.bf16.msra.mxu0 %v1266_v43  ;;  %1111 = vmatpush1.bf16.msra.mxu1 %v1266_v43 }
 0x21b   : > { %733 = vmatmul.mubr.bf16.vlgmr.msra.gmra.mrb[0].mxu0 %v500_v44  ;;  %753 = vmatmul.mubr.bf16.vlgmr.msra.gmra.mrb[0].mxu1 %v504_v54 }
 0x21c   : > { %742 = vmatprep.mubr.bf16.mxu0 %v503_v55  ;;  %762 = vmatprep.mubr.bf16.mxu1 %v507_v33 }
 0x223   : > { %743 = vmatmul.mubr.bf16.gmra.mrb[4].mxu0 %v502_v34  ;;  %763 = vmatmul.mubr.bf16.gmra.mrb[4].mxu1 %v506_v35 }
 0x2ee   : > { %v734_v36 = vpop.f32.mrb[0].mxu0  ;;  %v754_v37 = vpop.f32.mrb[0].mxu1 }
 0x2ef   : > { %v736_v38 = vpop.f32.mrb[1].mxu0  ;;  %v756_v39 = vpop.f32.mrb[1].mxu1 }
 0x2f0   : > { %v1071_v42 = vpack.c.bf16 %v736_v38, %v734_v36  ;;  %v1075_v45 = vpack.c.bf16 %v756_v39, %v754_v37  ;;  %v738_v46 = vpop.f32.mrb[2].mxu0  ;;  %v758_v47 = vpop.f32.mrb[2].mxu1 }
 0x2f1   : > { %v740_v48 = vpop.f32.mrb[3].mxu0  ;;  %v760_v57 = vpop.f32.mrb[3].mxu1 }
 0x2f2   : > { %821 = vst [vmem:[%s1671_s10] sm:$0xff] %v1071_v42  ;;  %825 = vst [vmem:[%s1671_s10 + $0x20] sm:$0xff] %v1075_v45  ;;  %v1072_v58 = vpack.c.bf16 %v740_v48, %v738_v46  ;;  %v1076_v4 = vpack.c.bf16 %v760_v57, %v758_v47 }
 0x2f4   : > { %822 = vst [vmem:[%s1671_s10 + $0x8] sm:$0xff] %v1072_v58  ;;  %826 = vst [vmem:[%s1671_s10 + $0x28] sm:$0xff] %v1076_v4 }
 0x2f6   : > { %v744_v5 = vpop.f32.mrb[4].mxu0  ;;  %v764_v51 = vpop.f32.mrb[4].mxu1  ;;  %835 = sbr.rel (!%p1889_p6) target bundleno = 774 (0x306), region = 60 }
 0x2f7   : > { %v746_v52 = vpop.f32.mrb[5].mxu0  ;;  %v766_v53 = vpop.f32.mrb[5].mxu1 }
 0x2f8   : > { %v1073_v56 = vpack.c.bf16 %v746_v52, %v744_v5  ;;  %v1077_v59 = vpack.c.bf16 %v766_v53, %v764_v51  ;;  %v748_v60 = vpop.f32.mrb[6].mxu0  ;;  %v768_v61 = vpop.f32.mrb[6].mxu1 }
 0x2f9   : > { %v750_v63 = vpop.f32.mrb[7].mxu0  ;;  %v770_v1 = vpop.f32.mrb[7].mxu1  ;;  %v883_v8 = vld [vmem:[%s1671_s10] sm:$0xff] (%p1889_p6) }
 0x2fa   : > { %823 = vst [vmem:[%s1671_s10 + $0x10] sm:$0xff] %v1073_v56  ;;  %827 = vst [vmem:[%s1671_s10 + $0x30] sm:$0xff] %v1077_v59  ;;  %v1074_v2 = vpack.c.bf16 %v750_v63, %v748_v60  ;;  %v1078_v7 = vpack.c.bf16 %v770_v1, %v768_v61  ;;  %v891_v0 = vld [vmem:[%s1671_s10 + $0x20] sm:$0xff] (%p1889_p6) }
 0x2fb   : > { %v885_v49 = vld [vmem:[%s1671_s10 + $0x8] sm:$0xff] (%p1889_p6)  ;;  %884 = vst [vmem:[%s841_s13] sm:$0xff] (%p1889_p6), %v883_v8  ;;  %892 = vst [vmem:[%s841_s13 + $0x60] sm:$0xff] (%p1889_p6), %v891_v0 }
 0x2fc   : > { %824 = vst [vmem:[%s1671_s10 + $0x18] sm:$0xff] %v1074_v2  ;;  %828 = vst [vmem:[%s1671_s10 + $0x38] sm:$0xff] %v1078_v7  ;;  %v893_v3 = vld [vmem:[%s1671_s10 + $0x28] sm:$0xff] (%p1889_p6) }
 0x2fd   : > { %886 = vst [vmem:[%s841_s13 + $0x18] sm:$0xff] %v885_v49  ;;  %894 = vst [vmem:[%s841_s13 + $0x78] sm:$0xff] %v893_v3 }
 0x301   : > { %v887_v50 = vld [vmem:[%s1671_s10 + $0x10] sm:$0xff] }
 0x302   : > { %888 = vst [vmem:[%s841_s13 + $0x30] sm:$0xff] %v887_v50  ;;  %v895_v6 = vld [vmem:[%s1671_s10 + $0x30] sm:$0xff] }
 0x303   : > { %v889_v62 = vld [vmem:[%s1671_s10 + $0x18] sm:$0xff]  ;;  %896 = vst [vmem:[%s841_s13 + $0x90] sm:$0xff] %v895_v6 }
 0x304   : > { %890 = vst [vmem:[%s841_s13 + $0x48] sm:$0xff] %v889_v62  ;;  %v897_v9 = vld [vmem:[%s1671_s10 + $0x38] sm:$0xff] }
 0x305   : > { %898 = vst [vmem:[%s841_s13 + $0xa8] sm:$0xff] %v897_v9 }
 0x306 PF: > { %s19_s20 = sadd.s32 1, %s1439_s20   ;;  %s1890_s15 = smov %s1423_s16 }
 0x307   : > { %p16_p9 = scmp.ge.s32.totalorder %s19_s20, 5   ;;  %s1891_s16 = smov %s1427_s17 }
 0x308   : > { %s1892_s17 = smov %s1622_s9  ;;  %s1893_s18 = smov %s1435_s19 }
 0x309   : > { %s1894_s19 = smov %s1896_s30  ;;  %18 = sbr.rel (!%p16_p9) target bundleno = 8 (0x8), region = 132 }
 0x310   :  { %914 = vsyncpa [#allocation4], 1 }
 0x311   :  { %916 = vsyncpa [#allocation4 + $0x1], 1 }
 0x312   :  { %917 = vsyncpa [#allocation6], 1 }
 0x313   :  { %918 = vsyncpa [#allocation9], 1 }
 0x314   :  { %920 = vsyncpa [#allocation9 + $0x1], 1 }

// kernel: transformer_forward.8
= control target key start
LH: loop header
LB: loop body
LE: loop exit
PB: predicated region body
PF: predicated region fallthrough
CT: control target
= control target key end

     0   :  { %s1325_s6 = smov 0   ;;  %s1576_s0 = inlined_call_operand.vmem [shape: bf16[2,32,768], index: 0, kind: input, shape index: {}]   ;;  %s1577_s1 = inlined_call_operand.vmem [shape: bf16[2,32,256], index: 1, kind: output, shape index: {}]  }
   0x1 LB: > { %s1043_s7 = sadd.s32 4294967295, %s1312_s6   ;;  %p1047_p0 = scmp.ge.s32.totalorder %s1312_s6, 1  ;;  %s1312_s6 = sphi %s1325_s6, %s11_s6  }
   0x2   : > { %p87_p1 = scmp.lt.s32.totalorder %s1312_s6, 3 }
   0x4   : > { %p88_p2 = pnand %p1047_p0, %p87_p1 }
   0x5   : > { %p107_p3 = scmp.lt.s32.totalorder (!%p88_p2), %s1043_s7, 1  ;;  %s1314_s12 = smov (!%p88_p2), 64   ;;  %vm202_vm0 = vcmask (!%p88_p2), 523264   ;;  %vm483_vm1 = vcmask (!%p88_p2), 261120  }
   0x6   : > { %91 = sbr.rel (%p88_p2) target bundleno = 1059 (0x423), region = 24 }
   0xd   : > { %s1579_s7 = smov (!%p107_p3, %s1043_s7), 1 }
   0xe   : > { %s1206_s8 = smul.u32 96, %s1579_s7  ;;  %s1097_s13 = sshll.u32 %s1579_s7, 5 }
   0xf   : > { %s116_s16 = scalar_lea.vmem %s1577_s1, %s1097_s13 }
  0x10   : > { %s1339_s11 = scalar_lea.vmem %s1576_s0, %s1206_s8 }
  0x11   : > { %v119_v0 = vld [vmem:[%s1339_s11 + $0x8] sm:$0xff]  ;;  %v125_v1 = vld [vmem:[%s1339_s11 + $0x38] sm:$0xff]  ;;  %v122_v2 = vld [vmem:[%s1339_s11 + $0x20] sm:$0xff] }
  0x12   : > { %158 = vrot.lane.b32.xlu0 %v119_v0, %s1314_s12  ;;  %162 = vrot.lane.b32.xlu1 %v125_v1, %s1314_s12  ;;  %v128_v3 = vld [vmem:[%s1339_s11 + $0x50] sm:$0xff]  ;;  %v1053_v5 = vcombine.low %v119_v0, %v122_v2  ;;  %v121_v6 = vld [vmem:[%s1339_s11 + $0x18] sm:$0xff]  ;;  %v154_v9 = vrot.slane %v119_v0, 4  ;;  %v155_v10 = vrot.slane %v122_v2, 4  ;;  %v156_v17 = vrot.slane %v125_v1, 4 }
  0x13   : > { %v1054_v4 = vcombine.low %v125_v1, %v128_v3  ;;  %v118_v7 = vld [vmem:[%s1339_s11] sm:$0xff]  ;;  %v127_v11 = vld [vmem:[%s1339_s11 + $0x48] sm:$0xff]  ;;  %v124_v12 = vld [vmem:[%s1339_s11 + $0x30] sm:$0xff]  ;;  %v135_v15 = vrot.slane %v121_v6, 4  ;;  %v157_v18 = vrot.slane %v128_v3, 4 }
  0x14   : > { %1198 = vmatprep.subr.msk.bf16.mxu0 %vm202_vm0, %v1053_v5  ;;  %v210_v8 = vsel %vm202_vm0, %v1053_v5, 0  ;;  %v1065_v13 = vcombine.low %v154_v9, %v155_v10  ;;  %v134_v16 = vrot.slane %v118_v7, 4  ;;  %v1052_v19 = vcombine.low %v124_v12, %v127_v11 }
  0x15   : > { %1135 = vmatpush3.bf16.xpose.msra.mxu0 %v210_v8  ;;  %v213_v14 = vsel %vm202_vm0, %v1054_v4, 0  ;;  %v1051_v21 = vcombine.low %v118_v7, %v121_v6  ;;  %v1066_v22 = vcombine.low %v156_v17, %v157_v18  ;;  %v137_v25 = vrot.slane %v127_v11, 4 }
  0x16   : > { %160 = vrot.lane.b32.xlu0 %v122_v2, %s1314_s12  ;;  %164 = vrot.lane.b32.xlu1 %v128_v3, %s1314_s12  ;;  %v1063_v20 = vcombine.low %v134_v16, %v135_v15  ;;  %v356_v23 = vsel %vm202_vm0, %v1065_v13, 0  ;;  %v136_v26 = vrot.slane %v124_v12, 4 }
  0x17   : > { %1199 = vmatprep.subr.msk.bf16.mxu0 %vm202_vm0, %v1054_v4  ;;  %1138 = vmatprep.mubr.msk.bf16.mxu0 %vm202_vm0, %v1051_v21  ;;  %v359_v24 = vsel %vm202_vm0, %v1066_v22, 0 }
  0x18   : > { %v1064_v27 = vcombine.low %v136_v26, %v137_v25 }
  0x1a   : > { %140 = vrot.lane.b32.xlu1 %v121_v6, %s1314_s12  ;;  %138 = vrot.lane.b32.xlu0 %v118_v7, %s1314_s12 }
  0x1d   : > { %1137 = vmatpush3.bf16.xpose.msra.mxu0 %v213_v14 }
  0x1e   : > { %144 = vrot.lane.b32.xlu1 %v127_v11, %s1314_s12  ;;  %142 = vrot.lane.b32.xlu0 %v124_v12, %s1314_s12 }
  0x1f   : > { %1202 = vmatprep.subr.msk.bf16.mxu0 %vm202_vm0, %v1065_v13 }
  0x24   : > { %1139 = vmatmul.mubr.msk.bf16.vlgmr.msra.gmra.mrb[0].mxu0 %vm202_vm0, %v1052_v19 }
  0x25   : > { %1151 = vmatpush3.bf16.xpose.msra.mxu0 %v356_v23  ;;  %1154 = vmatprep.mubr.msk.bf16.mxu0 %vm202_vm0, %v1063_v20 }
  0x26   : > { %1203 = vmatprep.subr.msk.bf16.mxu0 %vm202_vm0, %v1066_v22 }
  0x2d   : > { %1153 = vmatpush3.bf16.xpose.msra.mxu0 %v359_v24  ;;  %v1428_v24 = vld [vmem:[%s1339_s11 + $0x10] sm:$0xff] }
  0x34   : > { %1155 = vmatmul.mubr.msk.bf16.vlgmr.msra.gmra.mrb[4].mxu0 %vm202_vm0, %v1064_v27 }
  0x84   : > { %v159_v28 = vpop.permute.xlu0 %158  ;;  %v163_v29 = vpop.permute.xlu1 %162 }
  0x85   : > { %v166_v39 = vrot.slane %v159_v28, 4  ;;  %v168_v46 = vrot.slane %v163_v29, 4 }
  0x88   : > { %v161_v30 = vpop.permute.xlu0 %160  ;;  %v165_v31 = vpop.permute.xlu1 %164 }
  0x89   : > { %v1059_v32 = vcombine.low %v159_v28, %v161_v30  ;;  %v1060_v33 = vcombine.low %v163_v29, %v165_v31  ;;  %v167_v38 = vrot.slane %v161_v30, 4  ;;  %v169_v47 = vrot.slane %v165_v31, 4 }
  0x8b   : > { %1200 = vmatprep.subr.msk.bf16.mxu1 %vm202_vm0, %v1059_v32  ;;  %v283_v34 = vsel %vm202_vm0, %v1059_v32, 0  ;;  %v1071_v40 = vcombine.low %v166_v39, %v167_v38  ;;  %v286_v41 = vsel %vm202_vm0, %v1060_v33, 0  ;;  %v1072_v50 = vcombine.low %v168_v46, %v169_v47 }
  0x8c   : > { %1143 = vmatpush3.bf16.xpose.msra.mxu1 %v283_v34  ;;  %v141_v35 = vpop.permute.xlu1 %140  ;;  %v139_v36 = vpop.permute.xlu0 %138 }
  0x8d   : > { %1201 = vmatprep.subr.msk.bf16.mxu1 %vm202_vm0, %v1060_v33  ;;  %v1057_v37 = vcombine.low %v139_v36, %v141_v35  ;;  %v147_v44 = vrot.slane %v141_v35, 4  ;;  %v146_v45 = vrot.slane %v139_v36, 4  ;;  %v429_v51 = vsel %vm202_vm0, %v1071_v40, 0 }
  0x8e   : > { %v432_v52 = vsel %vm202_vm0, %v1072_v50, 0 }
  0x8f   : > { %1146 = vmatprep.mubr.msk.bf16.mxu1 %vm202_vm0, %v1057_v37  ;;  %v1069_v49 = vcombine.low %v146_v45, %v147_v44 }
  0x90   : > { %v145_v42 = vpop.permute.xlu1 %144  ;;  %v143_v43 = vpop.permute.xlu0 %142 }
  0x91   : > { %v1058_v48 = vcombine.low %v143_v43, %v145_v42  ;;  %v149_v53 = vrot.slane %v145_v42, 4  ;;  %v148_v54 = vrot.slane %v143_v43, 4 }
  0x93   : > { %v1070_v55 = vcombine.low %v148_v54, %v149_v53 }
  0x94   : > { %1145 = vmatpush3.bf16.xpose.msra.mxu1 %v286_v41 }
  0x95   : > { %1204 = vmatprep.subr.msk.bf16.mxu1 %vm202_vm0, %v1071_v40 }
  0x9b   : > { %1147 = vmatmul.mubr.msk.bf16.vlgmr.msra.gmra.mrb[0].mxu1 %vm202_vm0, %v1058_v48 }
  0x9c   : > { %1159 = vmatpush3.bf16.xpose.msra.mxu1 %v429_v51  ;;  %1162 = vmatprep.mubr.msk.bf16.mxu1 %vm202_vm0, %v1069_v49 }
  0x9d   : > { %1205 = vmatprep.subr.msk.bf16.mxu1 %vm202_vm0, %v1072_v50 }
  0xa4   : > { %1161 = vmatpush3.bf16.xpose.msra.mxu1 %v432_v52 }
  0xab   : > { %1163 = vmatmul.mubr.msk.bf16.vlgmr.msra.gmra.mrb[4].mxu1 %vm202_vm0, %v1070_v55 }
  0xf7   : > { %v1381_v56 = vpop.f32.mrb[0].mxu0 }
  0xf8   : > { %v1383_v57 = vpop.f32.mrb[1].mxu0  ;;  %v490_v18 = vsel %vm483_vm1, %v1381_v56, -inf }
  0xf9   : > { %v1385_v58 = vpop.f32.mrb[2].mxu0  ;;  %v484_v15 = vsel %vm483_vm1, %v1383_v57, -inf }
  0xfa   : > { %v1387_v59 = vpop.f32.mrb[3].mxu0  ;;  %v493_v19 = vsel %vm483_vm1, %v1385_v58, -inf }
  0xfb   : > { %v487_v17 = vsel %vm483_vm1, %v1387_v59, -inf }
 0x107   : > { %v1389_v60 = vpop.f32.mrb[4].mxu0 }
 0x108   : > { %v1391_v61 = vpop.f32.mrb[5].mxu0  ;;  %v514_v22 = vsel %vm483_vm1, %v1389_v60, -inf }
 0x109   : > { %v1393_v62 = vpop.f32.mrb[6].mxu0  ;;  %v508_v20 = vsel %vm483_vm1, %v1391_v61, -inf }
 0x10a   : > { %v1395_v63 = vpop.f32.mrb[7].mxu0  ;;  %v517_v23 = vsel %vm483_vm1, %v1393_v62, -inf }
 0x10b   : > { %v511_v21 = vsel %vm483_vm1, %v1395_v63, -inf }
 0x16e   : > { %v1148_v0 = vpop.f32.mrb[0].mxu1 }
 0x16f   : > { %v322_v1 = vpop.f32.mrb[1].mxu1  ;;  %v502_v2 = vsel %vm483_vm1, %v1148_v0, -inf }
 0x170   : > { %503 = vmax.xlane.f32.xlu0 %v502_v2  ;;  %v1149_v3 = vpop.f32.mrb[2].mxu1  ;;  %v496_v6 = vsel %vm483_vm1, %v322_v1, -inf }
 0x171   : > { %v325_v4 = vpop.f32.mrb[3].mxu1  ;;  %v505_v7 = vsel %vm483_vm1, %v1149_v3, -inf }
 0x172   : > { %v499_v5 = vsel %vm483_vm1, %v325_v4, -inf }
 0x173   : > { %500 = vmax.xlane.f32.xlu1 %v499_v5 }
 0x174   : > { %497 = vmax.xlane.f32.xlu0 %v496_v6 }
 0x178   : > { %506 = vmax.xlane.f32.xlu0 %v505_v7 }
 0x17e   : > { %v1164_v8 = vpop.f32.mrb[4].mxu1 }
 0x17f   : > { %v468_v9 = vpop.f32.mrb[5].mxu1  ;;  %v526_v10 = vsel %vm483_vm1, %v1164_v8, -inf }
 0x180   : > { %527 = vmax.xlane.f32.xlu1 %v526_v10  ;;  %v1402_v11 = vpop.f32.mrb[6].mxu1  ;;  %v520_v14 = vsel %vm483_vm1, %v468_v9, -inf  ;;  %v1472_v10 = vld [vmem:[%s1339_s11 + $0x58] sm:$0xff] }
 0x181   : > { %v1404_v12 = vpop.f32.mrb[7].mxu1  ;;  %v529_v16 = vsel %vm483_vm1, %v1402_v11, -inf }
 0x182   : > { %v523_v13 = vsel %vm483_vm1, %v1404_v12, -inf }
 0x183   : > { %524 = vmax.xlane.f32.xlu0 %v523_v13 }
 0x184   : > { %521 = vmax.xlane.f32.xlu1 %v520_v14 }
 0x187   : > { %530 = vmax.xlane.f32.xlu0 %v529_v16 }
 0x188   : > { %485 = vmax.xlane.f32.xlu1 %v484_v15 }
 0x18b   : > { %488 = vmax.xlane.f32.xlu0 %v487_v17 }
 0x18c   : > { %491 = vmax.xlane.f32.xlu1 %v490_v18 }
 0x18f   : > { %494 = vmax.xlane.f32.xlu0 %v493_v19 }
 0x190   : > { %509 = vmax.xlane.f32.xlu1 %v508_v20 }
 0x193   : > { %512 = vmax.xlane.f32.xlu0 %v511_v21 }
 0x194   : > { %515 = vmax.xlane.f32.xlu1 %v514_v22 }
 0x197   : > { %518 = vmax.xlane.f32.xlu0 %v517_v23 }
 0x1a5   : > { %178 = vrot.lane.b32.xlu1 %v1428_v24, %s1314_s12 }
 0x1fd   : > { %v504_v25 = vpop.xlane.xlu0 %503 }
 0x1fe   : > { %v538_v26 = vsub.f32 %v1148_v0, %v504_v25 }
 0x200   : > { %v560_v27 = vmul.f32 1.442695, %v538_v26  ;;  %v501_v28 = vpop.xlane.xlu1 %500 }
 0x201   : > { %v498_v29 = vpop.xlane.xlu0 %497  ;;  %v537_v31 = vsub.f32 %v325_v4, %v501_v28 }
 0x202   : > { %1242 = vpow2.f32 %v560_v27  ;;  %v536_v30 = vsub.f32 %v322_v1, %v498_v29 }
 0x203   : > { %v558_v35 = vmul.f32 1.442695, %v537_v31 }
 0x204   : > { %v556_v32 = vmul.f32 1.442695, %v536_v30 }
 0x205   : > { %v507_v33 = vpop.xlane.xlu0 %506 }
 0x206   : > { %1244 = vpow2.f32 %v556_v32  ;;  %v539_v34 = vsub.f32 %v1149_v3, %v507_v33 }
 0x208   : > { %v562_v36 = vmul.f32 1.442695, %v539_v34 }
 0x20a   : > { %1246 = vpow2.f32 %v562_v36 }
 0x20b   : > { %1248 = vpow2.f32 %v558_v35 }
 0x20c   : > { %v1432_v37 = vpop.eup %1242 }
 0x20d   : > { %v528_v38 = vpop.xlane.xlu1 %527  ;;  %v598_v39 = vsel %vm483_vm1, %v1432_v37, 0.0 }
 0x20e   : > { %v546_v40 = vsub.f32 %v1164_v8, %v528_v38  ;;  %599 = vadd.xlane.f32.xlu1 %v598_v39 }
 0x210   : > { %v1436_v41 = vpop.eup %1244  ;;  %v576_v42 = vmul.f32 1.442695, %v546_v40  ;;  %v525_v43 = vpop.xlane.xlu0 %524 }
 0x211   : > { %v522_v44 = vpop.xlane.xlu1 %521  ;;  %v592_v45 = vsel %vm483_vm1, %v1436_v41, 0.0  ;;  %v545_v47 = vsub.f32 %v1404_v12, %v525_v43  ;;  %v1477_v12 = vld [vmem:[%s1339_s11 + $0x28] sm:$0xff] }
 0x212   : > { %1250 = vpow2.f32 %v576_v42  ;;  %v544_v46 = vsub.f32 %v468_v9, %v522_v44  ;;  %593 = vadd.xlane.f32.xlu1 %v592_v45  ;;  %v1467_v9 = vld [vmem:[%s1339_s11 + $0x40] sm:$0xff] }
 0x213   : > { %v574_v54 = vmul.f32 1.442695, %v545_v47  ;;  %v1075_v47 = vcombine.low %v1428_v24, %v1477_v12 }
 0x214   : > { %v1441_v48 = vpop.eup %1246  ;;  %v572_v49 = vmul.f32 1.442695, %v544_v46  ;;  %v531_v50 = vpop.xlane.xlu0 %530 }
 0x215   : > { %v547_v51 = vsub.f32 %v1402_v11, %v531_v50  ;;  %v601_v52 = vsel %vm483_vm1, %v1441_v48, 0.0  ;;  %v1446_v53 = vpop.eup %1248  ;;  %v486_v11 = vpop.xlane.xlu1 %485  ;;  %1166 = vmatprep.subr.bf16.mxu0 %v1075_v47  ;;  %v175_v50 = vrot.slane %v1477_v12, 4 }
 0x216   : > { %1252 = vpow2.f32 %v572_v49  ;;  %602 = vadd.xlane.f32.xlu0 %v601_v52  ;;  %v595_v0 = vsel %vm483_vm1, %v1446_v53, 0.0  ;;  %v532_v17 = vsub.f32 %v1383_v57, %v486_v11  ;;  %1167 = vmatpush3.bf16.msra.mxu0 %v1075_v47  ;;  %v174_v49 = vrot.slane %v1428_v24, 4 }
 0x217   : > { %v578_v55 = vmul.f32 1.442695, %v547_v51  ;;  %v1076_v51 = vcombine.low %v1467_v9, %v1472_v10 }
 0x218   : > { %v489_v14 = vpop.xlane.xlu0 %488  ;;  %v548_v22 = vmul.f32 1.442695, %v532_v17  ;;  %v1527_v52 = vcombine.low %v174_v49, %v175_v50 }
 0x219   : > { %1254 = vpow2.f32 %v578_v55  ;;  %v492_v13 = vpop.xlane.xlu1 %491  ;;  %v533_v16 = vsub.f32 %v1387_v59, %v489_v14  ;;  %1168 = vmatprep.subr.bf16.mxu0 %v1076_v51 }
 0x21a   : > { %596 = vadd.xlane.f32.xlu0 %v595_v0  ;;  %1256 = vpow2.f32 %v574_v54  ;;  %v534_v23 = vsub.f32 %v1381_v56, %v492_v13  ;;  %1169 = vmatpush3.bf16.msra.mxu0 %v1076_v51 }
 0x21b   : > { %v550_v18 = vmul.f32 1.442695, %v533_v16  ;;  %1182 = vmatprep.subr.bf16.mxu0 %v1527_v52 }
 0x21c   : > { %v1450_v1 = vpop.eup %1250  ;;  %v495_v19 = vpop.xlane.xlu0 %494  ;;  %v552_v28 = vmul.f32 1.442695, %v534_v23 }
 0x21d   : > { %v622_v2 = vsel %vm483_vm1, %v1450_v1, 0.0  ;;  %v510_v15 = vpop.xlane.xlu1 %509  ;;  %1258 = vpow2.f32 %v550_v18  ;;  %v535_v29 = vsub.f32 %v1385_v58, %v495_v19 }
 0x21e   : > { %623 = vadd.xlane.f32.xlu1 %v622_v2  ;;  %v540_v20 = vsub.f32 %v1391_v61, %v510_v15  ;;  %1260 = vpow2.f32 %v548_v22 }
 0x21f   : > { %v554_v57 = vmul.f32 1.442695, %v535_v29 }
 0x220   : > { %v1454_v3 = vpop.eup %1252  ;;  %v564_v25 = vmul.f32 1.442695, %v540_v20  ;;  %v513_v27 = vpop.xlane.xlu0 %512 }
 0x221   : > { %v616_v4 = vsel %vm483_vm1, %v1454_v3, 0.0  ;;  %v516_v21 = vpop.xlane.xlu1 %515  ;;  %v541_v30 = vsub.f32 %v1395_v63, %v513_v27 }
 0x222   : > { %617 = vadd.xlane.f32.xlu1 %v616_v4  ;;  %v542_v26 = vsub.f32 %v1389_v60, %v516_v21  ;;  %1262 = vpow2.f32 %v564_v25 }
 0x223   : > { %v1458_v5 = vpop.eup %1254  ;;  %1264 = vpow2.f32 %v552_v28  ;;  %v566_v56 = vmul.f32 1.442695, %v541_v30 }
 0x224   : > { %v625_v6 = vsel %vm483_vm1, %v1458_v5, 0.0  ;;  %v1462_v7 = vpop.eup %1256  ;;  %v568_v59 = vmul.f32 1.442695, %v542_v26  ;;  %v519_v61 = vpop.xlane.xlu0 %518 }
 0x225   : > { %626 = vadd.xlane.f32.xlu0 %v625_v6  ;;  %v619_v8 = vsel %vm483_vm1, %v1462_v7, 0.0  ;;  %v543_v32 = vsub.f32 %v1393_v62, %v519_v61  ;;  %v179_v54 = vpop.permute.xlu1 %178 }
 0x226   : > { %1266 = vpow2.f32 %v568_v59  ;;  %v186_v25 = vrot.slane %v179_v54, 4 }
 0x227   : > { %v1488_v31 = vpop.eup %1258  ;;  %1268 = vpow2.f32 %v554_v57  ;;  %v570_v34 = vmul.f32 1.442695, %v543_v32 }
 0x228   : > { %v1491_v60 = vpop.eup %1260  ;;  %v583_v33 = vsel %vm483_vm1, %v1488_v31, 0.0  ;;  %1270 = vpow2.f32 %v566_v56 }
 0x229   : > { %620 = vadd.xlane.f32.xlu0 %v619_v8  ;;  %v580_v63 = vsel %vm483_vm1, %v1491_v60, 0.0  ;;  %1272 = vpow2.f32 %v570_v34 }
 0x22c   : > { %v1495_v58 = vpop.eup %1262 }
 0x22d   : > { %v1499_v35 = vpop.eup %1264  ;;  %v604_v36 = vsel %vm483_vm1, %v1495_v58, 0.0 }
 0x22e   : > { %v586_v38 = vsel %vm483_vm1, %v1499_v35, 0.0 }
 0x230   : > { %v1503_v62 = vpop.eup %1266 }
 0x231   : > { %v1507_v39 = vpop.eup %1268  ;;  %v610_v40 = vsel %vm483_vm1, %v1503_v62, 0.0 }
 0x232   : > { %v589_v42 = vsel %vm483_vm1, %v1507_v39, 0.0  ;;  %v1513_v43 = vpop.eup %1270 }
 0x233   : > { %182 = vrot.lane.b32.xlu1 %v1467_v9, %s1314_s12  ;;  %v607_v44 = vsel %vm483_vm1, %v1513_v43, 0.0  ;;  %v1517_v45 = vpop.eup %1272 }
 0x234   : > { %v613_v46 = vsel %vm483_vm1, %v1517_v45, 0.0 }
 0x237   : > { %184 = vrot.lane.b32.xlu1 %v1472_v10, %s1314_s12 }
 0x23f   : > { %180 = vrot.lane.b32.xlu0 %v1477_v12, %s1314_s12 }
 0x25b   : > { %584 = vadd.xlane.f32.xlu1 %v583_v33 }
 0x25e   : > { %581 = vadd.xlane.f32.xlu0 %v580_v63 }
 0x25f   : > { %605 = vadd.xlane.f32.xlu1 %v604_v36 }
 0x262   : > { %587 = vadd.xlane.f32.xlu0 %v586_v38 }
 0x263   : > { %611 = vadd.xlane.f32.xlu1 %v610_v40 }
 0x266   : > { %590 = vadd.xlane.f32.xlu0 %v589_v42 }
 0x26a   : > { %608 = vadd.xlane.f32.xlu0 %v607_v44 }
 0x26e   : > { %614 = vadd.xlane.f32.xlu0 %v613_v46 }
 0x29b   : > { %v600_v55 = vpop.xlane.xlu1 %599 }
 0x29f   : > { %v594_v0 = vpop.xlane.xlu1 %593 }
 0x2a0   : > { %1274 = vrcp.f32 %v594_v0  ;;  %v177_v0 = vrot.slane %v1472_v10, 4 }
 0x2a3   : > { %v603_v2 = vpop.xlane.xlu0 %602 }
 0x2a7   : > { %v597_v4 = vpop.xlane.xlu0 %596 }
 0x2a8   : > { %1276 = vrcp.f32 %v597_v4 }
 0x2a9   : > { %1278 = vrcp.f32 %v603_v2 }
 0x2aa   : > { %v1275_v24 = vpop.eup %1274  ;;  %1280 = vrcp.f32 %v600_v55  ;;  %v176_v55 = vrot.slane %v1467_v9, 4 }
 0x2ab   : > { %v624_v6 = vpop.xlane.xlu1 %623  ;;  %v637_v13 = vmul.f32 %v1275_v24, %v1436_v41 }
 0x2af   : > { %v618_v8 = vpop.xlane.xlu1 %617 }
 0x2b0   : > { %1282 = vrcp.f32 %v618_v8 }
 0x2b2   : > { %v1277_v11 = vpop.eup %1276  ;;  %v627_v12 = vpop.xlane.xlu0 %626 }
 0x2b3   : > { %v639_v14 = vmul.f32 %v1277_v11, %v1446_v53  ;;  %v183_v15 = vpop.permute.xlu1 %182  ;;  %v1279_v21 = vpop.eup %1278 }
 0x2b4   : > { %v1281_v41 = vpop.eup %1280  ;;  %v643_v26 = vmul.f32 %v1279_v21, %v1441_v48  ;;  %v188_v29 = vrot.slane %v183_v15, 4 }
 0x2b5   : > { %v662_v16 = vpack.c.bf16 %v639_v14, %v637_v13  ;;  %v641_v28 = vmul.f32 %v1281_v41, %v1432_v37 }
 0x2b6   : > { %v621_v17 = vpop.xlane.xlu0 %620 }
 0x2b7   : > { %1284 = vrcp.f32 %v621_v17  ;;  %1178 = vmatprep.mubr.msk.bf16.mxu1 %vm483_vm1, %v662_v16  ;;  %v185_v18 = vpop.permute.xlu1 %184  ;;  %v663_v56 = vpack.c.bf16 %v643_v26, %v641_v28 }
 0x2b8   : > { %1286 = vrcp.f32 %v627_v12  ;;  %v1080_v22 = vcombine.low %v183_v15, %v185_v18  ;;  %v189_v59 = vrot.slane %v185_v18, 4 }
 0x2b9   : > { %1288 = vrcp.f32 %v624_v6 }
 0x2ba   : > { %v181_v19 = vpop.permute.xlu0 %180  ;;  %v1283_v53 = vpop.eup %1282  ;;  %v1088_v34 = vcombine.low %v188_v29, %v189_v59 }
 0x2bb   : > { %v1079_v20 = vcombine.low %v179_v54, %v181_v19  ;;  %v187_v23 = vrot.slane %v181_v19, 4  ;;  %v653_v30 = vmul.f32 %v1283_v53, %v1454_v3 }
 0x2bd   : > { %1174 = vmatprep.subr.bf16.mxu1 %v1079_v20  ;;  %v1087_v57 = vcombine.low %v186_v25, %v187_v23 }
 0x2be   : > { %1175 = vmatpush3.bf16.msra.mxu1 %v1079_v20 }
 0x2bf   : > { %1176 = vmatprep.subr.bf16.mxu1 %v1080_v22 }
 0x2c1   : > { %v1285_v27 = vpop.eup %1284 }
 0x2c2   : > { %1177 = vmatpush3.bf16.msra.mxu1 %v1080_v22  ;;  %v655_v61 = vmul.f32 %v1285_v27, %v1462_v7  ;;  %v1287_v32 = vpop.eup %1286 }
 0x2c3   : > { %1190 = vmatprep.subr.bf16.mxu1 %v1087_v57  ;;  %v1289_v48 = vpop.eup %1288  ;;  %v659_v37 = vmul.f32 %v1287_v32, %v1458_v5 }
 0x2c4   : > { %v666_v33 = vpack.c.bf16 %v655_v61, %v653_v30  ;;  %v657_v63 = vmul.f32 %v1289_v48, %v1450_v1 }
 0x2c5   : > { %1179 = vmatmul.mubr.msk.bf16.vlgmr.msra.gmra.mrb[8].mxu1 %vm483_vm1, %v663_v56 }
 0x2c6   : > { %1191 = vmatpush3.bf16.msra.mxu1 %v1087_v57  ;;  %1194 = vmatprep.mubr.msk.bf16.mxu1 %vm483_vm1, %v666_v33  ;;  %v667_v3 = vpack.c.bf16 %v659_v37, %v657_v63 }
 0x2c7   : > { %1192 = vmatprep.subr.bf16.mxu1 %v1088_v34 }
 0x2ca   : > { %1193 = vmatpush3.bf16.msra.mxu1 %v1088_v34 }
 0x2cd   : > { %1195 = vmatmul.mubr.msk.bf16.vlgmr.msra.gmra.mrb[12].mxu1 %vm483_vm1, %v667_v3 }
 0x2e8   : > { %v585_v7 = vpop.xlane.xlu1 %584 }
 0x2e9   : > { %1290 = vrcp.f32 %v585_v7 }
 0x2eb   : > { %v582_v36 = vpop.xlane.xlu0 %581 }
 0x2ec   : > { %1292 = vrcp.f32 %v582_v36  ;;  %v606_v40 = vpop.xlane.xlu1 %605 }
 0x2ef   : > { %v588_v38 = vpop.xlane.xlu0 %587 }
 0x2f0   : > { %1294 = vrcp.f32 %v588_v38  ;;  %v612_v5 = vpop.xlane.xlu1 %611 }
 0x2f3   : > { %v591_v42 = vpop.xlane.xlu0 %590  ;;  %v1291_v44 = vpop.eup %1290 }
 0x2f4   : > { %1296 = vrcp.f32 %v591_v42  ;;  %v631_v49 = vmul.f32 %v1291_v44, %v1488_v31  ;;  %v1084_v31 = vcombine.low %v176_v55, %v177_v0 }
 0x2f5   : > { %1298 = vrcp.f32 %v606_v40 }
 0x2f6   : > { %v1293_v46 = vpop.eup %1292 }
 0x2f7   : > { %v609_v47 = vpop.xlane.xlu0 %608  ;;  %v629_v1 = vmul.f32 %v1293_v46, %v1491_v60 }
 0x2f8   : > { %1300 = vrcp.f32 %v609_v47 }
 0x2f9   : > { %v660_v50 = vpack.c.bf16 %v631_v49, %v629_v1  ;;  %1302 = vrcp.f32 %v612_v5 }
 0x2fa   : > { %v1295_v54 = vpop.eup %1294 }
 0x2fb   : > { %1170 = vmatprep.mubr.msk.bf16.mxu0 %vm483_vm1, %v660_v50  ;;  %v615_v51 = vpop.xlane.xlu0 %614  ;;  %v633_v4 = vmul.f32 %v1295_v54, %v1499_v35 }
 0x2fc   : > { %1304 = vrcp.f32 %v615_v51 }
 0x2fe   : > { %v1297_v2 = vpop.eup %1296 }
 0x2ff   : > { %v635_v6 = vmul.f32 %v1297_v2, %v1507_v39  ;;  %v1299_v60 = vpop.eup %1298 }
 0x300   : > { %v645_v11 = vmul.f32 %v1299_v60, %v1495_v58 }
 0x301   : > { %v661_v24 = vpack.c.bf16 %v635_v6, %v633_v4 }
 0x302   : > { %v1301_v8 = vpop.eup %1300 }
 0x303   : > { %1171 = vmatmul.mubr.msk.bf16.vlgmr.msra.gmra.mrb[8].mxu0 %vm483_vm1, %v661_v24  ;;  %v647_v12 = vmul.f32 %v1301_v8, %v1513_v43  ;;  %v1303_v13 = vpop.eup %1302 }
 0x304   : > { %1183 = vmatpush3.bf16.msra.mxu0 %v1527_v52  ;;  %v649_v35 = vmul.f32 %v1303_v13, %v1503_v62 }
 0x305   : > { %1184 = vmatprep.subr.bf16.mxu0 %v1084_v31  ;;  %v664_v9 = vpack.c.bf16 %v647_v12, %v645_v11 }
 0x306   : > { %v1305_v10 = vpop.eup %1304 }
 0x307   : > { %v651_v39 = vmul.f32 %v1305_v10, %v1517_v45  ;;  %1186 = vmatprep.mubr.msk.bf16.mxu0 %vm483_vm1, %v664_v9 }
 0x308   : > { %1185 = vmatpush3.bf16.msra.mxu0 %v1084_v31 }
 0x309   : > { %v665_v14 = vpack.c.bf16 %v651_v39, %v649_v35 }
 0x30b   : > { %1187 = vmatmul.mubr.msk.bf16.vlgmr.msra.gmra.mrb[12].mxu0 %vm483_vm1, %v665_v14 }
 0x398   : > { %v1180_v15 = vpop.f32.mrb[8].mxu1 }
 0x399   : > { %v779_v58 = vpop.f32.mrb[9].mxu1 }
 0x39a   : > { %v1181_v16 = vpop.f32.mrb[10].mxu1 }
 0x39b   : > { %v1221_v43 = vpack.i.bf16 %v1181_v16, %v1180_v15  ;;  %v782_v17 = vpop.f32.mrb[11].mxu1 }
 0x39c   : > { %v1216_v18 = vpack.i.bf16 %v782_v17, %v779_v58 }
 0x39d   : > { %1222 = vrot.lane.b32.xlu0 %v1221_v43, %s1314_s12 }
 0x39e   : > { %1217 = vrot.lane.b32.xlu1 %v1216_v18, %s1314_s12 }
 0x3a0   : > { %v1196_v52 = vpop.f32.mrb[12].mxu1 }
 0x3a1   : > { %v905_v62 = vpop.f32.mrb[13].mxu1 }
 0x3a2   : > { %v1197_v19 = vpop.f32.mrb[14].mxu1 }
 0x3a3   : > { %v1231_v45 = vpack.i.bf16 %v1197_v19, %v1196_v52  ;;  %v908_v20 = vpop.f32.mrb[15].mxu1 }
 0x3a4   : > { %v1226_v21 = vpack.i.bf16 %v908_v20, %v905_v62 }
 0x3a6   : > { %1227 = vrot.lane.b32.xlu1 %v1226_v21, %s1314_s12 }
 0x3aa   : > { %1232 = vrot.lane.b32.xlu1 %v1231_v45, %s1314_s12 }
 0x3d6   : > { %v1172_v22 = vpop.f32.mrb[8].mxu0 }
 0x3d7   : > { %v716_v23 = vpop.f32.mrb[9].mxu0 }
 0x3d8   : > { %v1173_v41 = vpop.f32.mrb[10].mxu0 }
 0x3d9   : > { %v719_v53 = vpop.f32.mrb[11].mxu0 }
 0x3de   : > { %v1188_v25 = vpop.f32.mrb[12].mxu0 }
 0x3df   : > { %v842_v26 = vpop.f32.mrb[13].mxu0 }
 0x3e0   : > { %v1189_v27 = vpop.f32.mrb[14].mxu0 }
 0x3e1   : > { %v845_v28 = vpop.f32.mrb[15].mxu0 }
 0x40f   : > { %v1223_v59 = vpop.permute.xlu0 %1222 }
 0x410   : > { %v1218_v29 = vpop.permute.xlu1 %1217  ;;  %v1225_v33 = vunpack.i.h.bf16 %v1223_v59  ;;  %v1224_v34 = vunpack.i.l.bf16 %v1223_v59 }
 0x411   : > { %v1220_v57 = vunpack.i.h.bf16 %v1218_v29  ;;  %v1219_v30 = vunpack.i.l.bf16 %v1218_v29 }
 0x412   : > { %v955_v44 = vsel %vm202_vm0, %v1173_v41, %v1225_v33  ;;  %v954_v46 = vsel %vm202_vm0, %v1172_v22, %v1224_v34 }
 0x413   : > { %v952_v48 = vsel %vm202_vm0, %v716_v23, %v1219_v30  ;;  %v953_v37 = vsel %vm202_vm0, %v719_v53, %v1220_v57 }
 0x418   : > { %v1228_v61 = vpop.permute.xlu1 %1227 }
 0x419   : > { %v1230_v56 = vunpack.i.h.bf16 %v1228_v61  ;;  %v1229_v32 = vunpack.i.l.bf16 %v1228_v61 }
 0x41b   : > { %v956_v63 = vsel %vm202_vm0, %v842_v26, %v1229_v32  ;;  %v957_v3 = vsel %vm202_vm0, %v845_v28, %v1230_v56 }
 0x41c   : > { %v1098_v7 = vpack.c.bf16 %v956_v63, %v952_v48  ;;  %v1099_v36 = vpack.c.bf16 %v957_v3, %v953_v37  ;;  %v1233_v38 = vpop.permute.xlu1 %1232 }
 0x41d   : > { %v1235_v40 = vunpack.i.h.bf16 %v1233_v38  ;;  %v1234_v42 = vunpack.i.l.bf16 %v1233_v38 }
 0x41e   : > { %984 = vst [vmem:[%s116_s16] sm:$0xff] %v1098_v7  ;;  %985 = vst [vmem:[%s116_s16 + $0x8] sm:$0xff] %v1099_v36 }
 0x41f   : > { %v958_v5 = vsel %vm202_vm0, %v1188_v25, %v1234_v42  ;;  %v959_v47 = vsel %vm202_vm0, %v1189_v27, %v1235_v40 }
 0x420   : > { %v1100_v1 = vpack.c.bf16 %v958_v5, %v954_v46  ;;  %v1101_v49 = vpack.c.bf16 %v959_v47, %v955_v44 }
 0x422   : > { %986 = vst [vmem:[%s116_s16 + $0x10] sm:$0xff] %v1100_v1  ;;  %987 = vst [vmem:[%s116_s16 + $0x18] sm:$0xff] %v1101_v49 }
 0x423 PF: > { %s11_s6 = sadd.s32 1, %s1312_s6  }
 0x424   : > { %p8_p4 = scmp.ge.s32.totalorder %s11_s6, 4  }
 0x426   :  { %10 = sbr.rel (!%p8_p4) target bundleno = 1 (0x1), region = 54 }

// kernel: transformer_forward.9
= control target key start
LH: loop header
LB: loop body
LE: loop exit
PB: predicated region body
PF: predicated region fallthrough
CT: control target
= control target key end

     0   :  { %s3701_s0 = inlined_call_operand.vmem [shape: bf16[64,256], index: 0, kind: input, shape index: {}]   ;;  %s3702_s1 = inlined_call_operand.vmem [shape: bf16[256,256], index: 1, kind: input, shape index: {}]   ;;  %s3703_s2 = inlined_call_operand.vmem [shape: f32[1,256], index: 2, kind: input, shape index: {}]   ;;  %s3704_s3 = inlined_call_operand.vmem [shape: f32[1,256], index: 3, kind: input, shape index: {}]   ;;  %s3705_s4 = inlined_call_operand.vmem [shape: f32[64,256], index: 4, kind: input, shape index: {}]   ;;  %s3706_s5 = inlined_call_operand.vmem [shape: f32[1,256], index: 5, kind: input, shape index: {}]   ;;  %s3707_s6 = inlined_call_operand.vmem [shape: f32[1,256], index: 6, kind: input, shape index: {}]   ;;  %s3708_s7 = inlined_call_operand.vmem [shape: bf16[256,1024], index: 7, kind: input, shape index: {}]   ;;  %s3709_s8 = inlined_call_operand.hbm [shape: bf16[256,1024], index: 8, kind: input, shape index: {}]   ;;  %s3710_s9 = inlined_call_operand.vmem [shape: f32[1,1024], index: 9, kind: input, shape index: {}]   ;;  %s3711_s10 = inlined_call_operand.vmem [shape: f32[1,1024], index: 10, kind: input, shape index: {}]   ;;  %s3712_s11 = inlined_call_operand.vmem [shape: f32[64,256], index: 11, kind: output, shape index: {0}]   ;;  %s3713_s12 = inlined_call_operand.vmem [shape: bf16[64,1024], index: 12, kind: output, shape index: {1}]  }
   0x1   :  { %3716 = sst [smem:[#allocation11_spill]] %s3708_s7 }
   0x2   :  { %3717 = sst [smem:[#allocation12_spill]] %s3709_s8 }
   0x3   :  { %18 = vsyncpa [#allocation5], 0 }
   0x4   :  { %20 = vsyncpa [#allocation5 + $0x1], 0  ;;  %s2881_s21 = smov 0   ;;  %s2883_s22 = smov 0  }
   0x5   :  { %s2885_s23 = smov 0   ;;  %s2887_s24 = smov 0  }
   0x6   :  { %s2889_s25 = smov 0   ;;  %s2891_s26 = smov 0  }
   0x7 LB: > { %3718 = sst [smem:[#allocation8_spill]] %s2806_s25  ;;  %s2294_s27 = sadd.s32 4294967295, %s2810_s26   ;;  %s2810_s26 = sphi %s2891_s26, %s26_s26   ;;  %s2806_s25 = sphi %s2889_s25, %s3730_s25   ;;  %s2802_s24 = sphi %s2887_s24, %s3734_s24   ;;  %s2798_s23 = sphi %s2885_s23, %s3733_s23   ;;  %s2794_s22 = sphi %s2883_s22, %s3732_s22   ;;  %s2790_s21 = sphi %s2881_s21, %s3731_s21  }
   0x8   : > { %s35_s28 = sadd.s32 1, %s2806_s25  ;;  %s202_s29 = sadd.s32 1, %s2798_s23 }
   0x9   : > { %p36_p0 = scmp.ge.s32.totalorder %s35_s28, 4  ;;  %p209_p1 = scmp.ne.s32.totalorder %s2798_s23, %s2794_s22 }
   0xa   : > { %p210_p2 = scmp.eq.s32.totalorder %s2810_s26, 0  ;;  %p241_p4 = scmp.ne.s32.totalorder %s2794_s22, %s2790_s21 }
   0xb   : > { %s3736_s28 = smov (%p36_p0, %s35_s28), 0  ;;  %p242_p5 = scmp.eq.s32.totalorder %s2294_s27, 0 }
   0xc   : > { %3719 = sst [smem:[#allocation9_spill]] %s3736_s28  ;;  %p2917_p3 = por %p210_p2, %p209_p1 }
   0xd   : > { %s199_s13 = ssub.s32 %s2806_s25, %s3736_s28  ;;  %p345_p7 = scmp.eq.s32.totalorder %s2294_s27, 3 }
   0xe   : > { %p200_p6 = scmp.eq.s32.totalorder %s199_s13, 0  ;;  %p2924_p8 = por %p242_p5, %p241_p4 }
   0xf   : > { %p2931_p9 = por %p345_p7, %p209_p1  ;;  %p2299_p10 = scmp.ge.s32.totalorder %s2810_s26, 4 }
  0x10   : > { %s2929_s15 = scalar_select %p200_p6, %s2798_s23, %s202_s29  }
  0x11   : > { %s3723_s16 = scalar_select %p2931_p9, 1, 0 }
  0x12   : > { %3722 = sst [smem:[#allocation10_spill]] %s2929_s15  ;;  %402 = sbr.rel (%p2299_p10) target bundleno = 98 (0x62), region = 44 }
  0x19   : > { %405 = sbr.rel (!%p2917_p3) target bundleno = 67 (0x43), region = 48  ;;  %s407_s17 = sand.u32 (%p2917_p3), 1, %s2798_s23  }
  0x1a   : > { %s2432_s18 = sshll.u32 (%p2917_p3), %s2806_s25, 3  ;;  %s2300_s19 = sshll.u32 (%p2917_p3), %s407_s17, 8 }
  0x1b   : > { %s3724_s7 = sld [smem:[#allocation11_spill]] (%p2917_p3)  ;;  %s2948_s29 = scalar_lea.vmem (%p2917_p3), [#allocation3], %s2300_s19 }
  0x21   : > { %s2943_s27 = scalar_lea.vmem %s3724_s7, %s2432_s18 }
  0x22   : > { %v502_v0 = vld [vmem:[%s2943_s27] sm:$0xff] }
  0x23   : > { %v504_v1 = vld [vmem:[%s2943_s27 + $0x20] sm:$0xff]  ;;  %503 = vst [vmem:[%s2948_s29] sm:$0xff] %v502_v0 }
  0x24   : > { %v506_v2 = vld [vmem:[%s2943_s27 + $0x40] sm:$0xff]  ;;  %505 = vst [vmem:[%s2948_s29 + $0x8] sm:$0xff] %v504_v1 }
  0x25   : > { %507 = vst [vmem:[%s2948_s29 + $0x10] sm:$0xff] %v506_v2  ;;  %v508_v3 = vld [vmem:[%s2943_s27 + $0x60] sm:$0xff] }
  0x26   : > { %v510_v4 = vld [vmem:[%s2943_s27 + $0x80] sm:$0xff]  ;;  %509 = vst [vmem:[%s2948_s29 + $0x18] sm:$0xff] %v508_v3 }
  0x27   : > { %v512_v5 = vld [vmem:[%s2943_s27 + $0xa0] sm:$0xff]  ;;  %511 = vst [vmem:[%s2948_s29 + $0x20] sm:$0xff] %v510_v4 }
  0x28   : > { %513 = vst [vmem:[%s2948_s29 + $0x28] sm:$0xff] %v512_v5  ;;  %v514_v6 = vld [vmem:[%s2943_s27 + $0xc0] sm:$0xff] }
  0x29   : > { %v516_v7 = vld [vmem:[%s2943_s27 + $0xe0] sm:$0xff]  ;;  %515 = vst [vmem:[%s2948_s29 + $0x30] sm:$0xff] %v514_v6 }
  0x2a   : > { %v518_v8 = vld [vmem:[%s2943_s27 + $0x100] sm:$0xff]  ;;  %517 = vst [vmem:[%s2948_s29 + $0x38] sm:$0xff] %v516_v7 }
  0x2b   : > { %519 = vst [vmem:[%s2948_s29 + $0x40] sm:$0xff] %v518_v8  ;;  %v520_v9 = vld [vmem:[%s2943_s27 + $0x120] sm:$0xff] }
  0x2c   : > { %v522_v10 = vld [vmem:[%s2943_s27 + $0x140] sm:$0xff]  ;;  %521 = vst [vmem:[%s2948_s29 + $0x48] sm:$0xff] %v520_v9 }
  0x2d   : > { %v524_v11 = vld [vmem:[%s2943_s27 + $0x160] sm:$0xff]  ;;  %523 = vst [vmem:[%s2948_s29 + $0x50] sm:$0xff] %v522_v10 }
  0x2e   : > { %525 = vst [vmem:[%s2948_s29 + $0x58] sm:$0xff] %v524_v11  ;;  %v526_v12 = vld [vmem:[%s2943_s27 + $0x180] sm:$0xff] }
  0x2f   : > { %v528_v13 = vld [vmem:[%s2943_s27 + $0x1a0] sm:$0xff]  ;;  %527 = vst [vmem:[%s2948_s29 + $0x60] sm:$0xff] %v526_v12 }
  0x30   : > { %v530_v14 = vld [vmem:[%s2943_s27 + $0x1c0] sm:$0xff]  ;;  %529 = vst [vmem:[%s2948_s29 + $0x68] sm:$0xff] %v528_v13 }
  0x31   : > { %531 = vst [vmem:[%s2948_s29 + $0x70] sm:$0xff] %v530_v14  ;;  %v532_v15 = vld [vmem:[%s2943_s27 + $0x1e0] sm:$0xff] }
  0x32   : > { %v534_v16 = vld [vmem:[%s2943_s27 + $0x200] sm:$0xff]  ;;  %533 = vst [vmem:[%s2948_s29 + $0x78] sm:$0xff] %v532_v15 }
  0x33   : > { %v536_v17 = vld [vmem:[%s2943_s27 + $0x220] sm:$0xff]  ;;  %535 = vst [vmem:[%s2948_s29 + $0x80] sm:$0xff] %v534_v16 }
  0x34   : > { %537 = vst [vmem:[%s2948_s29 + $0x88] sm:$0xff] %v536_v17  ;;  %v538_v18 = vld [vmem:[%s2943_s27 + $0x240] sm:$0xff] }
  0x35   : > { %v540_v19 = vld [vmem:[%s2943_s27 + $0x260] sm:$0xff]  ;;  %539 = vst [vmem:[%s2948_s29 + $0x90] sm:$0xff] %v538_v18 }
  0x36   : > { %v542_v20 = vld [vmem:[%s2943_s27 + $0x280] sm:$0xff]  ;;  %541 = vst [vmem:[%s2948_s29 + $0x98] sm:$0xff] %v540_v19 }
  0x37   : > { %543 = vst [vmem:[%s2948_s29 + $0xa0] sm:$0xff] %v542_v20  ;;  %v544_v21 = vld [vmem:[%s2943_s27 + $0x2a0] sm:$0xff] }
  0x38   : > { %v546_v22 = vld [vmem:[%s2943_s27 + $0x2c0] sm:$0xff]  ;;  %545 = vst [vmem:[%s2948_s29 + $0xa8] sm:$0xff] %v544_v21 }
  0x39   : > { %v548_v23 = vld [vmem:[%s2943_s27 + $0x2e0] sm:$0xff]  ;;  %547 = vst [vmem:[%s2948_s29 + $0xb0] sm:$0xff] %v546_v22 }
  0x3a   : > { %549 = vst [vmem:[%s2948_s29 + $0xb8] sm:$0xff] %v548_v23  ;;  %v550_v24 = vld [vmem:[%s2943_s27 + $0x300] sm:$0xff] }
  0x3b   : > { %v552_v25 = vld [vmem:[%s2943_s27 + $0x320] sm:$0xff]  ;;  %551 = vst [vmem:[%s2948_s29 + $0xc0] sm:$0xff] %v550_v24 }
  0x3c   : > { %v554_v26 = vld [vmem:[%s2943_s27 + $0x340] sm:$0xff]  ;;  %553 = vst [vmem:[%s2948_s29 + $0xc8] sm:$0xff] %v552_v25 }
  0x3d   : > { %555 = vst [vmem:[%s2948_s29 + $0xd0] sm:$0xff] %v554_v26  ;;  %v556_v27 = vld [vmem:[%s2943_s27 + $0x360] sm:$0xff] }
  0x3e   : > { %v558_v28 = vld [vmem:[%s2943_s27 + $0x380] sm:$0xff]  ;;  %557 = vst [vmem:[%s2948_s29 + $0xd8] sm:$0xff] %v556_v27 }
  0x3f   : > { %v560_v29 = vld [vmem:[%s2943_s27 + $0x3a0] sm:$0xff]  ;;  %559 = vst [vmem:[%s2948_s29 + $0xe0] sm:$0xff] %v558_v28 }
  0x40   : > { %561 = vst [vmem:[%s2948_s29 + $0xe8] sm:$0xff] %v560_v29  ;;  %v562_v30 = vld [vmem:[%s2943_s27 + $0x3c0] sm:$0xff] }
  0x41   : > { %v564_v31 = vld [vmem:[%s2943_s27 + $0x3e0] sm:$0xff]  ;;  %563 = vst [vmem:[%s2948_s29 + $0xf0] sm:$0xff] %v562_v30 }
  0x42   : > { %565 = vst [vmem:[%s2948_s29 + $0xf8] sm:$0xff] %v564_v31 }
  0x43 PF: > { %s572_s13 = sand.u32 1, %s2798_s23   ;;  %s2433_s17 = sshll.u32 %s2806_s25, 7 }
  0x44   : > { %s2303_s18 = sshll.u32 %s572_s13, 8  ;;  %s3725_s8 = sld [smem:[#allocation12_spill]] }
  0x45   : > { %s576_s7 = scalar_lea.vmem [#allocation4], %s2303_s18  ;;  %s3020_s29 = scalar_lea.sflag [#allocation5], %s572_s13 }
  0x46   : > { %s583_s27 = sshll.u32 %s576_s7, 4  ;;  %s3018_s27 = int_to_ptr.vmem [resolvable:$true] %s583_s27 }
  0x4a   : > { %s3016_s21 = scalar_lea.hbm %s3725_s8, %s2433_s17  ;;  %s2736_s17 = scalar_lea.hbm %s3725_s8, 16384 }
  0x4b   : > { %s2732_s28 = scalar_lea.hbm %s3016_s21, 4096  ;;  %p2737_p0 = scmp.lt.u32.totalorder %s3016_s21, %s3725_s8 }
  0x4c   : > { %p2733_p11 = scmp.ne.s32.totalorder %s3016_s21, %s2732_s28  ;;  %p2738_p1 = scmp.lt.u32.totalorder %s2736_s17, %s2732_s28 }
  0x4d   : > { %p2740_p4 = scmp.lt.u32.totalorder %s2732_s28, %s3016_s21 }
  0x4e   : > { %p2734_p12 = pnand %p2733_p11, %p2917_p3  ;;  %p2739_p2 = por %p2738_p1, %p2737_p0 }
  0x50   : > { %p2735_p13 = pneg %p2734_p12  ;;  %p2741_p5 = por %p2740_p4, %p2739_p2 }
  0x52   : > { %p2742_p6 = pnand %p2741_p5, %p2735_p13 }
  0x54   : > { %2745 = shalt.err (!%p2742_p6)
}
  0x55   : > { %s2746_s7 = scalar_lea.vmem %s3018_s27, 4096  ;;  %s2812_s25 = smov [#allocation4]  }
  0x56   : > { %p2747_p7 = scmp.ne.s32.totalorder %s3018_s27, %s2746_s7  ;;  %s2750_s15 = sshll.u32 %s2812_s25, 4  ;;  %s2751_s15 = int_to_ptr.vmem [resolvable:$false] %s2750_s15 }
  0x57   : > { %s2752_s13 = scalar_lea.vmem %s2751_s15, 8192  ;;  %p2753_p12 = scmp.lt.s32.totalorder %s3018_s27, %s2751_s15 }
  0x58   : > { %p2748_p10 = pnand %p2747_p7, %p2917_p3  ;;  %p2754_p9 = scmp.lt.s32.totalorder %s2752_s13, %s2746_s7 }
  0x5a   : > { %p2749_p11 = pneg %p2748_p10  ;;  %p2755_p0 = por %p2754_p9, %p2753_p12 }
  0x5c   : > { %p2756_p1 = pnand %p2755_p0, %p2749_p11 }
  0x5e   : > { %2759 = shalt.err (!%p2756_p1)
}
  0x5f   : > { %s2813_s28 = smov 512   ;;  %s2814_s18 = smov 128  }
  0x60   : > { %s2815_s17 = smov 8  }
  0x61   : > { %2475 = dma.hbm_to_vmem [thread:$0]  (%p2917_p3), %s3016_s21, 4096, %s3018_s27, %s3020_s29, %s2813_s28, %s2814_s18, %s2815_s17  }
  0x62 PF: > { %p2306_p13 = scmp.ge.s32.totalorder %s2810_s26, 1  ;;  %p607_p2 = scmp.lt.s32.totalorder %s2810_s26, 5 }
  0x64   : > { %p608_p4 = pnand %p2306_p13, %p607_p2 }
  0x65   : > { %s614_s19 = sand.u32 (!%p608_p4), 1, %s2794_s22  }
  0x66   : > { %611 = sbr.rel (%p608_p4) target bundleno = 1072 (0x430), region = 98  ;;  %s2307_s20 = sshll.u32 (!%p608_p4), %s614_s19, 8 }
  0x67   : > { %s3047_s7 = scalar_lea.vmem (!%p608_p4), [#allocation3], %s2307_s20  ;;  %s621_s25 = scalar_lea.sflag (!%p608_p4), [#allocation5], %s614_s19 }
  0x68   : > { %s3049_s15 = scalar_lea.vmem (!%p608_p4), [#allocation4], %s2307_s20 }
  0x6d   : > { %2785 = dma.done.wait (%p2924_p8), %s621_s25, 4096  }
  0x6e   : > { %2787 = vsyncadd (%p2924_p8), %s621_s25, 4294963200  ;;  %s2309_s30 = sshll.u32 %s614_s19, 6  ;;  %s2310_s21 = sshll.u32 %s2802_s24, 1 }
  0x6f   : > { %p711_p3 = scmp.lt.s32.totalorder %s2310_s21, 7  ;;  %s3066_s20 = scalar_lea.vmem [#allocation6], %s2309_s30 }
  0x70   : > { %p2312_p8 = scmp.ne.s32.totalorder %s2802_s24, 0 }
  0x71   : > { %s3738_s21 = smov (!%p711_p3, %s2310_s21), 7  ;;  %v2528_v32 = vld [vmem:[%s3702_s1 + $0x4] ss:$8 sps:$4 sm:$0xff] (!%p2312_p8)   ;;  %v2530_v33 = vld [vmem:[%s3702_s1] ss:$8 sps:$4 sm:$0xff] (!%p2312_p8)   ;;  %v791_v8 = vlaneseq (!%p2312_p8) }
  0x72   : > { %s718_s17 = scalar_lea.vmem %s3711_s10, %s3738_s21  ;;  %732 = sbr.rel (%p2312_p8) target bundleno = 736 (0x2e0), region = 110  ;;  %1001 = vmatprep.subr.bf16.mxu0 (!%p2312_p8), %v2528_v32  ;;  %2443 = vmatprep.subr.bf16.mxu1 (!%p2312_p8), %v2528_v32  ;;  %v2531_v34 = vld [vmem:[%s3702_s1 + $0x14] ss:$8 sps:$4 sm:$0xff] (!%p2312_p8)   ;;  %v2533_v35 = vld [vmem:[%s3702_s1 + $0x10] ss:$8 sps:$4 sm:$0xff] (!%p2312_p8)   ;;  %v781_v24 = vld [vmem:[%s3705_s4 + $0x40] sm:$0xff] (!%p2312_p8) }
  0x73   : > { %1002 = vmatpush1.bf16.msra.mxu0 (!%p2312_p8), %v2530_v33  ;;  %2459 = vmatpush1.bf16.msra.mxu1 (!%p2312_p8), %v2530_v33  ;;  %v2534_v36 = vld [vmem:[%s3702_s1 + $0x24] ss:$8 sps:$4 sm:$0xff] (!%p2312_p8)   ;;  %v2536_v37 = vld [vmem:[%s3702_s1 + $0x20] ss:$8 sps:$4 sm:$0xff] (!%p2312_p8)   ;;  %v2537_v38 = vld [vmem:[%s3702_s1 + $0x34] ss:$8 sps:$4 sm:$0xff] (!%p2312_p8)  }
  0x74   : > { %1003 = vmatprep.subr.bf16.mxu0 (!%p2312_p8), %v2531_v34  ;;  %2444 = vmatprep.subr.bf16.mxu1 (!%p2312_p8), %v2531_v34  ;;  %v2539_v39 = vld [vmem:[%s3702_s1 + $0x30] ss:$8 sps:$4 sm:$0xff] (!%p2312_p8)   ;;  %v2540_v40 = vld [vmem:[%s3702_s1 + $0x44] ss:$8 sps:$4 sm:$0xff] (!%p2312_p8)   ;;  %v2542_v41 = vld [vmem:[%s3702_s1 + $0x40] ss:$8 sps:$4 sm:$0xff] (!%p2312_p8)  }
  0x75   : > { %v2543_v42 = vld [vmem:[%s3702_s1 + $0x54] ss:$8 sps:$4 sm:$0xff] (!%p2312_p8)   ;;  %v2545_v43 = vld [vmem:[%s3702_s1 + $0x50] ss:$8 sps:$4 sm:$0xff] (!%p2312_p8)   ;;  %v2546_v44 = vld [vmem:[%s3702_s1 + $0x64] ss:$8 sps:$4 sm:$0xff] (!%p2312_p8)  }
  0x76   : > { %v2578_v45 = vld [vmem:[%s3701_s0 + $0x4] ss:$8 sps:$4 sm:$0xff] (!%p2312_p8)   ;;  %v2548_v46 = vld [vmem:[%s3702_s1 + $0x60] ss:$8 sps:$4 sm:$0xff] (!%p2312_p8)   ;;  %v2549_v48 = vld [vmem:[%s3702_s1 + $0x74] ss:$8 sps:$4 sm:$0xff] (!%p2312_p8)  }
  0x77   : > { %1004 = vmatpush1.bf16.msra.mxu0 (!%p2312_p8), %v2533_v35  ;;  %2460 = vmatpush1.bf16.msra.mxu1 (!%p2312_p8), %v2533_v35  ;;  %v2581_v47 = vld [vmem:[%s3701_s0 + $0x24] ss:$8 sps:$4 sm:$0xff] (!%p2312_p8)   ;;  %v2551_v49 = vld [vmem:[%s3702_s1 + $0x70] ss:$8 sps:$4 sm:$0xff] (!%p2312_p8)   ;;  %v2554_v51 = vld [vmem:[%s3702_s1 + $0x80] ss:$8 sps:$4 sm:$0xff] (!%p2312_p8)  }
  0x78   : > { %1005 = vmatprep.subr.bf16.mxu0 (!%p2312_p8), %v2534_v36  ;;  %2445 = vmatprep.subr.bf16.mxu1 (!%p2312_p8), %v2534_v36  ;;  %v2552_v50 = vld [vmem:[%s3702_s1 + $0x84] ss:$8 sps:$4 sm:$0xff] (!%p2312_p8)   ;;  %v2555_v52 = vld [vmem:[%s3702_s1 + $0x94] ss:$8 sps:$4 sm:$0xff] (!%p2312_p8)   ;;  %v2557_v53 = vld [vmem:[%s3702_s1 + $0x90] ss:$8 sps:$4 sm:$0xff] (!%p2312_p8)  }
  0x79   : > { %1033 = vmatprep.mubr.bf16.mxu0 %v2578_v45  ;;  %1053 = vmatprep.mubr.bf16.mxu1 %v2581_v47  ;;  %v2558_v54 = vld [vmem:[%s3702_s1 + $0xa4] ss:$8 sps:$4 sm:$0xff]   ;;  %v2560_v55 = vld [vmem:[%s3702_s1 + $0xa0] ss:$8 sps:$4 sm:$0xff]   ;;  %v2561_v56 = vld [vmem:[%s3702_s1 + $0xb4] ss:$8 sps:$4 sm:$0xff]  }
  0x7a   : > { %v2563_v57 = vld [vmem:[%s3702_s1 + $0xb0] ss:$8 sps:$4 sm:$0xff]   ;;  %v2564_v58 = vld [vmem:[%s3702_s1 + $0xc4] ss:$8 sps:$4 sm:$0xff]   ;;  %v2566_v59 = vld [vmem:[%s3702_s1 + $0xc0] ss:$8 sps:$4 sm:$0xff]  }
  0x7b   : > { %1006 = vmatpush1.bf16.msra.mxu0 %v2536_v37  ;;  %2461 = vmatpush1.bf16.msra.mxu1 %v2536_v37  ;;  %v2567_v60 = vld [vmem:[%s3702_s1 + $0xd4] ss:$8 sps:$4 sm:$0xff]   ;;  %v2569_v61 = vld [vmem:[%s3702_s1 + $0xd0] ss:$8 sps:$4 sm:$0xff]   ;;  %v2570_v62 = vld [vmem:[%s3702_s1 + $0xe4] ss:$8 sps:$4 sm:$0xff]  }
  0x7c   : > { %1007 = vmatprep.subr.bf16.mxu0 %v2537_v38  ;;  %2446 = vmatprep.subr.bf16.mxu1 %v2537_v38  ;;  %v2572_v63 = vld [vmem:[%s3702_s1 + $0xe0] ss:$8 sps:$4 sm:$0xff]   ;;  %v2573_v0 = vld [vmem:[%s3702_s1 + $0xf4] ss:$8 sps:$4 sm:$0xff]   ;;  %v2575_v1 = vld [vmem:[%s3702_s1 + $0xf0] ss:$8 sps:$4 sm:$0xff]  }
  0x7d   : > { %v2576_v2 = vld [vmem:[%s3701_s0] ss:$8 sps:$4 sm:$0xff]   ;;  %v2582_v4 = vld [vmem:[%s3701_s0 + $0x14] ss:$8 sps:$4 sm:$0xff]   ;;  %v2584_v6 = vld [vmem:[%s3701_s0 + $0x10] ss:$8 sps:$4 sm:$0xff]  }
  0x7e   : > { %v2579_v3 = vld [vmem:[%s3701_s0 + $0x20] ss:$8 sps:$4 sm:$0xff]   ;;  %v2585_v5 = vld [vmem:[%s3701_s0 + $0x34] ss:$8 sps:$4 sm:$0xff]   ;;  %v2587_v7 = vld [vmem:[%s3701_s0 + $0x30] ss:$8 sps:$4 sm:$0xff]  }
  0x7f   : > { %1008 = vmatpush1.bf16.msra.mxu0 %v2539_v39  ;;  %2462 = vmatpush1.bf16.msra.mxu1 %v2539_v39  ;;  %v792_v9 = vshrl.u32 %v791_v8, 7  ;;  %v789_v11 = vld [vmem:[%s3703_s2] sm:$0x3]  ;;  %v782_v32 = vld [vmem:[%s3705_s4 + $0x48] sm:$0xff]  ;;  %v776_v47 = vld [vmem:[%s3705_s4 + $0x18] sm:$0xff] }
  0x80   : > { %1009 = vmatprep.subr.bf16.mxu0 %v2540_v40  ;;  %2447 = vmatprep.subr.bf16.mxu1 %v2540_v40  ;;  %v1074_v13 = vld [vmem:[%s3704_s3] sm:$0x3]  ;;  %v774_v37 = vld [vmem:[%s3705_s4 + $0x8] sm:$0xff]  ;;  %v775_v40 = vld [vmem:[%s3705_s4 + $0x10] sm:$0xff] }
  0x81   : > { %v3189_v10 = vsub.s32 0, %v792_v9  ;;  %v3194_v12 = vsub.s32 1, %v792_v9  ;;  %v773_v29 = vld [vmem:[%s3705_s4] sm:$0xff] }
  0x83   : > { %1010 = vmatpush1.bf16.msra.mxu0 %v2542_v41  ;;  %2463 = vmatpush1.bf16.msra.mxu1 %v2542_v41  ;;  %v3200_v14 = vrot.slane %v789_v11, %v3189_v10  ;;  %v3203_v15 = vrot.slane %v789_v11, %v3194_v12  ;;  %v3206_v16 = vrot.slane %v1074_v13, %v3189_v10  ;;  %v778_v11 = vld [vmem:[%s3705_s4 + $0x28] sm:$0xff] }
  0x84   : > { %1011 = vmatprep.subr.bf16.mxu0 %v2543_v42  ;;  %2448 = vmatprep.subr.bf16.mxu1 %v2543_v42  ;;  %v3209_v19 = vrot.slane %v1074_v13, %v3194_v12 }
  0x87   : > { %1012 = vmatpush1.bf16.msra.mxu0 %v2545_v43  ;;  %2464 = vmatpush1.bf16.msra.mxu1 %v2545_v43  ;;  %v783_v43 = vld [vmem:[%s3705_s4 + $0x50] sm:$0xff] }
  0x88   : > { %1013 = vmatprep.subr.bf16.mxu0 %v2546_v44  ;;  %2449 = vmatprep.subr.bf16.mxu1 %v2546_v44 }
  0x8b   : > { %1014 = vmatpush1.bf16.msra.mxu0 %v2548_v46  ;;  %2465 = vmatpush1.bf16.msra.mxu1 %v2548_v46 }
  0x8c   : > { %1015 = vmatprep.subr.bf16.mxu0 %v2549_v48  ;;  %2450 = vmatprep.subr.bf16.mxu1 %v2549_v48 }
  0x8f   : > { %1016 = vmatpush1.bf16.msra.mxu0 %v2551_v49  ;;  %2466 = vmatpush1.bf16.msra.mxu1 %v2551_v49  ;;  %v784_v49 = vld [vmem:[%s3705_s4 + $0x58] sm:$0xff] }
  0x90   : > { %1017 = vmatprep.subr.bf16.mxu0 %v2552_v50  ;;  %2451 = vmatprep.subr.bf16.mxu1 %v2552_v50 }
  0x93   : > { %1018 = vmatpush1.bf16.msra.mxu0 %v2554_v51  ;;  %2467 = vmatpush1.bf16.msra.mxu1 %v2554_v51 }
  0x94   : > { %1019 = vmatprep.subr.bf16.mxu0 %v2555_v52  ;;  %2452 = vmatprep.subr.bf16.mxu1 %v2555_v52 }
  0x97   : > { %1020 = vmatpush1.bf16.msra.mxu0 %v2557_v53  ;;  %2468 = vmatpush1.bf16.msra.mxu1 %v2557_v53 }
  0x98   : > { %1021 = vmatprep.subr.bf16.mxu0 %v2558_v54  ;;  %2453 = vmatprep.subr.bf16.mxu1 %v2558_v54 }
  0x9b   : > { %1022 = vmatpush1.bf16.msra.mxu0 %v2560_v55  ;;  %2469 = vmatpush1.bf16.msra.mxu1 %v2560_v55 }
  0x9c   : > { %1023 = vmatprep.subr.bf16.mxu0 %v2561_v56  ;;  %2454 = vmatprep.subr.bf16.mxu1 %v2561_v56 }
  0x9f   : > { %1024 = vmatpush1.bf16.msra.mxu0 %v2563_v57  ;;  %2470 = vmatpush1.bf16.msra.mxu1 %v2563_v57 }
  0xa0   : > { %1025 = vmatprep.subr.bf16.mxu0 %v2564_v58  ;;  %2455 = vmatprep.subr.bf16.mxu1 %v2564_v58 }
  0xa3   : > { %1026 = vmatpush1.bf16.msra.mxu0 %v2566_v59  ;;  %2471 = vmatpush1.bf16.msra.mxu1 %v2566_v59 }
  0xa4   : > { %1027 = vmatprep.subr.bf16.mxu0 %v2567_v60  ;;  %2456 = vmatprep.subr.bf16.mxu1 %v2567_v60 }
  0xa7   : > { %1028 = vmatpush1.bf16.msra.mxu0 %v2569_v61  ;;  %2472 = vmatpush1.bf16.msra.mxu1 %v2569_v61 }
  0xa8   : > { %1029 = vmatprep.subr.bf16.mxu0 %v2570_v62  ;;  %2457 = vmatprep.subr.bf16.mxu1 %v2570_v62 }
  0xab   : > { %1030 = vmatpush1.bf16.msra.mxu0 %v2572_v63  ;;  %2473 = vmatpush1.bf16.msra.mxu1 %v2572_v63 }
  0xac   : > { %1031 = vmatprep.subr.bf16.mxu0 %v2573_v0  ;;  %2458 = vmatprep.subr.bf16.mxu1 %v2573_v0 }
  0xaf   : > { %1032 = vmatpush1.bf16.msra.mxu0 %v2575_v1  ;;  %2474 = vmatpush1.bf16.msra.mxu1 %v2575_v1  ;;  %v777_v1 = vld [vmem:[%s3705_s4 + $0x20] sm:$0xff] }
  0xb2   : > { %1034 = vmatmul.mubr.bf16.vlgmr.msra.gmra.mrb[0].mxu0 %v2576_v2  ;;  %1054 = vmatmul.mubr.bf16.vlgmr.msra.gmra.mrb[0].mxu1 %v2579_v3 }
  0xb3   : > { %1043 = vmatprep.mubr.bf16.mxu0 %v2582_v4  ;;  %1063 = vmatprep.mubr.bf16.mxu1 %v2585_v5  ;;  %v785_v4 = vld [vmem:[%s3705_s4 + $0x60] sm:$0xff] }
  0xba   : > { %1044 = vmatmul.mubr.bf16.gmra.mrb[4].mxu0 %v2584_v6  ;;  %1064 = vmatmul.mubr.bf16.gmra.mrb[4].mxu1 %v2587_v7 }
 0x185   : > { %v1035_v17 = vpop.f32.mrb[0].mxu0  ;;  %v1055_v18 = vpop.f32.mrb[0].mxu1 }
 0x186   : > { %v1036_v20 = vadd.f32 %v1035_v17, %v3200_v14  ;;  %v1056_v21 = vadd.f32 %v1055_v18, %v3200_v14  ;;  %v1037_v22 = vpop.f32.mrb[1].mxu0  ;;  %v1057_v23 = vpop.f32.mrb[1].mxu1 }
 0x187   : > { %v1038_v25 = vadd.f32 %v1037_v22, %v3203_v15  ;;  %v1058_v26 = vadd.f32 %v1057_v23, %v3203_v15  ;;  %v1039_v27 = vpop.f32.mrb[2].mxu0  ;;  %v1059_v28 = vpop.f32.mrb[2].mxu1 }
 0x188   : > { %v1086_v30 = vmul.f32 %v3206_v16, %v1036_v20  ;;  %v1094_v31 = vmul.f32 %v3206_v16, %v1056_v21  ;;  %v1040_v33 = vadd.f32 %v1039_v27, %v3200_v14  ;;  %v1060_v34 = vadd.f32 %v1059_v28, %v3200_v14  ;;  %v1041_v35 = vpop.f32.mrb[3].mxu0  ;;  %v1061_v36 = vpop.f32.mrb[3].mxu1  ;;  %v786_v20 = vld [vmem:[%s3705_s4 + $0x68] sm:$0xff]  ;;  %v787_v27 = vld [vmem:[%s3705_s4 + $0x70] sm:$0xff] }
 0x189   : > { %v1087_v38 = vmul.f32 %v3209_v19, %v1038_v25  ;;  %v1095_v39 = vmul.f32 %v3209_v19, %v1058_v26  ;;  %v1042_v41 = vadd.f32 %v1041_v35, %v3203_v15  ;;  %v1062_v42 = vadd.f32 %v1061_v36, %v3203_v15 }
 0x18a   : > { %v3241_v44 = vadd.f32 %v1094_v31, %v781_v24  ;;  %v1088_v45 = vmul.f32 %v3206_v16, %v1040_v33  ;;  %v1096_v46 = vmul.f32 %v3206_v16, %v1060_v34  ;;  %v3248_v48 = vadd.f32 %v1086_v30, %v773_v29  ;;  %v779_v24 = vld [vmem:[%s3705_s4 + $0x30] sm:$0xff]  ;;  %v780_v31 = vld [vmem:[%s3705_s4 + $0x38] sm:$0xff] }
 0x18b   : > { %v3253_v50 = vadd.f32 %v1095_v39, %v782_v32  ;;  %v1089_v51 = vmul.f32 %v3209_v19, %v1042_v41  ;;  %v1097_v52 = vmul.f32 %v3209_v19, %v1062_v42  ;;  %v3257_v53 = vadd.f32 %v1087_v38, %v774_v37  ;;  %v788_v33 = vld [vmem:[%s3705_s4 + $0x78] sm:$0xff] }
 0x18c   : > { %1126 = vst [vmem:[%s3712_s11 + $0x40] sm:$0xff] %v3241_v44  ;;  %v3263_v54 = vadd.f32 %v1088_v45, %v775_v40  ;;  %1118 = vst [vmem:[%s3712_s11] sm:$0xff] %v3248_v48  ;;  %v3269_v55 = vadd.f32 %v1096_v46, %v783_v43 }
 0x18d   : > { %1127 = vst [vmem:[%s3712_s11 + $0x48] sm:$0xff] %v3253_v50  ;;  %v3275_v56 = vadd.f32 %v1089_v51, %v776_v47  ;;  %v1045_v57 = vpop.f32.mrb[4].mxu0  ;;  %1119 = vst [vmem:[%s3712_s11 + $0x8] sm:$0xff] %v3257_v53  ;;  %v1134_v58 = vadd.f32 %v3257_v53, %v3248_v48  ;;  %v1065_v59 = vpop.f32.mrb[4].mxu1  ;;  %v3283_v60 = vadd.f32 %v1097_v52, %v784_v49 }
 0x18e   : > { %1120 = vst [vmem:[%s3712_s11 + $0x10] sm:$0xff] %v3263_v54  ;;  %v1046_v61 = vadd.f32 %v1045_v57, %v3200_v14  ;;  %v1047_v62 = vpop.f32.mrb[5].mxu0  ;;  %v1066_v63 = vadd.f32 %v1065_v59, %v3200_v14  ;;  %1128 = vst [vmem:[%s3712_s11 + $0x50] sm:$0xff] %v3269_v55  ;;  %v1067_v0 = vpop.f32.mrb[5].mxu1  ;;  %v1146_v7 = vadd.f32 %v3253_v50, %v3241_v44 }
 0x18f   : > { %1121 = vst [vmem:[%s3712_s11 + $0x18] sm:$0xff] %v3275_v56  ;;  %v1048_v2 = vadd.f32 %v1047_v62, %v3203_v15  ;;  %1135 = vadd.xlane.f32.xlu0 %v1134_v58  ;;  %v1049_v3 = vpop.f32.mrb[6].mxu0  ;;  %1129 = vst [vmem:[%s3712_s11 + $0x58] sm:$0xff] %v3283_v60  ;;  %v1149_v5 = vadd.f32 %v3283_v60, %v3269_v55  ;;  %v1068_v6 = vadd.f32 %v1067_v0, %v3203_v15  ;;  %v1069_v8 = vpop.f32.mrb[6].mxu1 }
 0x190   : > { %v1090_v9 = vmul.f32 %v3206_v16, %v1046_v61  ;;  %v1050_v13 = vadd.f32 %v1049_v3, %v3200_v14  ;;  %v1098_v17 = vmul.f32 %v3206_v16, %v1066_v63  ;;  %v1051_v18 = vpop.f32.mrb[7].mxu0  ;;  %v1070_v21 = vadd.f32 %v1069_v8, %v3200_v14  ;;  %v1071_v22 = vpop.f32.mrb[7].mxu1 }
 0x191   : > { %v1091_v23 = vmul.f32 %v3209_v19, %v1048_v2  ;;  %1150 = vadd.xlane.f32.xlu1 %v1149_v5  ;;  %v1052_v25 = vadd.f32 %v1051_v18, %v3203_v15  ;;  %v1099_v26 = vmul.f32 %v3209_v19, %v1068_v6  ;;  %v1072_v28 = vadd.f32 %v1071_v22, %v3203_v15 }
 0x192   : > { %v1106_v29 = vadd.f32 %v1090_v9, %v777_v1  ;;  %v1092_v14 = vmul.f32 %v3206_v16, %v1050_v13  ;;  %v3336_v30 = vadd.f32 %v1098_v17, %v785_v4  ;;  %v1100_v32 = vmul.f32 %v3206_v16, %v1070_v21 }
 0x193   : > { %v1107_v34 = vadd.f32 %v1091_v23, %v778_v11  ;;  %v1093_v35 = vmul.f32 %v3209_v19, %v1052_v25  ;;  %v1115_v36 = vadd.f32 %v1099_v26, %v786_v20  ;;  %1147 = vadd.xlane.f32.xlu0 %v1146_v7  ;;  %v1101_v15 = vmul.f32 %v3209_v19, %v1072_v28 }
 0x194   : > { %1122 = vst [vmem:[%s3712_s11 + $0x20] sm:$0xff] %v1106_v29  ;;  %v1108_v37 = vadd.f32 %v1092_v14, %v779_v24  ;;  %1130 = vst [vmem:[%s3712_s11 + $0x60] sm:$0xff] %v3336_v30  ;;  %v3354_v16 = vadd.f32 %v1100_v32, %v787_v27  ;;  %v1137_v40 = vadd.f32 %v3275_v56, %v3263_v54 }
 0x195   : > { %1123 = vst [vmem:[%s3712_s11 + $0x28] sm:$0xff] %v1107_v34  ;;  %v1109_v38 = vadd.f32 %v1093_v35, %v780_v31  ;;  %1131 = vst [vmem:[%s3712_s11 + $0x68] sm:$0xff] %v1115_v36  ;;  %v3362_v19 = vadd.f32 %v1101_v15, %v788_v33  ;;  %v1140_v39 = vadd.f32 %v1107_v34, %v1106_v29 }
 0x196   : > { %1124 = vst [vmem:[%s3712_s11 + $0x30] sm:$0xff] %v1108_v37  ;;  %1132 = vst [vmem:[%s3712_s11 + $0x70] sm:$0xff] %v3354_v16  ;;  %v1152_v42 = vadd.f32 %v1115_v36, %v3336_v30 }
 0x197   : > { %1125 = vst [vmem:[%s3712_s11 + $0x38] sm:$0xff] %v1109_v38  ;;  %1133 = vst [vmem:[%s3712_s11 + $0x78] sm:$0xff] %v3362_v19  ;;  %1141 = vadd.xlane.f32.xlu1 %v1140_v39  ;;  %1138 = vadd.xlane.f32.xlu0 %v1137_v40  ;;  %v1143_v41 = vadd.f32 %v1109_v38, %v1108_v37  ;;  %v1155_v43 = vadd.f32 %v3362_v19, %v3354_v16 }
 0x19b   : > { %1144 = vadd.xlane.f32.xlu1 %v1143_v41  ;;  %1153 = vadd.xlane.f32.xlu0 %v1152_v42 }
 0x19f   : > { %1156 = vadd.xlane.f32.xlu1 %v1155_v43 }
 0x21c   : > { %v1136_v45 = vpop.xlane.xlu0 %1135 }
 0x21d   : > { %v1159_v46 = vmul.f32 0.00390625, %v1136_v45 }
 0x21e   : > { %v1151_v51 = vpop.xlane.xlu1 %1150 }
 0x21f   : > { %v3384_v47 = vsub.f32 %v3248_v48, %v1159_v46  ;;  %v3387_v49 = vsub.f32 %v3257_v53, %v1159_v46  ;;  %v1164_v59 = vmul.f32 0.00390625, %v1151_v51 }
 0x220   : > { %v1148_v52 = vpop.xlane.xlu0 %1147 }
 0x221   : > { %v1163_v57 = vmul.f32 0.00390625, %v1148_v52  ;;  %v1183_v58 = vmul.f32 %v3384_v47, %v3384_v47  ;;  %v1184_v61 = vmul.f32 %v3387_v49, %v3387_v49  ;;  %v3404_v5 = vsub.f32 %v3269_v55, %v1164_v59 }
 0x223   : > { %v3394_v62 = vsub.f32 %v3241_v44, %v1163_v57  ;;  %v3397_v63 = vsub.f32 %v3253_v50, %v1163_v57  ;;  %v1199_v53 = vadd.f32 %v1184_v61, %v1183_v58  ;;  %v3407_v44 = vsub.f32 %v3283_v60, %v1164_v59 }
 0x224   : > { %v1142_v48 = vpop.xlane.xlu1 %1141  ;;  %v1139_v0 = vpop.xlane.xlu0 %1138  ;;  %v1193_v22 = vmul.f32 %v3404_v5, %v3404_v5 }
 0x225   : > { %v1161_v1 = vmul.f32 0.00390625, %v1142_v48  ;;  %v1160_v2 = vmul.f32 0.00390625, %v1139_v0  ;;  %v1191_v3 = vmul.f32 %v3394_v62, %v3394_v62  ;;  %v1192_v4 = vmul.f32 %v3397_v63, %v3397_v63  ;;  %1200 = vadd.xlane.f32.xlu0 %v1199_v53  ;;  %v1263_v53 = vld [vmem:[%s3706_s5] sm:$0x3] }
 0x226   : > { %v1194_v23 = vmul.f32 %v3407_v44, %v3407_v44 }
 0x227   : > { %v3409_v50 = vsub.f32 %v1106_v29, %v1161_v1  ;;  %v3411_v6 = vsub.f32 %v1107_v34, %v1161_v1  ;;  %v3414_v7 = vsub.f32 %v3263_v54, %v1160_v2  ;;  %v3417_v8 = vsub.f32 %v3275_v56, %v1160_v2 }
 0x228   : > { %v1145_v9 = vpop.xlane.xlu1 %1144  ;;  %v1154_v11 = vpop.xlane.xlu0 %1153  ;;  %v1211_v13 = vadd.f32 %v1192_v4, %v1191_v3  ;;  %v1214_v31 = vadd.f32 %v1194_v23, %v1193_v22 }
 0x229   : > { %v1162_v17 = vmul.f32 0.00390625, %v1145_v9  ;;  %v1165_v55 = vmul.f32 0.00390625, %v1154_v11  ;;  %v1187_v60 = vmul.f32 %v3409_v50, %v3409_v50  ;;  %v1188_v18 = vmul.f32 %v3411_v6, %v3411_v6 }
 0x22a   : > { %1212 = vadd.xlane.f32.xlu0 %v1211_v13  ;;  %v1185_v20 = vmul.f32 %v3414_v7, %v3414_v7  ;;  %v1186_v54 = vmul.f32 %v3417_v8, %v3417_v8  ;;  %v3462_v11 = vrot.slane %v1263_v53, %v3189_v10 }
 0x22b   : > { %v3428_v56 = vsub.f32 %v3336_v30, %v1165_v55  ;;  %v3430_v21 = vsub.f32 %v1115_v36, %v1165_v55  ;;  %v3436_v24 = vsub.f32 %v1108_v37, %v1162_v17  ;;  %v3438_v25 = vsub.f32 %v1109_v38, %v1162_v17  ;;  %v1291_v55 = vld [vmem:[%s3707_s6] sm:$0x3] }
 0x22c   : > { %v1157_v26 = vpop.xlane.xlu1 %1156  ;;  %v1205_v27 = vadd.f32 %v1188_v18, %v1187_v60  ;;  %v1202_v28 = vadd.f32 %v1186_v54, %v1185_v20  ;;  %v3465_v17 = vrot.slane %v1263_v53, %v3194_v12 }
 0x22d   : > { %v1166_v29 = vmul.f32 0.00390625, %v1157_v26  ;;  %v1195_v14 = vmul.f32 %v3428_v56, %v3428_v56  ;;  %v1196_v30 = vmul.f32 %v3430_v21, %v3430_v21  ;;  %v1189_v35 = vmul.f32 %v3436_v24, %v3436_v24 }
 0x22e   : > { %1206 = vadd.xlane.f32.xlu0 %v1205_v27  ;;  %1203 = vadd.xlane.f32.xlu1 %v1202_v28  ;;  %v1190_v36 = vmul.f32 %v3438_v25, %v3438_v25  ;;  %v3475_v27 = vrot.slane %v1291_v55, %v3189_v10 }
 0x22f   : > { %v1217_v32 = vadd.f32 %v1196_v30, %v1195_v14  ;;  %v3445_v33 = vsub.f32 %v3354_v16, %v1166_v29  ;;  %v3448_v34 = vsub.f32 %v3362_v19, %v1166_v29  ;;  %v3478_v29 = vrot.slane %v1291_v55, %v3194_v12 }
 0x230   : > { %v1208_v15 = vadd.f32 %v1190_v36, %v1189_v35 }
 0x231   : > { %v1197_v37 = vmul.f32 %v3445_v33, %v3445_v33  ;;  %v1198_v38 = vmul.f32 %v3448_v34, %v3448_v34 }
 0x232   : > { %1215 = vadd.xlane.f32.xlu1 %v1214_v31  ;;  %1218 = vadd.xlane.f32.xlu0 %v1217_v32 }
 0x233   : > { %v1220_v16 = vadd.f32 %v1198_v38, %v1197_v37 }
 0x236   : > { %1209 = vadd.xlane.f32.xlu1 %v1208_v15 }
 0x23a   : > { %1221 = vadd.xlane.f32.xlu1 %v1220_v16 }
 0x2b2   : > { %v1201_v19 = vpop.xlane.xlu0 %1200 }
 0x2b3   : > { %v1223_v39 = vmul.f32 0.00390625, %v1201_v19 }
 0x2b5   : > { %v1231_v40 = vadd.f32 1e-05, %v1223_v39 }
 0x2b7   : > { %v1213_v41 = vpop.xlane.xlu0 %1212  ;;  %2588 = vrsqrt.f32 %v1231_v40 }
 0x2b8   : > { %v1227_v42 = vmul.f32 0.00390625, %v1213_v41 }
 0x2ba   : > { %v1235_v43 = vadd.f32 1e-05, %v1227_v42 }
 0x2bb   : > { %v1204_v45 = vpop.xlane.xlu1 %1203  ;;  %v1207_v46 = vpop.xlane.xlu0 %1206 }
 0x2bc   : > { %2590 = vrsqrt.f32 %v1235_v43  ;;  %v1224_v51 = vmul.f32 0.00390625, %v1204_v45  ;;  %v1225_v52 = vmul.f32 0.00390625, %v1207_v46 }
 0x2be   : > { %v1232_v57 = vadd.f32 1e-05, %v1224_v51  ;;  %v1233_v58 = vadd.f32 1e-05, %v1225_v52 }
 0x2bf   : > { %v1216_v59 = vpop.xlane.xlu1 %1215  ;;  %v1219_v61 = vpop.xlane.xlu0 %1218 }
 0x2c0   : > { %2592 = vrsqrt.f32 %v1232_v57  ;;  %v1228_v48 = vmul.f32 0.00390625, %v1216_v59  ;;  %v1229_v0 = vmul.f32 0.00390625, %v1219_v61 }
 0x2c1   : > { %2594 = vrsqrt.f32 %v1233_v58  ;;  %v2589_v3 = vpop.eup %2588 }
 0x2c2   : > { %v1236_v1 = vadd.f32 1e-05, %v1228_v48  ;;  %v1237_v2 = vadd.f32 1e-05, %v1229_v0  ;;  %v1247_v60 = vmul.f32 %v2589_v3, %v3384_v47  ;;  %v1248_v18 = vmul.f32 %v2589_v3, %v3387_v49 }
 0x2c3   : > { %v1210_v4 = vpop.xlane.xlu1 %1209 }
 0x2c4   : > { %2596 = vrsqrt.f32 %v1236_v1  ;;  %v1226_v9 = vmul.f32 0.00390625, %v1210_v4  ;;  %v1275_v14 = vmul.f32 %v3462_v11, %v1247_v60  ;;  %v1276_v47 = vmul.f32 %v3465_v17, %v1248_v18 }
 0x2c5   : > { %2598 = vrsqrt.f32 %v1237_v2 }
 0x2c6   : > { %v2591_v13 = vpop.eup %2590  ;;  %v1234_v20 = vadd.f32 1e-05, %v1226_v9  ;;  %v1303_v36 = vadd.f32 %v3475_v27, %v1275_v14  ;;  %v1304_v15 = vadd.f32 %v3478_v29, %v1276_v47 }
 0x2c7   : > { %v1222_v54 = vpop.xlane.xlu1 %1221  ;;  %v1255_v22 = vmul.f32 %v2591_v13, %v3394_v62  ;;  %v1256_v23 = vmul.f32 %v2591_v13, %v3397_v63 }
 0x2c8   : > { %2600 = vrsqrt.f32 %v1234_v20  ;;  %v1230_v26 = vmul.f32 0.00390625, %v1222_v54 }
 0x2c9   : > { %v1283_v63 = vmul.f32 %v3462_v11, %v1255_v22  ;;  %v1284_v32 = vmul.f32 %v3465_v17, %v1256_v23 }
 0x2ca   : > { %v2593_v28 = vpop.eup %2592  ;;  %v1238_v49 = vadd.f32 1e-05, %v1230_v26 }
 0x2cb   : > { %v2595_v30 = vpop.eup %2594  ;;  %v1249_v31 = vmul.f32 %v2593_v28, %v3414_v7  ;;  %v1250_v62 = vmul.f32 %v2593_v28, %v3417_v8  ;;  %v1311_v40 = vadd.f32 %v3475_v27, %v1283_v63  ;;  %v1312_v41 = vadd.f32 %v3478_v29, %v1284_v32 }
 0x2cc   : > { %2602 = vrsqrt.f32 %v1238_v49  ;;  %v1251_v37 = vmul.f32 %v2595_v30, %v3409_v50  ;;  %v1252_v7 = vmul.f32 %v2595_v30, %v3411_v6 }
 0x2cd   : > { %v1277_v10 = vmul.f32 %v3462_v11, %v1249_v31  ;;  %v1278_v12 = vmul.f32 %v3465_v17, %v1250_v62 }
 0x2ce   : > { %v2597_v35 = vpop.eup %2596  ;;  %v1279_v46 = vmul.f32 %v3462_v11, %v1251_v37  ;;  %v1280_v51 = vmul.f32 %v3465_v17, %v1252_v7 }
 0x2cf   : > { %v2599_v38 = vpop.eup %2598  ;;  %v1305_v8 = vadd.f32 %v3475_v27, %v1277_v10  ;;  %v1306_v16 = vadd.f32 %v3478_v29, %v1278_v12  ;;  %v1257_v19 = vmul.f32 %v2597_v35, %v3404_v5  ;;  %v1258_v39 = vmul.f32 %v2597_v35, %v3407_v44 }
 0x2d0   : > { %v1259_v52 = vmul.f32 %v2599_v38, %v3428_v56  ;;  %v1260_v5 = vmul.f32 %v2599_v38, %v3430_v21  ;;  %v1307_v56 = vadd.f32 %v3475_v27, %v1279_v46  ;;  %v1308_v21 = vadd.f32 %v3478_v29, %v1280_v51 }
 0x2d1   : > { %v1319_v42 = vpack.c.bf16 %v1305_v8, %v1303_v36  ;;  %v1320_v43 = vpack.c.bf16 %v1306_v16, %v1304_v15  ;;  %v1285_v45 = vmul.f32 %v3462_v11, %v1257_v19  ;;  %v1286_v50 = vmul.f32 %v3465_v17, %v1258_v39 }
 0x2d2   : > { %v2601_v6 = vpop.eup %2600  ;;  %v1287_v2 = vmul.f32 %v3462_v11, %v1259_v52  ;;  %v1288_v3 = vmul.f32 %v3465_v17, %v1260_v5 }
 0x2d3   : > { %1327 = vst [vmem:[#allocation2] sm:$0xff] %v1319_v42  ;;  %1328 = vst [vmem:[#allocation2 + $0x8] sm:$0xff] %v1320_v43  ;;  %v1313_v44 = vadd.f32 %v3475_v27, %v1285_v45  ;;  %v1314_v57 = vadd.f32 %v3478_v29, %v1286_v50  ;;  %v1253_v58 = vmul.f32 %v2601_v6, %v3436_v24 }
 0x2d4   : > { %v1254_v59 = vmul.f32 %v2601_v6, %v3438_v25  ;;  %v1315_v20 = vadd.f32 %v3475_v27, %v1287_v2  ;;  %v1316_v54 = vadd.f32 %v3478_v29, %v1288_v3 }
 0x2d5   : > { %v1323_v61 = vpack.c.bf16 %v1313_v44, %v1311_v40  ;;  %v1324_v48 = vpack.c.bf16 %v1314_v57, %v1312_v41  ;;  %v1281_v0 = vmul.f32 %v3462_v11, %v1253_v58 }
 0x2d6   : > { %v1282_v53 = vmul.f32 %v3465_v17, %v1254_v59  ;;  %v2603_v1 = vpop.eup %2602 }
 0x2d7   : > { %1331 = vst [vmem:[#allocation2 + $0x20] sm:$0xff] %v1323_v61  ;;  %1332 = vst [vmem:[#allocation2 + $0x28] sm:$0xff] %v1324_v48  ;;  %v1309_v24 = vadd.f32 %v3475_v27, %v1281_v0  ;;  %v1261_v4 = vmul.f32 %v2603_v1, %v3445_v33  ;;  %v1262_v9 = vmul.f32 %v2603_v1, %v3448_v34 }
 0x2d8   : > { %v1310_v25 = vadd.f32 %v3478_v29, %v1282_v53 }
 0x2d9   : > { %v1321_v13 = vpack.c.bf16 %v1309_v24, %v1307_v56  ;;  %v1289_v60 = vmul.f32 %v3462_v11, %v1261_v4  ;;  %v1290_v18 = vmul.f32 %v3465_v17, %v1262_v9 }
 0x2da   : > { %v1322_v55 = vpack.c.bf16 %v1310_v25, %v1308_v21 }
 0x2db   : > { %1329 = vst [vmem:[#allocation2 + $0x10] sm:$0xff] %v1321_v13  ;;  %v1317_v22 = vadd.f32 %v3475_v27, %v1289_v60  ;;  %v1318_v23 = vadd.f32 %v3478_v29, %v1290_v18 }
 0x2dc   : > { %1330 = vst [vmem:[#allocation2 + $0x18] sm:$0xff] %v1322_v55 }
 0x2dd   : > { %v1325_v26 = vpack.c.bf16 %v1317_v22, %v1315_v20  ;;  %v1326_v33 = vpack.c.bf16 %v1318_v23, %v1316_v54 }
 0x2df   : > { %1333 = vst [vmem:[#allocation2 + $0x30] sm:$0xff] %v1325_v26  ;;  %1334 = vst [vmem:[#allocation2 + $0x38] sm:$0xff] %v1326_v33 }
 0x2e0 PF: > { %v2604_v34 = vld [vmem:[%s3049_s15 + $0x4] ss:$8 sps:$4 sm:$0xff]   ;;  %v2606_v11 = vld [vmem:[%s3049_s15] ss:$8 sps:$4 sm:$0xff]   ;;  %v2607_v17 = vld [vmem:[%s3049_s15 + $0x14] ss:$8 sps:$4 sm:$0xff]   ;;  %s3726_s29 = scalar_lea.vmem %s3710_s9, %s3738_s21 }
 0x2e1   : > { %1824 = vmatprep.subr.bf16.mxu1 %v2604_v34  ;;  %v2609_v27 = vld [vmem:[%s3049_s15 + $0x10] ss:$8 sps:$4 sm:$0xff]   ;;  %v2610_v28 = vld [vmem:[%s3049_s15 + $0x24] ss:$8 sps:$4 sm:$0xff]   ;;  %v2618_v14 = vld [vmem:[%s3047_s7] ss:$8 sps:$4 sm:$0xff]  }
 0x2e2   : > { %1825 = vmatpush1.bf16.msra.mxu1 %v2606_v11  ;;  %v2616_v29 = vld [vmem:[%s3047_s7 + $0x4] ss:$8 sps:$4 sm:$0xff]   ;;  %v2612_v47 = vld [vmem:[%s3049_s15 + $0x20] ss:$8 sps:$4 sm:$0xff]   ;;  %v2613_v49 = vld [vmem:[%s3049_s15 + $0x34] ss:$8 sps:$4 sm:$0xff]  }
 0x2e3   : > { %1826 = vmatprep.subr.bf16.mxu1 %v2607_v17  ;;  %1547 = vmatprep.subr.bf16.mxu0 %v2616_v29  ;;  %v2622_v30 = vld [vmem:[%s3047_s7 + $0x14] ss:$8 sps:$4 sm:$0xff]   ;;  %v2624_v31 = vld [vmem:[%s3047_s7 + $0x10] ss:$8 sps:$4 sm:$0xff]   ;;  %v2628_v63 = vld [vmem:[%s3047_s7 + $0x24] ss:$8 sps:$4 sm:$0xff]  }
 0x2e4   : > { %1548 = vmatpush1.bf16.msra.mxu0 %v2618_v14  ;;  %v2615_v62 = vld [vmem:[%s3049_s15 + $0x30] ss:$8 sps:$4 sm:$0xff]   ;;  %v2619_v32 = vld [vmem:[%s3049_s15 + $0x44] ss:$8 sps:$4 sm:$0xff]   ;;  %v2630_v10 = vld [vmem:[%s3047_s7 + $0x20] ss:$8 sps:$4 sm:$0xff]  }
 0x2e5   : > { %1549 = vmatprep.subr.bf16.mxu0 %v2622_v30  ;;  %v2634_v12 = vld [vmem:[%s3047_s7 + $0x34] ss:$8 sps:$4 sm:$0xff]   ;;  %v2621_v35 = vld [vmem:[%s3049_s15 + $0x40] ss:$8 sps:$4 sm:$0xff]   ;;  %v2636_v15 = vld [vmem:[%s3047_s7 + $0x30] ss:$8 sps:$4 sm:$0xff]  }
 0x2e6   : > { %1827 = vmatpush1.bf16.msra.mxu1 %v2609_v27  ;;  %v2625_v36 = vld [vmem:[%s3049_s15 + $0x54] ss:$8 sps:$4 sm:$0xff]   ;;  %v2640_v37 = vld [vmem:[%s3047_s7 + $0x44] ss:$8 sps:$4 sm:$0xff]   ;;  %v2627_v7 = vld [vmem:[%s3049_s15 + $0x50] ss:$8 sps:$4 sm:$0xff]  }
 0x2e7   : > { %1828 = vmatprep.subr.bf16.mxu1 %v2610_v28  ;;  %v2631_v38 = vld [vmem:[%s3049_s15 + $0x64] ss:$8 sps:$4 sm:$0xff]   ;;  %v2642_v8 = vld [vmem:[%s3047_s7 + $0x40] ss:$8 sps:$4 sm:$0xff]   ;;  %v2646_v16 = vld [vmem:[%s3047_s7 + $0x54] ss:$8 sps:$4 sm:$0xff]  }
 0x2e8   : > { %1550 = vmatpush1.bf16.msra.mxu0 %v2624_v31  ;;  %v2633_v19 = vld [vmem:[%s3049_s15 + $0x60] ss:$8 sps:$4 sm:$0xff]   ;;  %v2637_v39 = vld [vmem:[%s3049_s15 + $0x74] ss:$8 sps:$4 sm:$0xff]   ;;  %v2648_v40 = vld [vmem:[%s3047_s7 + $0x50] ss:$8 sps:$4 sm:$0xff]  }
 0x2e9   : > { %1551 = vmatprep.subr.bf16.mxu0 %v2628_v63  ;;  %v2652_v41 = vld [vmem:[%s3047_s7 + $0x64] ss:$8 sps:$4 sm:$0xff]   ;;  %v2639_v42 = vld [vmem:[%s3049_s15 + $0x70] ss:$8 sps:$4 sm:$0xff]   ;;  %v2654_v45 = vld [vmem:[%s3047_s7 + $0x60] ss:$8 sps:$4 sm:$0xff]  }
 0x2ea   : > { %1829 = vmatpush1.bf16.msra.mxu1 %v2612_v47  ;;  %v2643_v43 = vld [vmem:[%s3049_s15 + $0x84] ss:$8 sps:$4 sm:$0xff]   ;;  %v2658_v50 = vld [vmem:[%s3047_s7 + $0x74] ss:$8 sps:$4 sm:$0xff]   ;;  %v2645_v6 = vld [vmem:[%s3049_s15 + $0x80] ss:$8 sps:$4 sm:$0xff]  }
 0x2eb   : > { %1830 = vmatprep.subr.bf16.mxu1 %v2613_v49  ;;  %v2649_v46 = vld [vmem:[%s3049_s15 + $0x94] ss:$8 sps:$4 sm:$0xff]   ;;  %v2660_v51 = vld [vmem:[%s3047_s7 + $0x70] ss:$8 sps:$4 sm:$0xff]   ;;  %v2664_v52 = vld [vmem:[%s3047_s7 + $0x84] ss:$8 sps:$4 sm:$0xff]   ;;  %v1377_v49 = vlaneseq }
 0x2ec   : > { %1552 = vmatpush1.bf16.msra.mxu0 %v2630_v10  ;;  %v2651_v5 = vld [vmem:[%s3049_s15 + $0x90] ss:$8 sps:$4 sm:$0xff]   ;;  %v2655_v44 = vld [vmem:[%s3049_s15 + $0xa4] ss:$8 sps:$4 sm:$0xff]   ;;  %v2666_v57 = vld [vmem:[%s3047_s7 + $0x80] ss:$8 sps:$4 sm:$0xff]  }
 0x2ed   : > { %1553 = vmatprep.subr.bf16.mxu0 %v2634_v12  ;;  %v2670_v58 = vld [vmem:[%s3047_s7 + $0x94] ss:$8 sps:$4 sm:$0xff]   ;;  %v1336_v59 = vld [vmem:[#allocation2 + $0x8] sm:$0xff]  ;;  %v2672_v0 = vld [vmem:[%s3047_s7 + $0x90] ss:$8 sps:$4 sm:$0xff]   ;;  %v1378_v30 = vshrl.u32 %v1377_v49, 7 }
 0x2ee   : > { %1831 = vmatpush1.bf16.msra.mxu1 %v2615_v62  ;;  %v2657_v61 = vld [vmem:[%s3049_s15 + $0xa0] ss:$8 sps:$4 sm:$0xff]   ;;  %1856 = vmatprep.mubr.bf16.mxu1 %v1336_v59  ;;  %v2661_v48 = vld [vmem:[%s3049_s15 + $0xb4] ss:$8 sps:$4 sm:$0xff]   ;;  %v2676_v53 = vld [vmem:[%s3047_s7 + $0xa4] ss:$8 sps:$4 sm:$0xff]  }
 0x2ef   : > { %1832 = vmatprep.subr.bf16.mxu1 %v2619_v32  ;;  %1579 = vmatprep.mubr.bf16.mxu0 %v1336_v59  ;;  %v2663_v1 = vld [vmem:[%s3049_s15 + $0xb0] ss:$8 sps:$4 sm:$0xff]   ;;  %v2667_v56 = vld [vmem:[%s3049_s15 + $0xc4] ss:$8 sps:$4 sm:$0xff]   ;;  %v2678_v21 = vld [vmem:[%s3047_s7 + $0xa0] ss:$8 sps:$4 sm:$0xff]  }
 0x2f0   : > { %1554 = vmatpush1.bf16.msra.mxu0 %v2636_v15  ;;  %v2682_v2 = vld [vmem:[%s3047_s7 + $0xb4] ss:$8 sps:$4 sm:$0xff]   ;;  %v2669_v3 = vld [vmem:[%s3049_s15 + $0xc0] ss:$8 sps:$4 sm:$0xff]   ;;  %v2684_v25 = vld [vmem:[%s3047_s7 + $0xb0] ss:$8 sps:$4 sm:$0xff]  }
 0x2f1   : > { %1555 = vmatprep.subr.bf16.mxu0 %v2640_v37  ;;  %v2673_v24 = vld [vmem:[%s3049_s15 + $0xd4] ss:$8 sps:$4 sm:$0xff]   ;;  %v2688_v4 = vld [vmem:[%s3047_s7 + $0xc4] ss:$8 sps:$4 sm:$0xff]   ;;  %v2675_v9 = vld [vmem:[%s3049_s15 + $0xd0] ss:$8 sps:$4 sm:$0xff]  }
 0x2f2   : > { %1833 = vmatpush1.bf16.msra.mxu1 %v2621_v35  ;;  %v2679_v13 = vld [vmem:[%s3049_s15 + $0xe4] ss:$8 sps:$4 sm:$0xff]   ;;  %v2690_v55 = vld [vmem:[%s3047_s7 + $0xc0] ss:$8 sps:$4 sm:$0xff]   ;;  %v2691_v60 = vld [vmem:[%s3047_s7 + $0xd4] ss:$8 sps:$4 sm:$0xff]  }
 0x2f3   : > { %1834 = vmatprep.subr.bf16.mxu1 %v2625_v36  ;;  %v2681_v18 = vld [vmem:[%s3049_s15 + $0xe0] ss:$8 sps:$4 sm:$0xff]   ;;  %v2685_v20 = vld [vmem:[%s3049_s15 + $0xf4] ss:$8 sps:$4 sm:$0xff]   ;;  %v2693_v54 = vld [vmem:[%s3047_s7 + $0xd0] ss:$8 sps:$4 sm:$0xff]  }
 0x2f4   : > { %1556 = vmatpush1.bf16.msra.mxu0 %v2642_v8  ;;  %v2694_v22 = vld [vmem:[%s3047_s7 + $0xe4] ss:$8 sps:$4 sm:$0xff]   ;;  %v2687_v23 = vld [vmem:[%s3049_s15 + $0xf0] ss:$8 sps:$4 sm:$0xff]   ;;  %v2696_v26 = vld [vmem:[%s3047_s7 + $0xe0] ss:$8 sps:$4 sm:$0xff]  }
 0x2f5   : > { %1557 = vmatprep.subr.bf16.mxu0 %v2646_v16  ;;  %v2697_v33 = vld [vmem:[%s3047_s7 + $0xf4] ss:$8 sps:$4 sm:$0xff]   ;;  %v1335_v34 = vld [vmem:[#allocation2] sm:$0xff]  ;;  %v2699_v17 = vld [vmem:[%s3047_s7 + $0xf0] ss:$8 sps:$4 sm:$0xff]   ;;  %v1379_v31 = vsub.s32 0, %v1378_v30 }
 0x2f6   : > { %1835 = vmatpush1.bf16.msra.mxu1 %v2627_v7  ;;  %v1338_v11 = vld [vmem:[#allocation2 + $0x18] sm:$0xff]  ;;  %v1337_v27 = vld [vmem:[#allocation2 + $0x10] sm:$0xff]  ;;  %v1340_v28 = vld [vmem:[#allocation2 + $0x28] sm:$0xff]  ;;  %v1383_v63 = vsub.s32 1, %v1378_v30  ;;  %p3727_p9 = scmp.ne.s32.totalorder %s3723_s16, 0 }
 0x2f7   : > { %1836 = vmatprep.subr.bf16.mxu1 %v2631_v38  ;;  %v1339_v29 = vld [vmem:[#allocation2 + $0x20] sm:$0xff]  ;;  %v1342_v14 = vld [vmem:[#allocation2 + $0x38] sm:$0xff]  ;;  %v1341_v47 = vld [vmem:[#allocation2 + $0x30] sm:$0xff]  ;;  %s2442_s21 = sshll.u32 (%p3727_p9), %s2802_s24, 3 }
 0x2f8   : > { %1558 = vmatpush1.bf16.msra.mxu0 %v2648_v40  ;;  %v1652_v62 = vld [vmem:[%s718_s17] sm:$0x3]  ;;  %s2071_s18 = scalar_lea.vmem (%p3727_p9), %s3713_s12, %s2442_s21 }
 0x2f9   : > { %1559 = vmatprep.subr.bf16.mxu0 %v2652_v41  ;;  %v3593_v32 = vrot.slane %v1652_v62, %v1379_v31  ;;  %v3595_v10 = vrot.slane %v1652_v62, %v1383_v63 }
 0x2fa   : > { %1837 = vmatpush1.bf16.msra.mxu1 %v2633_v19 }
 0x2fb   : > { %1838 = vmatprep.subr.bf16.mxu1 %v2637_v39 }
 0x2fc   : > { %1560 = vmatpush1.bf16.msra.mxu0 %v2654_v45 }
 0x2fd   : > { %1561 = vmatprep.subr.bf16.mxu0 %v2658_v50 }
 0x2fe   : > { %1839 = vmatpush1.bf16.msra.mxu1 %v2639_v42 }
 0x2ff   : > { %1840 = vmatprep.subr.bf16.mxu1 %v2643_v43 }
 0x300   : > { %1562 = vmatpush1.bf16.msra.mxu0 %v2660_v51 }
 0x301   : > { %1563 = vmatprep.subr.bf16.mxu0 %v2664_v52 }
 0x302   : > { %1841 = vmatpush1.bf16.msra.mxu1 %v2645_v6 }
 0x303   : > { %1842 = vmatprep.subr.bf16.mxu1 %v2649_v46  ;;  %v1375_v46 = vld [vmem:[%s3726_s29] sm:$0x3] }
 0x304   : > { %1564 = vmatpush1.bf16.msra.mxu0 %v2666_v57 }
 0x305   : > { %1565 = vmatprep.subr.bf16.mxu0 %v2670_v58 }
 0x306   : > { %1843 = vmatpush1.bf16.msra.mxu1 %v2651_v5 }
 0x307   : > { %1844 = vmatprep.subr.bf16.mxu1 %v2655_v44 }
 0x308   : > { %1566 = vmatpush1.bf16.msra.mxu0 %v2672_v0 }
 0x309   : > { %1567 = vmatprep.subr.bf16.mxu0 %v2676_v53  ;;  %v3612_v53 = vrot.slane %v1375_v46, %v1383_v63 }
 0x30a   : > { %1845 = vmatpush1.bf16.msra.mxu1 %v2657_v61 }
 0x30b   : > { %1846 = vmatprep.subr.bf16.mxu1 %v2661_v48  ;;  %v3610_v48 = vrot.slane %v1375_v46, %v1379_v31 }
 0x30c   : > { %1568 = vmatpush1.bf16.msra.mxu0 %v2678_v21 }
 0x30d   : > { %1569 = vmatprep.subr.bf16.mxu0 %v2682_v2 }
 0x30e   : > { %1847 = vmatpush1.bf16.msra.mxu1 %v2663_v1 }
 0x30f   : > { %1848 = vmatprep.subr.bf16.mxu1 %v2667_v56 }
 0x310   : > { %1570 = vmatpush1.bf16.msra.mxu0 %v2684_v25 }
 0x311   : > { %1571 = vmatprep.subr.bf16.mxu0 %v2688_v4 }
 0x312   : > { %1849 = vmatpush1.bf16.msra.mxu1 %v2669_v3 }
 0x313   : > { %1850 = vmatprep.subr.bf16.mxu1 %v2673_v24 }
 0x314   : > { %1572 = vmatpush1.bf16.msra.mxu0 %v2690_v55 }
 0x315   : > { %1573 = vmatprep.subr.bf16.mxu0 %v2691_v60 }
 0x316   : > { %1851 = vmatpush1.bf16.msra.mxu1 %v2675_v9 }
 0x317   : > { %1852 = vmatprep.subr.bf16.mxu1 %v2679_v13 }
 0x318   : > { %1574 = vmatpush1.bf16.msra.mxu0 %v2693_v54 }
 0x319   : > { %1575 = vmatprep.subr.bf16.mxu0 %v2694_v22 }
 0x31a   : > { %1853 = vmatpush1.bf16.msra.mxu1 %v2681_v18 }
 0x31b   : > { %1854 = vmatprep.subr.bf16.mxu1 %v2685_v20 }
 0x31c   : > { %1576 = vmatpush1.bf16.msra.mxu0 %v2696_v26 }
 0x31d   : > { %1577 = vmatprep.subr.bf16.mxu0 %v2697_v33 }
 0x31e   : > { %1855 = vmatpush1.bf16.msra.mxu1 %v2687_v23 }
 0x320   : > { %1578 = vmatpush1.bf16.msra.mxu0 %v2699_v17 }
 0x321   : > { %1857 = vmatmul.mubr.bf16.vlgmr.msra.gmra.mrb[0].mxu1 %v1335_v34 }
 0x322   : > { %1866 = vmatprep.mubr.bf16.mxu1 %v1338_v11 }
 0x323   : > { %1580 = vmatmul.mubr.bf16.vlgmr.msra.gmra.mrb[0].mxu0 %v1335_v34 }
 0x324   : > { %1589 = vmatprep.mubr.bf16.mxu0 %v1338_v11 }
 0x329   : > { %1867 = vmatmul.mubr.bf16.gmra.mrb[4].mxu1 %v1337_v27 }
 0x32a   : > { %1876 = vmatprep.mubr.bf16.mxu1 %v1340_v28 }
 0x32b   : > { %1590 = vmatmul.mubr.bf16.gmra.mrb[4].mxu0 %v1337_v27 }
 0x32c   : > { %1599 = vmatprep.mubr.bf16.mxu0 %v1340_v28 }
 0x331   : > { %1877 = vmatmul.mubr.bf16.gmra.mrb[8].mxu1 %v1339_v29 }
 0x332   : > { %1886 = vmatprep.mubr.bf16.mxu1 %v1342_v14 }
 0x333   : > { %1600 = vmatmul.mubr.bf16.gmra.mrb[8].mxu0 %v1339_v29 }
 0x334   : > { %1609 = vmatprep.mubr.bf16.mxu0 %v1342_v14 }
 0x339   : > { %1887 = vmatmul.mubr.bf16.gmra.mrb[12].mxu1 %v1341_v47 }
 0x33b   : > { %1610 = vmatmul.mubr.bf16.gmra.mrb[12].mxu0 %v1341_v47 }
 0x3f4   : > { %v1858_v12 = vpop.f32.mrb[0].mxu1 }
 0x3f5   : > { %v1859_v35 = vadd.f32 %v1858_v12, %v3593_v32  ;;  %v1860_v36 = vpop.f32.mrb[1].mxu1 }
 0x3f6   : > { %v1861_v15 = vadd.f32 %v1860_v36, %v3595_v10  ;;  %v1862_v37 = vpop.f32.mrb[2].mxu1  ;;  %v1581_v41 = vpop.f32.mrb[0].mxu0 }
 0x3f7   : > { %v1913_v7 = vmul.f32 0.70710677, %v1859_v35  ;;  %v1863_v38 = vadd.f32 %v1862_v37, %v3593_v32  ;;  %v1864_v8 = vpop.f32.mrb[3].mxu1  ;;  %v1583_v42 = vpop.f32.mrb[1].mxu0  ;;  %v1897_v2 = vmul.f32 0.5, %v1859_v35  ;;  %v1582_v55 = vadd.f32 %v1581_v41, %v3610_v48 }
 0x3f8   : > { %v1914_v16 = vmul.f32 0.70710677, %v1861_v15  ;;  %v1865_v19 = vadd.f32 %v1864_v8, %v3595_v10  ;;  %v1585_v45 = vpop.f32.mrb[2].mxu0  ;;  %v1898_v3 = vmul.f32 0.5, %v1861_v15  ;;  %v1584_v22 = vadd.f32 %v1583_v42, %v3612_v53 }
 0x3f9   : > { %2700 = verf.f32 %v1913_v7  ;;  %v1915_v39 = vmul.f32 0.70710677, %v1863_v38  ;;  %v1587_v51 = vpop.f32.mrb[3].mxu0  ;;  %v1899_v24 = vmul.f32 0.5, %v1863_v38  ;;  %v1586_v23 = vadd.f32 %v1585_v45, %v3610_v48 }
 0x3fa   : > { %2702 = verf.f32 %v1914_v16  ;;  %v1916_v40 = vmul.f32 0.70710677, %v1865_v19  ;;  %v1900_v13 = vmul.f32 0.5, %v1865_v19  ;;  %v1588_v28 = vadd.f32 %v1587_v51, %v3612_v53 }
 0x3fb   : > { %2704 = verf.f32 %v1915_v39 }
 0x3fc   : > { %2706 = verf.f32 %v1916_v40  ;;  %v1868_v43 = vpop.f32.mrb[4].mxu1 }
 0x3fd   : > { %v1869_v50 = vadd.f32 %v1868_v43, %v3593_v32  ;;  %v1870_v6 = vpop.f32.mrb[5].mxu1 }
 0x3fe   : > { %v1871_v52 = vadd.f32 %v1870_v6, %v3595_v10  ;;  %v1872_v5 = vpop.f32.mrb[6].mxu1  ;;  %v1591_v56 = vpop.f32.mrb[4].mxu0 }
 0x3ff   : > { %v1917_v44 = vmul.f32 0.70710677, %v1869_v50  ;;  %v1873_v57 = vadd.f32 %v1872_v5, %v3593_v32  ;;  %v1874_v58 = vpop.f32.mrb[7].mxu1  ;;  %v1593_v25 = vpop.f32.mrb[5].mxu0  ;;  %v1901_v49 = vmul.f32 0.5, %v1869_v50  ;;  %v1592_v51 = vadd.f32 %v1591_v56, %v3610_v48 }
 0x400   : > { %v1918_v59 = vmul.f32 0.70710677, %v1871_v52  ;;  %v1875_v61 = vadd.f32 %v1874_v58, %v3595_v10  ;;  %v1595_v18 = vpop.f32.mrb[6].mxu0  ;;  %v1902_v63 = vmul.f32 0.5, %v1871_v52  ;;  %v1594_v52 = vadd.f32 %v1593_v25, %v3612_v53 }
 0x401   : > { %2708 = verf.f32 %v1917_v44  ;;  %v1919_v0 = vmul.f32 0.70710677, %v1873_v57  ;;  %v1597_v34 = vpop.f32.mrb[7].mxu0  ;;  %v1903_v38 = vmul.f32 0.5, %v1873_v57 }
 0x402   : > { %2710 = verf.f32 %v1918_v59  ;;  %v1920_v1 = vmul.f32 0.70710677, %v1875_v61  ;;  %v1904_v40 = vmul.f32 0.5, %v1875_v61 }
 0x403   : > { %v2701_v21 = vpop.eup %2700  ;;  %2712 = verf.f32 %v1919_v0 }
 0x404   : > { %v2703_v4 = vpop.eup %2702  ;;  %v1945_v9 = vadd.f32 1.0, %v2701_v21  ;;  %2714 = verf.f32 %v1920_v1  ;;  %v1878_v60 = vpop.f32.mrb[8].mxu1 }
 0x405   : > { %v2705_v20 = vpop.eup %2704  ;;  %v1946_v54 = vadd.f32 1.0, %v2703_v4  ;;  %v3618_v26 = vadd.f32 %v1878_v60, %v3593_v32  ;;  %v1880_v33 = vpop.f32.mrb[9].mxu1 }
 0x406   : > { %v2707_v11 = vpop.eup %2706  ;;  %v1947_v17 = vadd.f32 1.0, %v2705_v20  ;;  %v1961_v27 = vmul.f32 %v1945_v9, %v1897_v2  ;;  %v3622_v29 = vadd.f32 %v1880_v33, %v3595_v10  ;;  %v1882_v14 = vpop.f32.mrb[10].mxu1  ;;  %v1596_v9 = vadd.f32 %v1595_v18, %v3610_v48 }
 0x407   : > { %v1948_v47 = vadd.f32 1.0, %v2707_v11  ;;  %v1962_v30 = vmul.f32 %v1946_v54, %v1898_v3  ;;  %v1921_v31 = vmul.f32 0.70710677, %v3618_v26  ;;  %v1884_v62 = vpop.f32.mrb[11].mxu1  ;;  %v3627_v7 = vadd.f32 %v1882_v14, %v3593_v32  ;;  %v1601_v19 = vpop.f32.mrb[8].mxu0 }
 0x408   : > { %v1977_v12 = vmul.f32 %v1961_v27, %v1582_v55  ;;  %v1963_v35 = vmul.f32 %v1947_v17, %v1899_v24  ;;  %v1922_v36 = vmul.f32 0.70710677, %v3622_v29  ;;  %v3630_v16 = vadd.f32 %v1884_v62, %v3595_v10  ;;  %v1603_v45 = vpop.f32.mrb[9].mxu0 }
 0x409   : > { %v1978_v15 = vmul.f32 %v1962_v30, %v1584_v22  ;;  %2716 = verf.f32 %v1921_v31  ;;  %v1964_v37 = vmul.f32 %v1948_v47, %v1900_v13  ;;  %v1923_v43 = vmul.f32 0.70710677, %v3627_v7  ;;  %v3636_v44 = vpop.f32.mrb[10].mxu0 }
 0x40a   : > { %v1979_v8 = vmul.f32 %v1963_v35, %v1586_v23  ;;  %2718 = verf.f32 %v1922_v36  ;;  %v1924_v46 = vmul.f32 0.70710677, %v3630_v16  ;;  %v1607_v1 = vpop.f32.mrb[11].mxu0  ;;  %v1598_v54 = vadd.f32 %v1597_v34, %v3612_v53 }
 0x40b   : > { %v2709_v39 = vpop.eup %2708  ;;  %v2434_v41 = vpack.c.bf16 %v1978_v15, %v1977_v12  ;;  %v1980_v42 = vmul.f32 %v1964_v37, %v1588_v28  ;;  %2720 = verf.f32 %v1923_v43  ;;  %v1905_v14 = vmul.f32 0.5, %v3618_v26 }
 0x40c   : > { %v2711_v50 = vpop.eup %2710  ;;  %v1949_v6 = vadd.f32 1.0, %v2709_v39  ;;  %v1888_v5 = vpop.f32.mrb[12].mxu1  ;;  %2722 = verf.f32 %v1924_v46  ;;  %v1604_v15 = vadd.f32 %v1603_v45, %v3612_v53 }
 0x40d   : > { %v2713_v57 = vpop.eup %2712  ;;  %v1950_v58 = vadd.f32 1.0, %v2711_v50  ;;  %2041 = vst [vmem:[%s3066_s20] sm:$0xff] %v2434_v41  ;;  %v2435_v59 = vpack.c.bf16 %v1980_v42, %v1979_v8  ;;  %v3640_v61 = vadd.f32 %v1888_v5, %v3593_v32  ;;  %v1890_v0 = vpop.f32.mrb[13].mxu1  ;;  %v1606_v50 = vadd.f32 %v3636_v44, %v3610_v48 }
 0x40e   : > { %v2715_v21 = vpop.eup %2714  ;;  %v1951_v2 = vadd.f32 1.0, %v2713_v57  ;;  %v1965_v56 = vmul.f32 %v1949_v6, %v1901_v49  ;;  %v1891_v3 = vadd.f32 %v1890_v0, %v3595_v10  ;;  %v1892_v24 = vpop.f32.mrb[14].mxu1 }
 0x40f   : > { %v1952_v25 = vadd.f32 1.0, %v2715_v21  ;;  %2042 = vst [vmem:[%s3066_s20 + $0x8] sm:$0xff] %v2435_v59  ;;  %v1966_v4 = vmul.f32 %v1950_v58, %v1902_v63  ;;  %v1925_v13 = vmul.f32 0.70710677, %v3640_v61  ;;  %v1894_v55 = vpop.f32.mrb[15].mxu1  ;;  %v1893_v11 = vadd.f32 %v1892_v24, %v3593_v32  ;;  %v1611_v28 = vpop.f32.mrb[12].mxu0 }
 0x410   : > { %v1981_v60 = vmul.f32 %v1965_v56, %v1592_v51  ;;  %v1967_v20 = vmul.f32 %v1951_v2, %v1903_v38  ;;  %v1926_v22 = vmul.f32 0.70710677, %v1891_v3  ;;  %v1895_v27 = vadd.f32 %v1894_v55, %v3595_v10  ;;  %v1613_v31 = vpop.f32.mrb[13].mxu0 }
 0x411   : > { %v1982_v23 = vmul.f32 %v1966_v4, %v1594_v52  ;;  %2724 = verf.f32 %v1925_v13  ;;  %v1968_v33 = vmul.f32 %v1952_v25, %v1904_v40  ;;  %v1927_v30 = vmul.f32 0.70710677, %v1893_v11  ;;  %v1615_v35 = vpop.f32.mrb[14].mxu0 }
 0x412   : > { %v1983_v17 = vmul.f32 %v1967_v20, %v1596_v9  ;;  %2726 = verf.f32 %v1926_v22  ;;  %v1906_v63 = vmul.f32 0.5, %v3622_v29  ;;  %v1928_v12 = vmul.f32 0.70710677, %v1895_v27  ;;  %v1617_v26 = vpop.f32.mrb[15].mxu0 }
 0x413   : > { %v2717_v18 = vpop.eup %2716  ;;  %v2436_v47 = vpack.c.bf16 %v1982_v23, %v1981_v60  ;;  %v1984_v49 = vmul.f32 %v1968_v33, %v1598_v54  ;;  %v1602_v32 = vadd.f32 %v1601_v19, %v3610_v48  ;;  %2728 = verf.f32 %v1927_v30 }
 0x414   : > { %v2719_v34 = vpop.eup %2718  ;;  %v1953_v62 = vadd.f32 1.0, %v2717_v18  ;;  %2730 = verf.f32 %v1928_v12  ;;  %v1907_v40 = vmul.f32 0.5, %v3627_v7  ;;  %v1908_v19 = vmul.f32 0.5, %v3630_v16 }
 0x415   : > { %v1954_v36 = vadd.f32 1.0, %v2719_v34  ;;  %2043 = vst [vmem:[%s3066_s20 + $0x10] sm:$0xff] %v2436_v47  ;;  %v2437_v10 = vpack.c.bf16 %v1984_v49, %v1983_v17  ;;  %v2721_v38 = vpop.eup %2720  ;;  %v1608_v51 = vadd.f32 %v1607_v1, %v3612_v53  ;;  %v1909_v57 = vmul.f32 0.5, %v3640_v61 }
 0x416   : > { %v1969_v37 = vmul.f32 %v1953_v62, %v1905_v14  ;;  %v2723_v39 = vpop.eup %2722  ;;  %v1955_v29 = vadd.f32 1.0, %v2721_v38  ;;  %v1612_v59 = vadd.f32 %v1611_v28, %v3610_v48  ;;  %v1910_v16 = vmul.f32 0.5, %v1891_v3 }
 0x417   : > { %2044 = vst [vmem:[%s3066_s20 + $0x18] sm:$0xff] %v2437_v10  ;;  %v1970_v8 = vmul.f32 %v1954_v36, %v1906_v63  ;;  %v1956_v42 = vadd.f32 1.0, %v2723_v39  ;;  %v1614_v44 = vadd.f32 %v1613_v31, %v3612_v53  ;;  %v1911_v4 = vmul.f32 0.5, %v1893_v11 }
 0x418   : > { %v1985_v41 = vmul.f32 %v1969_v37, %v1602_v32  ;;  %v1971_v45 = vmul.f32 %v1955_v29, %v1907_v40  ;;  %v1912_v13 = vmul.f32 0.5, %v1895_v27  ;;  %v1616_v3 = vadd.f32 %v1615_v35, %v3610_v48  ;;  %v2113_v48 = vld [vmem:[%s3066_s20] sm:$0xff] (%p3727_p9) }
 0x419   : > { %v1986_v43 = vmul.f32 %v1970_v8, %v1604_v15  ;;  %v1972_v52 = vmul.f32 %v1956_v42, %v1908_v19  ;;  %v1618_v22 = vadd.f32 %v1617_v26, %v3612_v53  ;;  %v2115_v53 = vld [vmem:[%s3066_s20 + $0x8] sm:$0xff] (%p3727_p9)  ;;  %2114 = vst [vmem:[%s2071_s18] sm:$0xff] (%p3727_p9), %v2113_v48 }
 0x41a   : > { %v1987_v58 = vmul.f32 %v1971_v45, %v1606_v50  ;;  %2116 = vst [vmem:[%s2071_s18 + $0x20] sm:$0xff] (%p3727_p9), %v2115_v53 }
 0x41b   : > { %v2725_v6 = vpop.eup %2724  ;;  %v2438_v46 = vpack.c.bf16 %v1986_v43, %v1985_v41  ;;  %v1988_v21 = vmul.f32 %v1972_v52, %v1608_v51 }
 0x41c   : > { %v2727_v5 = vpop.eup %2726  ;;  %v1957_v7 = vadd.f32 1.0, %v2725_v6  ;;  %v2117_v11 = vld [vmem:[%s3066_s20 + $0x10] sm:$0xff] (%p3727_p9) }
 0x41d   : > { %v1958_v0 = vadd.f32 1.0, %v2727_v5  ;;  %2045 = vst [vmem:[%s3066_s20 + $0x20] sm:$0xff] %v2438_v46  ;;  %v2729_v56 = vpop.eup %2728  ;;  %v2439_v24 = vpack.c.bf16 %v1988_v21, %v1987_v58  ;;  %2118 = vst [vmem:[%s2071_s18 + $0x40] sm:$0xff] (%p3727_p9), %v2117_v11 }
 0x41e   : > { %v1973_v2 = vmul.f32 %v1957_v7, %v1909_v57  ;;  %v2731_v25 = vpop.eup %2730  ;;  %v1959_v61 = vadd.f32 1.0, %v2729_v56  ;;  %v2119_v27 = vld [vmem:[%s3066_s20 + $0x18] sm:$0xff] (%p3727_p9) }
 0x41f   : > { %v1974_v1 = vmul.f32 %v1958_v0, %v1910_v16  ;;  %v1960_v55 = vadd.f32 1.0, %v2731_v25  ;;  %2046 = vst [vmem:[%s3066_s20 + $0x28] sm:$0xff] %v2439_v24  ;;  %2120 = vst [vmem:[%s2071_s18 + $0x60] sm:$0xff] (%p3727_p9), %v2119_v27 }
 0x420   : > { %v1989_v9 = vmul.f32 %v1973_v2, %v1612_v59  ;;  %v1975_v20 = vmul.f32 %v1959_v61, %v1911_v4 }
 0x421   : > { %v1990_v60 = vmul.f32 %v1974_v1, %v1614_v44  ;;  %v1976_v23 = vmul.f32 %v1960_v55, %v1912_v13  ;;  %2065 = sbr.rel (!%p3727_p9) target bundleno = 1072 (0x430), region = 118 }
 0x422   : > { %v1991_v33 = vmul.f32 %v1975_v20, %v1616_v3 }
 0x423   : > { %v2440_v54 = vpack.c.bf16 %v1990_v60, %v1989_v9  ;;  %v1992_v17 = vmul.f32 %v1976_v23, %v1618_v22 }
 0x424   : > { %v2121_v18 = vld [vmem:[%s3066_s20 + $0x20] sm:$0xff] (%p3727_p9) }
 0x425   : > { %2047 = vst [vmem:[%s3066_s20 + $0x30] sm:$0xff] %v2440_v54  ;;  %v2441_v28 = vpack.c.bf16 %v1992_v17, %v1991_v33  ;;  %2122 = vst [vmem:[%s2071_s18 + $0x80] sm:$0xff] (%p3727_p9), %v2121_v18 }
 0x426   : > { %v2123_v14 = vld [vmem:[%s3066_s20 + $0x28] sm:$0xff] (%p3727_p9) }
 0x427   : > { %2048 = vst [vmem:[%s3066_s20 + $0x38] sm:$0xff] %v2441_v28  ;;  %2124 = vst [vmem:[%s2071_s18 + $0xa0] sm:$0xff] (%p3727_p9), %v2123_v14 }
 0x42c   : > { %v2125_v47 = vld [vmem:[%s3066_s20 + $0x30] sm:$0xff] }
 0x42d   : > { %2126 = vst [vmem:[%s2071_s18 + $0xc0] sm:$0xff] %v2125_v47 }
 0x42e   : > { %v2127_v49 = vld [vmem:[%s3066_s20 + $0x38] sm:$0xff] }
 0x42f   : > { %2128 = vst [vmem:[%s2071_s18 + $0xe0] sm:$0xff] %v2127_v49 }
 0x430 PF: > { %s26_s26 = sadd.s32 1, %s2810_s26   ;;  %s3728_s24 = sld [smem:[#allocation10_spill]] }
 0x431   : > { %p23_p5 = scmp.ge.s32.totalorder %s26_s26, 6   ;;  %s3729_s16 = sld [smem:[#allocation8_spill]] }
 0x432   : > { %s3730_s25 = sld [smem:[#allocation9_spill]]  ;;  %s3731_s21 = smov %s2794_s22 }
 0x433   : > { %s3732_s22 = smov %s2798_s23  ;;  %25 = sbr.rel (!%p23_p5) target bundleno = 7 (0x7), region = 216 }
 0x436   : > { %s3733_s23 = smov %s3728_s24 }
 0x437   : > { %s3734_s24 = smov %s3729_s16 }
 0x43a   :  { %2153 = vsyncpa [#allocation5], 1 }
 0x43b   :  { %2155 = vsyncpa [#allocation5 + $0x1], 1 }

// kernel: transformer_forward.10
= control target key start
LH: loop header
LB: loop body
LE: loop exit
PB: predicated region body
PF: predicated region fallthrough
CT: control target
= control target key end

     0   :  { %s3359_s30 = smov 0   ;;  %s3361_s10 = smov 0   ;;  %s4403_s0 = inlined_call_operand.vmem [shape: bf16[64,1024], index: 0, kind: input, shape index: {}]   ;;  %s4404_s1 = inlined_call_operand.vmem [shape: bf16[1024,256], index: 1, kind: input, shape index: {}]   ;;  %s4405_s2 = inlined_call_operand.vmem [shape: f32[1,256], index: 2, kind: input, shape index: {}]   ;;  %s4406_s3 = inlined_call_operand.vmem [shape: f32[1,256], index: 3, kind: input, shape index: {}]   ;;  %s4407_s4 = inlined_call_operand.vmem [shape: f32[64,256], index: 4, kind: input, shape index: {}]   ;;  %s4408_s5 = inlined_call_operand.vmem [shape: f32[1,256], index: 5, kind: input, shape index: {}]   ;;  %s4409_s6 = inlined_call_operand.vmem [shape: f32[1,256], index: 6, kind: input, shape index: {}]   ;;  %s4410_s7 = inlined_call_operand.vmem [shape: bf16[256,768], index: 7, kind: input, shape index: {}]   ;;  %s4411_s8 = inlined_call_operand.vmem [shape: f32[64,256], index: 8, kind: output, shape index: {0}]   ;;  %s4412_s9 = inlined_call_operand.vmem [shape: bf16[64,768], index: 9, kind: output, shape index: {1}]  }
   0x1   :  { %s3363_s11 = smov 0   ;;  %s3365_s12 = smov 0  }
   0x2   :  { %s3367_s13 = smov 0  }
   0x3 LB: > { %s29_s14 = sadd.s32 1, %s3303_s12  ;;  %s2647_s15 = sadd.s32 4294967295, %s3307_s13   ;;  %s3307_s13 = sphi %s3367_s13, %s20_s13   ;;  %s3303_s12 = sphi %s3365_s12, %s4417_s12   ;;  %s3299_s11 = sphi %s3363_s11, %s4416_s11   ;;  %s3295_s10 = sphi %s3361_s10, %s4415_s10   ;;  %s3291_s30 = sphi %s3359_s30, %s4414_s30  }
   0x4   : > { %p30_p0 = scmp.ge.s32.totalorder %s29_s14, 3  ;;  %p203_p1 = scmp.ne.s32.totalorder %s3295_s10, %s3291_s30 }
   0x5   : > { %p204_p2 = scmp.eq.s32.totalorder %s3307_s13, 0  ;;  %p261_p4 = scmp.eq.s32.totalorder %s2647_s15, 2 }
   0x6   : > { %s4419_s14 = smov (%p30_p0, %s29_s14), 0  ;;  %s196_s17 = sadd.s32 1, %s3295_s10 }
   0x7   : > { %p205_p3 = por %p204_p2, %p203_p1  ;;  %s193_s16 = ssub.s32 %s3303_s12, %s4419_s14 }
   0x8   : > { %p194_p5 = scmp.eq.s32.totalorder %s193_s16, 0  ;;  %p3394_p6 = por %p261_p4, %p203_p1 }
   0x9   : > { %p2652_p7 = scmp.ge.s32.totalorder %s3307_s13, 3 }
   0xa   : > { %s3399_s19 = scalar_select %p194_p5, %s3295_s10, %s196_s17  }
   0xb   : > { %318 = sbr.rel (%p2652_p7) target bundleno = 38 (0x26), region = 44 }
  0x12   : > { %321 = sbr.rel (!%p205_p3) target bundleno = 38 (0x26), region = 48  ;;  %s323_s20 = sand.u32 (%p205_p3), 1, %s3295_s10  }
  0x13   : > { %s2867_s21 = sshll.u32 (%p205_p3), %s3303_s12, 3  ;;  %s2653_s22 = sshll.u32 (%p205_p3), %s323_s20, 8 }
  0x14   : > { %s3407_s25 = scalar_lea.vmem (%p205_p3), %s4410_s7, %s2867_s21  ;;  %s3412_s26 = scalar_lea.vmem (%p205_p3), [#allocation3], %s2653_s22 }
  0x15   : > { %v418_v0 = vld [vmem:[%s3407_s25] sm:$0xff] (%p205_p3)  ;;  %v420_v1 = vld [vmem:[%s3407_s25 + $0x18] sm:$0xff] (%p205_p3)  ;;  %v422_v2 = vld [vmem:[%s3407_s25 + $0x30] sm:$0xff] (%p205_p3) }
  0x16   : > { %419 = vst [vmem:[%s3412_s26] sm:$0xff] (%p205_p3), %v418_v0  ;;  %421 = vst [vmem:[%s3412_s26 + $0x8] sm:$0xff] (%p205_p3), %v420_v1  ;;  %v424_v3 = vld [vmem:[%s3407_s25 + $0x48] sm:$0xff] (%p205_p3)  ;;  %v426_v4 = vld [vmem:[%s3407_s25 + $0x60] sm:$0xff] (%p205_p3) }
  0x17   : > { %423 = vst [vmem:[%s3412_s26 + $0x10] sm:$0xff] (%p205_p3), %v422_v2  ;;  %v428_v5 = vld [vmem:[%s3407_s25 + $0x78] sm:$0xff] (%p205_p3)  ;;  %425 = vst [vmem:[%s3412_s26 + $0x18] sm:$0xff] (%p205_p3), %v424_v3  ;;  %v430_v6 = vld [vmem:[%s3407_s25 + $0x90] sm:$0xff] (%p205_p3) }
  0x18   : > { %427 = vst [vmem:[%s3412_s26 + $0x20] sm:$0xff] (%p205_p3), %v426_v4  ;;  %429 = vst [vmem:[%s3412_s26 + $0x28] sm:$0xff] (%p205_p3), %v428_v5  ;;  %v432_v7 = vld [vmem:[%s3407_s25 + $0xa8] sm:$0xff] (%p205_p3)  ;;  %v434_v8 = vld [vmem:[%s3407_s25 + $0xc0] sm:$0xff] (%p205_p3) }
  0x19   : > { %431 = vst [vmem:[%s3412_s26 + $0x30] sm:$0xff] %v430_v6  ;;  %433 = vst [vmem:[%s3412_s26 + $0x38] sm:$0xff] %v432_v7  ;;  %v436_v9 = vld [vmem:[%s3407_s25 + $0xd8] sm:$0xff]  ;;  %v438_v10 = vld [vmem:[%s3407_s25 + $0xf0] sm:$0xff] }
  0x1a   : > { %435 = vst [vmem:[%s3412_s26 + $0x40] sm:$0xff] %v434_v8  ;;  %v440_v11 = vld [vmem:[%s3407_s25 + $0x108] sm:$0xff]  ;;  %437 = vst [vmem:[%s3412_s26 + $0x48] sm:$0xff] %v436_v9  ;;  %v442_v12 = vld [vmem:[%s3407_s25 + $0x120] sm:$0xff] }
  0x1b   : > { %439 = vst [vmem:[%s3412_s26 + $0x50] sm:$0xff] %v438_v10  ;;  %441 = vst [vmem:[%s3412_s26 + $0x58] sm:$0xff] %v440_v11  ;;  %v444_v13 = vld [vmem:[%s3407_s25 + $0x138] sm:$0xff]  ;;  %v446_v14 = vld [vmem:[%s3407_s25 + $0x150] sm:$0xff] }
  0x1c   : > { %443 = vst [vmem:[%s3412_s26 + $0x60] sm:$0xff] %v442_v12  ;;  %445 = vst [vmem:[%s3412_s26 + $0x68] sm:$0xff] %v444_v13  ;;  %v448_v15 = vld [vmem:[%s3407_s25 + $0x168] sm:$0xff]  ;;  %v450_v16 = vld [vmem:[%s3407_s25 + $0x180] sm:$0xff] }
  0x1d   : > { %447 = vst [vmem:[%s3412_s26 + $0x70] sm:$0xff] %v446_v14  ;;  %v452_v17 = vld [vmem:[%s3407_s25 + $0x198] sm:$0xff]  ;;  %449 = vst [vmem:[%s3412_s26 + $0x78] sm:$0xff] %v448_v15  ;;  %v454_v18 = vld [vmem:[%s3407_s25 + $0x1b0] sm:$0xff] }
  0x1e   : > { %451 = vst [vmem:[%s3412_s26 + $0x80] sm:$0xff] %v450_v16  ;;  %453 = vst [vmem:[%s3412_s26 + $0x88] sm:$0xff] %v452_v17  ;;  %v456_v19 = vld [vmem:[%s3407_s25 + $0x1c8] sm:$0xff]  ;;  %v458_v20 = vld [vmem:[%s3407_s25 + $0x1e0] sm:$0xff] }
  0x1f   : > { %455 = vst [vmem:[%s3412_s26 + $0x90] sm:$0xff] %v454_v18  ;;  %457 = vst [vmem:[%s3412_s26 + $0x98] sm:$0xff] %v456_v19  ;;  %v460_v21 = vld [vmem:[%s3407_s25 + $0x1f8] sm:$0xff]  ;;  %v462_v22 = vld [vmem:[%s3407_s25 + $0x210] sm:$0xff] }
  0x20   : > { %459 = vst [vmem:[%s3412_s26 + $0xa0] sm:$0xff] %v458_v20  ;;  %v464_v23 = vld [vmem:[%s3407_s25 + $0x228] sm:$0xff]  ;;  %461 = vst [vmem:[%s3412_s26 + $0xa8] sm:$0xff] %v460_v21  ;;  %v466_v24 = vld [vmem:[%s3407_s25 + $0x240] sm:$0xff] }
  0x21   : > { %463 = vst [vmem:[%s3412_s26 + $0xb0] sm:$0xff] %v462_v22  ;;  %465 = vst [vmem:[%s3412_s26 + $0xb8] sm:$0xff] %v464_v23  ;;  %v468_v25 = vld [vmem:[%s3407_s25 + $0x258] sm:$0xff]  ;;  %v470_v26 = vld [vmem:[%s3407_s25 + $0x270] sm:$0xff] }
  0x22   : > { %467 = vst [vmem:[%s3412_s26 + $0xc0] sm:$0xff] %v466_v24  ;;  %469 = vst [vmem:[%s3412_s26 + $0xc8] sm:$0xff] %v468_v25  ;;  %v472_v27 = vld [vmem:[%s3407_s25 + $0x288] sm:$0xff]  ;;  %v474_v28 = vld [vmem:[%s3407_s25 + $0x2a0] sm:$0xff] }
  0x23   : > { %471 = vst [vmem:[%s3412_s26 + $0xd0] sm:$0xff] %v470_v26  ;;  %v476_v29 = vld [vmem:[%s3407_s25 + $0x2b8] sm:$0xff]  ;;  %473 = vst [vmem:[%s3412_s26 + $0xd8] sm:$0xff] %v472_v27  ;;  %v478_v30 = vld [vmem:[%s3407_s25 + $0x2d0] sm:$0xff] }
  0x24   : > { %475 = vst [vmem:[%s3412_s26 + $0xe0] sm:$0xff] %v474_v28  ;;  %477 = vst [vmem:[%s3412_s26 + $0xe8] sm:$0xff] %v476_v29  ;;  %v480_v31 = vld [vmem:[%s3407_s25 + $0x2e8] sm:$0xff] }
  0x25   : > { %479 = vst [vmem:[%s3412_s26 + $0xf0] sm:$0xff] %v478_v30  ;;  %481 = vst [vmem:[%s3412_s26 + $0xf8] sm:$0xff] %v480_v31 }
  0x26 PF: > { %p2656_p8 = scmp.ge.s32.totalorder %s3307_s13, 1  ;;  %p486_p9 = scmp.lt.s32.totalorder %s3307_s13, 4 }
  0x28   : > { %p487_p10 = pnand %p2656_p8, %p486_p9 }
  0x29   : > { %s493_s27 = sand.u32 (!%p487_p10), 1, %s3291_s30   ;;  %p2659_p11 = scmp.ne.s32.totalorder (!%p487_p10), %s3299_s11, 0 }
  0x2a   : > { %490 = sbr.rel (%p487_p10) target bundleno = 1043 (0x413), region = 86  ;;  %s2657_s28 = sshll.u32 (!%p487_p10), %s493_s27, 8 }
  0x2b   : > { %s2658_s29 = sshll.u32 (!%p487_p10), %s493_s27, 6  ;;  %s3478_s15 = scalar_lea.vmem (!%p487_p10), [#allocation3], %s2657_s28 }
  0x2c   : > { %s3480_s16 = scalar_lea.vmem (!%p487_p10), [#allocation4], %s2658_s29 }
  0x31   : > { %572 = sbr.rel (%p2659_p11) target bundleno = 743 (0x2e7), region = 94  ;;  %v3013_v32 = vld [vmem:[%s4404_s1 + $0x4] ss:$8 sps:$4 sm:$0xff] (!%p2659_p11)   ;;  %v3017_v34 = vld [vmem:[%s4404_s1] ss:$8 sps:$4 sm:$0xff] (!%p2659_p11)   ;;  %v575_v21 = vld [vmem:[%s4403_s0 + $0x10] sm:$0xff] (!%p2659_p11) }
  0x32   : > { %v3015_v33 = vld [vmem:[%s4404_s1 + $0x204] ss:$8 sps:$4 sm:$0xff] (!%p2659_p11)   ;;  %1561 = vmatprep.subr.bf16.mxu1 (!%p2659_p11), %v3013_v32  ;;  %v3018_v35 = vld [vmem:[%s4404_s1 + $0x200] ss:$8 sps:$4 sm:$0xff] (!%p2659_p11)   ;;  %v3019_v36 = vld [vmem:[%s4404_s1 + $0x14] ss:$8 sps:$4 sm:$0xff] (!%p2659_p11)  }
  0x33   : > { %1707 = vmatprep.subr.bf16.mxu0 (!%p2659_p11), %v3015_v33  ;;  %1562 = vmatpush1.bf16.msra.mxu1 (!%p2659_p11), %v3017_v34  ;;  %v3021_v37 = vld [vmem:[%s4404_s1 + $0x214] ss:$8 sps:$4 sm:$0xff] (!%p2659_p11)   ;;  %v3023_v38 = vld [vmem:[%s4404_s1 + $0x10] ss:$8 sps:$4 sm:$0xff] (!%p2659_p11)   ;;  %v3025_v40 = vld [vmem:[%s4404_s1 + $0x24] ss:$8 sps:$4 sm:$0xff] (!%p2659_p11)  }
  0x34   : > { %1708 = vmatpush1.bf16.msra.mxu0 (!%p2659_p11), %v3018_v35  ;;  %1563 = vmatprep.subr.bf16.mxu1 (!%p2659_p11), %v3019_v36  ;;  %v3024_v39 = vld [vmem:[%s4404_s1 + $0x210] ss:$8 sps:$4 sm:$0xff] (!%p2659_p11)   ;;  %v3027_v41 = vld [vmem:[%s4404_s1 + $0x224] ss:$8 sps:$4 sm:$0xff] (!%p2659_p11)   ;;  %v3029_v42 = vld [vmem:[%s4404_s1 + $0x20] ss:$8 sps:$4 sm:$0xff] (!%p2659_p11)  }
  0x35   : > { %1709 = vmatprep.subr.bf16.mxu0 (!%p2659_p11), %v3021_v37  ;;  %v3030_v43 = vld [vmem:[%s4404_s1 + $0x220] ss:$8 sps:$4 sm:$0xff] (!%p2659_p11)   ;;  %v3031_v44 = vld [vmem:[%s4404_s1 + $0x34] ss:$8 sps:$4 sm:$0xff] (!%p2659_p11)   ;;  %v3035_v46 = vld [vmem:[%s4404_s1 + $0x30] ss:$8 sps:$4 sm:$0xff] (!%p2659_p11)  }
  0x36   : > { %v3033_v45 = vld [vmem:[%s4404_s1 + $0x234] ss:$8 sps:$4 sm:$0xff] (!%p2659_p11)   ;;  %v3036_v47 = vld [vmem:[%s4404_s1 + $0x230] ss:$8 sps:$4 sm:$0xff] (!%p2659_p11)   ;;  %v3037_v48 = vld [vmem:[%s4404_s1 + $0x44] ss:$8 sps:$4 sm:$0xff] (!%p2659_p11)  }
  0x37   : > { %1564 = vmatpush1.bf16.msra.mxu1 (!%p2659_p11), %v3023_v38  ;;  %v3039_v49 = vld [vmem:[%s4404_s1 + $0x244] ss:$8 sps:$4 sm:$0xff] (!%p2659_p11)   ;;  %v3041_v50 = vld [vmem:[%s4404_s1 + $0x40] ss:$8 sps:$4 sm:$0xff] (!%p2659_p11)   ;;  %v3043_v52 = vld [vmem:[%s4404_s1 + $0x54] ss:$8 sps:$4 sm:$0xff] (!%p2659_p11)  }
  0x38   : > { %1710 = vmatpush1.bf16.msra.mxu0 %v3024_v39  ;;  %1565 = vmatprep.subr.bf16.mxu1 %v3025_v40  ;;  %v3042_v51 = vld [vmem:[%s4404_s1 + $0x240] ss:$8 sps:$4 sm:$0xff]   ;;  %v3045_v53 = vld [vmem:[%s4404_s1 + $0x254] ss:$8 sps:$4 sm:$0xff]   ;;  %v3047_v54 = vld [vmem:[%s4404_s1 + $0x50] ss:$8 sps:$4 sm:$0xff]  }
  0x39   : > { %1711 = vmatprep.subr.bf16.mxu0 %v3027_v41  ;;  %v3048_v55 = vld [vmem:[%s4404_s1 + $0x250] ss:$8 sps:$4 sm:$0xff]   ;;  %v3049_v56 = vld [vmem:[%s4404_s1 + $0x64] ss:$8 sps:$4 sm:$0xff]   ;;  %v3053_v58 = vld [vmem:[%s4404_s1 + $0x60] ss:$8 sps:$4 sm:$0xff]  }
  0x3a   : > { %v3051_v57 = vld [vmem:[%s4404_s1 + $0x264] ss:$8 sps:$4 sm:$0xff]   ;;  %v3054_v59 = vld [vmem:[%s4404_s1 + $0x260] ss:$8 sps:$4 sm:$0xff]   ;;  %v3055_v60 = vld [vmem:[%s4404_s1 + $0x74] ss:$8 sps:$4 sm:$0xff]  }
  0x3b   : > { %1566 = vmatpush1.bf16.msra.mxu1 %v3029_v42  ;;  %v3057_v61 = vld [vmem:[%s4404_s1 + $0x274] ss:$8 sps:$4 sm:$0xff]   ;;  %v3059_v62 = vld [vmem:[%s4404_s1 + $0x70] ss:$8 sps:$4 sm:$0xff]   ;;  %v3061_v0 = vld [vmem:[%s4404_s1 + $0x84] ss:$8 sps:$4 sm:$0xff]  }
  0x3c   : > { %1712 = vmatpush1.bf16.msra.mxu0 %v3030_v43  ;;  %1567 = vmatprep.subr.bf16.mxu1 %v3031_v44  ;;  %v3060_v63 = vld [vmem:[%s4404_s1 + $0x270] ss:$8 sps:$4 sm:$0xff]   ;;  %v3063_v1 = vld [vmem:[%s4404_s1 + $0x284] ss:$8 sps:$4 sm:$0xff]   ;;  %v3065_v2 = vld [vmem:[%s4404_s1 + $0x80] ss:$8 sps:$4 sm:$0xff]  }
  0x3d   : > { %1713 = vmatprep.subr.bf16.mxu0 %v3033_v45  ;;  %v3066_v3 = vld [vmem:[%s4404_s1 + $0x280] ss:$8 sps:$4 sm:$0xff]   ;;  %v3067_v4 = vld [vmem:[%s4404_s1 + $0x94] ss:$8 sps:$4 sm:$0xff]   ;;  %v3071_v6 = vld [vmem:[%s4404_s1 + $0x90] ss:$8 sps:$4 sm:$0xff]  }
  0x3e   : > { %v3069_v5 = vld [vmem:[%s4404_s1 + $0x294] ss:$8 sps:$4 sm:$0xff]   ;;  %v3072_v7 = vld [vmem:[%s4404_s1 + $0x290] ss:$8 sps:$4 sm:$0xff]   ;;  %v3073_v8 = vld [vmem:[%s4404_s1 + $0xa4] ss:$8 sps:$4 sm:$0xff]  }
  0x3f   : > { %1568 = vmatpush1.bf16.msra.mxu1 %v3035_v46  ;;  %v3075_v9 = vld [vmem:[%s4404_s1 + $0x2a4] ss:$8 sps:$4 sm:$0xff]   ;;  %v3077_v10 = vld [vmem:[%s4404_s1 + $0xa0] ss:$8 sps:$4 sm:$0xff]   ;;  %v3079_v12 = vld [vmem:[%s4404_s1 + $0xb4] ss:$8 sps:$4 sm:$0xff]  }
  0x40   : > { %1714 = vmatpush1.bf16.msra.mxu0 %v3036_v47  ;;  %1569 = vmatprep.subr.bf16.mxu1 %v3037_v48  ;;  %v3078_v11 = vld [vmem:[%s4404_s1 + $0x2a0] ss:$8 sps:$4 sm:$0xff]   ;;  %v3081_v13 = vld [vmem:[%s4404_s1 + $0x2b4] ss:$8 sps:$4 sm:$0xff]   ;;  %v3083_v14 = vld [vmem:[%s4404_s1 + $0xb0] ss:$8 sps:$4 sm:$0xff]  }
  0x41   : > { %1715 = vmatprep.subr.bf16.mxu0 %v3039_v49  ;;  %v3084_v15 = vld [vmem:[%s4404_s1 + $0x2b0] ss:$8 sps:$4 sm:$0xff]   ;;  %v573_v16 = vld [vmem:[%s4403_s0] sm:$0xff]  ;;  %v3091_v26 = vld [vmem:[%s4404_s1 + $0xd4] ss:$8 sps:$4 sm:$0xff]  }
  0x42   : > { %v577_v17 = vld [vmem:[%s4403_s0 + $0x20] sm:$0xff]  ;;  %v579_v22 = vld [vmem:[%s4403_s0 + $0x30] sm:$0xff] }
  0x43   : > { %1570 = vmatpush1.bf16.msra.mxu1 %v3041_v50  ;;  %v3085_v18 = vld [vmem:[%s4404_s1 + $0xc4] ss:$8 sps:$4 sm:$0xff]   ;;  %v2661_v20 = vcombine.high %v573_v16, %v577_v17  ;;  %v2665_v23 = vcombine.high %v575_v21, %v579_v22  ;;  %v3089_v24 = vld [vmem:[%s4404_s1 + $0xc0] ss:$8 sps:$4 sm:$0xff]   ;;  %v3093_v27 = vld [vmem:[%s4404_s1 + $0x2d4] ss:$8 sps:$4 sm:$0xff]   ;;  %v2660_v40 = vcombine.low %v573_v16, %v577_v17  ;;  %v2664_v42 = vcombine.low %v575_v21, %v579_v22 }
  0x44   : > { %1716 = vmatpush1.bf16.msra.mxu0 %v3042_v51  ;;  %1571 = vmatprep.subr.bf16.mxu1 %v3043_v52  ;;  %v3087_v19 = vld [vmem:[%s4404_s1 + $0x2c4] ss:$8 sps:$4 sm:$0xff]   ;;  %v3090_v25 = vld [vmem:[%s4404_s1 + $0x2c0] ss:$8 sps:$4 sm:$0xff]   ;;  %v3095_v28 = vld [vmem:[%s4404_s1 + $0xd0] ss:$8 sps:$4 sm:$0xff]  }
  0x45   : > { %1717 = vmatprep.subr.bf16.mxu0 %v3045_v53  ;;  %1593 = vmatprep.mubr.bf16.mxu1 %v2661_v20  ;;  %v3096_v29 = vld [vmem:[%s4404_s1 + $0x2d0] ss:$8 sps:$4 sm:$0xff]   ;;  %v3097_v30 = vld [vmem:[%s4404_s1 + $0xe4] ss:$8 sps:$4 sm:$0xff]   ;;  %v3101_v32 = vld [vmem:[%s4404_s1 + $0xe0] ss:$8 sps:$4 sm:$0xff]  }
  0x46   : > { %1739 = vmatprep.mubr.bf16.mxu0 %v2665_v23  ;;  %v3099_v31 = vld [vmem:[%s4404_s1 + $0x2e4] ss:$8 sps:$4 sm:$0xff]   ;;  %v3102_v33 = vld [vmem:[%s4404_s1 + $0x2e0] ss:$8 sps:$4 sm:$0xff]   ;;  %v3103_v34 = vld [vmem:[%s4404_s1 + $0xf4] ss:$8 sps:$4 sm:$0xff]  }
  0x47   : > { %1572 = vmatpush1.bf16.msra.mxu1 %v3047_v54  ;;  %v3105_v35 = vld [vmem:[%s4404_s1 + $0x2f4] ss:$8 sps:$4 sm:$0xff]   ;;  %v3107_v36 = vld [vmem:[%s4404_s1 + $0xf0] ss:$8 sps:$4 sm:$0xff]   ;;  %v3111_v38 = vld [vmem:[%s4404_s1 + $0x104] ss:$8 sps:$4 sm:$0xff]  }
  0x48   : > { %1718 = vmatpush1.bf16.msra.mxu0 %v3048_v55  ;;  %1573 = vmatprep.subr.bf16.mxu1 %v3049_v56  ;;  %v3108_v37 = vld [vmem:[%s4404_s1 + $0x2f0] ss:$8 sps:$4 sm:$0xff]   ;;  %v3114_v39 = vld [vmem:[%s4404_s1 + $0x304] ss:$8 sps:$4 sm:$0xff]   ;;  %v3109_v41 = vld [vmem:[%s4404_s1 + $0x100] ss:$8 sps:$4 sm:$0xff]  }
  0x49   : > { %1719 = vmatprep.subr.bf16.mxu0 %v3051_v57  ;;  %v3112_v43 = vld [vmem:[%s4404_s1 + $0x300] ss:$8 sps:$4 sm:$0xff]   ;;  %v3117_v44 = vld [vmem:[%s4404_s1 + $0x114] ss:$8 sps:$4 sm:$0xff]   ;;  %v3115_v46 = vld [vmem:[%s4404_s1 + $0x110] ss:$8 sps:$4 sm:$0xff]  }
  0x4a   : > { %v3120_v45 = vld [vmem:[%s4404_s1 + $0x314] ss:$8 sps:$4 sm:$0xff]   ;;  %v3118_v47 = vld [vmem:[%s4404_s1 + $0x310] ss:$8 sps:$4 sm:$0xff]   ;;  %v3123_v48 = vld [vmem:[%s4404_s1 + $0x124] ss:$8 sps:$4 sm:$0xff]  }
  0x4b   : > { %1574 = vmatpush1.bf16.msra.mxu1 %v3053_v58  ;;  %v3126_v49 = vld [vmem:[%s4404_s1 + $0x324] ss:$8 sps:$4 sm:$0xff]   ;;  %v3121_v50 = vld [vmem:[%s4404_s1 + $0x120] ss:$8 sps:$4 sm:$0xff]   ;;  %v583_v54 = vld [vmem:[%s4403_s0 + $0x50] sm:$0xff] }
  0x4c   : > { %1720 = vmatpush1.bf16.msra.mxu0 %v3054_v59  ;;  %1575 = vmatprep.subr.bf16.mxu1 %v3055_v60  ;;  %v3124_v51 = vld [vmem:[%s4404_s1 + $0x320] ss:$8 sps:$4 sm:$0xff]   ;;  %v587_v55 = vld [vmem:[%s4403_s0 + $0x70] sm:$0xff]  ;;  %v3147_v16 = vld [vmem:[%s4404_s1 + $0x164] ss:$8 sps:$4 sm:$0xff]  }
  0x4d   : > { %1721 = vmatprep.subr.bf16.mxu0 %v3057_v61  ;;  %v581_v52 = vld [vmem:[%s4403_s0 + $0x40] sm:$0xff]  ;;  %v3129_v56 = vld [vmem:[%s4404_s1 + $0x134] ss:$8 sps:$4 sm:$0xff]   ;;  %v2673_v58 = vcombine.high %v583_v54, %v587_v55  ;;  %v2672_v61 = vcombine.low %v583_v54, %v587_v55 }
  0x4e   : > { %v585_v53 = vld [vmem:[%s4403_s0 + $0x60] sm:$0xff]  ;;  %v3132_v60 = vld [vmem:[%s4404_s1 + $0x334] ss:$8 sps:$4 sm:$0xff]  }
  0x4f   : > { %1576 = vmatpush1.bf16.msra.mxu1 %v3059_v62  ;;  %v2669_v57 = vcombine.high %v581_v52, %v585_v53  ;;  %v2668_v59 = vcombine.low %v581_v52, %v585_v53  ;;  %v3127_v62 = vld [vmem:[%s4404_s1 + $0x130] ss:$8 sps:$4 sm:$0xff]   ;;  %v3150_v17 = vld [vmem:[%s4404_s1 + $0x364] ss:$8 sps:$4 sm:$0xff]  }
  0x50   : > { %1722 = vmatpush1.bf16.msra.mxu0 %v3060_v63  ;;  %1577 = vmatprep.subr.bf16.mxu1 %v3061_v0  ;;  %v3130_v63 = vld [vmem:[%s4404_s1 + $0x330] ss:$8 sps:$4 sm:$0xff]   ;;  %v3135_v0 = vld [vmem:[%s4404_s1 + $0x144] ss:$8 sps:$4 sm:$0xff]  }
  0x51   : > { %1723 = vmatprep.subr.bf16.mxu0 %v3063_v1  ;;  %v3138_v1 = vld [vmem:[%s4404_s1 + $0x344] ss:$8 sps:$4 sm:$0xff]   ;;  %v599_v20 = vld [vmem:[%s4403_s0 + $0xd0] sm:$0xff] }
  0x52   : > { %v603_v22 = vld [vmem:[%s4403_s0 + $0xf0] sm:$0xff]  ;;  %v3183_v54 = vld [vmem:[%s4404_s1 + $0x1c4] ss:$8 sps:$4 sm:$0xff]  }
  0x53   : > { %1578 = vmatpush1.bf16.msra.mxu1 %v3065_v2  ;;  %v589_v2 = vld [vmem:[%s4403_s0 + $0x80] sm:$0xff]  ;;  %v2689_v23 = vcombine.high %v599_v20, %v603_v22  ;;  %v3175_v52 = vld [vmem:[%s4404_s1 + $0x1b0] ss:$8 sps:$4 sm:$0xff]  }
  0x54   : > { %1724 = vmatpush1.bf16.msra.mxu0 %v3066_v3  ;;  %1579 = vmatprep.subr.bf16.mxu1 %v3067_v4  ;;  %v593_v3 = vld [vmem:[%s4403_s0 + $0xa0] sm:$0xff]  ;;  %v3178_v53 = vld [vmem:[%s4404_s1 + $0x3b0] ss:$8 sps:$4 sm:$0xff]  }
  0x55   : > { %1725 = vmatprep.subr.bf16.mxu0 %v3069_v5  ;;  %v2677_v4 = vcombine.high %v589_v2, %v593_v3  ;;  %v591_v5 = vld [vmem:[%s4403_s0 + $0x90] sm:$0xff]  ;;  %v3186_v55 = vld [vmem:[%s4404_s1 + $0x3c4] ss:$8 sps:$4 sm:$0xff]  }
  0x57   : > { %1580 = vmatpush1.bf16.msra.mxu1 %v3071_v6  ;;  %v595_v6 = vld [vmem:[%s4403_s0 + $0xb0] sm:$0xff] }
  0x58   : > { %1726 = vmatpush1.bf16.msra.mxu0 %v3072_v7  ;;  %1581 = vmatprep.subr.bf16.mxu1 %v3073_v8  ;;  %v3133_v7 = vld [vmem:[%s4404_s1 + $0x140] ss:$8 sps:$4 sm:$0xff]  }
  0x59   : > { %1727 = vmatprep.subr.bf16.mxu0 %v3075_v9  ;;  %v3136_v8 = vld [vmem:[%s4404_s1 + $0x340] ss:$8 sps:$4 sm:$0xff]   ;;  %v2681_v9 = vcombine.high %v591_v5, %v595_v6 }
  0x5b   : > { %1582 = vmatpush1.bf16.msra.mxu1 %v3077_v10  ;;  %v2676_v10 = vcombine.low %v589_v2, %v593_v3  ;;  %v3201_v2 = vld [vmem:[%s4404_s1 + $0x1f4] ss:$8 sps:$4 sm:$0xff]  }
  0x5c   : > { %1728 = vmatpush1.bf16.msra.mxu0 %v3078_v11  ;;  %1583 = vmatprep.subr.bf16.mxu1 %v3079_v12  ;;  %v2680_v11 = vcombine.low %v591_v5, %v595_v6  ;;  %v3141_v12 = vld [vmem:[%s4404_s1 + $0x154] ss:$8 sps:$4 sm:$0xff]   ;;  %v3202_v5 = vld [vmem:[%s4404_s1 + $0x3f0] ss:$8 sps:$4 sm:$0xff]   ;;  %v582_v6 = vld [vmem:[%s4403_s0 + $0x48] sm:$0xff] }
  0x5d   : > { %1729 = vmatprep.subr.bf16.mxu0 %v3081_v13  ;;  %v3144_v13 = vld [vmem:[%s4404_s1 + $0x354] ss:$8 sps:$4 sm:$0xff]  }
  0x5e   : > { %v3204_v3 = vld [vmem:[%s4404_s1 + $0x3f4] ss:$8 sps:$4 sm:$0xff]  }
  0x5f   : > { %1584 = vmatpush1.bf16.msra.mxu1 %v3083_v14  ;;  %v3139_v14 = vld [vmem:[%s4404_s1 + $0x150] ss:$8 sps:$4 sm:$0xff]  }
  0x60   : > { %1730 = vmatpush1.bf16.msra.mxu0 %v3084_v15  ;;  %1585 = vmatprep.subr.bf16.mxu1 %v3085_v18  ;;  %v3142_v15 = vld [vmem:[%s4404_s1 + $0x350] ss:$8 sps:$4 sm:$0xff]   ;;  %v597_v18 = vld [vmem:[%s4403_s0 + $0xc0] sm:$0xff] }
  0x61   : > { %1731 = vmatprep.subr.bf16.mxu0 %v3087_v19  ;;  %v601_v19 = vld [vmem:[%s4403_s0 + $0xe0] sm:$0xff] }
  0x62   : > { %v2685_v21 = vcombine.high %v597_v18, %v601_v19 }
  0x63   : > { %1586 = vmatpush1.bf16.msra.mxu1 %v3089_v24  ;;  %v3145_v24 = vld [vmem:[%s4404_s1 + $0x160] ss:$8 sps:$4 sm:$0xff]  }
  0x64   : > { %1732 = vmatpush1.bf16.msra.mxu0 %v3090_v25  ;;  %1587 = vmatprep.subr.bf16.mxu1 %v3091_v26  ;;  %v3148_v25 = vld [vmem:[%s4404_s1 + $0x360] ss:$8 sps:$4 sm:$0xff]   ;;  %v2684_v26 = vcombine.low %v597_v18, %v601_v19 }
  0x65   : > { %1733 = vmatprep.subr.bf16.mxu0 %v3093_v27  ;;  %v2688_v27 = vcombine.low %v599_v20, %v603_v22  ;;  %v598_v22 = vld [vmem:[%s4403_s0 + $0xc8] sm:$0xff] }
  0x67   : > { %1588 = vmatpush1.bf16.msra.mxu1 %v3095_v28  ;;  %v3153_v28 = vld [vmem:[%s4404_s1 + $0x174] ss:$8 sps:$4 sm:$0xff]  }
  0x68   : > { %1734 = vmatpush1.bf16.msra.mxu0 %v3096_v29  ;;  %1589 = vmatprep.subr.bf16.mxu1 %v3097_v30  ;;  %v3156_v29 = vld [vmem:[%s4404_s1 + $0x374] ss:$8 sps:$4 sm:$0xff]   ;;  %v3816_v30 = vld [vmem:[%s4403_s0 + $0x8] sm:$0xff] }
  0x69   : > { %1735 = vmatprep.subr.bf16.mxu0 %v3099_v31  ;;  %v3821_v31 = vld [vmem:[%s4403_s0 + $0x28] sm:$0xff] }
  0x6b   : > { %1590 = vmatpush1.bf16.msra.mxu1 %v3101_v32  ;;  %v3826_v32 = vld [vmem:[%s4403_s0 + $0x18] sm:$0xff] }
  0x6c   : > { %1736 = vmatpush1.bf16.msra.mxu0 %v3102_v33  ;;  %1591 = vmatprep.subr.bf16.mxu1 %v3103_v34  ;;  %v3831_v33 = vld [vmem:[%s4403_s0 + $0x38] sm:$0xff] }
  0x6d   : > { %1737 = vmatprep.subr.bf16.mxu0 %v3105_v35  ;;  %v3151_v34 = vld [vmem:[%s4404_s1 + $0x170] ss:$8 sps:$4 sm:$0xff]  }
  0x6e   : > { %v3154_v35 = vld [vmem:[%s4404_s1 + $0x370] ss:$8 sps:$4 sm:$0xff]  }
  0x6f   : > { %1592 = vmatpush1.bf16.msra.mxu1 %v3107_v36  ;;  %v2663_v36 = vcombine.high %v3816_v30, %v3821_v31 }
  0x70   : > { %1738 = vmatpush1.bf16.msra.mxu0 %v3108_v37  ;;  %1634 = vmatprep.subr.bf16.mxu1 %v3111_v38  ;;  %v3159_v37 = vld [vmem:[%s4404_s1 + $0x184] ss:$8 sps:$4 sm:$0xff]  }
  0x71   : > { %1780 = vmatprep.subr.bf16.mxu0 %v3114_v39  ;;  %v3162_v38 = vld [vmem:[%s4404_s1 + $0x384] ss:$8 sps:$4 sm:$0xff]   ;;  %v2667_v39 = vcombine.high %v3826_v32, %v3831_v33 }
  0x72   : > { %1594 = vmatmul.mubr.bf16.vlgmr.msra.gmra.mrb[0].mxu1 %v2660_v40  ;;  %v3157_v40 = vld [vmem:[%s4404_s1 + $0x180] ss:$8 sps:$4 sm:$0xff]  }
  0x73   : > { %1740 = vmatmul.mubr.bf16.vlgmr.msra.gmra.mrb[0].mxu0 %v2664_v42  ;;  %1635 = vmatpush1.bf16.msra.mxu1 %v3109_v41  ;;  %v3160_v41 = vld [vmem:[%s4404_s1 + $0x380] ss:$8 sps:$4 sm:$0xff]   ;;  %v3165_v42 = vld [vmem:[%s4404_s1 + $0x194] ss:$8 sps:$4 sm:$0xff]  }
  0x74   : > { %1781 = vmatpush1.bf16.msra.mxu0 %v3112_v43  ;;  %1636 = vmatprep.subr.bf16.mxu1 %v3117_v44  ;;  %v3168_v43 = vld [vmem:[%s4404_s1 + $0x394] ss:$8 sps:$4 sm:$0xff]   ;;  %v3163_v44 = vld [vmem:[%s4404_s1 + $0x190] ss:$8 sps:$4 sm:$0xff]  }
  0x75   : > { %1782 = vmatprep.subr.bf16.mxu0 %v3120_v45  ;;  %1603 = vmatprep.mubr.bf16.mxu1 %v2669_v57  ;;  %v3166_v45 = vld [vmem:[%s4404_s1 + $0x390] ss:$8 sps:$4 sm:$0xff]   ;;  %v3184_v57 = vld [vmem:[%s4404_s1 + $0x3c0] ss:$8 sps:$4 sm:$0xff]  }
  0x76   : > { %1749 = vmatprep.mubr.bf16.mxu0 %v2673_v58  ;;  %v3189_v58 = vld [vmem:[%s4404_s1 + $0x1d4] ss:$8 sps:$4 sm:$0xff]  }
  0x77   : > { %1637 = vmatpush1.bf16.msra.mxu1 %v3115_v46  ;;  %v3171_v46 = vld [vmem:[%s4404_s1 + $0x1a4] ss:$8 sps:$4 sm:$0xff]  }
  0x78   : > { %1783 = vmatpush1.bf16.msra.mxu0 %v3118_v47  ;;  %1638 = vmatprep.subr.bf16.mxu1 %v3123_v48  ;;  %v3174_v47 = vld [vmem:[%s4404_s1 + $0x3a4] ss:$8 sps:$4 sm:$0xff]   ;;  %v3169_v48 = vld [vmem:[%s4404_s1 + $0x1a0] ss:$8 sps:$4 sm:$0xff]  }
  0x79   : > { %1784 = vmatprep.subr.bf16.mxu0 %v3126_v49  ;;  %v3172_v49 = vld [vmem:[%s4404_s1 + $0x3a0] ss:$8 sps:$4 sm:$0xff]  }
  0x7a   : > { %1604 = vmatmul.mubr.bf16.gmra.mrb[4].mxu1 %v2668_v59  ;;  %v3192_v59 = vld [vmem:[%s4404_s1 + $0x3d4] ss:$8 sps:$4 sm:$0xff]  }
  0x7b   : > { %1750 = vmatmul.mubr.bf16.gmra.mrb[4].mxu0 %v2672_v61  ;;  %1639 = vmatpush1.bf16.msra.mxu1 %v3121_v50  ;;  %v3177_v50 = vld [vmem:[%s4404_s1 + $0x1b4] ss:$8 sps:$4 sm:$0xff]   ;;  %v3190_v61 = vld [vmem:[%s4404_s1 + $0x3d0] ss:$8 sps:$4 sm:$0xff]  }
  0x7c   : > { %1785 = vmatpush1.bf16.msra.mxu0 %v3124_v51  ;;  %1640 = vmatprep.subr.bf16.mxu1 %v3129_v56  ;;  %v3180_v51 = vld [vmem:[%s4404_s1 + $0x3b4] ss:$8 sps:$4 sm:$0xff]   ;;  %v3181_v56 = vld [vmem:[%s4404_s1 + $0x1c0] ss:$8 sps:$4 sm:$0xff]  }
  0x7d   : > { %1786 = vmatprep.subr.bf16.mxu0 %v3132_v60  ;;  %1613 = vmatprep.mubr.bf16.mxu1 %v2677_v4  ;;  %v3187_v60 = vld [vmem:[%s4404_s1 + $0x1d0] ss:$8 sps:$4 sm:$0xff]  }
  0x7e   : > { %1759 = vmatprep.mubr.bf16.mxu0 %v2681_v9  ;;  %v3199_v4 = vld [vmem:[%s4404_s1 + $0x1f0] ss:$8 sps:$4 sm:$0xff]  }
  0x7f   : > { %1641 = vmatpush1.bf16.msra.mxu1 %v3127_v62  ;;  %v3195_v62 = vld [vmem:[%s4404_s1 + $0x1e4] ss:$8 sps:$4 sm:$0xff]   ;;  %v588_v9 = vld [vmem:[%s4403_s0 + $0x78] sm:$0xff] }
  0x80   : > { %1787 = vmatpush1.bf16.msra.mxu0 %v3130_v63  ;;  %1642 = vmatprep.subr.bf16.mxu1 %v3135_v0  ;;  %v3198_v63 = vld [vmem:[%s4404_s1 + $0x3e4] ss:$8 sps:$4 sm:$0xff]   ;;  %v3193_v0 = vld [vmem:[%s4404_s1 + $0x1e0] ss:$8 sps:$4 sm:$0xff]  }
  0x81   : > { %1788 = vmatprep.subr.bf16.mxu0 %v3138_v1  ;;  %v3196_v1 = vld [vmem:[%s4404_s1 + $0x3e0] ss:$8 sps:$4 sm:$0xff]  }
  0x82   : > { %1614 = vmatmul.mubr.bf16.gmra.mrb[8].mxu1 %v2676_v10  ;;  %v2662_v10 = vcombine.low %v3816_v30, %v3821_v31 }
  0x83   : > { %1760 = vmatmul.mubr.bf16.gmra.mrb[8].mxu0 %v2680_v11  ;;  %1643 = vmatpush1.bf16.msra.mxu1 %v3133_v7  ;;  %v586_v7 = vld [vmem:[%s4403_s0 + $0x68] sm:$0xff]  ;;  %v2666_v11 = vcombine.low %v3826_v32, %v3831_v33  ;;  %v751_v32 = vlaneseq }
  0x84   : > { %1789 = vmatpush1.bf16.msra.mxu0 %v3136_v8  ;;  %1644 = vmatprep.subr.bf16.mxu1 %v3141_v12  ;;  %v584_v8 = vld [vmem:[%s4403_s0 + $0x58] sm:$0xff]  ;;  %v2671_v12 = vcombine.high %v582_v6, %v586_v7  ;;  %v2670_v18 = vcombine.low %v582_v6, %v586_v7 }
  0x85   : > { %1790 = vmatprep.subr.bf16.mxu0 %v3144_v13  ;;  %1623 = vmatprep.mubr.bf16.mxu1 %v2685_v21  ;;  %v2675_v13 = vcombine.high %v584_v8, %v588_v9  ;;  %v2674_v19 = vcombine.low %v584_v8, %v588_v9  ;;  %v752_v33 = vshrl.u32 %v751_v32, 7 }
  0x86   : > { %1769 = vmatprep.mubr.bf16.mxu0 %v2689_v23  ;;  %v602_v23 = vld [vmem:[%s4403_s0 + $0xe8] sm:$0xff] }
  0x87   : > { %1645 = vmatpush1.bf16.msra.mxu1 %v3139_v14  ;;  %v590_v14 = vld [vmem:[%s4403_s0 + $0x88] sm:$0xff]  ;;  %v2686_v30 = vcombine.low %v598_v22, %v602_v23 }
  0x88   : > { %1791 = vmatpush1.bf16.msra.mxu0 %v3142_v15  ;;  %1646 = vmatprep.subr.bf16.mxu1 %v3147_v16  ;;  %v594_v15 = vld [vmem:[%s4403_s0 + $0xa8] sm:$0xff]  ;;  %v592_v16 = vld [vmem:[%s4403_s0 + $0x98] sm:$0xff] }
  0x89   : > { %1792 = vmatprep.subr.bf16.mxu0 %v3150_v17  ;;  %v596_v17 = vld [vmem:[%s4403_s0 + $0xb8] sm:$0xff]  ;;  %v2679_v20 = vcombine.high %v590_v14, %v594_v15 }
  0x8a   : > { %1624 = vmatmul.mubr.bf16.gmra.mrb[12].mxu1 %v2684_v26  ;;  %v2683_v21 = vcombine.high %v592_v16, %v596_v17  ;;  %v2678_v26 = vcombine.low %v590_v14, %v594_v15 }
  0x8b   : > { %1770 = vmatmul.mubr.bf16.gmra.mrb[12].mxu0 %v2688_v27  ;;  %1647 = vmatpush1.bf16.msra.mxu1 %v3145_v24  ;;  %v600_v24 = vld [vmem:[%s4403_s0 + $0xd8] sm:$0xff]  ;;  %v2682_v27 = vcombine.low %v592_v16, %v596_v17 }
  0x8c   : > { %1793 = vmatpush1.bf16.msra.mxu0 %v3148_v25  ;;  %1648 = vmatprep.subr.bf16.mxu1 %v3153_v28  ;;  %v604_v25 = vld [vmem:[%s4403_s0 + $0xf8] sm:$0xff]  ;;  %v2687_v28 = vcombine.high %v598_v22, %v602_v23 }
  0x8d   : > { %1794 = vmatprep.subr.bf16.mxu0 %v3156_v29  ;;  %1666 = vmatprep.mubr.bf16.mxu1 %v2663_v36  ;;  %v2691_v29 = vcombine.high %v600_v24, %v604_v25  ;;  %v2690_v31 = vcombine.low %v600_v24, %v604_v25  ;;  %v3984_v36 = vsub.s32 1, %v752_v33  ;;  %v738_v24 = vld [vmem:[%s4407_s4 + $0x28] sm:$0xff] }
  0x8e   : > { %1812 = vmatprep.mubr.bf16.mxu0 %v2667_v39 }
  0x8f   : > { %1649 = vmatpush1.bf16.msra.mxu1 %v3151_v34  ;;  %v3979_v34 = vsub.s32 0, %v752_v33 }
  0x90   : > { %1795 = vmatpush1.bf16.msra.mxu0 %v3154_v35  ;;  %1650 = vmatprep.subr.bf16.mxu1 %v3159_v37  ;;  %v749_v35 = vld [vmem:[%s4405_s2] sm:$0x3] }
  0x91   : > { %1796 = vmatprep.subr.bf16.mxu0 %v3162_v38  ;;  %v3987_v37 = vrot.slane %v749_v35, %v3979_v34  ;;  %v1853_v38 = vld [vmem:[%s4406_s3] sm:$0x3]  ;;  %v3993_v39 = vrot.slane %v749_v35, %v3984_v36 }
  0x93   : > { %1651 = vmatpush1.bf16.msra.mxu1 %v3157_v40 }
  0x94   : > { %1797 = vmatpush1.bf16.msra.mxu0 %v3160_v41  ;;  %1652 = vmatprep.subr.bf16.mxu1 %v3165_v42 }
  0x95   : > { %1798 = vmatprep.subr.bf16.mxu0 %v3168_v43  ;;  %v3997_v43 = vrot.slane %v1853_v38, %v3979_v34 }
  0x97   : > { %1653 = vmatpush1.bf16.msra.mxu1 %v3163_v44 }
  0x98   : > { %1799 = vmatpush1.bf16.msra.mxu0 %v3166_v45  ;;  %1654 = vmatprep.subr.bf16.mxu1 %v3171_v46 }
  0x99   : > { %1800 = vmatprep.subr.bf16.mxu0 %v3174_v47  ;;  %v4001_v47 = vrot.slane %v1853_v38, %v3984_v36 }
  0x9b   : > { %1655 = vmatpush1.bf16.msra.mxu1 %v3169_v48 }
  0x9c   : > { %1801 = vmatpush1.bf16.msra.mxu0 %v3172_v49  ;;  %1656 = vmatprep.subr.bf16.mxu1 %v3177_v50 }
  0x9d   : > { %1802 = vmatprep.subr.bf16.mxu0 %v3180_v51 }
  0x9f   : > { %1657 = vmatpush1.bf16.msra.mxu1 %v3175_v52 }
  0xa0   : > { %1803 = vmatpush1.bf16.msra.mxu0 %v3178_v53  ;;  %1658 = vmatprep.subr.bf16.mxu1 %v3183_v54 }
  0xa1   : > { %1804 = vmatprep.subr.bf16.mxu0 %v3186_v55 }
  0xa3   : > { %1659 = vmatpush1.bf16.msra.mxu1 %v3181_v56  ;;  %v733_v56 = vld [vmem:[%s4407_s4] sm:$0xff] }
  0xa4   : > { %1805 = vmatpush1.bf16.msra.mxu0 %v3184_v57  ;;  %1660 = vmatprep.subr.bf16.mxu1 %v3189_v58 }
  0xa5   : > { %1806 = vmatprep.subr.bf16.mxu0 %v3192_v59  ;;  %v734_v59 = vld [vmem:[%s4407_s4 + $0x8] sm:$0xff] }
  0xa7   : > { %1661 = vmatpush1.bf16.msra.mxu1 %v3187_v60 }
  0xa8   : > { %1807 = vmatpush1.bf16.msra.mxu0 %v3190_v61  ;;  %1662 = vmatprep.subr.bf16.mxu1 %v3195_v62  ;;  %v735_v61 = vld [vmem:[%s4407_s4 + $0x10] sm:$0xff] }
  0xa9   : > { %1808 = vmatprep.subr.bf16.mxu0 %v3198_v63 }
  0xab   : > { %1663 = vmatpush1.bf16.msra.mxu1 %v3193_v0  ;;  %v736_v0 = vld [vmem:[%s4407_s4 + $0x18] sm:$0xff] }
  0xac   : > { %1809 = vmatpush1.bf16.msra.mxu0 %v3196_v1  ;;  %1664 = vmatprep.subr.bf16.mxu1 %v3201_v2 }
  0xad   : > { %1810 = vmatprep.subr.bf16.mxu0 %v3204_v3 }
  0xaf   : > { %1665 = vmatpush1.bf16.msra.mxu1 %v3199_v4 }
  0xb0   : > { %1811 = vmatpush1.bf16.msra.mxu0 %v3202_v5 }
  0xb2   : > { %1667 = vmatmul.mubr.bf16.vlgmr.msra.gmra.mrb[0].mxu1 %v2662_v10 }
  0xb3   : > { %1813 = vmatmul.mubr.bf16.vlgmr.msra.gmra.mrb[0].mxu0 %v2666_v11  ;;  %1676 = vmatprep.mubr.bf16.mxu1 %v2671_v12 }
  0xb4   : > { %1822 = vmatprep.mubr.bf16.mxu0 %v2675_v13 }
  0xba   : > { %1677 = vmatmul.mubr.bf16.gmra.mrb[4].mxu1 %v2670_v18 }
  0xbb   : > { %1823 = vmatmul.mubr.bf16.gmra.mrb[4].mxu0 %v2674_v19  ;;  %1686 = vmatprep.mubr.bf16.mxu1 %v2679_v20 }
  0xbc   : > { %1832 = vmatprep.mubr.bf16.mxu0 %v2683_v21  ;;  %v737_v21 = vld [vmem:[%s4407_s4 + $0x20] sm:$0xff] }
  0xc2   : > { %1687 = vmatmul.mubr.bf16.gmra.mrb[8].mxu1 %v2678_v26  ;;  %v739_v26 = vld [vmem:[%s4407_s4 + $0x30] sm:$0xff] }
  0xc3   : > { %1833 = vmatmul.mubr.bf16.gmra.mrb[8].mxu0 %v2682_v27  ;;  %1696 = vmatprep.mubr.bf16.mxu1 %v2687_v28 }
  0xc4   : > { %1842 = vmatprep.mubr.bf16.mxu0 %v2691_v29 }
  0xca   : > { %1697 = vmatmul.mubr.bf16.gmra.mrb[12].mxu1 %v2686_v30  ;;  %v740_v30 = vld [vmem:[%s4407_s4 + $0x38] sm:$0xff] }
  0xcb   : > { %1843 = vmatmul.mubr.bf16.gmra.mrb[12].mxu0 %v2690_v31 }
 0x185   : > { %v1668_v40 = vpop.f32.mrb[0].mxu1 }
 0x186   : > { %v1814_v41 = vpop.f32.mrb[0].mxu0  ;;  %v2877_v42 = vadd.f32 %v1668_v40, %v3987_v37  ;;  %v1670_v44 = vpop.f32.mrb[1].mxu1 }
 0x187   : > { %v1816_v45 = vpop.f32.mrb[1].mxu0  ;;  %v2879_v46 = vadd.f32 %v1670_v44, %v3993_v39  ;;  %v1672_v48 = vpop.f32.mrb[2].mxu1 }
 0x188   : > { %v1818_v49 = vpop.f32.mrb[2].mxu0  ;;  %v2878_v50 = vadd.f32 %v2877_v42, %v1814_v41  ;;  %v2881_v51 = vadd.f32 %v1672_v48, %v3987_v37  ;;  %v1674_v52 = vpop.f32.mrb[3].mxu1 }
 0x189   : > { %v1820_v53 = vpop.f32.mrb[3].mxu0  ;;  %v2880_v54 = vadd.f32 %v2879_v46, %v1816_v45  ;;  %v2883_v55 = vadd.f32 %v1674_v52, %v3993_v39 }
 0x18a   : > { %v1865_v57 = vmul.f32 %v2878_v50, %v3997_v43  ;;  %v2882_v58 = vadd.f32 %v2881_v51, %v1818_v49 }
 0x18b   : > { %v1866_v60 = vmul.f32 %v2880_v54, %v4001_v47  ;;  %v2884_v62 = vadd.f32 %v2883_v55, %v1820_v53 }
 0x18c   : > { %v1867_v63 = vmul.f32 %v2882_v58, %v3997_v43  ;;  %v4020_v1 = vadd.f32 %v1865_v57, %v733_v56  ;;  %v741_v57 = vld [vmem:[%s4407_s4 + $0x40] sm:$0xff] }
 0x18d   : > { %v1868_v2 = vmul.f32 %v2884_v62, %v4001_v47  ;;  %v1678_v3 = vpop.f32.mrb[4].mxu1  ;;  %v4023_v5 = vadd.f32 %v1866_v60, %v734_v59  ;;  %v742_v59 = vld [vmem:[%s4407_s4 + $0x48] sm:$0xff]  ;;  %v743_v62 = vld [vmem:[%s4407_s4 + $0x50] sm:$0xff] }
 0x18e   : > { %v1824_v4 = vpop.f32.mrb[4].mxu0  ;;  %v4025_v6 = vadd.f32 %v1867_v63, %v735_v61  ;;  %v2885_v7 = vadd.f32 %v1678_v3, %v3987_v37  ;;  %v1680_v8 = vpop.f32.mrb[5].mxu1  ;;  %1897 = vst [vmem:[%s4411_s8] sm:$0xff] %v4020_v1  ;;  %v744_v3 = vld [vmem:[%s4407_s4 + $0x58] sm:$0xff] }
 0x18f   : > { %v1826_v9 = vpop.f32.mrb[5].mxu0  ;;  %v4032_v10 = vadd.f32 %v1868_v2, %v736_v0  ;;  %v2887_v11 = vadd.f32 %v1680_v8, %v3993_v39  ;;  %v1682_v12 = vpop.f32.mrb[6].mxu1  ;;  %v1913_v14 = vadd.f32 %v4023_v5, %v4020_v1  ;;  %1898 = vst [vmem:[%s4411_s8 + $0x8] sm:$0xff] %v4023_v5 }
 0x190   : > { %v1828_v13 = vpop.f32.mrb[6].mxu0  ;;  %1899 = vst [vmem:[%s4411_s8 + $0x10] sm:$0xff] %v4025_v6  ;;  %v2886_v15 = vadd.f32 %v2885_v7, %v1824_v4  ;;  %v2889_v16 = vadd.f32 %v1682_v12, %v3987_v37  ;;  %v1684_v17 = vpop.f32.mrb[7].mxu1 }
 0x191   : > { %v1830_v18 = vpop.f32.mrb[7].mxu0  ;;  %1900 = vst [vmem:[%s4411_s8 + $0x18] sm:$0xff] %v4032_v10  ;;  %v2888_v19 = vadd.f32 %v2887_v11, %v1826_v9  ;;  %v2891_v20 = vadd.f32 %v1684_v17, %v3993_v39  ;;  %1914 = vadd.xlane.f32.xlu0 %v1913_v14  ;;  %v1916_v28 = vadd.f32 %v4032_v10, %v4025_v6 }
 0x192   : > { %v1869_v22 = vmul.f32 %v2886_v15, %v3997_v43  ;;  %v2890_v23 = vadd.f32 %v2889_v16, %v1828_v13 }
 0x193   : > { %v1870_v25 = vmul.f32 %v2888_v19, %v4001_v47  ;;  %v2892_v27 = vadd.f32 %v2891_v20, %v1830_v18 }
 0x194   : > { %v1871_v29 = vmul.f32 %v2890_v23, %v3997_v43  ;;  %v4068_v31 = vadd.f32 %v1869_v22, %v737_v21 }
 0x195   : > { %v1872_v32 = vmul.f32 %v2892_v27, %v4001_v47  ;;  %1917 = vadd.xlane.f32.xlu0 %v1916_v28  ;;  %v1688_v35 = vpop.f32.mrb[8].mxu1  ;;  %v4071_v38 = vadd.f32 %v1870_v25, %v738_v24  ;;  %v745_v28 = vld [vmem:[%s4407_s4 + $0x60] sm:$0xff] }
 0x196   : > { %v1834_v33 = vpop.f32.mrb[8].mxu0  ;;  %v4073_v40 = vadd.f32 %v1871_v29, %v739_v26  ;;  %v2893_v41 = vadd.f32 %v1688_v35, %v3987_v37  ;;  %v1690_v42 = vpop.f32.mrb[9].mxu1  ;;  %1901 = vst [vmem:[%s4411_s8 + $0x20] sm:$0xff] %v4068_v31  ;;  %v746_v29 = vld [vmem:[%s4407_s4 + $0x68] sm:$0xff] }
 0x197   : > { %v1836_v44 = vpop.f32.mrb[9].mxu0  ;;  %v4080_v45 = vadd.f32 %v1872_v32, %v740_v30  ;;  %v2895_v46 = vadd.f32 %v1690_v42, %v3993_v39  ;;  %v1692_v48 = vpop.f32.mrb[10].mxu1  ;;  %v1919_v50 = vadd.f32 %v4071_v38, %v4068_v31  ;;  %1902 = vst [vmem:[%s4411_s8 + $0x28] sm:$0xff] %v4071_v38 }
 0x198   : > { %v1838_v49 = vpop.f32.mrb[10].mxu0  ;;  %1903 = vst [vmem:[%s4411_s8 + $0x30] sm:$0xff] %v4073_v40  ;;  %v2894_v51 = vadd.f32 %v2893_v41, %v1834_v33  ;;  %v2897_v52 = vadd.f32 %v1692_v48, %v3987_v37  ;;  %v1694_v53 = vpop.f32.mrb[11].mxu1  ;;  %v748_v41 = vld [vmem:[%s4407_s4 + $0x78] sm:$0xff] }
 0x199   : > { %v1840_v54 = vpop.f32.mrb[11].mxu0  ;;  %1904 = vst [vmem:[%s4411_s8 + $0x38] sm:$0xff] %v4080_v45  ;;  %v2896_v55 = vadd.f32 %v2895_v46, %v1836_v44  ;;  %v2899_v56 = vadd.f32 %v1694_v53, %v3993_v39  ;;  %1920 = vadd.xlane.f32.xlu1 %v1919_v50  ;;  %v1922_v0 = vadd.f32 %v4080_v45, %v4073_v40 }
 0x19a   : > { %v1873_v58 = vmul.f32 %v2894_v51, %v3997_v43  ;;  %v2898_v60 = vadd.f32 %v2897_v52, %v1838_v49 }
 0x19b   : > { %v1874_v61 = vmul.f32 %v2896_v55, %v4001_v47  ;;  %v2900_v63 = vadd.f32 %v2899_v56, %v1840_v54 }
 0x19c   : > { %v1875_v2 = vmul.f32 %v2898_v60, %v3997_v43  ;;  %v4116_v4 = vadd.f32 %v1873_v58, %v741_v57 }
 0x19d   : > { %v4118_v7 = vadd.f32 %v1874_v61, %v742_v59  ;;  %v1876_v8 = vmul.f32 %v2900_v63, %v4001_v47  ;;  %1923 = vadd.xlane.f32.xlu1 %v1922_v0  ;;  %v1698_v11 = vpop.f32.mrb[12].mxu1 }
 0x19e   : > { %v1844_v9 = vpop.f32.mrb[12].mxu0  ;;  %v4121_v12 = vadd.f32 %v1875_v2, %v743_v62  ;;  %v2901_v13 = vadd.f32 %v1698_v11, %v3987_v37  ;;  %v1700_v14 = vpop.f32.mrb[13].mxu1  ;;  %1905 = vst [vmem:[%s4411_s8 + $0x40] sm:$0xff] %v4116_v4 }
 0x19f   : > { %v1846_v15 = vpop.f32.mrb[13].mxu0  ;;  %1906 = vst [vmem:[%s4411_s8 + $0x48] sm:$0xff] %v4118_v7  ;;  %v4132_v16 = vadd.f32 %v1876_v8, %v744_v3  ;;  %v2903_v17 = vadd.f32 %v1700_v14, %v3993_v39  ;;  %v1702_v18 = vpop.f32.mrb[14].mxu1  ;;  %v1925_v20 = vadd.f32 %v4118_v7, %v4116_v4 }
 0x1a0   : > { %v1848_v19 = vpop.f32.mrb[14].mxu0  ;;  %1907 = vst [vmem:[%s4411_s8 + $0x50] sm:$0xff] %v4121_v12  ;;  %v2902_v21 = vadd.f32 %v2901_v13, %v1844_v9  ;;  %v2905_v22 = vadd.f32 %v1702_v18, %v3987_v37  ;;  %v1704_v23 = vpop.f32.mrb[15].mxu1 }
 0x1a1   : > { %v1850_v24 = vpop.f32.mrb[15].mxu0  ;;  %1908 = vst [vmem:[%s4411_s8 + $0x58] sm:$0xff] %v4132_v16  ;;  %v2904_v25 = vadd.f32 %v2903_v17, %v1846_v15  ;;  %v2907_v26 = vadd.f32 %v1704_v23, %v3993_v39  ;;  %1926 = vadd.xlane.f32.xlu0 %v1925_v20  ;;  %v1928_v27 = vadd.f32 %v4132_v16, %v4121_v12  ;;  %v747_v39 = vld [vmem:[%s4407_s4 + $0x70] sm:$0xff] }
 0x1a2   : > { %v1877_v37 = vmul.f32 %v2902_v21, %v3997_v43  ;;  %v2906_v30 = vadd.f32 %v2905_v22, %v1848_v19 }
 0x1a3   : > { %v1878_v32 = vmul.f32 %v2904_v25, %v4001_v47  ;;  %v2908_v33 = vadd.f32 %v2907_v26, %v1850_v24  ;;  %1929 = vadd.xlane.f32.xlu1 %v1928_v27 }
 0x1a4   : > { %v1879_v35 = vmul.f32 %v2906_v30, %v3997_v43  ;;  %v4164_v42 = vadd.f32 %v1877_v37, %v745_v28 }
 0x1a5   : > { %v4166_v44 = vadd.f32 %v1878_v32, %v746_v29  ;;  %v1880_v46 = vmul.f32 %v2908_v33, %v4001_v47 }
 0x1a6   : > { %v4169_v48 = vadd.f32 %v1879_v35, %v747_v39  ;;  %1909 = vst [vmem:[%s4411_s8 + $0x60] sm:$0xff] %v4164_v42 }
 0x1a7   : > { %1910 = vst [vmem:[%s4411_s8 + $0x68] sm:$0xff] %v4166_v44  ;;  %v1896_v43 = vadd.f32 %v1880_v46, %v748_v41  ;;  %v1931_v49 = vadd.f32 %v4166_v44, %v4164_v42 }
 0x1a8   : > { %1911 = vst [vmem:[%s4411_s8 + $0x70] sm:$0xff] %v4169_v48 }
 0x1a9   : > { %1912 = vst [vmem:[%s4411_s8 + $0x78] sm:$0xff] %v1896_v43  ;;  %1932 = vadd.xlane.f32.xlu0 %v1931_v49  ;;  %v1934_v47 = vadd.f32 %v1896_v43, %v4169_v48 }
 0x1ab   : > { %1935 = vadd.xlane.f32.xlu1 %v1934_v47 }
 0x21e   : > { %v1915_v50 = vpop.xlane.xlu0 %1914 }
 0x21f   : > { %v1938_v51 = vmul.f32 0.00390625, %v1915_v50 }
 0x221   : > { %v4190_v52 = vsub.f32 %v4020_v1, %v1938_v51  ;;  %v4193_v53 = vsub.f32 %v4023_v5, %v1938_v51 }
 0x222   : > { %v1918_v54 = vpop.xlane.xlu0 %1917 }
 0x223   : > { %v1939_v55 = vmul.f32 0.00390625, %v1918_v54  ;;  %v1962_v56 = vmul.f32 %v4190_v52, %v4190_v52  ;;  %v1963_v57 = vmul.f32 %v4193_v53, %v4193_v53 }
 0x225   : > { %v4200_v58 = vsub.f32 %v4025_v6, %v1939_v55  ;;  %v4203_v59 = vsub.f32 %v4032_v10, %v1939_v55  ;;  %v1978_v60 = vadd.f32 %v1963_v57, %v1962_v56  ;;  %v2042_v55 = vld [vmem:[%s4408_s5] sm:$0x3] }
 0x226   : > { %v1921_v1 = vpop.xlane.xlu1 %1920 }
 0x227   : > { %v1940_v61 = vmul.f32 0.00390625, %v1921_v1  ;;  %1979 = vadd.xlane.f32.xlu0 %v1978_v60  ;;  %v1964_v5 = vmul.f32 %v4200_v58, %v4200_v58  ;;  %v1965_v62 = vmul.f32 %v4203_v59, %v4203_v59  ;;  %v4272_v1 = vrot.slane %v2042_v55, %v3979_v34 }
 0x229   : > { %v4210_v63 = vsub.f32 %v4068_v31, %v1940_v61  ;;  %v4213_v0 = vsub.f32 %v4071_v38, %v1940_v61  ;;  %v1981_v6 = vadd.f32 %v1965_v62, %v1964_v5  ;;  %v4275_v61 = vrot.slane %v2042_v55, %v3984_v36  ;;  %v2070_v5 = vld [vmem:[%s4409_s6] sm:$0x3] }
 0x22a   : > { %v1924_v2 = vpop.xlane.xlu1 %1923 }
 0x22b   : > { %v1941_v10 = vmul.f32 0.00390625, %v1924_v2  ;;  %1982 = vadd.xlane.f32.xlu1 %v1981_v6  ;;  %v1966_v3 = vmul.f32 %v4210_v63, %v4210_v63  ;;  %v1967_v8 = vmul.f32 %v4213_v0, %v4213_v0 }
 0x22d   : > { %v4220_v9 = vsub.f32 %v4073_v40, %v1941_v10  ;;  %v4223_v11 = vsub.f32 %v4080_v45, %v1941_v10  ;;  %v1984_v31 = vadd.f32 %v1967_v8, %v1966_v3  ;;  %v4283_v8 = vrot.slane %v2070_v5, %v3979_v34 }
 0x22e   : > { %v1927_v13 = vpop.xlane.xlu0 %1926 }
 0x22f   : > { %v1942_v38 = vmul.f32 0.00390625, %v1927_v13  ;;  %1985 = vadd.xlane.f32.xlu0 %v1984_v31  ;;  %v1968_v14 = vmul.f32 %v4220_v9, %v4220_v9  ;;  %v1969_v15 = vmul.f32 %v4223_v11, %v4223_v11  ;;  %v4286_v31 = vrot.slane %v2070_v5, %v3984_v36 }
 0x230   : > { %v1930_v17 = vpop.xlane.xlu1 %1929 }
 0x231   : > { %v4230_v18 = vsub.f32 %v4116_v4, %v1942_v38  ;;  %v4233_v40 = vsub.f32 %v4118_v7, %v1942_v38  ;;  %v1943_v19 = vmul.f32 0.00390625, %v1930_v17  ;;  %v1987_v45 = vadd.f32 %v1969_v15, %v1968_v14 }
 0x233   : > { %v4236_v20 = vsub.f32 %v4121_v12, %v1943_v19  ;;  %v4239_v21 = vsub.f32 %v4132_v16, %v1943_v19  ;;  %1988 = vadd.xlane.f32.xlu1 %v1987_v45  ;;  %v1970_v22 = vmul.f32 %v4230_v18, %v4230_v18  ;;  %v1971_v23 = vmul.f32 %v4233_v40, %v4233_v40 }
 0x235   : > { %v1990_v4 = vadd.f32 %v1971_v23, %v1970_v22  ;;  %v1972_v7 = vmul.f32 %v4236_v20, %v4236_v20  ;;  %v1973_v24 = vmul.f32 %v4239_v21, %v4239_v21 }
 0x236   : > { %v1933_v25 = vpop.xlane.xlu0 %1932 }
 0x237   : > { %v1944_v12 = vmul.f32 0.00390625, %v1933_v25  ;;  %1991 = vadd.xlane.f32.xlu0 %v1990_v4  ;;  %v1993_v26 = vadd.f32 %v1973_v24, %v1972_v7 }
 0x238   : > { %v1936_v16 = vpop.xlane.xlu1 %1935 }
 0x239   : > { %v4250_v27 = vsub.f32 %v4164_v42, %v1944_v12  ;;  %v4253_v28 = vsub.f32 %v4166_v44, %v1944_v12  ;;  %v1945_v37 = vmul.f32 0.00390625, %v1936_v16  ;;  %1994 = vadd.xlane.f32.xlu1 %v1993_v26 }
 0x23b   : > { %v4256_v29 = vsub.f32 %v4169_v48, %v1945_v37  ;;  %v4258_v30 = vsub.f32 %v1896_v43, %v1945_v37  ;;  %v1974_v32 = vmul.f32 %v4250_v27, %v4250_v27  ;;  %v1975_v39 = vmul.f32 %v4253_v28, %v4253_v28 }
 0x23d   : > { %v1996_v33 = vadd.f32 %v1975_v39, %v1974_v32  ;;  %v1976_v35 = vmul.f32 %v4256_v29, %v4256_v29  ;;  %v1977_v41 = vmul.f32 %v4258_v30, %v4258_v30 }
 0x23f   : > { %1997 = vadd.xlane.f32.xlu0 %v1996_v33  ;;  %v1999_v42 = vadd.f32 %v1977_v41, %v1976_v35 }
 0x241   : > { %2000 = vadd.xlane.f32.xlu1 %v1999_v42 }
 0x2b4   : > { %v1980_v44 = vpop.xlane.xlu0 %1979 }
 0x2b5   : > { %v2002_v46 = vmul.f32 0.00390625, %v1980_v44 }
 0x2b7   : > { %v2010_v48 = vadd.f32 1e-05, %v2002_v46 }
 0x2b8   : > { %v1983_v43 = vpop.xlane.xlu1 %1982 }
 0x2b9   : > { %3205 = vrsqrt.f32 %v2010_v48  ;;  %v2003_v49 = vmul.f32 0.00390625, %v1983_v43 }
 0x2bb   : > { %v2011_v47 = vadd.f32 1e-05, %v2003_v49 }
 0x2bc   : > { %v1986_v50 = vpop.xlane.xlu0 %1985 }
 0x2bd   : > { %3207 = vrsqrt.f32 %v2011_v47  ;;  %v2004_v51 = vmul.f32 0.00390625, %v1986_v50 }
 0x2bf   : > { %v2012_v54 = vadd.f32 1e-05, %v2004_v51 }
 0x2c0   : > { %v1989_v56 = vpop.xlane.xlu1 %1988 }
 0x2c1   : > { %3209 = vrsqrt.f32 %v2012_v54  ;;  %v2005_v57 = vmul.f32 0.00390625, %v1989_v56 }
 0x2c3   : > { %v3206_v60 = vpop.eup %3205  ;;  %v2013_v62 = vadd.f32 1e-05, %v2005_v57 }
 0x2c4   : > { %v2026_v6 = vmul.f32 %v3206_v60, %v4190_v52  ;;  %v2027_v2 = vmul.f32 %v3206_v60, %v4193_v53  ;;  %v1992_v10 = vpop.xlane.xlu0 %1991 }
 0x2c5   : > { %3211 = vrsqrt.f32 %v2013_v62  ;;  %v2006_v3 = vmul.f32 0.00390625, %v1992_v10 }
 0x2c6   : > { %v1995_v13 = vpop.xlane.xlu1 %1994  ;;  %v2054_v14 = vmul.f32 %v4272_v1, %v2026_v6  ;;  %v2055_v15 = vmul.f32 %v4275_v61, %v2027_v2 }
 0x2c7   : > { %v3208_v38 = vpop.eup %3207  ;;  %v2014_v17 = vadd.f32 1e-05, %v2006_v3  ;;  %v2007_v19 = vmul.f32 0.00390625, %v1995_v13 }
 0x2c8   : > { %v2028_v52 = vmul.f32 %v3208_v38, %v4200_v58  ;;  %v2029_v53 = vmul.f32 %v3208_v38, %v4203_v59  ;;  %v2082_v23 = vadd.f32 %v4283_v8, %v2054_v14  ;;  %v2083_v4 = vadd.f32 %v4286_v31, %v2055_v15 }
 0x2c9   : > { %3213 = vrsqrt.f32 %v2014_v17  ;;  %v2015_v45 = vadd.f32 1e-05, %v2007_v19 }
 0x2ca   : > { %v2056_v34 = vmul.f32 %v4272_v1, %v2028_v52  ;;  %v2057_v22 = vmul.f32 %v4275_v61, %v2029_v53 }
 0x2cb   : > { %v3210_v36 = vpop.eup %3209  ;;  %3215 = vrsqrt.f32 %v2015_v45 }
 0x2cc   : > { %v2084_v7 = vadd.f32 %v4283_v8, %v2056_v34  ;;  %v2085_v24 = vadd.f32 %v4286_v31, %v2057_v22  ;;  %v2030_v58 = vmul.f32 %v3210_v36, %v4210_v63  ;;  %v2031_v59 = vmul.f32 %v3210_v36, %v4213_v0  ;;  %v1998_v25 = vpop.xlane.xlu0 %1997 }
 0x2cd   : > { %v2008_v12 = vmul.f32 0.00390625, %v1998_v25 }
 0x2ce   : > { %v2098_v26 = vpack.c.bf16 %v2084_v7, %v2082_v23  ;;  %v2099_v16 = vpack.c.bf16 %v2085_v24, %v2083_v4  ;;  %v2001_v37 = vpop.xlane.xlu1 %2000  ;;  %v2058_v39 = vmul.f32 %v4272_v1, %v2030_v58  ;;  %v2059_v33 = vmul.f32 %v4275_v61, %v2031_v59 }
 0x2cf   : > { %v3212_v32 = vpop.eup %3211  ;;  %v2016_v35 = vadd.f32 1e-05, %v2008_v12  ;;  %v2009_v41 = vmul.f32 0.00390625, %v2001_v37 }
 0x2d0   : > { %2106 = vst [vmem:[#allocation2] sm:$0xff] %v2098_v26  ;;  %2107 = vst [vmem:[#allocation2 + $0x8] sm:$0xff] %v2099_v16  ;;  %v2032_v42 = vmul.f32 %v3212_v32, %v4220_v9  ;;  %v2033_v63 = vmul.f32 %v3212_v32, %v4223_v11  ;;  %v2086_v43 = vadd.f32 %v4283_v8, %v2058_v39 }
 0x2d1   : > { %3217 = vrsqrt.f32 %v2016_v35  ;;  %v2017_v0 = vadd.f32 1e-05, %v2009_v41  ;;  %v2087_v49 = vadd.f32 %v4286_v31, %v2059_v33 }
 0x2d2   : > { %v2060_v44 = vmul.f32 %v4272_v1, %v2032_v42  ;;  %v2061_v46 = vmul.f32 %v4275_v61, %v2033_v63 }
 0x2d3   : > { %v3214_v48 = vpop.eup %3213  ;;  %3219 = vrsqrt.f32 %v2017_v0 }
 0x2d4   : > { %v2088_v47 = vadd.f32 %v4283_v8, %v2060_v44  ;;  %v2089_v50 = vadd.f32 %v4286_v31, %v2061_v46  ;;  %v2034_v9 = vmul.f32 %v3214_v48, %v4230_v18  ;;  %v2035_v11 = vmul.f32 %v3214_v48, %v4233_v40 }
 0x2d5   : > { %v3216_v51 = vpop.eup %3215 }
 0x2d6   : > { %v2100_v54 = vpack.c.bf16 %v2088_v47, %v2086_v43  ;;  %v2101_v55 = vpack.c.bf16 %v2089_v50, %v2087_v49  ;;  %v2062_v56 = vmul.f32 %v4272_v1, %v2034_v9  ;;  %v2063_v57 = vmul.f32 %v4275_v61, %v2035_v11 }
 0x2d7   : > { %v2036_v60 = vmul.f32 %v3216_v51, %v4236_v20  ;;  %v2037_v5 = vmul.f32 %v3216_v51, %v4239_v21 }
 0x2d8   : > { %2108 = vst [vmem:[#allocation2 + $0x10] sm:$0xff] %v2100_v54  ;;  %2109 = vst [vmem:[#allocation2 + $0x18] sm:$0xff] %v2101_v55  ;;  %v2090_v40 = vadd.f32 %v4283_v8, %v2062_v56  ;;  %v2091_v2 = vadd.f32 %v4286_v31, %v2063_v57 }
 0x2d9   : > { %v2064_v62 = vmul.f32 %v4272_v1, %v2036_v60  ;;  %v2065_v6 = vmul.f32 %v4275_v61, %v2037_v5 }
 0x2db   : > { %v3218_v18 = vpop.eup %3217  ;;  %v2092_v10 = vadd.f32 %v4283_v8, %v2064_v62  ;;  %v2093_v3 = vadd.f32 %v4286_v31, %v2065_v6 }
 0x2dc   : > { %v2038_v13 = vmul.f32 %v3218_v18, %v4250_v27  ;;  %v2039_v20 = vmul.f32 %v3218_v18, %v4253_v28 }
 0x2dd   : > { %v3220_v21 = vpop.eup %3219  ;;  %v2102_v38 = vpack.c.bf16 %v2092_v10, %v2090_v40  ;;  %v2103_v14 = vpack.c.bf16 %v2093_v3, %v2091_v2 }
 0x2de   : > { %v2066_v15 = vmul.f32 %v4272_v1, %v2038_v13  ;;  %v2067_v17 = vmul.f32 %v4275_v61, %v2039_v20  ;;  %v2040_v19 = vmul.f32 %v3220_v21, %v4256_v29  ;;  %v2041_v52 = vmul.f32 %v3220_v21, %v4258_v30 }
 0x2df   : > { %2110 = vst [vmem:[#allocation2 + $0x20] sm:$0xff] %v2102_v38  ;;  %2111 = vst [vmem:[#allocation2 + $0x28] sm:$0xff] %v2103_v14 }
 0x2e0   : > { %v2068_v53 = vmul.f32 %v4272_v1, %v2040_v19  ;;  %v2069_v45 = vmul.f32 %v4275_v61, %v2041_v52  ;;  %v2094_v27 = vadd.f32 %v4283_v8, %v2066_v15  ;;  %v2095_v28 = vadd.f32 %v4286_v31, %v2067_v17 }
 0x2e2   : > { %v2096_v34 = vadd.f32 %v4283_v8, %v2068_v53  ;;  %v2097_v22 = vadd.f32 %v4286_v31, %v2069_v45 }
 0x2e4   : > { %v2104_v36 = vpack.c.bf16 %v2096_v34, %v2094_v27  ;;  %v2105_v23 = vpack.c.bf16 %v2097_v22, %v2095_v28 }
 0x2e6   : > { %2112 = vst [vmem:[#allocation2 + $0x30] sm:$0xff] %v2104_v36  ;;  %2113 = vst [vmem:[#allocation2 + $0x38] sm:$0xff] %v2105_v23 }
 0x2e7 PF: > { %v3221_v29 = vld [vmem:[%s3478_s15 + $0x4] ss:$8 sps:$4 sm:$0xff]   ;;  %v3223_v30 = vld [vmem:[%s3478_s15] ss:$8 sps:$4 sm:$0xff]   ;;  %v3224_v1 = vld [vmem:[%s3478_s15 + $0x14] ss:$8 sps:$4 sm:$0xff]  }
 0x2e8   : > { %2314 = vmatprep.subr.bf16.mxu0 %v3221_v29  ;;  %2941 = vmatprep.subr.bf16.mxu1 %v3221_v29  ;;  %v3226_v61 = vld [vmem:[%s3478_s15 + $0x10] ss:$8 sps:$4 sm:$0xff]   ;;  %v3227_v8 = vld [vmem:[%s3478_s15 + $0x24] ss:$8 sps:$4 sm:$0xff]   ;;  %v3229_v31 = vld [vmem:[%s3478_s15 + $0x20] ss:$8 sps:$4 sm:$0xff]  }
 0x2e9   : > { %2315 = vmatpush1.bf16.msra.mxu0 %v3223_v30  ;;  %2957 = vmatpush1.bf16.msra.mxu1 %v3223_v30  ;;  %v3230_v4 = vld [vmem:[%s3478_s15 + $0x34] ss:$8 sps:$4 sm:$0xff]   ;;  %v3232_v7 = vld [vmem:[%s3478_s15 + $0x30] ss:$8 sps:$4 sm:$0xff]   ;;  %v3233_v24 = vld [vmem:[%s3478_s15 + $0x44] ss:$8 sps:$4 sm:$0xff]  }
 0x2ea   : > { %2316 = vmatprep.subr.bf16.mxu0 %v3224_v1  ;;  %2942 = vmatprep.subr.bf16.mxu1 %v3224_v1  ;;  %v3235_v58 = vld [vmem:[%s3478_s15 + $0x40] ss:$8 sps:$4 sm:$0xff]   ;;  %v3236_v59 = vld [vmem:[%s3478_s15 + $0x54] ss:$8 sps:$4 sm:$0xff]   ;;  %v3238_v25 = vld [vmem:[%s3478_s15 + $0x50] ss:$8 sps:$4 sm:$0xff]  }
 0x2eb   : > { %v3239_v12 = vld [vmem:[%s3478_s15 + $0x64] ss:$8 sps:$4 sm:$0xff]   ;;  %v3241_v37 = vld [vmem:[%s3478_s15 + $0x60] ss:$8 sps:$4 sm:$0xff]   ;;  %v3242_v32 = vld [vmem:[%s3478_s15 + $0x74] ss:$8 sps:$4 sm:$0xff]  }
 0x2ec   : > { %v2115_v26 = vld [vmem:[#allocation2 + $0x8] sm:$0xff]  ;;  %v3244_v39 = vld [vmem:[%s3478_s15 + $0x70] ss:$8 sps:$4 sm:$0xff]   ;;  %v3248_v41 = vld [vmem:[%s3478_s15 + $0x94] ss:$8 sps:$4 sm:$0xff]  }
 0x2ed   : > { %2317 = vmatpush1.bf16.msra.mxu0 %v3226_v61  ;;  %2958 = vmatpush1.bf16.msra.mxu1 %v3226_v61  ;;  %v2119_v16 = vld [vmem:[#allocation2 + $0x28] sm:$0xff]  ;;  %v3250_v42 = vld [vmem:[%s3478_s15 + $0x90] ss:$8 sps:$4 sm:$0xff]   ;;  %v3254_v44 = vld [vmem:[%s3478_s15 + $0xb4] ss:$8 sps:$4 sm:$0xff]  }
 0x2ee   : > { %2318 = vmatprep.subr.bf16.mxu0 %v3227_v8  ;;  %2943 = vmatprep.subr.bf16.mxu1 %v3227_v8  ;;  %v3245_v33 = vld [vmem:[%s3478_s15 + $0x84] ss:$8 sps:$4 sm:$0xff]   ;;  %v3247_v35 = vld [vmem:[%s3478_s15 + $0x80] ss:$8 sps:$4 sm:$0xff]   ;;  %v3256_v46 = vld [vmem:[%s3478_s15 + $0xb0] ss:$8 sps:$4 sm:$0xff]  }
 0x2ef   : > { %2346 = vmatprep.mubr.bf16.mxu0 %v2115_v26  ;;  %2366 = vmatprep.mubr.bf16.mxu1 %v2119_v16  ;;  %v3251_v63 = vld [vmem:[%s3478_s15 + $0xa4] ss:$8 sps:$4 sm:$0xff]   ;;  %v3253_v0 = vld [vmem:[%s3478_s15 + $0xa0] ss:$8 sps:$4 sm:$0xff]   ;;  %v3260_v49 = vld [vmem:[%s3478_s15 + $0xd4] ss:$8 sps:$4 sm:$0xff]  }
 0x2f0   : > { %v3257_v48 = vld [vmem:[%s3478_s15 + $0xc4] ss:$8 sps:$4 sm:$0xff]   ;;  %v3259_v43 = vld [vmem:[%s3478_s15 + $0xc0] ss:$8 sps:$4 sm:$0xff]   ;;  %v3262_v47 = vld [vmem:[%s3478_s15 + $0xd0] ss:$8 sps:$4 sm:$0xff]  }
 0x2f1   : > { %2319 = vmatpush1.bf16.msra.mxu0 %v3229_v31  ;;  %2959 = vmatpush1.bf16.msra.mxu1 %v3229_v31  ;;  %v3263_v50 = vld [vmem:[%s3478_s15 + $0xe4] ss:$8 sps:$4 sm:$0xff]   ;;  %v3265_v9 = vld [vmem:[%s3478_s15 + $0xe0] ss:$8 sps:$4 sm:$0xff]   ;;  %v3266_v11 = vld [vmem:[%s3478_s15 + $0xf4] ss:$8 sps:$4 sm:$0xff]  }
 0x2f2   : > { %2320 = vmatprep.subr.bf16.mxu0 %v3230_v4  ;;  %2944 = vmatprep.subr.bf16.mxu1 %v3230_v4  ;;  %v3268_v51 = vld [vmem:[%s3478_s15 + $0xf0] ss:$8 sps:$4 sm:$0xff]   ;;  %v2114_v54 = vld [vmem:[#allocation2] sm:$0xff]  ;;  %s2876_s15 = sshll.u32 (%p3394_p6), %s3299_s11, 3 }
 0x2f3   : > { %v2118_v55 = vld [vmem:[#allocation2 + $0x20] sm:$0xff]  ;;  %v2117_v56 = vld [vmem:[#allocation2 + $0x18] sm:$0xff]  ;;  %v2116_v60 = vld [vmem:[#allocation2 + $0x10] sm:$0xff]  ;;  %s2465_s28 = scalar_lea.vmem (%p3394_p6), %s4412_s9, %s2876_s15 }
 0x2f4   : > { %v2121_v57 = vld [vmem:[#allocation2 + $0x38] sm:$0xff]  ;;  %v2120_v5 = vld [vmem:[#allocation2 + $0x30] sm:$0xff] }
 0x2f5   : > { %2321 = vmatpush1.bf16.msra.mxu0 %v3232_v7  ;;  %2960 = vmatpush1.bf16.msra.mxu1 %v3232_v7 }
 0x2f6   : > { %2322 = vmatprep.subr.bf16.mxu0 %v3233_v24  ;;  %2945 = vmatprep.subr.bf16.mxu1 %v3233_v24 }
 0x2f9   : > { %2323 = vmatpush1.bf16.msra.mxu0 %v3235_v58  ;;  %2961 = vmatpush1.bf16.msra.mxu1 %v3235_v58 }
 0x2fa   : > { %2324 = vmatprep.subr.bf16.mxu0 %v3236_v59  ;;  %2946 = vmatprep.subr.bf16.mxu1 %v3236_v59 }
 0x2fd   : > { %2325 = vmatpush1.bf16.msra.mxu0 %v3238_v25  ;;  %2962 = vmatpush1.bf16.msra.mxu1 %v3238_v25 }
 0x2fe   : > { %2326 = vmatprep.subr.bf16.mxu0 %v3239_v12  ;;  %2947 = vmatprep.subr.bf16.mxu1 %v3239_v12 }
 0x301   : > { %2327 = vmatpush1.bf16.msra.mxu0 %v3241_v37  ;;  %2963 = vmatpush1.bf16.msra.mxu1 %v3241_v37 }
 0x302   : > { %2328 = vmatprep.subr.bf16.mxu0 %v3242_v32  ;;  %2948 = vmatprep.subr.bf16.mxu1 %v3242_v32 }
 0x305   : > { %2329 = vmatpush1.bf16.msra.mxu0 %v3244_v39  ;;  %2964 = vmatpush1.bf16.msra.mxu1 %v3244_v39 }
 0x306   : > { %2330 = vmatprep.subr.bf16.mxu0 %v3245_v33  ;;  %2949 = vmatprep.subr.bf16.mxu1 %v3245_v33 }
 0x309   : > { %2331 = vmatpush1.bf16.msra.mxu0 %v3247_v35  ;;  %2965 = vmatpush1.bf16.msra.mxu1 %v3247_v35 }
 0x30a   : > { %2332 = vmatprep.subr.bf16.mxu0 %v3248_v41  ;;  %2950 = vmatprep.subr.bf16.mxu1 %v3248_v41 }
 0x30d   : > { %2333 = vmatpush1.bf16.msra.mxu0 %v3250_v42  ;;  %2966 = vmatpush1.bf16.msra.mxu1 %v3250_v42 }
 0x30e   : > { %2334 = vmatprep.subr.bf16.mxu0 %v3251_v63  ;;  %2951 = vmatprep.subr.bf16.mxu1 %v3251_v63 }
 0x311   : > { %2335 = vmatpush1.bf16.msra.mxu0 %v3253_v0  ;;  %2967 = vmatpush1.bf16.msra.mxu1 %v3253_v0 }
 0x312   : > { %2336 = vmatprep.subr.bf16.mxu0 %v3254_v44  ;;  %2952 = vmatprep.subr.bf16.mxu1 %v3254_v44 }
 0x315   : > { %2337 = vmatpush1.bf16.msra.mxu0 %v3256_v46  ;;  %2968 = vmatpush1.bf16.msra.mxu1 %v3256_v46 }
 0x316   : > { %2338 = vmatprep.subr.bf16.mxu0 %v3257_v48  ;;  %2953 = vmatprep.subr.bf16.mxu1 %v3257_v48 }
 0x319   : > { %2339 = vmatpush1.bf16.msra.mxu0 %v3259_v43  ;;  %2969 = vmatpush1.bf16.msra.mxu1 %v3259_v43 }
 0x31a   : > { %2340 = vmatprep.subr.bf16.mxu0 %v3260_v49  ;;  %2954 = vmatprep.subr.bf16.mxu1 %v3260_v49 }
 0x31d   : > { %2341 = vmatpush1.bf16.msra.mxu0 %v3262_v47  ;;  %2970 = vmatpush1.bf16.msra.mxu1 %v3262_v47 }
 0x31e   : > { %2342 = vmatprep.subr.bf16.mxu0 %v3263_v50  ;;  %2955 = vmatprep.subr.bf16.mxu1 %v3263_v50 }
 0x321   : > { %2343 = vmatpush1.bf16.msra.mxu0 %v3265_v9  ;;  %2971 = vmatpush1.bf16.msra.mxu1 %v3265_v9 }
 0x322   : > { %2344 = vmatprep.subr.bf16.mxu0 %v3266_v11  ;;  %2956 = vmatprep.subr.bf16.mxu1 %v3266_v11 }
 0x325   : > { %2345 = vmatpush1.bf16.msra.mxu0 %v3268_v51  ;;  %2972 = vmatpush1.bf16.msra.mxu1 %v3268_v51 }
 0x328   : > { %2347 = vmatmul.mubr.bf16.vlgmr.msra.gmra.mrb[0].mxu0 %v2114_v54  ;;  %2367 = vmatmul.mubr.bf16.vlgmr.msra.gmra.mrb[0].mxu1 %v2118_v55 }
 0x329   : > { %2356 = vmatprep.mubr.bf16.mxu0 %v2117_v56  ;;  %2376 = vmatprep.mubr.bf16.mxu1 %v2121_v57 }
 0x330   : > { %2357 = vmatmul.mubr.bf16.gmra.mrb[4].mxu0 %v2116_v60  ;;  %2377 = vmatmul.mubr.bf16.gmra.mrb[4].mxu1 %v2120_v5 }
 0x3fb   : > { %v2348_v62 = vpop.f32.mrb[0].mxu0  ;;  %v2368_v6 = vpop.f32.mrb[0].mxu1 }
 0x3fc   : > { %v2350_v18 = vpop.f32.mrb[1].mxu0  ;;  %v2370_v40 = vpop.f32.mrb[1].mxu1 }
 0x3fd   : > { %v2868_v2 = vpack.c.bf16 %v2350_v18, %v2348_v62  ;;  %v2872_v10 = vpack.c.bf16 %v2370_v40, %v2368_v6  ;;  %v2352_v3 = vpop.f32.mrb[2].mxu0  ;;  %v2372_v13 = vpop.f32.mrb[2].mxu1 }
 0x3fe   : > { %v2354_v20 = vpop.f32.mrb[3].mxu0  ;;  %v2374_v21 = vpop.f32.mrb[3].mxu1 }
 0x3ff   : > { %2435 = vst [vmem:[%s3480_s16] sm:$0xff] %v2868_v2  ;;  %2439 = vst [vmem:[%s3480_s16 + $0x20] sm:$0xff] %v2872_v10  ;;  %v2869_v38 = vpack.c.bf16 %v2354_v20, %v2352_v3  ;;  %v2873_v14 = vpack.c.bf16 %v2374_v21, %v2372_v13 }
 0x401   : > { %2436 = vst [vmem:[%s3480_s16 + $0x8] sm:$0xff] %v2869_v38  ;;  %2440 = vst [vmem:[%s3480_s16 + $0x28] sm:$0xff] %v2873_v14 }
 0x403   : > { %v2358_v15 = vpop.f32.mrb[4].mxu0  ;;  %v2378_v17 = vpop.f32.mrb[4].mxu1  ;;  %2459 = sbr.rel (!%p3394_p6) target bundleno = 1043 (0x413), region = 102 }
 0x404   : > { %v2360_v19 = vpop.f32.mrb[5].mxu0  ;;  %v2380_v52 = vpop.f32.mrb[5].mxu1 }
 0x405   : > { %v2870_v53 = vpack.c.bf16 %v2360_v19, %v2358_v15  ;;  %v2874_v45 = vpack.c.bf16 %v2380_v52, %v2378_v17  ;;  %v2362_v27 = vpop.f32.mrb[6].mxu0  ;;  %v2382_v28 = vpop.f32.mrb[6].mxu1 }
 0x406   : > { %v2364_v34 = vpop.f32.mrb[7].mxu0  ;;  %v2384_v22 = vpop.f32.mrb[7].mxu1  ;;  %v2507_v29 = vld [vmem:[%s3480_s16] sm:$0xff] (%p3394_p6) }
 0x407   : > { %2437 = vst [vmem:[%s3480_s16 + $0x10] sm:$0xff] %v2870_v53  ;;  %2441 = vst [vmem:[%s3480_s16 + $0x30] sm:$0xff] %v2874_v45  ;;  %v2871_v36 = vpack.c.bf16 %v2364_v34, %v2362_v27  ;;  %v2875_v23 = vpack.c.bf16 %v2384_v22, %v2382_v28  ;;  %v2515_v8 = vld [vmem:[%s3480_s16 + $0x20] sm:$0xff] (%p3394_p6) }
 0x408   : > { %v2509_v30 = vld [vmem:[%s3480_s16 + $0x8] sm:$0xff] (%p3394_p6)  ;;  %2508 = vst [vmem:[%s2465_s28] sm:$0xff] (%p3394_p6), %v2507_v29  ;;  %2516 = vst [vmem:[%s2465_s28 + $0x60] sm:$0xff] (%p3394_p6), %v2515_v8 }
 0x409   : > { %2438 = vst [vmem:[%s3480_s16 + $0x18] sm:$0xff] %v2871_v36  ;;  %2442 = vst [vmem:[%s3480_s16 + $0x38] sm:$0xff] %v2875_v23  ;;  %v2517_v31 = vld [vmem:[%s3480_s16 + $0x28] sm:$0xff] (%p3394_p6) }
 0x40a   : > { %2510 = vst [vmem:[%s2465_s28 + $0x18] sm:$0xff] %v2509_v30  ;;  %2518 = vst [vmem:[%s2465_s28 + $0x78] sm:$0xff] %v2517_v31 }
 0x40e   : > { %v2511_v1 = vld [vmem:[%s3480_s16 + $0x10] sm:$0xff] }
 0x40f   : > { %2512 = vst [vmem:[%s2465_s28 + $0x30] sm:$0xff] %v2511_v1  ;;  %v2519_v4 = vld [vmem:[%s3480_s16 + $0x30] sm:$0xff] }
 0x410   : > { %v2513_v61 = vld [vmem:[%s3480_s16 + $0x18] sm:$0xff]  ;;  %2520 = vst [vmem:[%s2465_s28 + $0x90] sm:$0xff] %v2519_v4 }
 0x411   : > { %2514 = vst [vmem:[%s2465_s28 + $0x48] sm:$0xff] %v2513_v61  ;;  %v2521_v7 = vld [vmem:[%s3480_s16 + $0x38] sm:$0xff] }
 0x412   : > { %2522 = vst [vmem:[%s2465_s28 + $0xa8] sm:$0xff] %v2521_v7 }
 0x413 PF: > { %s20_s13 = sadd.s32 1, %s3307_s13   ;;  %s4414_s30 = smov %s3295_s10 }
 0x414   : > { %p17_p12 = scmp.ge.s32.totalorder %s20_s13, 5   ;;  %s4415_s10 = smov %s3399_s19 }
 0x415   : > { %s4416_s11 = smov %s3303_s12  ;;  %s4417_s12 = smov %s4419_s14 }
 0x416   :  { %19 = sbr.rel (!%p17_p12) target bundleno = 3 (0x3), region = 185 }

// kernel: transformer_forward.13
= control target key start
LH: loop header
LB: loop body
LE: loop exit
PB: predicated region body
PF: predicated region fallthrough
CT: control target
= control target key end

     0   :  { %s2455_s0 = inlined_call_operand.vmem [shape: bf16[64,1024], index: 0, kind: input, shape index: {}]   ;;  %s2456_s1 = inlined_call_operand.vmem [shape: bf16[1024,256], index: 1, kind: input, shape index: {}]   ;;  %s2457_s2 = inlined_call_operand.vmem [shape: f32[1,256], index: 2, kind: input, shape index: {}]   ;;  %s2458_s3 = inlined_call_operand.vmem [shape: f32[1,256], index: 3, kind: input, shape index: {}]   ;;  %s2459_s4 = inlined_call_operand.vmem [shape: f32[64,256], index: 4, kind: input, shape index: {}]   ;;  %s2460_s5 = inlined_call_operand.hbm [shape: f32[64,256], index: 5, kind: output, shape index: {}]  }
   0x1   :  { %v1604_v0 = vld [vmem:[%s2456_s1 + $0x4] ss:$8 sps:$4 sm:$0xff]   ;;  %v1608_v2 = vld [vmem:[%s2456_s1] ss:$8 sps:$4 sm:$0xff]   ;;  %v1610_v4 = vld [vmem:[%s2456_s1 + $0x14] ss:$8 sps:$4 sm:$0xff]  }
   0x2   :  { %v1606_v1 = vld [vmem:[%s2456_s1 + $0x204] ss:$8 sps:$4 sm:$0xff]   ;;  %1009 = vmatprep.subr.bf16.mxu1 %v1604_v0  ;;  %v1609_v3 = vld [vmem:[%s2456_s1 + $0x200] ss:$8 sps:$4 sm:$0xff]   ;;  %v1612_v5 = vld [vmem:[%s2456_s1 + $0x214] ss:$8 sps:$4 sm:$0xff]  }
   0x3   :  { %1155 = vmatprep.subr.bf16.mxu0 %v1606_v1  ;;  %1010 = vmatpush1.bf16.msra.mxu1 %v1608_v2  ;;  %v1614_v6 = vld [vmem:[%s2456_s1 + $0x10] ss:$8 sps:$4 sm:$0xff]   ;;  %v1616_v8 = vld [vmem:[%s2456_s1 + $0x24] ss:$8 sps:$4 sm:$0xff]   ;;  %v1620_v10 = vld [vmem:[%s2456_s1 + $0x20] ss:$8 sps:$4 sm:$0xff]  }
   0x4   :  { %1156 = vmatpush1.bf16.msra.mxu0 %v1609_v3  ;;  %1011 = vmatprep.subr.bf16.mxu1 %v1610_v4  ;;  %v1615_v7 = vld [vmem:[%s2456_s1 + $0x210] ss:$8 sps:$4 sm:$0xff]   ;;  %v1618_v9 = vld [vmem:[%s2456_s1 + $0x224] ss:$8 sps:$4 sm:$0xff]   ;;  %v1621_v11 = vld [vmem:[%s2456_s1 + $0x220] ss:$8 sps:$4 sm:$0xff]  }
   0x5   :  { %1157 = vmatprep.subr.bf16.mxu0 %v1612_v5  ;;  %v1622_v12 = vld [vmem:[%s2456_s1 + $0x34] ss:$8 sps:$4 sm:$0xff]   ;;  %v1626_v14 = vld [vmem:[%s2456_s1 + $0x30] ss:$8 sps:$4 sm:$0xff]   ;;  %v1628_v16 = vld [vmem:[%s2456_s1 + $0x44] ss:$8 sps:$4 sm:$0xff]  }
   0x6   :  { %v1624_v13 = vld [vmem:[%s2456_s1 + $0x234] ss:$8 sps:$4 sm:$0xff]   ;;  %v1627_v15 = vld [vmem:[%s2456_s1 + $0x230] ss:$8 sps:$4 sm:$0xff]   ;;  %v1630_v17 = vld [vmem:[%s2456_s1 + $0x244] ss:$8 sps:$4 sm:$0xff]  }
   0x7   :  { %1012 = vmatpush1.bf16.msra.mxu1 %v1614_v6  ;;  %v1632_v18 = vld [vmem:[%s2456_s1 + $0x40] ss:$8 sps:$4 sm:$0xff]   ;;  %v1634_v20 = vld [vmem:[%s2456_s1 + $0x54] ss:$8 sps:$4 sm:$0xff]   ;;  %v1638_v22 = vld [vmem:[%s2456_s1 + $0x50] ss:$8 sps:$4 sm:$0xff]  }
   0x8   :  { %1158 = vmatpush1.bf16.msra.mxu0 %v1615_v7  ;;  %1013 = vmatprep.subr.bf16.mxu1 %v1616_v8  ;;  %v1633_v19 = vld [vmem:[%s2456_s1 + $0x240] ss:$8 sps:$4 sm:$0xff]   ;;  %v1636_v21 = vld [vmem:[%s2456_s1 + $0x254] ss:$8 sps:$4 sm:$0xff]   ;;  %v1639_v23 = vld [vmem:[%s2456_s1 + $0x250] ss:$8 sps:$4 sm:$0xff]  }
   0x9   :  { %1159 = vmatprep.subr.bf16.mxu0 %v1618_v9  ;;  %v1640_v24 = vld [vmem:[%s2456_s1 + $0x64] ss:$8 sps:$4 sm:$0xff]   ;;  %v1644_v26 = vld [vmem:[%s2456_s1 + $0x60] ss:$8 sps:$4 sm:$0xff]   ;;  %v1646_v28 = vld [vmem:[%s2456_s1 + $0x74] ss:$8 sps:$4 sm:$0xff]  }
   0xa   :  { %v1642_v25 = vld [vmem:[%s2456_s1 + $0x264] ss:$8 sps:$4 sm:$0xff]   ;;  %v1645_v27 = vld [vmem:[%s2456_s1 + $0x260] ss:$8 sps:$4 sm:$0xff]   ;;  %v1648_v29 = vld [vmem:[%s2456_s1 + $0x274] ss:$8 sps:$4 sm:$0xff]  }
   0xb   :  { %1014 = vmatpush1.bf16.msra.mxu1 %v1620_v10  ;;  %v1650_v30 = vld [vmem:[%s2456_s1 + $0x70] ss:$8 sps:$4 sm:$0xff]   ;;  %v1652_v32 = vld [vmem:[%s2456_s1 + $0x84] ss:$8 sps:$4 sm:$0xff]   ;;  %v1656_v34 = vld [vmem:[%s2456_s1 + $0x80] ss:$8 sps:$4 sm:$0xff]  }
   0xc   :  { %1160 = vmatpush1.bf16.msra.mxu0 %v1621_v11  ;;  %1015 = vmatprep.subr.bf16.mxu1 %v1622_v12  ;;  %v1651_v31 = vld [vmem:[%s2456_s1 + $0x270] ss:$8 sps:$4 sm:$0xff]   ;;  %v1654_v33 = vld [vmem:[%s2456_s1 + $0x284] ss:$8 sps:$4 sm:$0xff]   ;;  %v1657_v35 = vld [vmem:[%s2456_s1 + $0x280] ss:$8 sps:$4 sm:$0xff]  }
   0xd   :  { %1161 = vmatprep.subr.bf16.mxu0 %v1624_v13  ;;  %v1658_v36 = vld [vmem:[%s2456_s1 + $0x94] ss:$8 sps:$4 sm:$0xff]   ;;  %v1662_v38 = vld [vmem:[%s2456_s1 + $0x90] ss:$8 sps:$4 sm:$0xff]   ;;  %v1664_v40 = vld [vmem:[%s2456_s1 + $0xa4] ss:$8 sps:$4 sm:$0xff]  }
   0xe   :  { %v1660_v37 = vld [vmem:[%s2456_s1 + $0x294] ss:$8 sps:$4 sm:$0xff]   ;;  %v1663_v39 = vld [vmem:[%s2456_s1 + $0x290] ss:$8 sps:$4 sm:$0xff]   ;;  %v1666_v41 = vld [vmem:[%s2456_s1 + $0x2a4] ss:$8 sps:$4 sm:$0xff]  }
   0xf   :  { %1016 = vmatpush1.bf16.msra.mxu1 %v1626_v14  ;;  %v1668_v42 = vld [vmem:[%s2456_s1 + $0xa0] ss:$8 sps:$4 sm:$0xff]   ;;  %v1670_v44 = vld [vmem:[%s2456_s1 + $0xb4] ss:$8 sps:$4 sm:$0xff]   ;;  %v1674_v46 = vld [vmem:[%s2456_s1 + $0xb0] ss:$8 sps:$4 sm:$0xff]  }
  0x10   :  { %1162 = vmatpush1.bf16.msra.mxu0 %v1627_v15  ;;  %1017 = vmatprep.subr.bf16.mxu1 %v1628_v16  ;;  %v1669_v43 = vld [vmem:[%s2456_s1 + $0x2a0] ss:$8 sps:$4 sm:$0xff]   ;;  %v1672_v45 = vld [vmem:[%s2456_s1 + $0x2b4] ss:$8 sps:$4 sm:$0xff]   ;;  %v1675_v47 = vld [vmem:[%s2456_s1 + $0x2b0] ss:$8 sps:$4 sm:$0xff]  }
  0x11   :  { %1163 = vmatprep.subr.bf16.mxu0 %v1630_v17  ;;  %v21_v48 = vld [vmem:[%s2455_s0] sm:$0xff]  ;;  %v23_v53 = vld [vmem:[%s2455_s0 + $0x10] sm:$0xff] }
  0x12   :  { %v25_v49 = vld [vmem:[%s2455_s0 + $0x20] sm:$0xff]  ;;  %v27_v54 = vld [vmem:[%s2455_s0 + $0x30] sm:$0xff] }
  0x13   :  { %1018 = vmatpush1.bf16.msra.mxu1 %v1632_v18  ;;  %v1676_v50 = vld [vmem:[%s2456_s1 + $0xc4] ss:$8 sps:$4 sm:$0xff]   ;;  %v1378_v52 = vcombine.high %v21_v48, %v25_v49  ;;  %v1382_v55 = vcombine.high %v23_v53, %v27_v54  ;;  %v1680_v56 = vld [vmem:[%s2456_s1 + $0xc0] ss:$8 sps:$4 sm:$0xff]   ;;  %v1682_v58 = vld [vmem:[%s2456_s1 + $0xd4] ss:$8 sps:$4 sm:$0xff]   ;;  %v1377_v8 = vcombine.low %v21_v48, %v25_v49  ;;  %v1381_v10 = vcombine.low %v23_v53, %v27_v54 }
  0x14   :  { %1164 = vmatpush1.bf16.msra.mxu0 %v1633_v19  ;;  %1019 = vmatprep.subr.bf16.mxu1 %v1634_v20  ;;  %v1678_v51 = vld [vmem:[%s2456_s1 + $0x2c4] ss:$8 sps:$4 sm:$0xff]   ;;  %v1681_v57 = vld [vmem:[%s2456_s1 + $0x2c0] ss:$8 sps:$4 sm:$0xff]   ;;  %v1684_v59 = vld [vmem:[%s2456_s1 + $0x2d4] ss:$8 sps:$4 sm:$0xff]  }
  0x15   :  { %1165 = vmatprep.subr.bf16.mxu0 %v1636_v21  ;;  %1041 = vmatprep.mubr.bf16.mxu1 %v1378_v52  ;;  %v1686_v60 = vld [vmem:[%s2456_s1 + $0xd0] ss:$8 sps:$4 sm:$0xff]   ;;  %v1688_v62 = vld [vmem:[%s2456_s1 + $0xe4] ss:$8 sps:$4 sm:$0xff]   ;;  %v1692_v0 = vld [vmem:[%s2456_s1 + $0xe0] ss:$8 sps:$4 sm:$0xff]  }
  0x16   :  { %1187 = vmatprep.mubr.bf16.mxu0 %v1382_v55  ;;  %v1687_v61 = vld [vmem:[%s2456_s1 + $0x2d0] ss:$8 sps:$4 sm:$0xff]   ;;  %v1690_v63 = vld [vmem:[%s2456_s1 + $0x2e4] ss:$8 sps:$4 sm:$0xff]   ;;  %v1693_v1 = vld [vmem:[%s2456_s1 + $0x2e0] ss:$8 sps:$4 sm:$0xff]  }
  0x17   :  { %1020 = vmatpush1.bf16.msra.mxu1 %v1638_v22  ;;  %v1694_v2 = vld [vmem:[%s2456_s1 + $0xf4] ss:$8 sps:$4 sm:$0xff]   ;;  %v1698_v4 = vld [vmem:[%s2456_s1 + $0xf0] ss:$8 sps:$4 sm:$0xff]   ;;  %v1702_v6 = vld [vmem:[%s2456_s1 + $0x104] ss:$8 sps:$4 sm:$0xff]  }
  0x18   :  { %1166 = vmatpush1.bf16.msra.mxu0 %v1639_v23  ;;  %1021 = vmatprep.subr.bf16.mxu1 %v1640_v24  ;;  %v1696_v3 = vld [vmem:[%s2456_s1 + $0x2f4] ss:$8 sps:$4 sm:$0xff]   ;;  %v1699_v5 = vld [vmem:[%s2456_s1 + $0x2f0] ss:$8 sps:$4 sm:$0xff]   ;;  %v1705_v7 = vld [vmem:[%s2456_s1 + $0x304] ss:$8 sps:$4 sm:$0xff]  }
  0x19   :  { %1167 = vmatprep.subr.bf16.mxu0 %v1642_v25  ;;  %v1700_v9 = vld [vmem:[%s2456_s1 + $0x100] ss:$8 sps:$4 sm:$0xff]   ;;  %v1708_v12 = vld [vmem:[%s2456_s1 + $0x114] ss:$8 sps:$4 sm:$0xff]   ;;  %v1706_v14 = vld [vmem:[%s2456_s1 + $0x110] ss:$8 sps:$4 sm:$0xff]  }
  0x1a   :  { %v1703_v11 = vld [vmem:[%s2456_s1 + $0x300] ss:$8 sps:$4 sm:$0xff]   ;;  %v1711_v13 = vld [vmem:[%s2456_s1 + $0x314] ss:$8 sps:$4 sm:$0xff]   ;;  %v1709_v15 = vld [vmem:[%s2456_s1 + $0x310] ss:$8 sps:$4 sm:$0xff]  }
  0x1b   :  { %1022 = vmatpush1.bf16.msra.mxu1 %v1644_v26  ;;  %v1714_v16 = vld [vmem:[%s2456_s1 + $0x124] ss:$8 sps:$4 sm:$0xff]   ;;  %v1712_v18 = vld [vmem:[%s2456_s1 + $0x120] ss:$8 sps:$4 sm:$0xff]   ;;  %v31_v22 = vld [vmem:[%s2455_s0 + $0x50] sm:$0xff] }
  0x1c   :  { %1168 = vmatpush1.bf16.msra.mxu0 %v1645_v27  ;;  %1023 = vmatprep.subr.bf16.mxu1 %v1646_v28  ;;  %v1717_v17 = vld [vmem:[%s2456_s1 + $0x324] ss:$8 sps:$4 sm:$0xff]   ;;  %v1715_v19 = vld [vmem:[%s2456_s1 + $0x320] ss:$8 sps:$4 sm:$0xff]   ;;  %v35_v23 = vld [vmem:[%s2455_s0 + $0x70] sm:$0xff] }
  0x1d   :  { %1169 = vmatprep.subr.bf16.mxu0 %v1648_v29  ;;  %v29_v20 = vld [vmem:[%s2455_s0 + $0x40] sm:$0xff]  ;;  %v1720_v24 = vld [vmem:[%s2456_s1 + $0x134] ss:$8 sps:$4 sm:$0xff]   ;;  %v1390_v26 = vcombine.high %v31_v22, %v35_v23  ;;  %v1389_v29 = vcombine.low %v31_v22, %v35_v23 }
  0x1e   :  { %v33_v21 = vld [vmem:[%s2455_s0 + $0x60] sm:$0xff]  ;;  %v1723_v28 = vld [vmem:[%s2456_s1 + $0x334] ss:$8 sps:$4 sm:$0xff]  }
  0x1f   :  { %1024 = vmatpush1.bf16.msra.mxu1 %v1650_v30  ;;  %v1386_v25 = vcombine.high %v29_v20, %v33_v21  ;;  %v1385_v27 = vcombine.low %v29_v20, %v33_v21  ;;  %v1718_v30 = vld [vmem:[%s2456_s1 + $0x130] ss:$8 sps:$4 sm:$0xff]   ;;  %v1738_v48 = vld [vmem:[%s2456_s1 + $0x164] ss:$8 sps:$4 sm:$0xff]  }
  0x20   :  { %1170 = vmatpush1.bf16.msra.mxu0 %v1651_v31  ;;  %1025 = vmatprep.subr.bf16.mxu1 %v1652_v32  ;;  %v1721_v31 = vld [vmem:[%s2456_s1 + $0x330] ss:$8 sps:$4 sm:$0xff]   ;;  %v1726_v32 = vld [vmem:[%s2456_s1 + $0x144] ss:$8 sps:$4 sm:$0xff]  }
  0x21   :  { %1171 = vmatprep.subr.bf16.mxu0 %v1654_v33  ;;  %v1729_v33 = vld [vmem:[%s2456_s1 + $0x344] ss:$8 sps:$4 sm:$0xff]   ;;  %v47_v52 = vld [vmem:[%s2455_s0 + $0xd0] sm:$0xff] }
  0x22   :  { %v1741_v49 = vld [vmem:[%s2456_s1 + $0x364] ss:$8 sps:$4 sm:$0xff]   ;;  %v51_v54 = vld [vmem:[%s2455_s0 + $0xf0] sm:$0xff] }
  0x23   :  { %1026 = vmatpush1.bf16.msra.mxu1 %v1656_v34  ;;  %v37_v34 = vld [vmem:[%s2455_s0 + $0x80] sm:$0xff]  ;;  %v1406_v55 = vcombine.high %v47_v52, %v51_v54 }
  0x24   :  { %1172 = vmatpush1.bf16.msra.mxu0 %v1657_v35  ;;  %1027 = vmatprep.subr.bf16.mxu1 %v1658_v36  ;;  %v41_v35 = vld [vmem:[%s2455_s0 + $0xa0] sm:$0xff] }
  0x25   :  { %1173 = vmatprep.subr.bf16.mxu0 %v1660_v37  ;;  %v1394_v36 = vcombine.high %v37_v34, %v41_v35  ;;  %v39_v37 = vld [vmem:[%s2455_s0 + $0x90] sm:$0xff] }
  0x27   :  { %1028 = vmatpush1.bf16.msra.mxu1 %v1662_v38  ;;  %v43_v38 = vld [vmem:[%s2455_s0 + $0xb0] sm:$0xff] }
  0x28   :  { %1174 = vmatpush1.bf16.msra.mxu0 %v1663_v39  ;;  %1029 = vmatprep.subr.bf16.mxu1 %v1664_v40  ;;  %v1724_v39 = vld [vmem:[%s2456_s1 + $0x140] ss:$8 sps:$4 sm:$0xff]  }
  0x29   :  { %1175 = vmatprep.subr.bf16.mxu0 %v1666_v41  ;;  %v1727_v40 = vld [vmem:[%s2456_s1 + $0x340] ss:$8 sps:$4 sm:$0xff]   ;;  %v1398_v41 = vcombine.high %v39_v37, %v43_v38 }
  0x2b   :  { %1030 = vmatpush1.bf16.msra.mxu1 %v1668_v42  ;;  %v1393_v42 = vcombine.low %v37_v34, %v41_v35 }
  0x2c   :  { %1176 = vmatpush1.bf16.msra.mxu0 %v1669_v43  ;;  %1031 = vmatprep.subr.bf16.mxu1 %v1670_v44  ;;  %v1397_v43 = vcombine.low %v39_v37, %v43_v38  ;;  %v1732_v44 = vld [vmem:[%s2456_s1 + $0x154] ss:$8 sps:$4 sm:$0xff]  }
  0x2d   :  { %1177 = vmatprep.subr.bf16.mxu0 %v1672_v45  ;;  %v1735_v45 = vld [vmem:[%s2456_s1 + $0x354] ss:$8 sps:$4 sm:$0xff]  }
  0x2f   :  { %1032 = vmatpush1.bf16.msra.mxu1 %v1674_v46  ;;  %v1730_v46 = vld [vmem:[%s2456_s1 + $0x150] ss:$8 sps:$4 sm:$0xff]  }
  0x30   :  { %1178 = vmatpush1.bf16.msra.mxu0 %v1675_v47  ;;  %1033 = vmatprep.subr.bf16.mxu1 %v1676_v50  ;;  %v1733_v47 = vld [vmem:[%s2456_s1 + $0x350] ss:$8 sps:$4 sm:$0xff]   ;;  %v45_v50 = vld [vmem:[%s2455_s0 + $0xc0] sm:$0xff] }
  0x31   :  { %1179 = vmatprep.subr.bf16.mxu0 %v1678_v51  ;;  %v49_v51 = vld [vmem:[%s2455_s0 + $0xe0] sm:$0xff] }
  0x32   :  { %v1402_v53 = vcombine.high %v45_v50, %v49_v51 }
  0x33   :  { %1034 = vmatpush1.bf16.msra.mxu1 %v1680_v56  ;;  %v1736_v56 = vld [vmem:[%s2456_s1 + $0x160] ss:$8 sps:$4 sm:$0xff]  }
  0x34   :  { %1180 = vmatpush1.bf16.msra.mxu0 %v1681_v57  ;;  %1035 = vmatprep.subr.bf16.mxu1 %v1682_v58  ;;  %v1739_v57 = vld [vmem:[%s2456_s1 + $0x360] ss:$8 sps:$4 sm:$0xff]   ;;  %v1401_v58 = vcombine.low %v45_v50, %v49_v51 }
  0x35   :  { %1181 = vmatprep.subr.bf16.mxu0 %v1684_v59  ;;  %v1405_v59 = vcombine.low %v47_v52, %v51_v54 }
  0x37   :  { %1036 = vmatpush1.bf16.msra.mxu1 %v1686_v60  ;;  %v1744_v60 = vld [vmem:[%s2456_s1 + $0x174] ss:$8 sps:$4 sm:$0xff]  }
  0x38   :  { %1182 = vmatpush1.bf16.msra.mxu0 %v1687_v61  ;;  %1037 = vmatprep.subr.bf16.mxu1 %v1688_v62  ;;  %v1747_v61 = vld [vmem:[%s2456_s1 + $0x374] ss:$8 sps:$4 sm:$0xff]   ;;  %v2186_v62 = vld [vmem:[%s2455_s0 + $0x8] sm:$0xff] }
  0x39   :  { %1183 = vmatprep.subr.bf16.mxu0 %v1690_v63  ;;  %v2191_v63 = vld [vmem:[%s2455_s0 + $0x28] sm:$0xff] }
  0x3b   :  { %1038 = vmatpush1.bf16.msra.mxu1 %v1692_v0  ;;  %v2196_v0 = vld [vmem:[%s2455_s0 + $0x18] sm:$0xff] }
  0x3c   :  { %1184 = vmatpush1.bf16.msra.mxu0 %v1693_v1  ;;  %1039 = vmatprep.subr.bf16.mxu1 %v1694_v2  ;;  %v2201_v1 = vld [vmem:[%s2455_s0 + $0x38] sm:$0xff] }
  0x3d   :  { %1185 = vmatprep.subr.bf16.mxu0 %v1696_v3  ;;  %v1742_v2 = vld [vmem:[%s2456_s1 + $0x170] ss:$8 sps:$4 sm:$0xff]  }
  0x3e   :  { %v1745_v3 = vld [vmem:[%s2456_s1 + $0x370] ss:$8 sps:$4 sm:$0xff]  }
  0x3f   :  { %1040 = vmatpush1.bf16.msra.mxu1 %v1698_v4  ;;  %v1380_v4 = vcombine.high %v2186_v62, %v2191_v63 }
  0x40   :  { %1186 = vmatpush1.bf16.msra.mxu0 %v1699_v5  ;;  %1082 = vmatprep.subr.bf16.mxu1 %v1702_v6  ;;  %v1750_v5 = vld [vmem:[%s2456_s1 + $0x184] ss:$8 sps:$4 sm:$0xff]  }
  0x41   :  { %1228 = vmatprep.subr.bf16.mxu0 %v1705_v7  ;;  %v1753_v6 = vld [vmem:[%s2456_s1 + $0x384] ss:$8 sps:$4 sm:$0xff]   ;;  %v1384_v7 = vcombine.high %v2196_v0, %v2201_v1 }
  0x42   :  { %1042 = vmatmul.mubr.bf16.vlgmr.msra.gmra.mrb[0].mxu1 %v1377_v8  ;;  %v1748_v8 = vld [vmem:[%s2456_s1 + $0x180] ss:$8 sps:$4 sm:$0xff]  }
  0x43   :  { %1188 = vmatmul.mubr.bf16.vlgmr.msra.gmra.mrb[0].mxu0 %v1381_v10  ;;  %1083 = vmatpush1.bf16.msra.mxu1 %v1700_v9  ;;  %v1751_v9 = vld [vmem:[%s2456_s1 + $0x380] ss:$8 sps:$4 sm:$0xff]  }
  0x44   :  { %1229 = vmatpush1.bf16.msra.mxu0 %v1703_v11  ;;  %1084 = vmatprep.subr.bf16.mxu1 %v1708_v12 }
  0x45   :  { %1230 = vmatprep.subr.bf16.mxu0 %v1711_v13  ;;  %1051 = vmatprep.mubr.bf16.mxu1 %v1386_v25 }
  0x46   :  { %1197 = vmatprep.mubr.bf16.mxu0 %v1390_v26 }
  0x47   :  { %1085 = vmatpush1.bf16.msra.mxu1 %v1706_v14 }
  0x48   :  { %1231 = vmatpush1.bf16.msra.mxu0 %v1709_v15  ;;  %1086 = vmatprep.subr.bf16.mxu1 %v1714_v16 }
  0x49   :  { %1232 = vmatprep.subr.bf16.mxu0 %v1717_v17 }
  0x4a   :  { %1052 = vmatmul.mubr.bf16.gmra.mrb[4].mxu1 %v1385_v27 }
  0x4b   :  { %1198 = vmatmul.mubr.bf16.gmra.mrb[4].mxu0 %v1389_v29  ;;  %1087 = vmatpush1.bf16.msra.mxu1 %v1712_v18 }
  0x4c   :  { %1233 = vmatpush1.bf16.msra.mxu0 %v1715_v19  ;;  %1088 = vmatprep.subr.bf16.mxu1 %v1720_v24 }
  0x4d   :  { %1234 = vmatprep.subr.bf16.mxu0 %v1723_v28  ;;  %1061 = vmatprep.mubr.bf16.mxu1 %v1394_v36 }
  0x4e   :  { %1207 = vmatprep.mubr.bf16.mxu0 %v1398_v41 }
  0x4f   :  { %1089 = vmatpush1.bf16.msra.mxu1 %v1718_v30 }
  0x50   :  { %1235 = vmatpush1.bf16.msra.mxu0 %v1721_v31  ;;  %1090 = vmatprep.subr.bf16.mxu1 %v1726_v32 }
  0x51   :  { %1236 = vmatprep.subr.bf16.mxu0 %v1729_v33 }
  0x52   :  { %1062 = vmatmul.mubr.bf16.gmra.mrb[8].mxu1 %v1393_v42 }
  0x53   :  { %1208 = vmatmul.mubr.bf16.gmra.mrb[8].mxu0 %v1397_v43  ;;  %1091 = vmatpush1.bf16.msra.mxu1 %v1724_v39 }
  0x54   :  { %1237 = vmatpush1.bf16.msra.mxu0 %v1727_v40  ;;  %1092 = vmatprep.subr.bf16.mxu1 %v1732_v44 }
  0x55   :  { %1238 = vmatprep.subr.bf16.mxu0 %v1735_v45  ;;  %1071 = vmatprep.mubr.bf16.mxu1 %v1402_v53 }
  0x56   :  { %1217 = vmatprep.mubr.bf16.mxu0 %v1406_v55 }
  0x57   :  { %1093 = vmatpush1.bf16.msra.mxu1 %v1730_v46 }
  0x58   :  { %1239 = vmatpush1.bf16.msra.mxu0 %v1733_v47  ;;  %1094 = vmatprep.subr.bf16.mxu1 %v1738_v48 }
  0x59   :  { %1240 = vmatprep.subr.bf16.mxu0 %v1741_v49 }
  0x5a   :  { %1072 = vmatmul.mubr.bf16.gmra.mrb[12].mxu1 %v1401_v58 }
  0x5b   :  { %1218 = vmatmul.mubr.bf16.gmra.mrb[12].mxu0 %v1405_v59  ;;  %1095 = vmatpush1.bf16.msra.mxu1 %v1736_v56 }
  0x5c   :  { %1241 = vmatpush1.bf16.msra.mxu0 %v1739_v57  ;;  %1096 = vmatprep.subr.bf16.mxu1 %v1744_v60 }
  0x5d   :  { %1242 = vmatprep.subr.bf16.mxu0 %v1747_v61  ;;  %1114 = vmatprep.mubr.bf16.mxu1 %v1380_v4 }
  0x5e   :  { %1260 = vmatprep.mubr.bf16.mxu0 %v1384_v7 }
  0x5f   :  { %1097 = vmatpush1.bf16.msra.mxu1 %v1742_v2 }
  0x60   :  { %1243 = vmatpush1.bf16.msra.mxu0 %v1745_v3 }
  0x61   :  { %10 = vsyncpa [#allocation3], 0  ;;  %1098 = vmatprep.subr.bf16.mxu1 %v1750_v5  ;;  %1244 = vmatprep.subr.bf16.mxu0 %v1753_v6  ;;  %v1756_v10 = vld [vmem:[%s2456_s1 + $0x194] ss:$8 sps:$4 sm:$0xff]   ;;  %v1754_v12 = vld [vmem:[%s2456_s1 + $0x190] ss:$8 sps:$4 sm:$0xff]   ;;  %v1379_v42 = vcombine.low %v2186_v62, %v2191_v63  ;;  %v1383_v43 = vcombine.low %v2196_v0, %v2201_v1  ;;  %v199_v0 = vlaneseq }
  0x62   :  { %v1759_v11 = vld [vmem:[%s2456_s1 + $0x394] ss:$8 sps:$4 sm:$0xff]   ;;  %v1757_v13 = vld [vmem:[%s2456_s1 + $0x390] ss:$8 sps:$4 sm:$0xff]   ;;  %v1762_v14 = vld [vmem:[%s2456_s1 + $0x1a4] ss:$8 sps:$4 sm:$0xff]  }
  0x63   :  { %1099 = vmatpush1.bf16.msra.mxu1 %v1748_v8  ;;  %v1765_v15 = vld [vmem:[%s2456_s1 + $0x3a4] ss:$8 sps:$4 sm:$0xff]   ;;  %v1760_v16 = vld [vmem:[%s2456_s1 + $0x1a0] ss:$8 sps:$4 sm:$0xff]   ;;  %v1768_v18 = vld [vmem:[%s2456_s1 + $0x1b4] ss:$8 sps:$4 sm:$0xff]  }
  0x64   :  { %1245 = vmatpush1.bf16.msra.mxu0 %v1751_v9  ;;  %1100 = vmatprep.subr.bf16.mxu1 %v1756_v10  ;;  %v1763_v17 = vld [vmem:[%s2456_s1 + $0x3a0] ss:$8 sps:$4 sm:$0xff]   ;;  %v1771_v19 = vld [vmem:[%s2456_s1 + $0x3b4] ss:$8 sps:$4 sm:$0xff]   ;;  %v1766_v20 = vld [vmem:[%s2456_s1 + $0x1b0] ss:$8 sps:$4 sm:$0xff]  }
  0x65   :  { %1246 = vmatprep.subr.bf16.mxu0 %v1759_v11  ;;  %v1769_v21 = vld [vmem:[%s2456_s1 + $0x3b0] ss:$8 sps:$4 sm:$0xff]   ;;  %v1774_v22 = vld [vmem:[%s2456_s1 + $0x1c4] ss:$8 sps:$4 sm:$0xff]   ;;  %v1772_v24 = vld [vmem:[%s2456_s1 + $0x1c0] ss:$8 sps:$4 sm:$0xff]  }
  0x66   :  { %v1777_v23 = vld [vmem:[%s2456_s1 + $0x3c4] ss:$8 sps:$4 sm:$0xff]   ;;  %v1775_v25 = vld [vmem:[%s2456_s1 + $0x3c0] ss:$8 sps:$4 sm:$0xff]   ;;  %v1780_v26 = vld [vmem:[%s2456_s1 + $0x1d4] ss:$8 sps:$4 sm:$0xff]  }
  0x67   :  { %1101 = vmatpush1.bf16.msra.mxu1 %v1754_v12  ;;  %v1783_v27 = vld [vmem:[%s2456_s1 + $0x3d4] ss:$8 sps:$4 sm:$0xff]   ;;  %v1778_v28 = vld [vmem:[%s2456_s1 + $0x1d0] ss:$8 sps:$4 sm:$0xff]   ;;  %v1786_v30 = vld [vmem:[%s2456_s1 + $0x1e4] ss:$8 sps:$4 sm:$0xff]  }
  0x68   :  { %1247 = vmatpush1.bf16.msra.mxu0 %v1757_v13  ;;  %1102 = vmatprep.subr.bf16.mxu1 %v1762_v14  ;;  %v1781_v29 = vld [vmem:[%s2456_s1 + $0x3d0] ss:$8 sps:$4 sm:$0xff]   ;;  %v1789_v31 = vld [vmem:[%s2456_s1 + $0x3e4] ss:$8 sps:$4 sm:$0xff]   ;;  %v1784_v32 = vld [vmem:[%s2456_s1 + $0x1e0] ss:$8 sps:$4 sm:$0xff]  }
  0x69   :  { %1248 = vmatprep.subr.bf16.mxu0 %v1765_v15  ;;  %v1787_v33 = vld [vmem:[%s2456_s1 + $0x3e0] ss:$8 sps:$4 sm:$0xff]   ;;  %v1792_v34 = vld [vmem:[%s2456_s1 + $0x1f4] ss:$8 sps:$4 sm:$0xff]   ;;  %v1790_v36 = vld [vmem:[%s2456_s1 + $0x1f0] ss:$8 sps:$4 sm:$0xff]  }
  0x6a   :  { %v1795_v35 = vld [vmem:[%s2456_s1 + $0x3f4] ss:$8 sps:$4 sm:$0xff]   ;;  %v1793_v37 = vld [vmem:[%s2456_s1 + $0x3f0] ss:$8 sps:$4 sm:$0xff]   ;;  %v30_v38 = vld [vmem:[%s2455_s0 + $0x48] sm:$0xff]  ;;  %v200_v1 = vshrl.u32 %v199_v0, 7 }
  0x6b   :  { %1103 = vmatpush1.bf16.msra.mxu1 %v1760_v16  ;;  %v34_v39 = vld [vmem:[%s2455_s0 + $0x68] sm:$0xff]  ;;  %v32_v40 = vld [vmem:[%s2455_s0 + $0x58] sm:$0xff]  ;;  %v197_v3 = vld [vmem:[%s2457_s2] sm:$0x3] }
  0x6c   :  { %1249 = vmatpush1.bf16.msra.mxu0 %v1763_v17  ;;  %1104 = vmatprep.subr.bf16.mxu1 %v1768_v18  ;;  %v36_v41 = vld [vmem:[%s2455_s0 + $0x78] sm:$0xff]  ;;  %v1388_v44 = vcombine.high %v30_v38, %v34_v39  ;;  %v38_v46 = vld [vmem:[%s2455_s0 + $0x88] sm:$0xff]  ;;  %v1387_v50 = vcombine.low %v30_v38, %v34_v39  ;;  %v201_v2 = vsub.s32 0, %v200_v1  ;;  %v205_v4 = vsub.s32 1, %v200_v1  ;;  %v1301_v6 = vld [vmem:[%s2458_s3] sm:$0x3] }
  0x6d   :  { %1250 = vmatprep.subr.bf16.mxu0 %v1771_v19  ;;  %v1392_v45 = vcombine.high %v32_v40, %v36_v41  ;;  %v42_v47 = vld [vmem:[%s2455_s0 + $0xa8] sm:$0xff]  ;;  %v40_v48 = vld [vmem:[%s2455_s0 + $0x98] sm:$0xff]  ;;  %v1391_v51 = vcombine.low %v32_v40, %v36_v41  ;;  %s1820_s3 = smov [#allocation2]  }
  0x6e   :  { %v44_v49 = vld [vmem:[%s2455_s0 + $0xb8] sm:$0xff]  ;;  %v1396_v52 = vcombine.high %v38_v46, %v42_v47  ;;  %v46_v54 = vld [vmem:[%s2455_s0 + $0xc8] sm:$0xff]  ;;  %v1395_v58 = vcombine.low %v38_v46, %v42_v47  ;;  %v2352_v5 = vrot.slane %v197_v3, %v201_v2  ;;  %v2357_v7 = vrot.slane %v197_v3, %v205_v4  ;;  %s1366_s15 = sshll.u32 %s1820_s3, 4  ;;  %s1367_s15 = int_to_ptr.vmem [resolvable:$true] %s1366_s15 }
  0x6f   :  { %1105 = vmatpush1.bf16.msra.mxu1 %v1766_v20  ;;  %v1400_v53 = vcombine.high %v40_v48, %v44_v49  ;;  %v50_v55 = vld [vmem:[%s2455_s0 + $0xe8] sm:$0xff]  ;;  %v48_v56 = vld [vmem:[%s2455_s0 + $0xd8] sm:$0xff]  ;;  %v1399_v59 = vcombine.low %v40_v48, %v44_v49  ;;  %v2360_v11 = vrot.slane %v1301_v6, %v201_v2  ;;  %v2363_v15 = vrot.slane %v1301_v6, %v205_v4  ;;  %s1796_s18 = scalar_lea.vmem %s1367_s15, 2048  ;;  %p1801_p1 = scmp.lt.s32.totalorder %s1367_s15, %s1367_s15 }
  0x70   :  { %1251 = vmatpush1.bf16.msra.mxu0 %v1769_v21  ;;  %1106 = vmatprep.subr.bf16.mxu1 %v1774_v22  ;;  %v52_v57 = vld [vmem:[%s2455_s0 + $0xf8] sm:$0xff]  ;;  %v1404_v60 = vcombine.high %v46_v54, %v50_v55  ;;  %v1403_v62 = vcombine.low %v46_v54, %v50_v55  ;;  %v181_v22 = vld [vmem:[%s2459_s4] sm:$0xff]  ;;  %v186_v54 = vld [vmem:[%s2459_s4 + $0x28] sm:$0xff]  ;;  %p1797_p0 = scmp.ne.s32.totalorder %s1367_s15, %s1796_s18  ;;  %p1802_p2 = scmp.lt.s32.totalorder %s1796_s18, %s1796_s18 }
  0x71   :  { %1252 = vmatprep.subr.bf16.mxu0 %v1777_v23  ;;  %v1408_v61 = vcombine.high %v48_v56, %v52_v57  ;;  %v1407_v63 = vcombine.low %v48_v56, %v52_v57  ;;  %v187_v57 = vld [vmem:[%s2459_s4 + $0x30] sm:$0xff] }
  0x72   :  { %p1803_p3 = por %p1802_p2, %p1801_p1 }
  0x73   :  { %1107 = vmatpush1.bf16.msra.mxu1 %v1772_v24 }
  0x74   :  { %1253 = vmatpush1.bf16.msra.mxu0 %v1775_v25  ;;  %1108 = vmatprep.subr.bf16.mxu1 %v1780_v26  ;;  %v182_v26 = vld [vmem:[%s2459_s4 + $0x8] sm:$0xff]  ;;  %p1804_p4 = pnand %p1803_p3, %p1797_p0 }
  0x75   :  { %1254 = vmatprep.subr.bf16.mxu0 %v1783_v27 }
  0x77   :  { %1109 = vmatpush1.bf16.msra.mxu1 %v1778_v28 }
  0x78   :  { %1255 = vmatpush1.bf16.msra.mxu0 %v1781_v29  ;;  %1110 = vmatprep.subr.bf16.mxu1 %v1786_v30  ;;  %v183_v29 = vld [vmem:[%s2459_s4 + $0x10] sm:$0xff] }
  0x79   :  { %1256 = vmatprep.subr.bf16.mxu0 %v1789_v31 }
  0x7b   :  { %1111 = vmatpush1.bf16.msra.mxu1 %v1784_v32 }
  0x7c   :  { %1257 = vmatpush1.bf16.msra.mxu0 %v1787_v33  ;;  %1112 = vmatprep.subr.bf16.mxu1 %v1792_v34  ;;  %v184_v33 = vld [vmem:[%s2459_s4 + $0x18] sm:$0xff] }
  0x7d   :  { %1258 = vmatprep.subr.bf16.mxu0 %v1795_v35 }
  0x7f   :  { %1113 = vmatpush1.bf16.msra.mxu1 %v1790_v36 }
  0x80   :  { %1259 = vmatpush1.bf16.msra.mxu0 %v1793_v37 }
  0x82   :  { %1115 = vmatmul.mubr.bf16.vlgmr.msra.gmra.mrb[0].mxu1 %v1379_v42 }
  0x83   :  { %1261 = vmatmul.mubr.bf16.vlgmr.msra.gmra.mrb[0].mxu0 %v1383_v43  ;;  %1124 = vmatprep.mubr.bf16.mxu1 %v1388_v44 }
  0x84   :  { %1270 = vmatprep.mubr.bf16.mxu0 %v1392_v45 }
  0x8a   :  { %1125 = vmatmul.mubr.bf16.gmra.mrb[4].mxu1 %v1387_v50  ;;  %v185_v50 = vld [vmem:[%s2459_s4 + $0x20] sm:$0xff] }
  0x8b   :  { %1271 = vmatmul.mubr.bf16.gmra.mrb[4].mxu0 %v1391_v51  ;;  %1134 = vmatprep.mubr.bf16.mxu1 %v1396_v52 }
  0x8c   :  { %1280 = vmatprep.mubr.bf16.mxu0 %v1400_v53 }
  0x92   :  { %1135 = vmatmul.mubr.bf16.gmra.mrb[8].mxu1 %v1395_v58 }
  0x93   :  { %1281 = vmatmul.mubr.bf16.gmra.mrb[8].mxu0 %v1399_v59  ;;  %1144 = vmatprep.mubr.bf16.mxu1 %v1404_v60 }
  0x94   :  { %1290 = vmatprep.mubr.bf16.mxu0 %v1408_v61  ;;  %v188_v61 = vld [vmem:[%s2459_s4 + $0x38] sm:$0xff] }
  0x9a   :  { %1145 = vmatmul.mubr.bf16.gmra.mrb[12].mxu1 %v1403_v62 }
  0x9b   :  { %1291 = vmatmul.mubr.bf16.gmra.mrb[12].mxu0 %v1407_v63 }
 0x155   :  { %v1116_v8 = vpop.f32.mrb[0].mxu1 }
 0x156   :  { %v1262_v9 = vpop.f32.mrb[0].mxu0  ;;  %v1537_v10 = vadd.f32 %v1116_v8, %v2352_v5  ;;  %v1118_v12 = vpop.f32.mrb[1].mxu1 }
 0x157   :  { %v1264_v13 = vpop.f32.mrb[1].mxu0  ;;  %v1539_v14 = vadd.f32 %v1118_v12, %v2357_v7  ;;  %v1120_v16 = vpop.f32.mrb[2].mxu1 }
 0x158   :  { %v1266_v17 = vpop.f32.mrb[2].mxu0  ;;  %v1538_v18 = vadd.f32 %v1537_v10, %v1262_v9  ;;  %v1541_v19 = vadd.f32 %v1120_v16, %v2352_v5  ;;  %v1122_v20 = vpop.f32.mrb[3].mxu1 }
 0x159   :  { %v1268_v21 = vpop.f32.mrb[3].mxu0  ;;  %v1540_v23 = vadd.f32 %v1539_v14, %v1264_v13  ;;  %v1543_v24 = vadd.f32 %v1122_v20, %v2357_v7 }
 0x15a   :  { %v1313_v25 = vmul.f32 %v1538_v18, %v2360_v11  ;;  %v1542_v27 = vadd.f32 %v1541_v19, %v1266_v17  ;;  %v189_v18 = vld [vmem:[%s2459_s4 + $0x40] sm:$0xff] }
 0x15b   :  { %v1314_v28 = vmul.f32 %v1540_v23, %v2363_v15  ;;  %v1544_v30 = vadd.f32 %v1543_v24, %v1268_v21 }
 0x15c   :  { %v1329_v31 = vadd.f32 %v1313_v25, %v181_v22  ;;  %v1315_v32 = vmul.f32 %v1542_v27, %v2360_v11  ;;  %v190_v22 = vld [vmem:[%s2459_s4 + $0x48] sm:$0xff]  ;;  %v191_v25 = vld [vmem:[%s2459_s4 + $0x50] sm:$0xff] }
 0x15d   :  { %v1330_v34 = vadd.f32 %v1314_v28, %v182_v26  ;;  %v1316_v35 = vmul.f32 %v1544_v30, %v2363_v15  ;;  %v1126_v36 = vpop.f32.mrb[4].mxu1 }
 0x15e   :  { %v1272_v37 = vpop.f32.mrb[4].mxu0  ;;  %1345 = vst [vmem:[#allocation2] sm:$0xff] %v1329_v31  ;;  %v1331_v38 = vadd.f32 %v1315_v32, %v183_v29  ;;  %v1545_v39 = vadd.f32 %v1126_v36, %v2352_v5  ;;  %v1128_v40 = vpop.f32.mrb[5].mxu1  ;;  %v192_v29 = vld [vmem:[%s2459_s4 + $0x58] sm:$0xff] }
 0x15f   :  { %v1274_v41 = vpop.f32.mrb[5].mxu0  ;;  %1346 = vst [vmem:[#allocation2 + $0x8] sm:$0xff] %v1330_v34  ;;  %v1332_v42 = vadd.f32 %v1316_v35, %v184_v33  ;;  %v1547_v43 = vadd.f32 %v1128_v40, %v2357_v7  ;;  %v1130_v44 = vpop.f32.mrb[6].mxu1 }
 0x160   :  { %v1276_v45 = vpop.f32.mrb[6].mxu0  ;;  %1347 = vst [vmem:[#allocation2 + $0x10] sm:$0xff] %v1331_v38  ;;  %v1546_v46 = vadd.f32 %v1545_v39, %v1272_v37  ;;  %v1549_v47 = vadd.f32 %v1130_v44, %v2352_v5  ;;  %v1132_v48 = vpop.f32.mrb[7].mxu1 }
 0x161   :  { %v1278_v49 = vpop.f32.mrb[7].mxu0  ;;  %1348 = vst [vmem:[#allocation2 + $0x18] sm:$0xff] %v1332_v42  ;;  %v1548_v51 = vadd.f32 %v1547_v43, %v1274_v41  ;;  %v1551_v52 = vadd.f32 %v1132_v48, %v2357_v7 }
 0x162   :  { %v1317_v53 = vmul.f32 %v1546_v46, %v2360_v11  ;;  %v1550_v55 = vadd.f32 %v1549_v47, %v1276_v45  ;;  %v193_v46 = vld [vmem:[%s2459_s4 + $0x60] sm:$0xff] }
 0x163   :  { %v1318_v56 = vmul.f32 %v1548_v51, %v2363_v15  ;;  %v1552_v58 = vadd.f32 %v1551_v52, %v1278_v49 }
 0x164   :  { %v1333_v59 = vadd.f32 %v1317_v53, %v185_v50  ;;  %v1319_v60 = vmul.f32 %v1550_v55, %v2360_v11  ;;  %v194_v50 = vld [vmem:[%s2459_s4 + $0x68] sm:$0xff] }
 0x165   :  { %v1334_v62 = vadd.f32 %v1318_v56, %v186_v54  ;;  %v1320_v63 = vmul.f32 %v1552_v58, %v2363_v15  ;;  %v1136_v0 = vpop.f32.mrb[8].mxu1 }
 0x166   :  { %v1282_v1 = vpop.f32.mrb[8].mxu0  ;;  %1349 = vst [vmem:[#allocation2 + $0x20] sm:$0xff] %v1333_v59  ;;  %v1335_v2 = vadd.f32 %v1319_v60, %v187_v57  ;;  %v1553_v3 = vadd.f32 %v1136_v0, %v2352_v5  ;;  %v1138_v4 = vpop.f32.mrb[9].mxu1 }
 0x167   :  { %v1284_v6 = vpop.f32.mrb[9].mxu0  ;;  %1350 = vst [vmem:[#allocation2 + $0x28] sm:$0xff] %v1334_v62  ;;  %v1336_v8 = vadd.f32 %v1320_v63, %v188_v61  ;;  %v1555_v9 = vadd.f32 %v1138_v4, %v2357_v7  ;;  %v1140_v10 = vpop.f32.mrb[10].mxu1 }
 0x168   :  { %v1286_v12 = vpop.f32.mrb[10].mxu0  ;;  %1351 = vst [vmem:[#allocation2 + $0x30] sm:$0xff] %v1335_v2  ;;  %v1554_v13 = vadd.f32 %v1553_v3, %v1282_v1  ;;  %v1557_v14 = vadd.f32 %v1140_v10, %v2352_v5  ;;  %v1142_v16 = vpop.f32.mrb[11].mxu1 }
 0x169   :  { %v1288_v17 = vpop.f32.mrb[11].mxu0  ;;  %1352 = vst [vmem:[#allocation2 + $0x38] sm:$0xff] %v1336_v8  ;;  %v1556_v19 = vadd.f32 %v1555_v9, %v1284_v6  ;;  %v1559_v20 = vadd.f32 %v1142_v16, %v2357_v7 }
 0x16a   :  { %v1321_v21 = vmul.f32 %v1554_v13, %v2360_v11  ;;  %v1558_v23 = vadd.f32 %v1557_v14, %v1286_v12 }
 0x16b   :  { %v1322_v24 = vmul.f32 %v1556_v19, %v2363_v15  ;;  %v1560_v26 = vadd.f32 %v1559_v20, %v1288_v17 }
 0x16c   :  { %v1337_v27 = vadd.f32 %v1321_v21, %v189_v18  ;;  %v1323_v28 = vmul.f32 %v1558_v23, %v2360_v11 }
 0x16d   :  { %v1338_v30 = vadd.f32 %v1322_v24, %v190_v22  ;;  %v1324_v31 = vmul.f32 %v1560_v26, %v2363_v15  ;;  %v1146_v32 = vpop.f32.mrb[12].mxu1 }
 0x16e   :  { %v1292_v33 = vpop.f32.mrb[12].mxu0  ;;  %1353 = vst [vmem:[#allocation2 + $0x40] sm:$0xff] %v1337_v27  ;;  %v1339_v34 = vadd.f32 %v1323_v28, %v191_v25  ;;  %v1561_v35 = vadd.f32 %v1146_v32, %v2352_v5  ;;  %v1148_v36 = vpop.f32.mrb[13].mxu1 }
 0x16f   :  { %v1294_v37 = vpop.f32.mrb[13].mxu0  ;;  %1354 = vst [vmem:[#allocation2 + $0x48] sm:$0xff] %v1338_v30  ;;  %v1340_v38 = vadd.f32 %v1324_v31, %v192_v29  ;;  %v1563_v39 = vadd.f32 %v1148_v36, %v2357_v7  ;;  %v1150_v40 = vpop.f32.mrb[14].mxu1 }
 0x170   :  { %v1296_v41 = vpop.f32.mrb[14].mxu0  ;;  %1355 = vst [vmem:[#allocation2 + $0x50] sm:$0xff] %v1339_v34  ;;  %v1562_v42 = vadd.f32 %v1561_v35, %v1292_v33  ;;  %v1565_v43 = vadd.f32 %v1150_v40, %v2352_v5  ;;  %v1152_v44 = vpop.f32.mrb[15].mxu1  ;;  %v195_v5 = vld [vmem:[%s2459_s4 + $0x70] sm:$0xff] }
 0x171   :  { %v1298_v45 = vpop.f32.mrb[15].mxu0  ;;  %1356 = vst [vmem:[#allocation2 + $0x58] sm:$0xff] %v1340_v38  ;;  %v1564_v47 = vadd.f32 %v1563_v39, %v1294_v37  ;;  %v1567_v48 = vadd.f32 %v1152_v44, %v2357_v7  ;;  %v196_v7 = vld [vmem:[%s2459_s4 + $0x78] sm:$0xff] }
 0x172   :  { %v1325_v49 = vmul.f32 %v1562_v42, %v2360_v11  ;;  %v1566_v51 = vadd.f32 %v1565_v43, %v1296_v41 }
 0x173   :  { %v1326_v52 = vmul.f32 %v1564_v47, %v2363_v15  ;;  %v1568_v53 = vadd.f32 %v1567_v48, %v1298_v45 }
 0x174   :  { %v1341_v54 = vadd.f32 %v1325_v49, %v193_v46  ;;  %v1327_v55 = vmul.f32 %v1566_v51, %v2360_v11 }
 0x175   :  { %v1342_v56 = vadd.f32 %v1326_v52, %v194_v50  ;;  %v1328_v57 = vmul.f32 %v1568_v53, %v2363_v15 }
 0x176   :  { %1357 = vst [vmem:[#allocation2 + $0x60] sm:$0xff] %v1341_v54  ;;  %v1343_v58 = vadd.f32 %v1327_v55, %v195_v5 }
 0x177   :  { %1358 = vst [vmem:[#allocation2 + $0x68] sm:$0xff] %v1342_v56  ;;  %v1344_v59 = vadd.f32 %v1328_v57, %v196_v7 }
 0x178   :  { %1359 = vst [vmem:[#allocation2 + $0x70] sm:$0xff] %v1343_v58 }
 0x179   :  { %1360 = vst [vmem:[#allocation2 + $0x78] sm:$0xff] %v1344_v59 }
 0x17a   :  { %1807 = shalt.err (!%p1804_p4)
}
 0x17b   :  { %s1808_s4 = scalar_lea.hbm %s2460_s5, 2048 }
 0x17c   :  { %p1809_p5 = scmp.ne.s32.totalorder %s2460_s5, %s1808_s4  ;;  %p1812_p6 = scmp.lt.u32.totalorder %s1808_s4, %s2460_s5 }
 0x17e   :  { %p1814_p7 = pnand %p1812_p6, %p1809_p5 }
 0x180   :  { %1817 = shalt.err (!%p1814_p7)
}
 0x181   :  { %s1821_s24 = smov 256   ;;  %s1822_s25 = smov 16  }
 0x182   :  { %1372 = dma.vmem_to_hbm [thread:$0]  %s1367_s15, 2048, %s2460_s5, [#allocation3], %s1821_s24, %s1821_s24, %s1822_s25  }
 0x183   :  { %1818 = dma.done.wait [#allocation3], 2048  }
 0x184   :  { %1819 = vsyncadd [#allocation3], 4294965248 }
 0x185   :  { %1376 = vsyncpa [#allocation3], 1 }

// kernel: transformer_forward.12
= control target key start
LH: loop header
LB: loop body
LE: loop exit
PB: predicated region body
PF: predicated region fallthrough
CT: control target
= control target key end

     0   :  { %s3805_s0 = inlined_call_operand.vmem [shape: bf16[64,256], index: 0, kind: input, shape index: {}]   ;;  %s3806_s1 = inlined_call_operand.vmem [shape: bf16[256,256], index: 1, kind: input, shape index: {}]   ;;  %s3807_s2 = inlined_call_operand.vmem [shape: f32[1,256], index: 2, kind: input, shape index: {}]   ;;  %s3808_s3 = inlined_call_operand.vmem [shape: f32[1,256], index: 3, kind: input, shape index: {}]   ;;  %s3809_s4 = inlined_call_operand.vmem [shape: f32[64,256], index: 4, kind: input, shape index: {}]   ;;  %s3810_s5 = inlined_call_operand.vmem [shape: f32[1,256], index: 5, kind: input, shape index: {}]   ;;  %s3811_s6 = inlined_call_operand.vmem [shape: f32[1,256], index: 6, kind: input, shape index: {}]   ;;  %s3812_s7 = inlined_call_operand.vmem [shape: bf16[256,1024], index: 7, kind: input, shape index: {}]   ;;  %s3813_s8 = inlined_call_operand.vmem [shape: bf16[256,1024], index: 8, kind: input, shape index: {}]   ;;  %s3814_s9 = inlined_call_operand.vmem [shape: f32[1,1024], index: 9, kind: input, shape index: {}]   ;;  %s3815_s10 = inlined_call_operand.vmem [shape: f32[1,1024], index: 10, kind: input, shape index: {}]   ;;  %s3816_s11 = inlined_call_operand.vmem [shape: f32[64,256], index: 11, kind: output, shape index: {0}]   ;;  %s3817_s12 = inlined_call_operand.vmem [shape: bf16[64,1024], index: 12, kind: output, shape index: {1}]  }
   0x1   :  { %3819 = sst [smem:[#allocation7_spill]] %s3812_s7 }
   0x2   :  { %3820 = sst [smem:[#allocation8_spill]] %s3813_s8 }
   0x3   :  { %s2958_s21 = smov 0   ;;  %s2960_s22 = smov 0  }
   0x4   :  { %s2962_s23 = smov 0   ;;  %s2964_s24 = smov 0  }
   0x5   :  { %s2966_s25 = smov 0  }
   0x6 LB: > { %s32_s26 = sadd.s32 1, %s2887_s24  ;;  %s2428_s27 = sadd.s32 4294967295, %s2891_s25   ;;  %s2891_s25 = sphi %s2966_s25, %s23_s25   ;;  %s2887_s24 = sphi %s2964_s24, %s3832_s24   ;;  %s2883_s23 = sphi %s2962_s23, %s3831_s23   ;;  %s2879_s22 = sphi %s2960_s22, %s3830_s22   ;;  %s2875_s21 = sphi %s2958_s21, %s3829_s21  }
   0x7   : > { %p33_p0 = scmp.ge.s32.totalorder %s32_s26, 4  ;;  %p206_p1 = scmp.ne.s32.totalorder %s2879_s22, %s2875_s21 }
   0x8   : > { %p207_p2 = scmp.eq.s32.totalorder %s2891_s25, 0  ;;  %p342_p4 = scmp.eq.s32.totalorder %s2428_s27, 3 }
   0x9   : > { %s3834_s26 = smov (%p33_p0, %s32_s26), 0  ;;  %s199_s30 = sadd.s32 1, %s2879_s22 }
   0xa   : > { %3821 = sst [smem:[#allocation6_spill]] %s3834_s26  ;;  %p2990_p3 = por %p207_p2, %p206_p1 }
   0xb   : > { %s196_s29 = ssub.s32 %s2887_s24, %s3834_s26  ;;  %p2997_p6 = por %p342_p4, %p206_p1 }
   0xc   : > { %p197_p5 = scmp.eq.s32.totalorder %s196_s29, 0  ;;  %p2433_p7 = scmp.ge.s32.totalorder %s2891_s25, 4 }
   0xe   : > { %s3002_s14 = scalar_select %p197_p5, %s2879_s22, %s199_s30  }
   0xf   : > { %399 = sbr.rel (%p2433_p7) target bundleno = 106 (0x6a), region = 44 }
  0x16   : > { %402 = sbr.rel (!%p2990_p3) target bundleno = 64 (0x40), region = 48  ;;  %s404_s15 = sand.u32 (%p2990_p3), 1, %s2879_s22  }
  0x17   : > { %s2566_s16 = sshll.u32 (%p2990_p3), %s2887_s24, 3  ;;  %s2434_s17 = sshll.u32 (%p2990_p3), %s404_s15, 8 }
  0x18   : > { %s3824_s7 = sld [smem:[#allocation7_spill]] (%p2990_p3)  ;;  %s3017_s27 = scalar_lea.vmem (%p2990_p3), [#allocation3], %s2434_s17 }
  0x1e   : > { %s3012_s20 = scalar_lea.vmem %s3824_s7, %s2566_s16 }
  0x1f   : > { %v499_v0 = vld [vmem:[%s3012_s20] sm:$0xff] }
  0x20   : > { %v501_v1 = vld [vmem:[%s3012_s20 + $0x20] sm:$0xff]  ;;  %500 = vst [vmem:[%s3017_s27] sm:$0xff] %v499_v0 }
  0x21   : > { %v503_v2 = vld [vmem:[%s3012_s20 + $0x40] sm:$0xff]  ;;  %502 = vst [vmem:[%s3017_s27 + $0x8] sm:$0xff] %v501_v1 }
  0x22   : > { %504 = vst [vmem:[%s3017_s27 + $0x10] sm:$0xff] %v503_v2  ;;  %v505_v3 = vld [vmem:[%s3012_s20 + $0x60] sm:$0xff] }
  0x23   : > { %v507_v4 = vld [vmem:[%s3012_s20 + $0x80] sm:$0xff]  ;;  %506 = vst [vmem:[%s3017_s27 + $0x18] sm:$0xff] %v505_v3 }
  0x24   : > { %v509_v5 = vld [vmem:[%s3012_s20 + $0xa0] sm:$0xff]  ;;  %508 = vst [vmem:[%s3017_s27 + $0x20] sm:$0xff] %v507_v4 }
  0x25   : > { %510 = vst [vmem:[%s3017_s27 + $0x28] sm:$0xff] %v509_v5  ;;  %v511_v6 = vld [vmem:[%s3012_s20 + $0xc0] sm:$0xff] }
  0x26   : > { %v513_v7 = vld [vmem:[%s3012_s20 + $0xe0] sm:$0xff]  ;;  %512 = vst [vmem:[%s3017_s27 + $0x30] sm:$0xff] %v511_v6 }
  0x27   : > { %v515_v8 = vld [vmem:[%s3012_s20 + $0x100] sm:$0xff]  ;;  %514 = vst [vmem:[%s3017_s27 + $0x38] sm:$0xff] %v513_v7 }
  0x28   : > { %516 = vst [vmem:[%s3017_s27 + $0x40] sm:$0xff] %v515_v8  ;;  %v517_v9 = vld [vmem:[%s3012_s20 + $0x120] sm:$0xff] }
  0x29   : > { %v519_v10 = vld [vmem:[%s3012_s20 + $0x140] sm:$0xff]  ;;  %518 = vst [vmem:[%s3017_s27 + $0x48] sm:$0xff] %v517_v9 }
  0x2a   : > { %v521_v11 = vld [vmem:[%s3012_s20 + $0x160] sm:$0xff]  ;;  %520 = vst [vmem:[%s3017_s27 + $0x50] sm:$0xff] %v519_v10 }
  0x2b   : > { %522 = vst [vmem:[%s3017_s27 + $0x58] sm:$0xff] %v521_v11  ;;  %v523_v12 = vld [vmem:[%s3012_s20 + $0x180] sm:$0xff] }
  0x2c   : > { %v525_v13 = vld [vmem:[%s3012_s20 + $0x1a0] sm:$0xff]  ;;  %524 = vst [vmem:[%s3017_s27 + $0x60] sm:$0xff] %v523_v12 }
  0x2d   : > { %v527_v14 = vld [vmem:[%s3012_s20 + $0x1c0] sm:$0xff]  ;;  %526 = vst [vmem:[%s3017_s27 + $0x68] sm:$0xff] %v525_v13 }
  0x2e   : > { %528 = vst [vmem:[%s3017_s27 + $0x70] sm:$0xff] %v527_v14  ;;  %v529_v15 = vld [vmem:[%s3012_s20 + $0x1e0] sm:$0xff] }
  0x2f   : > { %v531_v16 = vld [vmem:[%s3012_s20 + $0x200] sm:$0xff]  ;;  %530 = vst [vmem:[%s3017_s27 + $0x78] sm:$0xff] %v529_v15 }
  0x30   : > { %v533_v17 = vld [vmem:[%s3012_s20 + $0x220] sm:$0xff]  ;;  %532 = vst [vmem:[%s3017_s27 + $0x80] sm:$0xff] %v531_v16 }
  0x31   : > { %534 = vst [vmem:[%s3017_s27 + $0x88] sm:$0xff] %v533_v17  ;;  %v535_v18 = vld [vmem:[%s3012_s20 + $0x240] sm:$0xff] }
  0x32   : > { %v537_v19 = vld [vmem:[%s3012_s20 + $0x260] sm:$0xff]  ;;  %536 = vst [vmem:[%s3017_s27 + $0x90] sm:$0xff] %v535_v18 }
  0x33   : > { %v539_v20 = vld [vmem:[%s3012_s20 + $0x280] sm:$0xff]  ;;  %538 = vst [vmem:[%s3017_s27 + $0x98] sm:$0xff] %v537_v19 }
  0x34   : > { %540 = vst [vmem:[%s3017_s27 + $0xa0] sm:$0xff] %v539_v20  ;;  %v541_v21 = vld [vmem:[%s3012_s20 + $0x2a0] sm:$0xff] }
  0x35   : > { %v543_v22 = vld [vmem:[%s3012_s20 + $0x2c0] sm:$0xff]  ;;  %542 = vst [vmem:[%s3017_s27 + $0xa8] sm:$0xff] %v541_v21 }
  0x36   : > { %v545_v23 = vld [vmem:[%s3012_s20 + $0x2e0] sm:$0xff]  ;;  %544 = vst [vmem:[%s3017_s27 + $0xb0] sm:$0xff] %v543_v22 }
  0x37   : > { %546 = vst [vmem:[%s3017_s27 + $0xb8] sm:$0xff] %v545_v23  ;;  %v547_v24 = vld [vmem:[%s3012_s20 + $0x300] sm:$0xff] }
  0x38   : > { %v549_v25 = vld [vmem:[%s3012_s20 + $0x320] sm:$0xff]  ;;  %548 = vst [vmem:[%s3017_s27 + $0xc0] sm:$0xff] %v547_v24 }
  0x39   : > { %v551_v26 = vld [vmem:[%s3012_s20 + $0x340] sm:$0xff]  ;;  %550 = vst [vmem:[%s3017_s27 + $0xc8] sm:$0xff] %v549_v25 }
  0x3a   : > { %552 = vst [vmem:[%s3017_s27 + $0xd0] sm:$0xff] %v551_v26  ;;  %v553_v27 = vld [vmem:[%s3012_s20 + $0x360] sm:$0xff] }
  0x3b   : > { %v555_v28 = vld [vmem:[%s3012_s20 + $0x380] sm:$0xff]  ;;  %554 = vst [vmem:[%s3017_s27 + $0xd8] sm:$0xff] %v553_v27 }
  0x3c   : > { %v557_v29 = vld [vmem:[%s3012_s20 + $0x3a0] sm:$0xff]  ;;  %556 = vst [vmem:[%s3017_s27 + $0xe0] sm:$0xff] %v555_v28 }
  0x3d   : > { %558 = vst [vmem:[%s3017_s27 + $0xe8] sm:$0xff] %v557_v29  ;;  %v559_v30 = vld [vmem:[%s3012_s20 + $0x3c0] sm:$0xff] }
  0x3e   : > { %v561_v31 = vld [vmem:[%s3012_s20 + $0x3e0] sm:$0xff]  ;;  %560 = vst [vmem:[%s3017_s27 + $0xf0] sm:$0xff] %v559_v30 }
  0x3f   : > { %562 = vst [vmem:[%s3017_s27 + $0xf8] sm:$0xff] %v561_v31 }
  0x40 PF: > { %568 = sbr.rel (!%p2990_p3) target bundleno = 106 (0x6a), region = 86  ;;  %s570_s29 = sand.u32 (%p2990_p3), 1, %s2879_s22  }
  0x41   : > { %s2567_s30 = sshll.u32 (%p2990_p3), %s2887_s24, 3  ;;  %s2437_s15 = sshll.u32 (%p2990_p3), %s570_s29, 8 }
  0x42   : > { %s3825_s8 = sld [smem:[#allocation8_spill]] (%p2990_p3)  ;;  %s3092_s28 = scalar_lea.vmem (%p2990_p3), [#allocation4], %s2437_s15 }
  0x48   : > { %s3087_s18 = scalar_lea.vmem %s3825_s8, %s2567_s30 }
  0x49   : > { %v665_v32 = vld [vmem:[%s3087_s18] sm:$0xff] }
  0x4a   : > { %v667_v33 = vld [vmem:[%s3087_s18 + $0x20] sm:$0xff]  ;;  %666 = vst [vmem:[%s3092_s28] sm:$0xff] %v665_v32 }
  0x4b   : > { %v669_v34 = vld [vmem:[%s3087_s18 + $0x40] sm:$0xff]  ;;  %668 = vst [vmem:[%s3092_s28 + $0x8] sm:$0xff] %v667_v33 }
  0x4c   : > { %670 = vst [vmem:[%s3092_s28 + $0x10] sm:$0xff] %v669_v34  ;;  %v671_v35 = vld [vmem:[%s3087_s18 + $0x60] sm:$0xff] }
  0x4d   : > { %v673_v36 = vld [vmem:[%s3087_s18 + $0x80] sm:$0xff]  ;;  %672 = vst [vmem:[%s3092_s28 + $0x18] sm:$0xff] %v671_v35 }
  0x4e   : > { %v675_v37 = vld [vmem:[%s3087_s18 + $0xa0] sm:$0xff]  ;;  %674 = vst [vmem:[%s3092_s28 + $0x20] sm:$0xff] %v673_v36 }
  0x4f   : > { %676 = vst [vmem:[%s3092_s28 + $0x28] sm:$0xff] %v675_v37  ;;  %v677_v38 = vld [vmem:[%s3087_s18 + $0xc0] sm:$0xff] }
  0x50   : > { %v679_v39 = vld [vmem:[%s3087_s18 + $0xe0] sm:$0xff]  ;;  %678 = vst [vmem:[%s3092_s28 + $0x30] sm:$0xff] %v677_v38 }
  0x51   : > { %v681_v40 = vld [vmem:[%s3087_s18 + $0x100] sm:$0xff]  ;;  %680 = vst [vmem:[%s3092_s28 + $0x38] sm:$0xff] %v679_v39 }
  0x52   : > { %682 = vst [vmem:[%s3092_s28 + $0x40] sm:$0xff] %v681_v40  ;;  %v683_v41 = vld [vmem:[%s3087_s18 + $0x120] sm:$0xff] }
  0x53   : > { %v685_v42 = vld [vmem:[%s3087_s18 + $0x140] sm:$0xff]  ;;  %684 = vst [vmem:[%s3092_s28 + $0x48] sm:$0xff] %v683_v41 }
  0x54   : > { %v687_v43 = vld [vmem:[%s3087_s18 + $0x160] sm:$0xff]  ;;  %686 = vst [vmem:[%s3092_s28 + $0x50] sm:$0xff] %v685_v42 }
  0x55   : > { %688 = vst [vmem:[%s3092_s28 + $0x58] sm:$0xff] %v687_v43  ;;  %v689_v44 = vld [vmem:[%s3087_s18 + $0x180] sm:$0xff] }
  0x56   : > { %v691_v45 = vld [vmem:[%s3087_s18 + $0x1a0] sm:$0xff]  ;;  %690 = vst [vmem:[%s3092_s28 + $0x60] sm:$0xff] %v689_v44 }
  0x57   : > { %v693_v46 = vld [vmem:[%s3087_s18 + $0x1c0] sm:$0xff]  ;;  %692 = vst [vmem:[%s3092_s28 + $0x68] sm:$0xff] %v691_v45 }
  0x58   : > { %694 = vst [vmem:[%s3092_s28 + $0x70] sm:$0xff] %v693_v46  ;;  %v695_v47 = vld [vmem:[%s3087_s18 + $0x1e0] sm:$0xff] }
  0x59   : > { %v697_v48 = vld [vmem:[%s3087_s18 + $0x200] sm:$0xff]  ;;  %696 = vst [vmem:[%s3092_s28 + $0x78] sm:$0xff] %v695_v47 }
  0x5a   : > { %v699_v49 = vld [vmem:[%s3087_s18 + $0x220] sm:$0xff]  ;;  %698 = vst [vmem:[%s3092_s28 + $0x80] sm:$0xff] %v697_v48 }
  0x5b   : > { %700 = vst [vmem:[%s3092_s28 + $0x88] sm:$0xff] %v699_v49  ;;  %v701_v50 = vld [vmem:[%s3087_s18 + $0x240] sm:$0xff] }
  0x5c   : > { %v703_v51 = vld [vmem:[%s3087_s18 + $0x260] sm:$0xff]  ;;  %702 = vst [vmem:[%s3092_s28 + $0x90] sm:$0xff] %v701_v50 }
  0x5d   : > { %v705_v52 = vld [vmem:[%s3087_s18 + $0x280] sm:$0xff]  ;;  %704 = vst [vmem:[%s3092_s28 + $0x98] sm:$0xff] %v703_v51 }
  0x5e   : > { %706 = vst [vmem:[%s3092_s28 + $0xa0] sm:$0xff] %v705_v52  ;;  %v707_v53 = vld [vmem:[%s3087_s18 + $0x2a0] sm:$0xff] }
  0x5f   : > { %v709_v54 = vld [vmem:[%s3087_s18 + $0x2c0] sm:$0xff]  ;;  %708 = vst [vmem:[%s3092_s28 + $0xa8] sm:$0xff] %v707_v53 }
  0x60   : > { %v711_v55 = vld [vmem:[%s3087_s18 + $0x2e0] sm:$0xff]  ;;  %710 = vst [vmem:[%s3092_s28 + $0xb0] sm:$0xff] %v709_v54 }
  0x61   : > { %712 = vst [vmem:[%s3092_s28 + $0xb8] sm:$0xff] %v711_v55  ;;  %v713_v56 = vld [vmem:[%s3087_s18 + $0x300] sm:$0xff] }
  0x62   : > { %v715_v57 = vld [vmem:[%s3087_s18 + $0x320] sm:$0xff]  ;;  %714 = vst [vmem:[%s3092_s28 + $0xc0] sm:$0xff] %v713_v56 }
  0x63   : > { %v717_v58 = vld [vmem:[%s3087_s18 + $0x340] sm:$0xff]  ;;  %716 = vst [vmem:[%s3092_s28 + $0xc8] sm:$0xff] %v715_v57 }
  0x64   : > { %718 = vst [vmem:[%s3092_s28 + $0xd0] sm:$0xff] %v717_v58  ;;  %v719_v59 = vld [vmem:[%s3087_s18 + $0x360] sm:$0xff] }
  0x65   : > { %v721_v60 = vld [vmem:[%s3087_s18 + $0x380] sm:$0xff]  ;;  %720 = vst [vmem:[%s3092_s28 + $0xd8] sm:$0xff] %v719_v59 }
  0x66   : > { %v723_v61 = vld [vmem:[%s3087_s18 + $0x3a0] sm:$0xff]  ;;  %722 = vst [vmem:[%s3092_s28 + $0xe0] sm:$0xff] %v721_v60 }
  0x67   : > { %724 = vst [vmem:[%s3092_s28 + $0xe8] sm:$0xff] %v723_v61  ;;  %v725_v62 = vld [vmem:[%s3087_s18 + $0x3c0] sm:$0xff] }
  0x68   : > { %v727_v63 = vld [vmem:[%s3087_s18 + $0x3e0] sm:$0xff]  ;;  %726 = vst [vmem:[%s3092_s28 + $0xf0] sm:$0xff] %v725_v62 }
  0x69   : > { %728 = vst [vmem:[%s3092_s28 + $0xf8] sm:$0xff] %v727_v63 }
  0x6a PF: > { %p2440_p8 = scmp.ge.s32.totalorder %s2891_s25, 1  ;;  %p749_p9 = scmp.lt.s32.totalorder %s2891_s25, 5 }
  0x6c   : > { %p750_p10 = pnand %p2440_p8, %p749_p9 }
  0x6d   : > { %s756_s19 = sand.u32 (!%p750_p10), 1, %s2875_s21   ;;  %s2444_s20 = sshll.u32 (!%p750_p10), %s2883_s23, 1 }
  0x6e   : > { %753 = sbr.rel (%p750_p10) target bundleno = 1077 (0x435), region = 132  ;;  %s2441_s27 = sshll.u32 (!%p750_p10), %s756_s19, 8 }
  0x6f   : > { %s2443_s29 = sshll.u32 (!%p750_p10), %s756_s19, 6  ;;  %p850_p11 = scmp.lt.s32.totalorder (!%p750_p10), %s2444_s20, 7 }
  0x70   : > { %s3169_s7 = scalar_lea.vmem (!%p750_p10), [#allocation3], %s2441_s27  ;;  %s3171_s8 = scalar_lea.vmem (!%p750_p10), [#allocation4], %s2441_s27 }
  0x71   : > { %s3173_s21 = scalar_lea.vmem (!%p750_p10), [#allocation5], %s2443_s29  ;;  %p2446_p12 = scmp.ne.s32.totalorder (!%p750_p10), %s2883_s23, 0 }
  0x75   : > { %s3836_s20 = smov (!%p850_p11, %s2444_s20), 7  ;;  %871 = sbr.rel (%p2446_p12) target bundleno = 741 (0x2e5), region = 144 }
  0x76   : > { %v2649_v0 = vld [vmem:[%s3806_s1 + $0x4] ss:$8 sps:$4 sm:$0xff] (!%p2446_p12)   ;;  %v2651_v1 = vld [vmem:[%s3806_s1] ss:$8 sps:$4 sm:$0xff] (!%p2446_p12)   ;;  %v2652_v2 = vld [vmem:[%s3806_s1 + $0x14] ss:$8 sps:$4 sm:$0xff] (!%p2446_p12)   ;;  %v930_v40 = vlaneseq (!%p2446_p12) }
  0x77   : > { %1140 = vmatprep.subr.bf16.mxu0 (!%p2446_p12), %v2649_v0  ;;  %2577 = vmatprep.subr.bf16.mxu1 (!%p2446_p12), %v2649_v0  ;;  %v2654_v3 = vld [vmem:[%s3806_s1 + $0x10] ss:$8 sps:$4 sm:$0xff] (!%p2446_p12)   ;;  %v2655_v4 = vld [vmem:[%s3806_s1 + $0x24] ss:$8 sps:$4 sm:$0xff] (!%p2446_p12)   ;;  %v2657_v5 = vld [vmem:[%s3806_s1 + $0x20] ss:$8 sps:$4 sm:$0xff] (!%p2446_p12)  }
  0x78   : > { %1141 = vmatpush1.bf16.msra.mxu0 (!%p2446_p12), %v2651_v1  ;;  %2593 = vmatpush1.bf16.msra.mxu1 (!%p2446_p12), %v2651_v1  ;;  %v2658_v6 = vld [vmem:[%s3806_s1 + $0x34] ss:$8 sps:$4 sm:$0xff] (!%p2446_p12)   ;;  %v2660_v7 = vld [vmem:[%s3806_s1 + $0x30] ss:$8 sps:$4 sm:$0xff] (!%p2446_p12)   ;;  %v2661_v8 = vld [vmem:[%s3806_s1 + $0x44] ss:$8 sps:$4 sm:$0xff] (!%p2446_p12)  }
  0x79   : > { %1142 = vmatprep.subr.bf16.mxu0 (!%p2446_p12), %v2652_v2  ;;  %2578 = vmatprep.subr.bf16.mxu1 (!%p2446_p12), %v2652_v2  ;;  %v2663_v9 = vld [vmem:[%s3806_s1 + $0x40] ss:$8 sps:$4 sm:$0xff] (!%p2446_p12)   ;;  %v2664_v10 = vld [vmem:[%s3806_s1 + $0x54] ss:$8 sps:$4 sm:$0xff] (!%p2446_p12)   ;;  %v2666_v11 = vld [vmem:[%s3806_s1 + $0x50] ss:$8 sps:$4 sm:$0xff] (!%p2446_p12)  }
  0x7a   : > { %v2667_v12 = vld [vmem:[%s3806_s1 + $0x64] ss:$8 sps:$4 sm:$0xff] (!%p2446_p12)   ;;  %v2669_v14 = vld [vmem:[%s3806_s1 + $0x60] ss:$8 sps:$4 sm:$0xff] (!%p2446_p12)   ;;  %v2670_v16 = vld [vmem:[%s3806_s1 + $0x74] ss:$8 sps:$4 sm:$0xff] (!%p2446_p12)  }
  0x7b   : > { %v2699_v13 = vld [vmem:[%s3805_s0 + $0x4] ss:$8 sps:$4 sm:$0xff] (!%p2446_p12)   ;;  %v2672_v17 = vld [vmem:[%s3806_s1 + $0x70] ss:$8 sps:$4 sm:$0xff] (!%p2446_p12)   ;;  %v2675_v19 = vld [vmem:[%s3806_s1 + $0x80] ss:$8 sps:$4 sm:$0xff] (!%p2446_p12)  }
  0x7c   : > { %1143 = vmatpush1.bf16.msra.mxu0 %v2654_v3  ;;  %2594 = vmatpush1.bf16.msra.mxu1 %v2654_v3  ;;  %v2702_v15 = vld [vmem:[%s3805_s0 + $0x24] ss:$8 sps:$4 sm:$0xff]   ;;  %v2676_v20 = vld [vmem:[%s3806_s1 + $0x94] ss:$8 sps:$4 sm:$0xff]   ;;  %v2678_v21 = vld [vmem:[%s3806_s1 + $0x90] ss:$8 sps:$4 sm:$0xff]  }
  0x7d   : > { %1144 = vmatprep.subr.bf16.mxu0 %v2655_v4  ;;  %2579 = vmatprep.subr.bf16.mxu1 %v2655_v4  ;;  %v2673_v18 = vld [vmem:[%s3806_s1 + $0x84] ss:$8 sps:$4 sm:$0xff]   ;;  %v2681_v23 = vld [vmem:[%s3806_s1 + $0xa0] ss:$8 sps:$4 sm:$0xff]   ;;  %v2682_v24 = vld [vmem:[%s3806_s1 + $0xb4] ss:$8 sps:$4 sm:$0xff]  }
  0x7e   : > { %1172 = vmatprep.mubr.bf16.mxu0 %v2699_v13  ;;  %1192 = vmatprep.mubr.bf16.mxu1 %v2702_v15  ;;  %v2679_v22 = vld [vmem:[%s3806_s1 + $0xa4] ss:$8 sps:$4 sm:$0xff]   ;;  %v2684_v25 = vld [vmem:[%s3806_s1 + $0xb0] ss:$8 sps:$4 sm:$0xff]   ;;  %v2687_v27 = vld [vmem:[%s3806_s1 + $0xc0] ss:$8 sps:$4 sm:$0xff]  }
  0x7f   : > { %v2685_v26 = vld [vmem:[%s3806_s1 + $0xc4] ss:$8 sps:$4 sm:$0xff]   ;;  %v2688_v28 = vld [vmem:[%s3806_s1 + $0xd4] ss:$8 sps:$4 sm:$0xff]   ;;  %v2690_v29 = vld [vmem:[%s3806_s1 + $0xd0] ss:$8 sps:$4 sm:$0xff]  }
  0x80   : > { %1145 = vmatpush1.bf16.msra.mxu0 %v2657_v5  ;;  %2595 = vmatpush1.bf16.msra.mxu1 %v2657_v5  ;;  %v2691_v30 = vld [vmem:[%s3806_s1 + $0xe4] ss:$8 sps:$4 sm:$0xff]   ;;  %v2693_v31 = vld [vmem:[%s3806_s1 + $0xe0] ss:$8 sps:$4 sm:$0xff]   ;;  %v2694_v32 = vld [vmem:[%s3806_s1 + $0xf4] ss:$8 sps:$4 sm:$0xff]  }
  0x81   : > { %1146 = vmatprep.subr.bf16.mxu0 %v2658_v6  ;;  %2580 = vmatprep.subr.bf16.mxu1 %v2658_v6  ;;  %v2696_v33 = vld [vmem:[%s3806_s1 + $0xf0] ss:$8 sps:$4 sm:$0xff]   ;;  %v2697_v34 = vld [vmem:[%s3805_s0] ss:$8 sps:$4 sm:$0xff]   ;;  %v2703_v36 = vld [vmem:[%s3805_s0 + $0x14] ss:$8 sps:$4 sm:$0xff]  }
  0x82   : > { %v2700_v35 = vld [vmem:[%s3805_s0 + $0x20] ss:$8 sps:$4 sm:$0xff]   ;;  %v2706_v37 = vld [vmem:[%s3805_s0 + $0x34] ss:$8 sps:$4 sm:$0xff]   ;;  %v2705_v38 = vld [vmem:[%s3805_s0 + $0x10] ss:$8 sps:$4 sm:$0xff]  }
  0x83   : > { %v2708_v39 = vld [vmem:[%s3805_s0 + $0x30] ss:$8 sps:$4 sm:$0xff]   ;;  %v931_v41 = vshrl.u32 %v930_v40, 7  ;;  %v928_v43 = vld [vmem:[%s3807_s2] sm:$0x3]  ;;  %v921_v0 = vld [vmem:[%s3809_s4 + $0x48] sm:$0xff] }
  0x84   : > { %1147 = vmatpush1.bf16.msra.mxu0 %v2660_v7  ;;  %2596 = vmatpush1.bf16.msra.mxu1 %v2660_v7  ;;  %v1213_v45 = vld [vmem:[%s3808_s3] sm:$0x3]  ;;  %v913_v5 = vld [vmem:[%s3809_s4 + $0x8] sm:$0xff]  ;;  %v915_v15 = vld [vmem:[%s3809_s4 + $0x18] sm:$0xff] }
  0x85   : > { %1148 = vmatprep.subr.bf16.mxu0 %v2661_v8  ;;  %2581 = vmatprep.subr.bf16.mxu1 %v2661_v8  ;;  %v3296_v42 = vsub.s32 0, %v931_v41  ;;  %v3301_v44 = vsub.s32 1, %v931_v41  ;;  %v920_v56 = vld [vmem:[%s3809_s4 + $0x40] sm:$0xff]  ;;  %v914_v8 = vld [vmem:[%s3809_s4 + $0x10] sm:$0xff] }
  0x86   : > { %v912_v61 = vld [vmem:[%s3809_s4] sm:$0xff] }
  0x87   : > { %v3307_v46 = vrot.slane %v928_v43, %v3296_v42  ;;  %v3310_v47 = vrot.slane %v928_v43, %v3301_v44  ;;  %v3313_v48 = vrot.slane %v1213_v45, %v3296_v42  ;;  %v3316_v51 = vrot.slane %v1213_v45, %v3301_v44  ;;  %v917_v43 = vld [vmem:[%s3809_s4 + $0x28] sm:$0xff] }
  0x88   : > { %1149 = vmatpush1.bf16.msra.mxu0 %v2663_v9  ;;  %2597 = vmatpush1.bf16.msra.mxu1 %v2663_v9 }
  0x89   : > { %1150 = vmatprep.subr.bf16.mxu0 %v2664_v10  ;;  %2582 = vmatprep.subr.bf16.mxu1 %v2664_v10 }
  0x8c   : > { %1151 = vmatpush1.bf16.msra.mxu0 %v2666_v11  ;;  %2598 = vmatpush1.bf16.msra.mxu1 %v2666_v11  ;;  %v922_v11 = vld [vmem:[%s3809_s4 + $0x50] sm:$0xff] }
  0x8d   : > { %1152 = vmatprep.subr.bf16.mxu0 %v2667_v12  ;;  %2583 = vmatprep.subr.bf16.mxu1 %v2667_v12 }
  0x90   : > { %1153 = vmatpush1.bf16.msra.mxu0 %v2669_v14  ;;  %2599 = vmatpush1.bf16.msra.mxu1 %v2669_v14 }
  0x91   : > { %1154 = vmatprep.subr.bf16.mxu0 %v2670_v16  ;;  %2584 = vmatprep.subr.bf16.mxu1 %v2670_v16 }
  0x94   : > { %1155 = vmatpush1.bf16.msra.mxu0 %v2672_v17  ;;  %2600 = vmatpush1.bf16.msra.mxu1 %v2672_v17  ;;  %v923_v17 = vld [vmem:[%s3809_s4 + $0x58] sm:$0xff] }
  0x95   : > { %1156 = vmatprep.subr.bf16.mxu0 %v2673_v18  ;;  %2585 = vmatprep.subr.bf16.mxu1 %v2673_v18 }
  0x98   : > { %1157 = vmatpush1.bf16.msra.mxu0 %v2675_v19  ;;  %2601 = vmatpush1.bf16.msra.mxu1 %v2675_v19 }
  0x99   : > { %1158 = vmatprep.subr.bf16.mxu0 %v2676_v20  ;;  %2586 = vmatprep.subr.bf16.mxu1 %v2676_v20 }
  0x9c   : > { %1159 = vmatpush1.bf16.msra.mxu0 %v2678_v21  ;;  %2602 = vmatpush1.bf16.msra.mxu1 %v2678_v21 }
  0x9d   : > { %1160 = vmatprep.subr.bf16.mxu0 %v2679_v22  ;;  %2587 = vmatprep.subr.bf16.mxu1 %v2679_v22 }
  0xa0   : > { %1161 = vmatpush1.bf16.msra.mxu0 %v2681_v23  ;;  %2603 = vmatpush1.bf16.msra.mxu1 %v2681_v23 }
  0xa1   : > { %1162 = vmatprep.subr.bf16.mxu0 %v2682_v24  ;;  %2588 = vmatprep.subr.bf16.mxu1 %v2682_v24 }
  0xa4   : > { %1163 = vmatpush1.bf16.msra.mxu0 %v2684_v25  ;;  %2604 = vmatpush1.bf16.msra.mxu1 %v2684_v25 }
  0xa5   : > { %1164 = vmatprep.subr.bf16.mxu0 %v2685_v26  ;;  %2589 = vmatprep.subr.bf16.mxu1 %v2685_v26 }
  0xa8   : > { %1165 = vmatpush1.bf16.msra.mxu0 %v2687_v27  ;;  %2605 = vmatpush1.bf16.msra.mxu1 %v2687_v27 }
  0xa9   : > { %1166 = vmatprep.subr.bf16.mxu0 %v2688_v28  ;;  %2590 = vmatprep.subr.bf16.mxu1 %v2688_v28 }
  0xac   : > { %1167 = vmatpush1.bf16.msra.mxu0 %v2690_v29  ;;  %2606 = vmatpush1.bf16.msra.mxu1 %v2690_v29 }
  0xad   : > { %1168 = vmatprep.subr.bf16.mxu0 %v2691_v30  ;;  %2591 = vmatprep.subr.bf16.mxu1 %v2691_v30 }
  0xb0   : > { %1169 = vmatpush1.bf16.msra.mxu0 %v2693_v31  ;;  %2607 = vmatpush1.bf16.msra.mxu1 %v2693_v31 }
  0xb1   : > { %1170 = vmatprep.subr.bf16.mxu0 %v2694_v32  ;;  %2592 = vmatprep.subr.bf16.mxu1 %v2694_v32 }
  0xb4   : > { %1171 = vmatpush1.bf16.msra.mxu0 %v2696_v33  ;;  %2608 = vmatpush1.bf16.msra.mxu1 %v2696_v33  ;;  %v916_v33 = vld [vmem:[%s3809_s4 + $0x20] sm:$0xff] }
  0xb7   : > { %1173 = vmatmul.mubr.bf16.vlgmr.msra.gmra.mrb[0].mxu0 %v2697_v34  ;;  %1193 = vmatmul.mubr.bf16.vlgmr.msra.gmra.mrb[0].mxu1 %v2700_v35 }
  0xb8   : > { %1182 = vmatprep.mubr.bf16.mxu0 %v2703_v36  ;;  %1202 = vmatprep.mubr.bf16.mxu1 %v2706_v37  ;;  %v924_v36 = vld [vmem:[%s3809_s4 + $0x60] sm:$0xff] }
  0xbf   : > { %1183 = vmatmul.mubr.bf16.gmra.mrb[4].mxu0 %v2705_v38  ;;  %1203 = vmatmul.mubr.bf16.gmra.mrb[4].mxu1 %v2708_v39 }
 0x18a   : > { %v1174_v49 = vpop.f32.mrb[0].mxu0  ;;  %v1194_v50 = vpop.f32.mrb[0].mxu1 }
 0x18b   : > { %v1175_v52 = vadd.f32 %v1174_v49, %v3307_v46  ;;  %v1195_v53 = vadd.f32 %v1194_v50, %v3307_v46  ;;  %v1176_v54 = vpop.f32.mrb[1].mxu0  ;;  %v1196_v55 = vpop.f32.mrb[1].mxu1 }
 0x18c   : > { %v1177_v57 = vadd.f32 %v1176_v54, %v3310_v47  ;;  %v1197_v58 = vadd.f32 %v1196_v55, %v3310_v47  ;;  %v1178_v59 = vpop.f32.mrb[2].mxu0  ;;  %v1198_v60 = vpop.f32.mrb[2].mxu1 }
 0x18d   : > { %v1225_v62 = vmul.f32 %v3313_v48, %v1175_v52  ;;  %v1233_v63 = vmul.f32 %v3313_v48, %v1195_v53  ;;  %v1179_v1 = vadd.f32 %v1178_v59, %v3307_v46  ;;  %v1199_v2 = vadd.f32 %v1198_v60, %v3307_v46  ;;  %v1180_v3 = vpop.f32.mrb[3].mxu0  ;;  %v1200_v4 = vpop.f32.mrb[3].mxu1  ;;  %v925_v52 = vld [vmem:[%s3809_s4 + $0x68] sm:$0xff]  ;;  %v926_v59 = vld [vmem:[%s3809_s4 + $0x70] sm:$0xff] }
 0x18e   : > { %v1226_v6 = vmul.f32 %v3316_v51, %v1177_v57  ;;  %v1234_v7 = vmul.f32 %v3316_v51, %v1197_v58  ;;  %v1181_v9 = vadd.f32 %v1180_v3, %v3310_v47  ;;  %v1201_v10 = vadd.f32 %v1200_v4, %v3310_v47 }
 0x18f   : > { %v3348_v12 = vadd.f32 %v1233_v63, %v920_v56  ;;  %v1227_v13 = vmul.f32 %v3313_v48, %v1179_v1  ;;  %v1235_v14 = vmul.f32 %v3313_v48, %v1199_v2  ;;  %v3355_v16 = vadd.f32 %v1225_v62, %v912_v61  ;;  %v918_v56 = vld [vmem:[%s3809_s4 + $0x30] sm:$0xff]  ;;  %v919_v63 = vld [vmem:[%s3809_s4 + $0x38] sm:$0xff] }
 0x190   : > { %v3360_v18 = vadd.f32 %v1234_v7, %v921_v0  ;;  %v1228_v19 = vmul.f32 %v3316_v51, %v1181_v9  ;;  %v1236_v20 = vmul.f32 %v3316_v51, %v1201_v10  ;;  %v3364_v21 = vadd.f32 %v1226_v6, %v913_v5  ;;  %v927_v1 = vld [vmem:[%s3809_s4 + $0x78] sm:$0xff] }
 0x191   : > { %1265 = vst [vmem:[%s3816_s11 + $0x40] sm:$0xff] %v3348_v12  ;;  %v3370_v22 = vadd.f32 %v1227_v13, %v914_v8  ;;  %1257 = vst [vmem:[%s3816_s11] sm:$0xff] %v3355_v16  ;;  %v3376_v23 = vadd.f32 %v1235_v14, %v922_v11 }
 0x192   : > { %1266 = vst [vmem:[%s3816_s11 + $0x48] sm:$0xff] %v3360_v18  ;;  %v3382_v24 = vadd.f32 %v1228_v19, %v915_v15  ;;  %v1184_v25 = vpop.f32.mrb[4].mxu0  ;;  %1258 = vst [vmem:[%s3816_s11 + $0x8] sm:$0xff] %v3364_v21  ;;  %v1273_v26 = vadd.f32 %v3364_v21, %v3355_v16  ;;  %v1204_v27 = vpop.f32.mrb[4].mxu1  ;;  %v3390_v28 = vadd.f32 %v1236_v20, %v923_v17 }
 0x193   : > { %1259 = vst [vmem:[%s3816_s11 + $0x10] sm:$0xff] %v3370_v22  ;;  %v1185_v29 = vadd.f32 %v1184_v25, %v3307_v46  ;;  %v1186_v30 = vpop.f32.mrb[5].mxu0  ;;  %v1205_v31 = vadd.f32 %v1204_v27, %v3307_v46  ;;  %1267 = vst [vmem:[%s3816_s11 + $0x50] sm:$0xff] %v3376_v23  ;;  %v1206_v32 = vpop.f32.mrb[5].mxu1  ;;  %v1285_v39 = vadd.f32 %v3360_v18, %v3348_v12 }
 0x194   : > { %1260 = vst [vmem:[%s3816_s11 + $0x18] sm:$0xff] %v3382_v24  ;;  %v1187_v34 = vadd.f32 %v1186_v30, %v3310_v47  ;;  %1274 = vadd.xlane.f32.xlu0 %v1273_v26  ;;  %v1188_v35 = vpop.f32.mrb[6].mxu0  ;;  %1268 = vst [vmem:[%s3816_s11 + $0x58] sm:$0xff] %v3390_v28  ;;  %v1288_v37 = vadd.f32 %v3390_v28, %v3376_v23  ;;  %v1207_v38 = vadd.f32 %v1206_v32, %v3310_v47  ;;  %v1208_v40 = vpop.f32.mrb[6].mxu1 }
 0x195   : > { %v1229_v41 = vmul.f32 %v3313_v48, %v1185_v29  ;;  %v1189_v45 = vadd.f32 %v1188_v35, %v3307_v46  ;;  %v1237_v49 = vmul.f32 %v3313_v48, %v1205_v31  ;;  %v1190_v50 = vpop.f32.mrb[7].mxu0  ;;  %v1209_v53 = vadd.f32 %v1208_v40, %v3307_v46  ;;  %v1210_v54 = vpop.f32.mrb[7].mxu1 }
 0x196   : > { %v1230_v55 = vmul.f32 %v3316_v51, %v1187_v34  ;;  %1289 = vadd.xlane.f32.xlu1 %v1288_v37  ;;  %v1191_v57 = vadd.f32 %v1190_v50, %v3310_v47  ;;  %v1238_v58 = vmul.f32 %v3316_v51, %v1207_v38  ;;  %v1211_v60 = vadd.f32 %v1210_v54, %v3310_v47 }
 0x197   : > { %v1245_v61 = vadd.f32 %v1229_v41, %v916_v33  ;;  %v1231_v46 = vmul.f32 %v3313_v48, %v1189_v45  ;;  %v3443_v62 = vadd.f32 %v1237_v49, %v924_v36  ;;  %v1239_v0 = vmul.f32 %v3313_v48, %v1209_v53 }
 0x198   : > { %v1246_v2 = vadd.f32 %v1230_v55, %v917_v43  ;;  %v1232_v3 = vmul.f32 %v3316_v51, %v1191_v57  ;;  %v1254_v4 = vadd.f32 %v1238_v58, %v925_v52  ;;  %1286 = vadd.xlane.f32.xlu0 %v1285_v39  ;;  %v1240_v47 = vmul.f32 %v3316_v51, %v1211_v60 }
 0x199   : > { %1261 = vst [vmem:[%s3816_s11 + $0x20] sm:$0xff] %v1245_v61  ;;  %v1247_v5 = vadd.f32 %v1231_v46, %v918_v56  ;;  %1269 = vst [vmem:[%s3816_s11 + $0x60] sm:$0xff] %v3443_v62  ;;  %v3461_v48 = vadd.f32 %v1239_v0, %v926_v59  ;;  %v1276_v8 = vadd.f32 %v3382_v24, %v3370_v22 }
 0x19a   : > { %1262 = vst [vmem:[%s3816_s11 + $0x28] sm:$0xff] %v1246_v2  ;;  %v1248_v6 = vadd.f32 %v1232_v3, %v919_v63  ;;  %1270 = vst [vmem:[%s3816_s11 + $0x68] sm:$0xff] %v1254_v4  ;;  %v3469_v51 = vadd.f32 %v1240_v47, %v927_v1  ;;  %v1279_v7 = vadd.f32 %v1246_v2, %v1245_v61 }
 0x19b   : > { %1263 = vst [vmem:[%s3816_s11 + $0x30] sm:$0xff] %v1247_v5  ;;  %1271 = vst [vmem:[%s3816_s11 + $0x70] sm:$0xff] %v3461_v48  ;;  %v1291_v10 = vadd.f32 %v1254_v4, %v3443_v62 }
 0x19c   : > { %1264 = vst [vmem:[%s3816_s11 + $0x38] sm:$0xff] %v1248_v6  ;;  %1272 = vst [vmem:[%s3816_s11 + $0x78] sm:$0xff] %v3469_v51  ;;  %1280 = vadd.xlane.f32.xlu1 %v1279_v7  ;;  %1277 = vadd.xlane.f32.xlu0 %v1276_v8  ;;  %v1282_v9 = vadd.f32 %v1248_v6, %v1247_v5  ;;  %v1294_v11 = vadd.f32 %v3469_v51, %v3461_v48 }
 0x1a0   : > { %1283 = vadd.xlane.f32.xlu1 %v1282_v9  ;;  %1292 = vadd.xlane.f32.xlu0 %v1291_v10 }
 0x1a4   : > { %1295 = vadd.xlane.f32.xlu1 %v1294_v11 }
 0x221   : > { %v1275_v13 = vpop.xlane.xlu0 %1274 }
 0x222   : > { %v1298_v14 = vmul.f32 0.00390625, %v1275_v13 }
 0x223   : > { %v1290_v19 = vpop.xlane.xlu1 %1289 }
 0x224   : > { %v3491_v15 = vsub.f32 %v3355_v16, %v1298_v14  ;;  %v3494_v17 = vsub.f32 %v3364_v21, %v1298_v14  ;;  %v1303_v27 = vmul.f32 0.00390625, %v1290_v19 }
 0x225   : > { %v1287_v20 = vpop.xlane.xlu0 %1286 }
 0x226   : > { %v1302_v25 = vmul.f32 0.00390625, %v1287_v20  ;;  %v1322_v26 = vmul.f32 %v3491_v15, %v3491_v15  ;;  %v1323_v29 = vmul.f32 %v3494_v17, %v3494_v17  ;;  %v3511_v37 = vsub.f32 %v3376_v23, %v1303_v27 }
 0x228   : > { %v3501_v30 = vsub.f32 %v3348_v12, %v1302_v25  ;;  %v3504_v31 = vsub.f32 %v3360_v18, %v1302_v25  ;;  %v1338_v21 = vadd.f32 %v1323_v29, %v1322_v26  ;;  %v3514_v12 = vsub.f32 %v3390_v28, %v1303_v27 }
 0x229   : > { %v1281_v16 = vpop.xlane.xlu1 %1280  ;;  %v1278_v32 = vpop.xlane.xlu0 %1277  ;;  %v1332_v54 = vmul.f32 %v3511_v37, %v3511_v37 }
 0x22a   : > { %v1300_v33 = vmul.f32 0.00390625, %v1281_v16  ;;  %v1299_v34 = vmul.f32 0.00390625, %v1278_v32  ;;  %v1330_v35 = vmul.f32 %v3501_v30, %v3501_v30  ;;  %v1331_v36 = vmul.f32 %v3504_v31, %v3504_v31  ;;  %1339 = vadd.xlane.f32.xlu0 %v1338_v21  ;;  %v1402_v21 = vld [vmem:[%s3810_s5] sm:$0x3] }
 0x22b   : > { %v1333_v55 = vmul.f32 %v3514_v12, %v3514_v12 }
 0x22c   : > { %v3516_v18 = vsub.f32 %v1245_v61, %v1300_v33  ;;  %v3518_v38 = vsub.f32 %v1246_v2, %v1300_v33  ;;  %v3521_v39 = vsub.f32 %v3370_v22, %v1299_v34  ;;  %v3524_v40 = vsub.f32 %v3382_v24, %v1299_v34 }
 0x22d   : > { %v1284_v41 = vpop.xlane.xlu1 %1283  ;;  %v1293_v43 = vpop.xlane.xlu0 %1292  ;;  %v1350_v45 = vadd.f32 %v1331_v36, %v1330_v35  ;;  %v1353_v63 = vadd.f32 %v1333_v55, %v1332_v54 }
 0x22e   : > { %v1301_v49 = vmul.f32 0.00390625, %v1284_v41  ;;  %v1304_v23 = vmul.f32 0.00390625, %v1293_v43  ;;  %v1326_v28 = vmul.f32 %v3516_v18, %v3516_v18  ;;  %v1327_v50 = vmul.f32 %v3518_v38, %v3518_v38 }
 0x22f   : > { %1351 = vadd.xlane.f32.xlu0 %v1350_v45  ;;  %v1324_v52 = vmul.f32 %v3521_v39, %v3521_v39  ;;  %v1325_v22 = vmul.f32 %v3524_v40, %v3524_v40  ;;  %v3569_v43 = vrot.slane %v1402_v21, %v3296_v42 }
 0x230   : > { %v3535_v24 = vsub.f32 %v3443_v62, %v1304_v23  ;;  %v3537_v53 = vsub.f32 %v1254_v4, %v1304_v23  ;;  %v3543_v56 = vsub.f32 %v1247_v5, %v1301_v49  ;;  %v3545_v57 = vsub.f32 %v1248_v6, %v1301_v49  ;;  %v1430_v23 = vld [vmem:[%s3811_s6] sm:$0x3] }
 0x231   : > { %v1296_v58 = vpop.xlane.xlu1 %1295  ;;  %v1344_v59 = vadd.f32 %v1327_v50, %v1326_v28  ;;  %v1341_v60 = vadd.f32 %v1325_v22, %v1324_v52  ;;  %v3572_v49 = vrot.slane %v1402_v21, %v3301_v44 }
 0x232   : > { %v1305_v61 = vmul.f32 0.00390625, %v1296_v58  ;;  %v1334_v46 = vmul.f32 %v3535_v24, %v3535_v24  ;;  %v1335_v62 = vmul.f32 %v3537_v53, %v3537_v53  ;;  %v1328_v3 = vmul.f32 %v3543_v56, %v3543_v56 }
 0x233   : > { %1345 = vadd.xlane.f32.xlu0 %v1344_v59  ;;  %1342 = vadd.xlane.f32.xlu1 %v1341_v60  ;;  %v1329_v4 = vmul.f32 %v3545_v57, %v3545_v57  ;;  %v3582_v59 = vrot.slane %v1430_v23, %v3296_v42 }
 0x234   : > { %v1356_v0 = vadd.f32 %v1335_v62, %v1334_v46  ;;  %v3552_v1 = vsub.f32 %v3461_v48, %v1305_v61  ;;  %v3555_v2 = vsub.f32 %v3469_v51, %v1305_v61  ;;  %v3585_v61 = vrot.slane %v1430_v23, %v3301_v44 }
 0x235   : > { %v1347_v47 = vadd.f32 %v1329_v4, %v1328_v3 }
 0x236   : > { %v1336_v5 = vmul.f32 %v3552_v1, %v3552_v1  ;;  %v1337_v6 = vmul.f32 %v3555_v2, %v3555_v2 }
 0x237   : > { %1354 = vadd.xlane.f32.xlu1 %v1353_v63  ;;  %1357 = vadd.xlane.f32.xlu0 %v1356_v0 }
 0x238   : > { %v1359_v48 = vadd.f32 %v1337_v6, %v1336_v5 }
 0x23b   : > { %1348 = vadd.xlane.f32.xlu1 %v1347_v47 }
 0x23f   : > { %1360 = vadd.xlane.f32.xlu1 %v1359_v48 }
 0x2b7   : > { %v1340_v51 = vpop.xlane.xlu0 %1339 }
 0x2b8   : > { %v1362_v7 = vmul.f32 0.00390625, %v1340_v51 }
 0x2ba   : > { %v1370_v8 = vadd.f32 1e-05, %v1362_v7 }
 0x2bc   : > { %v1352_v9 = vpop.xlane.xlu0 %1351  ;;  %2709 = vrsqrt.f32 %v1370_v8 }
 0x2bd   : > { %v1366_v10 = vmul.f32 0.00390625, %v1352_v9 }
 0x2bf   : > { %v1374_v11 = vadd.f32 1e-05, %v1366_v10 }
 0x2c0   : > { %v1343_v13 = vpop.xlane.xlu1 %1342  ;;  %v1346_v14 = vpop.xlane.xlu0 %1345 }
 0x2c1   : > { %2711 = vrsqrt.f32 %v1374_v11  ;;  %v1363_v19 = vmul.f32 0.00390625, %v1343_v13  ;;  %v1364_v20 = vmul.f32 0.00390625, %v1346_v14 }
 0x2c3   : > { %v1371_v25 = vadd.f32 1e-05, %v1363_v19  ;;  %v1372_v26 = vadd.f32 1e-05, %v1364_v20 }
 0x2c4   : > { %v1355_v27 = vpop.xlane.xlu1 %1354  ;;  %v1358_v29 = vpop.xlane.xlu0 %1357 }
 0x2c5   : > { %2713 = vrsqrt.f32 %v1371_v25  ;;  %v1367_v16 = vmul.f32 0.00390625, %v1355_v27  ;;  %v1368_v32 = vmul.f32 0.00390625, %v1358_v29 }
 0x2c6   : > { %2715 = vrsqrt.f32 %v1372_v26  ;;  %v2710_v35 = vpop.eup %2709 }
 0x2c7   : > { %v1375_v33 = vadd.f32 1e-05, %v1367_v16  ;;  %v1376_v34 = vadd.f32 1e-05, %v1368_v32  ;;  %v1386_v28 = vmul.f32 %v2710_v35, %v3491_v15  ;;  %v1387_v50 = vmul.f32 %v2710_v35, %v3494_v17 }
 0x2c8   : > { %v1349_v36 = vpop.xlane.xlu1 %1348 }
 0x2c9   : > { %2717 = vrsqrt.f32 %v1375_v33  ;;  %v1365_v41 = vmul.f32 0.00390625, %v1349_v36  ;;  %v1414_v46 = vmul.f32 %v3569_v43, %v1386_v28  ;;  %v1415_v15 = vmul.f32 %v3572_v49, %v1387_v50 }
 0x2ca   : > { %2719 = vrsqrt.f32 %v1376_v34 }
 0x2cb   : > { %v2712_v45 = vpop.eup %2711  ;;  %v1373_v52 = vadd.f32 1e-05, %v1365_v41  ;;  %v1442_v4 = vadd.f32 %v3582_v59, %v1414_v46  ;;  %v1443_v47 = vadd.f32 %v3585_v61, %v1415_v15 }
 0x2cc   : > { %v1361_v22 = vpop.xlane.xlu1 %1360  ;;  %v1394_v54 = vmul.f32 %v2712_v45, %v3501_v30  ;;  %v1395_v55 = vmul.f32 %v2712_v45, %v3504_v31 }
 0x2cd   : > { %2721 = vrsqrt.f32 %v1373_v52  ;;  %v1369_v58 = vmul.f32 0.00390625, %v1361_v22 }
 0x2ce   : > { %v1422_v31 = vmul.f32 %v3569_v43, %v1394_v54  ;;  %v1423_v0 = vmul.f32 %v3572_v49, %v1395_v55 }
 0x2cf   : > { %v2714_v60 = vpop.eup %2713  ;;  %v1377_v17 = vadd.f32 1e-05, %v1369_v58 }
 0x2d0   : > { %v2716_v62 = vpop.eup %2715  ;;  %v1388_v63 = vmul.f32 %v2714_v60, %v3521_v39  ;;  %v1389_v30 = vmul.f32 %v2714_v60, %v3524_v40  ;;  %v1450_v8 = vadd.f32 %v3582_v59, %v1422_v31  ;;  %v1451_v9 = vadd.f32 %v3585_v61, %v1423_v0 }
 0x2d1   : > { %2723 = vrsqrt.f32 %v1377_v17  ;;  %v1390_v5 = vmul.f32 %v2716_v62, %v3516_v18  ;;  %v1391_v39 = vmul.f32 %v2716_v62, %v3518_v38 }
 0x2d2   : > { %v1416_v42 = vmul.f32 %v3569_v43, %v1388_v63  ;;  %v1417_v44 = vmul.f32 %v3572_v49, %v1389_v30 }
 0x2d3   : > { %v2718_v3 = vpop.eup %2717  ;;  %v1418_v14 = vmul.f32 %v3569_v43, %v1390_v5  ;;  %v1419_v19 = vmul.f32 %v3572_v49, %v1391_v39 }
 0x2d4   : > { %v2720_v6 = vpop.eup %2719  ;;  %v1444_v40 = vadd.f32 %v3582_v59, %v1416_v42  ;;  %v1445_v48 = vadd.f32 %v3585_v61, %v1417_v44  ;;  %v1396_v51 = vmul.f32 %v2718_v3, %v3511_v37  ;;  %v1397_v7 = vmul.f32 %v2718_v3, %v3514_v12 }
 0x2d5   : > { %v1398_v20 = vmul.f32 %v2720_v6, %v3535_v24  ;;  %v1399_v37 = vmul.f32 %v2720_v6, %v3537_v53  ;;  %v1446_v24 = vadd.f32 %v3582_v59, %v1418_v14  ;;  %v1447_v53 = vadd.f32 %v3585_v61, %v1419_v19 }
 0x2d6   : > { %v1458_v10 = vpack.c.bf16 %v1444_v40, %v1442_v4  ;;  %v1459_v11 = vpack.c.bf16 %v1445_v48, %v1443_v47  ;;  %v1424_v13 = vmul.f32 %v3569_v43, %v1396_v51  ;;  %v1425_v18 = vmul.f32 %v3572_v49, %v1397_v7 }
 0x2d7   : > { %v2722_v38 = vpop.eup %2721  ;;  %v1426_v34 = vmul.f32 %v3569_v43, %v1398_v20  ;;  %v1427_v35 = vmul.f32 %v3572_v49, %v1399_v37 }
 0x2d8   : > { %1466 = vst [vmem:[#allocation2] sm:$0xff] %v1458_v10  ;;  %1467 = vst [vmem:[#allocation2 + $0x8] sm:$0xff] %v1459_v11  ;;  %v1452_v12 = vadd.f32 %v3582_v59, %v1424_v13  ;;  %v1453_v25 = vadd.f32 %v3585_v61, %v1425_v18  ;;  %v1392_v26 = vmul.f32 %v2722_v38, %v3543_v56 }
 0x2d9   : > { %v1393_v27 = vmul.f32 %v2722_v38, %v3545_v57  ;;  %v1454_v52 = vadd.f32 %v3582_v59, %v1426_v34  ;;  %v1455_v22 = vadd.f32 %v3585_v61, %v1427_v35 }
 0x2da   : > { %v1462_v29 = vpack.c.bf16 %v1452_v12, %v1450_v8  ;;  %v1463_v16 = vpack.c.bf16 %v1453_v25, %v1451_v9  ;;  %v1420_v32 = vmul.f32 %v3569_v43, %v1392_v26 }
 0x2db   : > { %v1421_v21 = vmul.f32 %v3572_v49, %v1393_v27  ;;  %v2724_v33 = vpop.eup %2723 }
 0x2dc   : > { %1470 = vst [vmem:[#allocation2 + $0x20] sm:$0xff] %v1462_v29  ;;  %1471 = vst [vmem:[#allocation2 + $0x28] sm:$0xff] %v1463_v16  ;;  %v1448_v56 = vadd.f32 %v3582_v59, %v1420_v32  ;;  %v1400_v36 = vmul.f32 %v2724_v33, %v3552_v1  ;;  %v1401_v41 = vmul.f32 %v2724_v33, %v3555_v2 }
 0x2dd   : > { %v1449_v57 = vadd.f32 %v3585_v61, %v1421_v21 }
 0x2de   : > { %v1460_v45 = vpack.c.bf16 %v1448_v56, %v1446_v24  ;;  %v1428_v28 = vmul.f32 %v3569_v43, %v1400_v36  ;;  %v1429_v50 = vmul.f32 %v3572_v49, %v1401_v41 }
 0x2df   : > { %v1461_v23 = vpack.c.bf16 %v1449_v57, %v1447_v53 }
 0x2e0   : > { %1468 = vst [vmem:[#allocation2 + $0x10] sm:$0xff] %v1460_v45  ;;  %v1456_v54 = vadd.f32 %v3582_v59, %v1428_v28  ;;  %v1457_v55 = vadd.f32 %v3585_v61, %v1429_v50 }
 0x2e1   : > { %1469 = vst [vmem:[#allocation2 + $0x18] sm:$0xff] %v1461_v23 }
 0x2e2   : > { %v1464_v58 = vpack.c.bf16 %v1456_v54, %v1454_v52  ;;  %v1465_v1 = vpack.c.bf16 %v1457_v55, %v1455_v22 }
 0x2e4   : > { %1472 = vst [vmem:[#allocation2 + $0x30] sm:$0xff] %v1464_v58  ;;  %1473 = vst [vmem:[#allocation2 + $0x38] sm:$0xff] %v1465_v1 }
 0x2e5 PF: > { %v2725_v2 = vld [vmem:[%s3171_s8 + $0x4] ss:$8 sps:$4 sm:$0xff]   ;;  %v2727_v43 = vld [vmem:[%s3171_s8] ss:$8 sps:$4 sm:$0xff]   ;;  %v2728_v49 = vld [vmem:[%s3171_s8 + $0x14] ss:$8 sps:$4 sm:$0xff]   ;;  %s3826_s27 = scalar_lea.vmem %s3815_s10, %s3836_s20  ;;  %s3827_s19 = scalar_lea.vmem %s3814_s9, %s3836_s20 }
 0x2e6   : > { %1963 = vmatprep.subr.bf16.mxu1 %v2725_v2  ;;  %v2730_v59 = vld [vmem:[%s3171_s8 + $0x10] ss:$8 sps:$4 sm:$0xff]   ;;  %v2731_v60 = vld [vmem:[%s3171_s8 + $0x24] ss:$8 sps:$4 sm:$0xff]   ;;  %v2739_v46 = vld [vmem:[%s3169_s7] ss:$8 sps:$4 sm:$0xff]  }
 0x2e7   : > { %1964 = vmatpush1.bf16.msra.mxu1 %v2727_v43  ;;  %v2737_v61 = vld [vmem:[%s3169_s7 + $0x4] ss:$8 sps:$4 sm:$0xff]   ;;  %v2733_v15 = vld [vmem:[%s3171_s8 + $0x20] ss:$8 sps:$4 sm:$0xff]   ;;  %v2734_v17 = vld [vmem:[%s3171_s8 + $0x34] ss:$8 sps:$4 sm:$0xff]  }
 0x2e8   : > { %1965 = vmatprep.subr.bf16.mxu1 %v2728_v49  ;;  %1686 = vmatprep.subr.bf16.mxu0 %v2737_v61  ;;  %v2743_v62 = vld [vmem:[%s3169_s7 + $0x14] ss:$8 sps:$4 sm:$0xff]   ;;  %v2745_v63 = vld [vmem:[%s3169_s7 + $0x10] ss:$8 sps:$4 sm:$0xff]   ;;  %v2749_v31 = vld [vmem:[%s3169_s7 + $0x24] ss:$8 sps:$4 sm:$0xff]  }
 0x2e9   : > { %1687 = vmatpush1.bf16.msra.mxu0 %v2739_v46  ;;  %v2736_v30 = vld [vmem:[%s3171_s8 + $0x30] ss:$8 sps:$4 sm:$0xff]   ;;  %v2740_v0 = vld [vmem:[%s3171_s8 + $0x44] ss:$8 sps:$4 sm:$0xff]   ;;  %v2751_v42 = vld [vmem:[%s3169_s7 + $0x20] ss:$8 sps:$4 sm:$0xff]  }
 0x2ea   : > { %1688 = vmatprep.subr.bf16.mxu0 %v2743_v62  ;;  %v2755_v44 = vld [vmem:[%s3169_s7 + $0x34] ss:$8 sps:$4 sm:$0xff]   ;;  %v2742_v3 = vld [vmem:[%s3171_s8 + $0x40] ss:$8 sps:$4 sm:$0xff]   ;;  %v2757_v47 = vld [vmem:[%s3169_s7 + $0x30] ss:$8 sps:$4 sm:$0xff]  }
 0x2eb   : > { %1966 = vmatpush1.bf16.msra.mxu1 %v2730_v59  ;;  %v2746_v4 = vld [vmem:[%s3171_s8 + $0x54] ss:$8 sps:$4 sm:$0xff]   ;;  %v2761_v5 = vld [vmem:[%s3169_s7 + $0x44] ss:$8 sps:$4 sm:$0xff]   ;;  %v2748_v39 = vld [vmem:[%s3171_s8 + $0x50] ss:$8 sps:$4 sm:$0xff]  }
 0x2ec   : > { %1967 = vmatprep.subr.bf16.mxu1 %v2731_v60  ;;  %v2752_v6 = vld [vmem:[%s3171_s8 + $0x64] ss:$8 sps:$4 sm:$0xff]   ;;  %v2763_v40 = vld [vmem:[%s3169_s7 + $0x40] ss:$8 sps:$4 sm:$0xff]   ;;  %v2767_v48 = vld [vmem:[%s3169_s7 + $0x54] ss:$8 sps:$4 sm:$0xff]  }
 0x2ed   : > { %1689 = vmatpush1.bf16.msra.mxu0 %v2745_v63  ;;  %v2754_v51 = vld [vmem:[%s3171_s8 + $0x60] ss:$8 sps:$4 sm:$0xff]   ;;  %v2758_v7 = vld [vmem:[%s3171_s8 + $0x74] ss:$8 sps:$4 sm:$0xff]   ;;  %v2769_v8 = vld [vmem:[%s3169_s7 + $0x50] ss:$8 sps:$4 sm:$0xff]  }
 0x2ee   : > { %1690 = vmatprep.subr.bf16.mxu0 %v2749_v31  ;;  %v2773_v9 = vld [vmem:[%s3169_s7 + $0x64] ss:$8 sps:$4 sm:$0xff]   ;;  %v2760_v10 = vld [vmem:[%s3171_s8 + $0x70] ss:$8 sps:$4 sm:$0xff]   ;;  %v2775_v13 = vld [vmem:[%s3169_s7 + $0x60] ss:$8 sps:$4 sm:$0xff]  }
 0x2ef   : > { %1968 = vmatpush1.bf16.msra.mxu1 %v2733_v15  ;;  %v2764_v11 = vld [vmem:[%s3171_s8 + $0x84] ss:$8 sps:$4 sm:$0xff]   ;;  %v2779_v18 = vld [vmem:[%s3169_s7 + $0x74] ss:$8 sps:$4 sm:$0xff]   ;;  %v2766_v38 = vld [vmem:[%s3171_s8 + $0x80] ss:$8 sps:$4 sm:$0xff]  }
 0x2f0   : > { %1969 = vmatprep.subr.bf16.mxu1 %v2734_v17  ;;  %v2770_v14 = vld [vmem:[%s3171_s8 + $0x94] ss:$8 sps:$4 sm:$0xff]   ;;  %v2781_v19 = vld [vmem:[%s3169_s7 + $0x70] ss:$8 sps:$4 sm:$0xff]   ;;  %v2785_v20 = vld [vmem:[%s3169_s7 + $0x84] ss:$8 sps:$4 sm:$0xff]   ;;  %v1516_v17 = vlaneseq }
 0x2f1   : > { %1691 = vmatpush1.bf16.msra.mxu0 %v2751_v42  ;;  %v2772_v37 = vld [vmem:[%s3171_s8 + $0x90] ss:$8 sps:$4 sm:$0xff]   ;;  %v2776_v12 = vld [vmem:[%s3171_s8 + $0xa4] ss:$8 sps:$4 sm:$0xff]   ;;  %v2787_v25 = vld [vmem:[%s3169_s7 + $0x80] ss:$8 sps:$4 sm:$0xff]  }
 0x2f2   : > { %1692 = vmatprep.subr.bf16.mxu0 %v2755_v44  ;;  %v2791_v26 = vld [vmem:[%s3169_s7 + $0x94] ss:$8 sps:$4 sm:$0xff]   ;;  %v1475_v27 = vld [vmem:[#allocation2 + $0x8] sm:$0xff]  ;;  %v2793_v32 = vld [vmem:[%s3169_s7 + $0x90] ss:$8 sps:$4 sm:$0xff]   ;;  %v1517_v62 = vshrl.u32 %v1516_v17, 7 }
 0x2f3   : > { %1970 = vmatpush1.bf16.msra.mxu1 %v2736_v30  ;;  %v2778_v29 = vld [vmem:[%s3171_s8 + $0xa0] ss:$8 sps:$4 sm:$0xff]   ;;  %1995 = vmatprep.mubr.bf16.mxu1 %v1475_v27  ;;  %v2782_v16 = vld [vmem:[%s3171_s8 + $0xb4] ss:$8 sps:$4 sm:$0xff]   ;;  %v2797_v21 = vld [vmem:[%s3169_s7 + $0xa4] ss:$8 sps:$4 sm:$0xff]  }
 0x2f4   : > { %1971 = vmatprep.subr.bf16.mxu1 %v2740_v0  ;;  %1718 = vmatprep.mubr.bf16.mxu0 %v1475_v27  ;;  %v2784_v33 = vld [vmem:[%s3171_s8 + $0xb0] ss:$8 sps:$4 sm:$0xff]   ;;  %v2788_v24 = vld [vmem:[%s3171_s8 + $0xc4] ss:$8 sps:$4 sm:$0xff]   ;;  %v2799_v53 = vld [vmem:[%s3169_s7 + $0xa0] ss:$8 sps:$4 sm:$0xff]  }
 0x2f5   : > { %1693 = vmatpush1.bf16.msra.mxu0 %v2757_v47  ;;  %v2803_v34 = vld [vmem:[%s3169_s7 + $0xb4] ss:$8 sps:$4 sm:$0xff]   ;;  %v2790_v35 = vld [vmem:[%s3171_s8 + $0xc0] ss:$8 sps:$4 sm:$0xff]   ;;  %v2805_v57 = vld [vmem:[%s3169_s7 + $0xb0] ss:$8 sps:$4 sm:$0xff]  }
 0x2f6   : > { %1694 = vmatprep.subr.bf16.mxu0 %v2761_v5  ;;  %v2794_v56 = vld [vmem:[%s3171_s8 + $0xd4] ss:$8 sps:$4 sm:$0xff]   ;;  %v2809_v36 = vld [vmem:[%s3169_s7 + $0xc4] ss:$8 sps:$4 sm:$0xff]   ;;  %v2796_v41 = vld [vmem:[%s3171_s8 + $0xd0] ss:$8 sps:$4 sm:$0xff]  }
 0x2f7   : > { %1972 = vmatpush1.bf16.msra.mxu1 %v2742_v3  ;;  %v2800_v45 = vld [vmem:[%s3171_s8 + $0xe4] ss:$8 sps:$4 sm:$0xff]   ;;  %v2811_v23 = vld [vmem:[%s3169_s7 + $0xc0] ss:$8 sps:$4 sm:$0xff]   ;;  %v2812_v28 = vld [vmem:[%s3169_s7 + $0xd4] ss:$8 sps:$4 sm:$0xff]  }
 0x2f8   : > { %1973 = vmatprep.subr.bf16.mxu1 %v2746_v4  ;;  %v2802_v50 = vld [vmem:[%s3171_s8 + $0xe0] ss:$8 sps:$4 sm:$0xff]   ;;  %v2806_v52 = vld [vmem:[%s3171_s8 + $0xf4] ss:$8 sps:$4 sm:$0xff]   ;;  %v2814_v22 = vld [vmem:[%s3169_s7 + $0xd0] ss:$8 sps:$4 sm:$0xff]  }
 0x2f9   : > { %1695 = vmatpush1.bf16.msra.mxu0 %v2763_v40  ;;  %v2815_v54 = vld [vmem:[%s3169_s7 + $0xe4] ss:$8 sps:$4 sm:$0xff]   ;;  %v2808_v55 = vld [vmem:[%s3171_s8 + $0xf0] ss:$8 sps:$4 sm:$0xff]   ;;  %v2817_v58 = vld [vmem:[%s3169_s7 + $0xe0] ss:$8 sps:$4 sm:$0xff]  }
 0x2fa   : > { %1696 = vmatprep.subr.bf16.mxu0 %v2767_v48  ;;  %v2818_v1 = vld [vmem:[%s3169_s7 + $0xf4] ss:$8 sps:$4 sm:$0xff]   ;;  %v1474_v2 = vld [vmem:[#allocation2] sm:$0xff]  ;;  %v2820_v49 = vld [vmem:[%s3169_s7 + $0xf0] ss:$8 sps:$4 sm:$0xff]   ;;  %v1518_v63 = vsub.s32 0, %v1517_v62 }
 0x2fb   : > { %1974 = vmatpush1.bf16.msra.mxu1 %v2748_v39  ;;  %v1477_v43 = vld [vmem:[#allocation2 + $0x18] sm:$0xff]  ;;  %v1476_v59 = vld [vmem:[#allocation2 + $0x10] sm:$0xff]  ;;  %v1479_v60 = vld [vmem:[#allocation2 + $0x28] sm:$0xff]  ;;  %v1522_v31 = vsub.s32 1, %v1517_v62  ;;  %s2576_s20 = sshll.u32 (%p2997_p6), %s2883_s23, 3 }
 0x2fc   : > { %1975 = vmatprep.subr.bf16.mxu1 %v2752_v6  ;;  %v1478_v61 = vld [vmem:[#allocation2 + $0x20] sm:$0xff]  ;;  %v1481_v46 = vld [vmem:[#allocation2 + $0x38] sm:$0xff]  ;;  %v1480_v15 = vld [vmem:[#allocation2 + $0x30] sm:$0xff]  ;;  %s2210_s16 = scalar_lea.vmem (%p2997_p6), %s3817_s12, %s2576_s20 }
 0x2fd   : > { %1697 = vmatpush1.bf16.msra.mxu0 %v2769_v8  ;;  %v1791_v30 = vld [vmem:[%s3826_s27] sm:$0x3] }
 0x2fe   : > { %1698 = vmatprep.subr.bf16.mxu0 %v2773_v9  ;;  %v3700_v0 = vrot.slane %v1791_v30, %v1518_v63  ;;  %v3702_v42 = vrot.slane %v1791_v30, %v1522_v31 }
 0x2ff   : > { %1976 = vmatpush1.bf16.msra.mxu1 %v2754_v51 }
 0x300   : > { %1977 = vmatprep.subr.bf16.mxu1 %v2758_v7 }
 0x301   : > { %1699 = vmatpush1.bf16.msra.mxu0 %v2775_v13 }
 0x302   : > { %1700 = vmatprep.subr.bf16.mxu0 %v2779_v18 }
 0x303   : > { %1978 = vmatpush1.bf16.msra.mxu1 %v2760_v10 }
 0x304   : > { %1979 = vmatprep.subr.bf16.mxu1 %v2764_v11 }
 0x305   : > { %1701 = vmatpush1.bf16.msra.mxu0 %v2781_v19 }
 0x306   : > { %1702 = vmatprep.subr.bf16.mxu0 %v2785_v20 }
 0x307   : > { %1980 = vmatpush1.bf16.msra.mxu1 %v2766_v38 }
 0x308   : > { %1981 = vmatprep.subr.bf16.mxu1 %v2770_v14  ;;  %v1514_v14 = vld [vmem:[%s3827_s19] sm:$0x3] }
 0x309   : > { %1703 = vmatpush1.bf16.msra.mxu0 %v2787_v25 }
 0x30a   : > { %1704 = vmatprep.subr.bf16.mxu0 %v2791_v26 }
 0x30b   : > { %1982 = vmatpush1.bf16.msra.mxu1 %v2772_v37 }
 0x30c   : > { %1983 = vmatprep.subr.bf16.mxu1 %v2776_v12 }
 0x30d   : > { %1705 = vmatpush1.bf16.msra.mxu0 %v2793_v32 }
 0x30e   : > { %1706 = vmatprep.subr.bf16.mxu0 %v2797_v21  ;;  %v3719_v21 = vrot.slane %v1514_v14, %v1522_v31 }
 0x30f   : > { %1984 = vmatpush1.bf16.msra.mxu1 %v2778_v29 }
 0x310   : > { %1985 = vmatprep.subr.bf16.mxu1 %v2782_v16  ;;  %v3717_v16 = vrot.slane %v1514_v14, %v1518_v63 }
 0x311   : > { %1707 = vmatpush1.bf16.msra.mxu0 %v2799_v53 }
 0x312   : > { %1708 = vmatprep.subr.bf16.mxu0 %v2803_v34 }
 0x313   : > { %1986 = vmatpush1.bf16.msra.mxu1 %v2784_v33 }
 0x314   : > { %1987 = vmatprep.subr.bf16.mxu1 %v2788_v24 }
 0x315   : > { %1709 = vmatpush1.bf16.msra.mxu0 %v2805_v57 }
 0x316   : > { %1710 = vmatprep.subr.bf16.mxu0 %v2809_v36 }
 0x317   : > { %1988 = vmatpush1.bf16.msra.mxu1 %v2790_v35 }
 0x318   : > { %1989 = vmatprep.subr.bf16.mxu1 %v2794_v56 }
 0x319   : > { %1711 = vmatpush1.bf16.msra.mxu0 %v2811_v23 }
 0x31a   : > { %1712 = vmatprep.subr.bf16.mxu0 %v2812_v28 }
 0x31b   : > { %1990 = vmatpush1.bf16.msra.mxu1 %v2796_v41 }
 0x31c   : > { %1991 = vmatprep.subr.bf16.mxu1 %v2800_v45 }
 0x31d   : > { %1713 = vmatpush1.bf16.msra.mxu0 %v2814_v22 }
 0x31e   : > { %1714 = vmatprep.subr.bf16.mxu0 %v2815_v54 }
 0x31f   : > { %1992 = vmatpush1.bf16.msra.mxu1 %v2802_v50 }
 0x320   : > { %1993 = vmatprep.subr.bf16.mxu1 %v2806_v52 }
 0x321   : > { %1715 = vmatpush1.bf16.msra.mxu0 %v2817_v58 }
 0x322   : > { %1716 = vmatprep.subr.bf16.mxu0 %v2818_v1 }
 0x323   : > { %1994 = vmatpush1.bf16.msra.mxu1 %v2808_v55 }
 0x325   : > { %1717 = vmatpush1.bf16.msra.mxu0 %v2820_v49 }
 0x326   : > { %1996 = vmatmul.mubr.bf16.vlgmr.msra.gmra.mrb[0].mxu1 %v1474_v2 }
 0x327   : > { %2005 = vmatprep.mubr.bf16.mxu1 %v1477_v43 }
 0x328   : > { %1719 = vmatmul.mubr.bf16.vlgmr.msra.gmra.mrb[0].mxu0 %v1474_v2 }
 0x329   : > { %1728 = vmatprep.mubr.bf16.mxu0 %v1477_v43 }
 0x32e   : > { %2006 = vmatmul.mubr.bf16.gmra.mrb[4].mxu1 %v1476_v59 }
 0x32f   : > { %2015 = vmatprep.mubr.bf16.mxu1 %v1479_v60 }
 0x330   : > { %1729 = vmatmul.mubr.bf16.gmra.mrb[4].mxu0 %v1476_v59 }
 0x331   : > { %1738 = vmatprep.mubr.bf16.mxu0 %v1479_v60 }
 0x336   : > { %2016 = vmatmul.mubr.bf16.gmra.mrb[8].mxu1 %v1478_v61 }
 0x337   : > { %2025 = vmatprep.mubr.bf16.mxu1 %v1481_v46 }
 0x338   : > { %1739 = vmatmul.mubr.bf16.gmra.mrb[8].mxu0 %v1478_v61 }
 0x339   : > { %1748 = vmatprep.mubr.bf16.mxu0 %v1481_v46 }
 0x33e   : > { %2026 = vmatmul.mubr.bf16.gmra.mrb[12].mxu1 %v1480_v15 }
 0x340   : > { %1749 = vmatmul.mubr.bf16.gmra.mrb[12].mxu0 %v1480_v15 }
 0x3f9   : > { %v1997_v44 = vpop.f32.mrb[0].mxu1 }
 0x3fa   : > { %v1998_v3 = vadd.f32 %v1997_v44, %v3700_v0  ;;  %v1999_v4 = vpop.f32.mrb[1].mxu1 }
 0x3fb   : > { %v2000_v47 = vadd.f32 %v1999_v4, %v3702_v42  ;;  %v2001_v5 = vpop.f32.mrb[2].mxu1  ;;  %v1720_v9 = vpop.f32.mrb[0].mxu0 }
 0x3fc   : > { %v2052_v39 = vmul.f32 0.70710677, %v1998_v3  ;;  %v2002_v6 = vadd.f32 %v2001_v5, %v3700_v0  ;;  %v2003_v40 = vpop.f32.mrb[3].mxu1  ;;  %v1722_v10 = vpop.f32.mrb[1].mxu0  ;;  %v2036_v34 = vmul.f32 0.5, %v1998_v3  ;;  %v1721_v23 = vadd.f32 %v1720_v9, %v3717_v16 }
 0x3fd   : > { %v2053_v48 = vmul.f32 0.70710677, %v2000_v47  ;;  %v2004_v51 = vadd.f32 %v2003_v40, %v3702_v42  ;;  %v1724_v13 = vpop.f32.mrb[2].mxu0  ;;  %v2037_v35 = vmul.f32 0.5, %v2000_v47  ;;  %v1723_v54 = vadd.f32 %v1722_v10, %v3719_v21 }
 0x3fe   : > { %2821 = verf.f32 %v2052_v39  ;;  %v2054_v7 = vmul.f32 0.70710677, %v2002_v6  ;;  %v1726_v19 = vpop.f32.mrb[3].mxu0  ;;  %v2038_v56 = vmul.f32 0.5, %v2002_v6  ;;  %v1725_v55 = vadd.f32 %v1724_v13, %v3717_v16 }
 0x3ff   : > { %2823 = verf.f32 %v2053_v48  ;;  %v2055_v8 = vmul.f32 0.70710677, %v2004_v51  ;;  %v2039_v45 = vmul.f32 0.5, %v2004_v51  ;;  %v1727_v60 = vadd.f32 %v1726_v19, %v3719_v21 }
 0x400   : > { %2825 = verf.f32 %v2054_v7 }
 0x401   : > { %2827 = verf.f32 %v2055_v8  ;;  %v2007_v11 = vpop.f32.mrb[4].mxu1 }
 0x402   : > { %v2008_v18 = vadd.f32 %v2007_v11, %v3700_v0  ;;  %v2009_v38 = vpop.f32.mrb[5].mxu1 }
 0x403   : > { %v2010_v20 = vadd.f32 %v2009_v38, %v3702_v42  ;;  %v2011_v37 = vpop.f32.mrb[6].mxu1  ;;  %v1730_v24 = vpop.f32.mrb[4].mxu0 }
 0x404   : > { %v2056_v12 = vmul.f32 0.70710677, %v2008_v18  ;;  %v2012_v25 = vadd.f32 %v2011_v37, %v3700_v0  ;;  %v2013_v26 = vpop.f32.mrb[7].mxu1  ;;  %v1732_v57 = vpop.f32.mrb[5].mxu0  ;;  %v2040_v17 = vmul.f32 0.5, %v2008_v18  ;;  %v1731_v19 = vadd.f32 %v1730_v24, %v3717_v16 }
 0x405   : > { %v2057_v27 = vmul.f32 0.70710677, %v2010_v20  ;;  %v2014_v29 = vadd.f32 %v2013_v26, %v3702_v42  ;;  %v1734_v50 = vpop.f32.mrb[6].mxu0  ;;  %v2041_v31 = vmul.f32 0.5, %v2010_v20  ;;  %v1733_v20 = vadd.f32 %v1732_v57, %v3719_v21 }
 0x406   : > { %2829 = verf.f32 %v2056_v12  ;;  %v2058_v32 = vmul.f32 0.70710677, %v2012_v25  ;;  %v1736_v2 = vpop.f32.mrb[7].mxu0  ;;  %v2042_v6 = vmul.f32 0.5, %v2012_v25 }
 0x407   : > { %2831 = verf.f32 %v2057_v27  ;;  %v2059_v33 = vmul.f32 0.70710677, %v2014_v29  ;;  %v2043_v8 = vmul.f32 0.5, %v2014_v29 }
 0x408   : > { %v2822_v53 = vpop.eup %2821  ;;  %2833 = verf.f32 %v2058_v32 }
 0x409   : > { %v2824_v36 = vpop.eup %2823  ;;  %v2084_v41 = vadd.f32 1.0, %v2822_v53  ;;  %2835 = verf.f32 %v2059_v33  ;;  %v2017_v28 = vpop.f32.mrb[8].mxu1 }
 0x40a   : > { %v2826_v52 = vpop.eup %2825  ;;  %v2085_v22 = vadd.f32 1.0, %v2824_v36  ;;  %v3725_v58 = vadd.f32 %v2017_v28, %v3700_v0  ;;  %v2019_v1 = vpop.f32.mrb[9].mxu1 }
 0x40b   : > { %v2828_v43 = vpop.eup %2827  ;;  %v2086_v49 = vadd.f32 1.0, %v2826_v52  ;;  %v2100_v59 = vmul.f32 %v2084_v41, %v2036_v34  ;;  %v3729_v61 = vadd.f32 %v2019_v1, %v3702_v42  ;;  %v2021_v46 = vpop.f32.mrb[10].mxu1  ;;  %v1735_v41 = vadd.f32 %v1734_v50, %v3717_v16 }
 0x40c   : > { %v2087_v15 = vadd.f32 1.0, %v2828_v43  ;;  %v2101_v62 = vmul.f32 %v2085_v22, %v2037_v35  ;;  %v2060_v63 = vmul.f32 0.70710677, %v3725_v58  ;;  %v2023_v30 = vpop.f32.mrb[11].mxu1  ;;  %v3734_v39 = vadd.f32 %v2021_v46, %v3700_v0  ;;  %v1740_v51 = vpop.f32.mrb[8].mxu0 }
 0x40d   : > { %v2116_v44 = vmul.f32 %v2100_v59, %v1721_v23  ;;  %v2102_v3 = vmul.f32 %v2086_v49, %v2038_v56  ;;  %v2061_v4 = vmul.f32 0.70710677, %v3729_v61  ;;  %v3737_v48 = vadd.f32 %v2023_v30, %v3702_v42  ;;  %v1742_v13 = vpop.f32.mrb[9].mxu0 }
 0x40e   : > { %v2117_v47 = vmul.f32 %v2101_v62, %v1723_v54  ;;  %2837 = verf.f32 %v2060_v63  ;;  %v2103_v5 = vmul.f32 %v2087_v15, %v2039_v45  ;;  %v2062_v11 = vmul.f32 0.70710677, %v3734_v39  ;;  %v3743_v12 = vpop.f32.mrb[10].mxu0 }
 0x40f   : > { %v2118_v40 = vmul.f32 %v2102_v3, %v1725_v55  ;;  %2839 = verf.f32 %v2061_v4  ;;  %v2063_v14 = vmul.f32 0.70710677, %v3737_v48  ;;  %v1746_v33 = vpop.f32.mrb[11].mxu0  ;;  %v1737_v22 = vadd.f32 %v1736_v2, %v3719_v21 }
 0x410   : > { %v2830_v7 = vpop.eup %2829  ;;  %v2568_v9 = vpack.c.bf16 %v2117_v47, %v2116_v44  ;;  %v2119_v10 = vmul.f32 %v2103_v5, %v1727_v60  ;;  %2841 = verf.f32 %v2062_v11  ;;  %v2044_v46 = vmul.f32 0.5, %v3725_v58 }
 0x411   : > { %v2832_v18 = vpop.eup %2831  ;;  %v2088_v38 = vadd.f32 1.0, %v2830_v7  ;;  %v2027_v37 = vpop.f32.mrb[12].mxu1  ;;  %2843 = verf.f32 %v2063_v14  ;;  %v1743_v47 = vadd.f32 %v1742_v13, %v3719_v21 }
 0x412   : > { %v2834_v25 = vpop.eup %2833  ;;  %v2089_v26 = vadd.f32 1.0, %v2832_v18  ;;  %2180 = vst [vmem:[%s3173_s21] sm:$0xff] %v2568_v9  ;;  %v2569_v27 = vpack.c.bf16 %v2119_v10, %v2118_v40  ;;  %v3747_v29 = vadd.f32 %v2027_v37, %v3700_v0  ;;  %v2029_v32 = vpop.f32.mrb[13].mxu1  ;;  %v1745_v18 = vadd.f32 %v3743_v12, %v3717_v16 }
 0x413   : > { %v2836_v53 = vpop.eup %2835  ;;  %v2090_v34 = vadd.f32 1.0, %v2834_v25  ;;  %v2104_v24 = vmul.f32 %v2088_v38, %v2040_v17  ;;  %v2030_v35 = vadd.f32 %v2029_v32, %v3702_v42  ;;  %v2031_v56 = vpop.f32.mrb[14].mxu1 }
 0x414   : > { %v2091_v57 = vadd.f32 1.0, %v2836_v53  ;;  %2181 = vst [vmem:[%s3173_s21 + $0x8] sm:$0xff] %v2569_v27  ;;  %v2105_v36 = vmul.f32 %v2089_v26, %v2041_v31  ;;  %v2064_v45 = vmul.f32 0.70710677, %v3747_v29  ;;  %v2033_v23 = vpop.f32.mrb[15].mxu1  ;;  %v2032_v43 = vadd.f32 %v2031_v56, %v3700_v0  ;;  %v1750_v60 = vpop.f32.mrb[12].mxu0 }
 0x415   : > { %v2120_v28 = vmul.f32 %v2104_v24, %v1731_v19  ;;  %v2106_v52 = vmul.f32 %v2090_v34, %v2042_v6  ;;  %v2065_v54 = vmul.f32 0.70710677, %v2030_v35  ;;  %v2034_v59 = vadd.f32 %v2033_v23, %v3702_v42  ;;  %v1752_v63 = vpop.f32.mrb[13].mxu0 }
 0x416   : > { %v2121_v55 = vmul.f32 %v2105_v36, %v1733_v20  ;;  %2845 = verf.f32 %v2064_v45  ;;  %v2107_v1 = vmul.f32 %v2091_v57, %v2043_v8  ;;  %v2066_v62 = vmul.f32 0.70710677, %v2032_v43  ;;  %v1754_v3 = vpop.f32.mrb[14].mxu0 }
 0x417   : > { %v2122_v49 = vmul.f32 %v2106_v52, %v1735_v41  ;;  %2847 = verf.f32 %v2065_v54  ;;  %v2045_v31 = vmul.f32 0.5, %v3729_v61  ;;  %v2067_v44 = vmul.f32 0.70710677, %v2034_v59  ;;  %v1756_v58 = vpop.f32.mrb[15].mxu0 }
 0x418   : > { %v2838_v50 = vpop.eup %2837  ;;  %v2570_v15 = vpack.c.bf16 %v2121_v55, %v2120_v28  ;;  %v2123_v17 = vmul.f32 %v2107_v1, %v1737_v22  ;;  %v1741_v0 = vadd.f32 %v1740_v51, %v3717_v16  ;;  %2849 = verf.f32 %v2066_v62 }
 0x419   : > { %v2840_v2 = vpop.eup %2839  ;;  %v2092_v30 = vadd.f32 1.0, %v2838_v50  ;;  %2851 = verf.f32 %v2067_v44  ;;  %v2046_v8 = vmul.f32 0.5, %v3734_v39  ;;  %v2047_v51 = vmul.f32 0.5, %v3737_v48 }
 0x41a   : > { %v2093_v4 = vadd.f32 1.0, %v2840_v2  ;;  %2182 = vst [vmem:[%s3173_s21 + $0x10] sm:$0xff] %v2570_v15  ;;  %v2571_v42 = vpack.c.bf16 %v2123_v17, %v2122_v49  ;;  %v2842_v6 = vpop.eup %2841  ;;  %v1747_v19 = vadd.f32 %v1746_v33, %v3719_v21  ;;  %v2048_v25 = vmul.f32 0.5, %v3747_v29 }
 0x41b   : > { %v2108_v5 = vmul.f32 %v2092_v30, %v2044_v46  ;;  %v2844_v7 = vpop.eup %2843  ;;  %v2094_v61 = vadd.f32 1.0, %v2842_v6  ;;  %v1751_v27 = vadd.f32 %v1750_v60, %v3717_v16  ;;  %v2049_v48 = vmul.f32 0.5, %v2030_v35 }
 0x41c   : > { %2183 = vst [vmem:[%s3173_s21 + $0x18] sm:$0xff] %v2571_v42  ;;  %v2109_v40 = vmul.f32 %v2093_v4, %v2045_v31  ;;  %v2095_v10 = vadd.f32 1.0, %v2844_v7  ;;  %v1753_v12 = vadd.f32 %v1752_v63, %v3719_v21  ;;  %v2050_v36 = vmul.f32 0.5, %v2032_v43 }
 0x41d   : > { %v2124_v9 = vmul.f32 %v2108_v5, %v1741_v0  ;;  %v2110_v13 = vmul.f32 %v2094_v61, %v2046_v8  ;;  %v2051_v45 = vmul.f32 0.5, %v2034_v59  ;;  %v1755_v35 = vadd.f32 %v1754_v3, %v3717_v16  ;;  %v2252_v16 = vld [vmem:[%s3173_s21] sm:$0xff] (%p2997_p6) }
 0x41e   : > { %v2125_v11 = vmul.f32 %v2109_v40, %v1743_v47  ;;  %v2111_v20 = vmul.f32 %v2095_v10, %v2047_v51  ;;  %v1757_v54 = vadd.f32 %v1756_v58, %v3719_v21  ;;  %v2254_v21 = vld [vmem:[%s3173_s21 + $0x8] sm:$0xff] (%p2997_p6)  ;;  %2253 = vst [vmem:[%s2210_s16] sm:$0xff] (%p2997_p6), %v2252_v16 }
 0x41f   : > { %v2126_v26 = vmul.f32 %v2110_v13, %v1745_v18  ;;  %2255 = vst [vmem:[%s2210_s16 + $0x20] sm:$0xff] (%p2997_p6), %v2254_v21 }
 0x420   : > { %v2846_v38 = vpop.eup %2845  ;;  %v2572_v14 = vpack.c.bf16 %v2125_v11, %v2124_v9  ;;  %v2127_v53 = vmul.f32 %v2111_v20, %v1747_v19 }
 0x421   : > { %v2848_v37 = vpop.eup %2847  ;;  %v2096_v39 = vadd.f32 1.0, %v2846_v38  ;;  %v2256_v43 = vld [vmem:[%s3173_s21 + $0x10] sm:$0xff] (%p2997_p6) }
 0x422   : > { %v2097_v32 = vadd.f32 1.0, %v2848_v37  ;;  %2184 = vst [vmem:[%s3173_s21 + $0x20] sm:$0xff] %v2572_v14  ;;  %v2850_v24 = vpop.eup %2849  ;;  %v2573_v56 = vpack.c.bf16 %v2127_v53, %v2126_v26  ;;  %2257 = vst [vmem:[%s2210_s16 + $0x40] sm:$0xff] (%p2997_p6), %v2256_v43 }
 0x423   : > { %v2112_v34 = vmul.f32 %v2096_v39, %v2048_v25  ;;  %v2852_v57 = vpop.eup %2851  ;;  %v2098_v29 = vadd.f32 1.0, %v2850_v24  ;;  %v2258_v59 = vld [vmem:[%s3173_s21 + $0x18] sm:$0xff] (%p2997_p6) }
 0x424   : > { %v2113_v33 = vmul.f32 %v2097_v32, %v2049_v48  ;;  %v2099_v23 = vadd.f32 1.0, %v2852_v57  ;;  %2185 = vst [vmem:[%s3173_s21 + $0x28] sm:$0xff] %v2573_v56  ;;  %2259 = vst [vmem:[%s2210_s16 + $0x60] sm:$0xff] (%p2997_p6), %v2258_v59 }
 0x425   : > { %v2128_v41 = vmul.f32 %v2112_v34, %v1751_v27  ;;  %v2114_v52 = vmul.f32 %v2098_v29, %v2050_v36 }
 0x426   : > { %v2129_v28 = vmul.f32 %v2113_v33, %v1753_v12  ;;  %v2115_v55 = vmul.f32 %v2099_v23, %v2051_v45  ;;  %2204 = sbr.rel (!%p2997_p6) target bundleno = 1077 (0x435), region = 152 }
 0x427   : > { %v2130_v1 = vmul.f32 %v2114_v52, %v1755_v35 }
 0x428   : > { %v2574_v22 = vpack.c.bf16 %v2129_v28, %v2128_v41  ;;  %v2131_v49 = vmul.f32 %v2115_v55, %v1757_v54 }
 0x429   : > { %v2260_v50 = vld [vmem:[%s3173_s21 + $0x20] sm:$0xff] (%p2997_p6) }
 0x42a   : > { %2186 = vst [vmem:[%s3173_s21 + $0x30] sm:$0xff] %v2574_v22  ;;  %v2575_v60 = vpack.c.bf16 %v2131_v49, %v2130_v1  ;;  %2261 = vst [vmem:[%s2210_s16 + $0x80] sm:$0xff] (%p2997_p6), %v2260_v50 }
 0x42b   : > { %v2262_v46 = vld [vmem:[%s3173_s21 + $0x28] sm:$0xff] (%p2997_p6) }
 0x42c   : > { %2187 = vst [vmem:[%s3173_s21 + $0x38] sm:$0xff] %v2575_v60  ;;  %2263 = vst [vmem:[%s2210_s16 + $0xa0] sm:$0xff] (%p2997_p6), %v2262_v46 }
 0x431   : > { %v2264_v15 = vld [vmem:[%s3173_s21 + $0x30] sm:$0xff] }
 0x432   : > { %2265 = vst [vmem:[%s2210_s16 + $0xc0] sm:$0xff] %v2264_v15 }
 0x433   : > { %v2266_v17 = vld [vmem:[%s3173_s21 + $0x38] sm:$0xff] }
 0x434   : > { %2267 = vst [vmem:[%s2210_s16 + $0xe0] sm:$0xff] %v2266_v17 }
 0x435 PF: > { %s23_s25 = sadd.s32 1, %s2891_s25   ;;  %s3828_s13 = sld [smem:[#allocation6_spill]] }
 0x436   : > { %p20_p13 = scmp.ge.s32.totalorder %s23_s25, 6   ;;  %s3829_s21 = smov %s2879_s22 }
 0x437   : > { %s3830_s22 = smov %s3002_s14  ;;  %s3831_s23 = smov %s2887_s24 }
 0x438   :  { %22 = sbr.rel (!%p20_p13) target bundleno = 6 (0x6), region = 249 }
 0x43b   : > { %s3832_s24 = smov %s3828_s13 }

</bundles_post_ra>
